<compile_context>
chip_gen: v6e
topology: v6e:2x2x1
jax: 0.10.0
libtpu: 0.0.40
codegen_flags: <defaults>
</compile_context>

<pallas_src>
import functools

import jax
import jax.numpy as jnp
from jax import lax
from jax.experimental import pallas as pl
from jax.experimental.pallas import tpu as pltpu

_LANE = 128


def _round_up(x, m):
    return (x + m - 1) // m * m


def _pick_tile_h(H, W):
    """Largest divisor of H keeping tile_h * W around <= 2048 output pixels."""
    target = max(1, 2048 // max(W, 1))
    best = 1
    for d in range(1, H + 1):
        if H % d == 0 and d <= target:
            best = d
    return best


def _conv3x3_im2col(inp, w_ref, b_ref, rows, cols):
    """Valid 3x3 conv as a single im2col matmul.

    inp   : (rows+2, cols+2, Cin)  bf16 value
    w_ref : (9*Cin, Cout)          bf16 ref (dy-major, dx, cin ordering)
    b_ref : (1, Cout)              f32 ref
    returns (rows*cols, Cout) f32 with bias added (no activation).
    """
    cin = inp.shape[-1]
    patches = jnp.concatenate(
        [inp[dy:dy + rows, dx:dx + cols, :] for dy in range(3) for dx in range(3)],
        axis=-1)                                       # (rows, cols, 9*Cin)
    patches = patches.reshape(rows * cols, 9 * cin)
    acc = jnp.dot(patches, w_ref[...], preferred_element_type=jnp.float32)
    return acc + b_ref[...]                            # (1, Cout) bias broadcast


def _relu_mask(acc2d, rows, cols, row_start, col_lo, col_hi, H):
    """ReLU, then zero everything outside the valid image region.

    This reproduces the zero padding the next conv layer expects.
    acc2d     : (rows*cols, Cout) f32
    row_start : (traced) global image row of local row 0
    col_lo/hi : static local-column bounds of in-image columns
    returns (rows, cols, Cout) bf16.
    """
    cout = acc2d.shape[-1]
    a = acc2d.reshape(rows, cols, cout)
    r_idx = lax.broadcasted_iota(jnp.int32, (rows, cols, cout), 0)
    c_idx = lax.broadcasted_iota(jnp.int32, (rows, cols, cout), 1)
    row_g = r_idx + row_start
    valid = (row_g >= 0) & (row_g < H) & (c_idx >= col_lo) & (c_idx < col_hi)
    return jnp.where(valid, jnp.maximum(a, 0.0), 0.0).astype(jnp.bfloat16)


def _fused_cls_kernel(x_ref, w1_ref, b1_ref, w2_ref, b2_ref, w3_ref, b3_ref,
                      o_ref, *, H, W, tile_h):
    """Fused conv1+ReLU -> conv2+ReLU -> output conv for one (batch, row-tile).

    x_ref : (1, H+6, W+6, C0p) bf16   whole padded image (resident across tiles)
    w*_ref: (9*Cin_p, Cout)    bf16   im2col weight slabs
    b*_ref: (1, Cout)          f32
    o_ref : (1, tile_h*W, A*K)        output tile (row-major over (h, w))
    """
    th = tile_h
    t = pl.program_id(1)
    r0 = pl.multiple_of(t * th, th)              # global row of first output row

    # Input slab: global rows [r0-3, r0+th+3) == padded rows [r0, r0+th+6).
    x = x_ref[0, pl.ds(r0, th + 6), :, :]        # (th+6, W+6, C0p) bf16

    # layer 1 + ReLU: extended region rows [r0-2, r0+th+2), cols [-2, W+2)
    a1 = _conv3x3_im2col(x, w1_ref, b1_ref, th + 4, W + 4)
    a1 = _relu_mask(a1, th + 4, W + 4, r0 - 2, 2, W + 2, H)

    # layer 2 + ReLU: extended region rows [r0-1, r0+th+1), cols [-1, W+1)
    a2 = _conv3x3_im2col(a1, w2_ref, b2_ref, th + 2, W + 2)
    a2 = _relu_mask(a2, th + 2, W + 2, r0 - 1, 1, W + 1, H)

    # output conv (no activation): rows [r0, r0+th), cols [0, W)
    a3 = _conv3x3_im2col(a2, w3_ref, b3_ref, th, W)        # (th*W, A*K) f32
    o_ref[0] = a3.astype(o_ref.dtype)


def classification_model_forward(x_nchw, params, num_anchor_points, num_classes,
                                 *, tile_h=None):
    """Exact semantics of ClassificationModel.forward (NCHW in, (N, H*W*A, K) out)."""
    N, cin, H, W = x_nchw.shape
    AK = num_anchor_points * num_classes
    feat = params["w1"].shape[-1]

    if tile_h is None:
        tile_h = _pick_tile_h(H, W)
    assert H % tile_h == 0, (H, tile_h)

    c0p = _round_up(cin, _LANE)                  # lane-dense channel dims
    c1p = _round_up(feat, _LANE)

    # NCHW -> NHWC, one 3-pixel halo pad for the fused 3-conv chain,
    # channel pad to lane width, bf16 MXU operands.
    x = jnp.transpose(x_nchw, (0, 2, 3, 1))
    x = jnp.pad(x, ((0, 0), (3, 3), (3, 3), (0, c0p - cin))).astype(jnp.bfloat16)

    def prep_w(w, cip, cop):
        ci, co = w.shape[2], w.shape[3]
        w = jnp.pad(w, ((0, 0), (0, 0), (0, cip - ci), (0, cop - co)))
        return w.reshape(9 * cip, cop).astype(jnp.bfloat16)   # (dy, dx, cin) major

    def prep_b(b, cop):
        return jnp.pad(b, (0, cop - b.shape[0])).reshape(1, cop).astype(jnp.float32)

    w1 = prep_w(params["w1"], c0p, c1p)
    w2 = prep_w(params["w2"], c1p, c1p)
    w3 = prep_w(params["wo"], c1p, AK)           # final layer kept unpadded: fewer HBM bytes
    b1 = prep_b(params["b1"], c1p)
    b2 = prep_b(params["b2"], c1p)
    b3 = prep_b(params["bo"], AK)

    kernel = functools.partial(_fused_cls_kernel, H=H, W=W, tile_h=tile_h)
    inv = lambda n, t: (0, 0)                    # grid-invariant weight/bias tiles

    out = pl.pallas_call(
        kernel,
        out_shape=jax.ShapeDtypeStruct((N, H * W, AK), x_nchw.dtype),
        grid_spec=pltpu.PrefetchScalarGridSpec(
            num_scalar_prefetch=0,
            grid=(N, H // tile_h),
            in_specs=[
                # whole padded image, resident across the row-tile axis
                pl.BlockSpec((1, H + 6, W + 6, c0p), lambda n, t: (n, 0, 0, 0)),
                pl.BlockSpec((9 * c0p, c1p), inv),
                pl.BlockSpec((1, c1p), inv),
                pl.BlockSpec((9 * c1p, c1p), inv),
                pl.BlockSpec((1, c1p), inv),
                pl.BlockSpec((9 * c1p, AK), inv),
                pl.BlockSpec((1, AK), inv),
            ],
            out_specs=pl.BlockSpec((1, tile_h * W, AK), lambda n, t: (n, t, 0)),
        ),
        compiler_params=pltpu.CompilerParams(
            dimension_semantics=("parallel", "parallel"),
            vmem_limit_bytes=64 * 1024 * 1024),
    )(x, w1, b1, w2, b2, w3, b3)

    # out is (N, H*W, A*K) in NHWC ordering == torch permute(0,2,3,1) + view
    return out.reshape(N, H * W * num_anchor_points, num_classes)


def _reference_forward(x_nchw, params, num_anchor_points, num_classes):
    """Plain-JAX f32 reference (lax conv) for correctness checking."""
    def conv(x, w_hwio, b, relu):
        y = jax.lax.conv_general_dilated(
            x, w_hwio, window_strides=(1, 1), padding="SAME",
            dimension_numbers=("NHWC", "HWIO", "NHWC"))
        y = y + b[None, None, None, :]
        return jnp.maximum(y, 0.0) if relu else y

    N, _, H, W = x_nchw.shape
    x = jnp.transpose(x_nchw, (0, 2, 3, 1))
    y = conv(x, params["w1"], params["b1"], True)
    y = conv(y, params["w2"], params["b2"], True)
    y = conv(y, params["wo"], params["bo"], False)
    return y.reshape(N, H * W * num_anchor_points, num_classes)


def init_params(key, num_features_in, feature_size, num_anchor_points, num_classes):
    ks = jax.random.split(key, 6)
    def w(k, cin, cout):
        return (0.05 * jax.random.normal(k, (3, 3, cin, cout))).astype(jnp.float32)
    def b(k, cout):
        return (0.01 * jax.random.normal(k, (cout,))).astype(jnp.float32)
    out_ch = num_anchor_points * num_classes
    return {
        "w1": w(ks[0], num_features_in, feature_size), "b1": b(ks[1], feature_size),
        "w2": w(ks[2], feature_size, feature_size),    "b2": b(ks[3], feature_size),
        "wo": w(ks[4], feature_size, out_ch),          "bo": b(ks[5], out_ch),
    }


if __name__ == "__main__":
    # Small, module-consistent shapes.
    batch = 2
    num_features_in = 8
    feature_size = 32
    num_anchor_points = 4
    num_classes = 8
    H = W = 16

    key = jax.random.PRNGKey(0)
    k_x, k_p = jax.random.split(key)
    x = jax.random.normal(k_x, (batch, num_features_in, H, W), dtype=jnp.float32)
    params = init_params(k_p, num_features_in, feature_size,
                         num_anchor_points, num_classes)

    ref = jax.block_until_ready(
        _reference_forward(x, params, num_anchor_points, num_classes))

    fwd = jax.jit(classification_model_forward,
                  static_argnames=("num_anchor_points", "num_classes", "tile_h"))

    # tile_h=8 exercises the spatially-tiled path (interior halo seams + image
    # boundary masking); tile_h=16 is the whole-image-per-tile path.
    for th in (8, 16):
        out = jax.block_until_ready(
            fwd(x, params, num_anchor_points=num_anchor_points,
                num_classes=num_classes, tile_h=th))
        assert out.shape == (batch, H * W * num_anchor_points, num_classes), out.shape
        max_err = float(jnp.max(jnp.abs(out - ref)))
        # bf16 MXU operands with f32 accumulation -> relaxed tolerance vs f32 ref.
        assert jnp.allclose(out, ref, atol=2e-2, rtol=2e-2), (th, max_err)

    print("KERNEL_OK")
</pallas_src>

<mosaic_0001>
module attributes {stable_mosaic.version = 11 : i64} {
  func.func @_fused_cls_kernel(%arg0: i32, %arg1: i32, %arg2: memref<1x22x22x128xbf16, #tpu.memory_space<vmem>>, %arg3: memref<1152x128xbf16, #tpu.memory_space<vmem>>, %arg4: memref<1x128xf32, #tpu.memory_space<vmem>>, %arg5: memref<1152x128xbf16, #tpu.memory_space<vmem>>, %arg6: memref<1x128xf32, #tpu.memory_space<vmem>>, %arg7: memref<1152x32xbf16, #tpu.memory_space<vmem>>, %arg8: memref<1x32xf32, #tpu.memory_space<vmem>>, %arg9: memref<1x128x32xf32, #tpu.memory_space<vmem>>) attributes {dimension_semantics = [#tpu.dimension_semantics<parallel>, #tpu.dimension_semantics<parallel>], iteration_bounds = array<i64: 2, 2>, scalar_prefetch = 0 : i64, scratch_operands = 0 : i64, tpu.core_type = #tpu.core_type<tc>, window_params = [{transform_indices = @transform_0, window_bounds = array<i64: 1, 22, 22, 128>}, {pipeline_mode = #tpu.pipeline_mode<synchronous>, transform_indices = @transform_1, window_bounds = array<i64: 1152, 128>}, {pipeline_mode = #tpu.pipeline_mode<synchronous>, transform_indices = @transform_2, window_bounds = array<i64: 1, 128>}, {pipeline_mode = #tpu.pipeline_mode<synchronous>, transform_indices = @transform_3, window_bounds = array<i64: 1152, 128>}, {pipeline_mode = #tpu.pipeline_mode<synchronous>, transform_indices = @transform_4, window_bounds = array<i64: 1, 128>}, {pipeline_mode = #tpu.pipeline_mode<synchronous>, transform_indices = @transform_5, window_bounds = array<i64: 1152, 32>}, {pipeline_mode = #tpu.pipeline_mode<synchronous>, transform_indices = @transform_6, window_bounds = array<i64: 1, 32>}, {transform_indices = @transform_7, window_bounds = array<i64: 1, 128, 32>}]} {
    %c8_i32 = arith.constant 8 : i32
    %0 = arith.muli %arg1, %c8_i32 : i32
    %1 = tpu.assume_multiple %0, 8 : i32
    %c0 = arith.constant 0 : index
    %2 = arith.index_cast %1 : i32 to index
    %c0_0 = arith.constant 0 : index
    %c0_1 = arith.constant 0 : index
    %3 = vector.load %arg2[%c0, %2, %c0_0, %c0_1] : memref<1x22x22x128xbf16, #tpu.memory_space<vmem>>, vector<1x14x22x128xbf16>
    %4 = vector.shape_cast %3 : vector<1x14x22x128xbf16> to vector<14x22x128xbf16>
    %5 = vector.extract_strided_slice %4 {offsets = [0, 0, 0], sizes = [12, 20, 128], strides = [1, 1, 1]} : vector<14x22x128xbf16> to vector<12x20x128xbf16>
    %6 = vector.extract_strided_slice %4 {offsets = [0, 1, 0], sizes = [12, 20, 128], strides = [1, 1, 1]} : vector<14x22x128xbf16> to vector<12x20x128xbf16>
    %7 = vector.extract_strided_slice %4 {offsets = [0, 2, 0], sizes = [12, 20, 128], strides = [1, 1, 1]} : vector<14x22x128xbf16> to vector<12x20x128xbf16>
    %8 = vector.extract_strided_slice %4 {offsets = [1, 0, 0], sizes = [12, 20, 128], strides = [1, 1, 1]} : vector<14x22x128xbf16> to vector<12x20x128xbf16>
    %9 = vector.extract_strided_slice %4 {offsets = [1, 1, 0], sizes = [12, 20, 128], strides = [1, 1, 1]} : vector<14x22x128xbf16> to vector<12x20x128xbf16>
    %10 = vector.extract_strided_slice %4 {offsets = [1, 2, 0], sizes = [12, 20, 128], strides = [1, 1, 1]} : vector<14x22x128xbf16> to vector<12x20x128xbf16>
    %11 = vector.extract_strided_slice %4 {offsets = [2, 0, 0], sizes = [12, 20, 128], strides = [1, 1, 1]} : vector<14x22x128xbf16> to vector<12x20x128xbf16>
    %12 = vector.extract_strided_slice %4 {offsets = [2, 1, 0], sizes = [12, 20, 128], strides = [1, 1, 1]} : vector<14x22x128xbf16> to vector<12x20x128xbf16>
    %13 = vector.extract_strided_slice %4 {offsets = [2, 2, 0], sizes = [12, 20, 128], strides = [1, 1, 1]} : vector<14x22x128xbf16> to vector<12x20x128xbf16>
    %14 = tpu.concatenate %5, %6, %7, %8, %9, %10, %11, %12, %13 in 2 : vector<12x20x128xbf16>, vector<12x20x128xbf16>, vector<12x20x128xbf16>, vector<12x20x128xbf16>, vector<12x20x128xbf16>, vector<12x20x128xbf16>, vector<12x20x128xbf16>, vector<12x20x128xbf16>, vector<12x20x128xbf16> -> vector<12x20x1152xbf16>
    %15 = vector.shape_cast %14 : vector<12x20x1152xbf16> to vector<240x1152xbf16>
    %c0_2 = arith.constant 0 : index
    %c0_3 = arith.constant 0 : index
    %16 = vector.load %arg3[%c0_2, %c0_3] : memref<1152x128xbf16, #tpu.memory_space<vmem>>, vector<1152x128xbf16>
    %cst = arith.constant dense<0.000000e+00> : vector<240x128xf32>
    %17 = tpu.matmul %15, %16, %cst {dimension_numbers = #tpu.dot_dimension_numbers<[1], [0], [0], [1], [0, 0, 1, 1], [], []>} : vector<240x1152xbf16>, vector<1152x128xbf16>, vector<240x128xf32> -> vector<240x128xf32>
    %c0_4 = arith.constant 0 : index
    %c0_5 = arith.constant 0 : index
    %18 = vector.load %arg4[%c0_4, %c0_5] : memref<1x128xf32, #tpu.memory_space<vmem>>, vector<1x128xf32>
    %19 = vector.broadcast %18 : vector<1x128xf32> to vector<240x128xf32>
    %20 = arith.addf %17, %19 : vector<240x128xf32>
    %c2_i32 = arith.constant 2 : i32
    %21 = arith.subi %1, %c2_i32 : i32
    %22 = vector.shape_cast %20 : vector<240x128xf32> to vector<12x20x128xf32>
    %23 = tpu.iota {dimensions = array<i32: 0>} : vector<12x20x128xi32>
    %24 = tpu.iota {dimensions = array<i32: 1>} : vector<12x20x128xi32>
    %25 = vector.broadcast %21 : i32 to vector<12x20x128xi32>
    %26 = arith.addi %23, %25 : vector<12x20x128xi32>
    %c0_i32 = arith.constant 0 : i32
    %27 = vector.broadcast %c0_i32 : i32 to vector<12x20x128xi32>
    %28 = arith.cmpi sge, %26, %27 : vector<12x20x128xi32>
    %c16_i32 = arith.constant 16 : i32
    %29 = vector.broadcast %c16_i32 : i32 to vector<12x20x128xi32>
    %30 = arith.cmpi slt, %26, %29 : vector<12x20x128xi32>
    %31 = arith.andi %28, %30 : vector<12x20x128xi1>
    %c2_i32_6 = arith.constant 2 : i32
    %32 = vector.broadcast %c2_i32_6 : i32 to vector<12x20x128xi32>
    %33 = arith.cmpi sge, %24, %32 : vector<12x20x128xi32>
    %34 = arith.andi %31, %33 : vector<12x20x128xi1>
    %c18_i32 = arith.constant 18 : i32
    %35 = vector.broadcast %c18_i32 : i32 to vector<12x20x128xi32>
    %36 = arith.cmpi slt, %24, %35 : vector<12x20x128xi32>
    %37 = arith.andi %34, %36 : vector<12x20x128xi1>
    %cst_7 = arith.constant 0.000000e+00 : f32
    %38 = vector.broadcast %cst_7 : f32 to vector<12x20x128xf32>
    %39 = arith.maximumf %22, %38 : vector<12x20x128xf32>
    %cst_8 = arith.constant 0.000000e+00 : f32
    %40 = vector.broadcast %cst_8 : f32 to vector<12x20x128xf32>
    %41 = arith.select %37, %39, %40 : vector<12x20x128xi1>, vector<12x20x128xf32>
    %42 = arith.truncf %41 : vector<12x20x128xf32> to vector<12x20x128xbf16>
    %43 = vector.extract_strided_slice %42 {offsets = [0, 0, 0], sizes = [10, 18, 128], strides = [1, 1, 1]} : vector<12x20x128xbf16> to vector<10x18x128xbf16>
    %44 = vector.extract_strided_slice %42 {offsets = [0, 1, 0], sizes = [10, 18, 128], strides = [1, 1, 1]} : vector<12x20x128xbf16> to vector<10x18x128xbf16>
    %45 = vector.extract_strided_slice %42 {offsets = [0, 2, 0], sizes = [10, 18, 128], strides = [1, 1, 1]} : vector<12x20x128xbf16> to vector<10x18x128xbf16>
    %46 = vector.extract_strided_slice %42 {offsets = [1, 0, 0], sizes = [10, 18, 128], strides = [1, 1, 1]} : vector<12x20x128xbf16> to vector<10x18x128xbf16>
    %47 = vector.extract_strided_slice %42 {offsets = [1, 1, 0], sizes = [10, 18, 128], strides = [1, 1, 1]} : vector<12x20x128xbf16> to vector<10x18x128xbf16>
    %48 = vector.extract_strided_slice %42 {offsets = [1, 2, 0], sizes = [10, 18, 128], strides = [1, 1, 1]} : vector<12x20x128xbf16> to vector<10x18x128xbf16>
    %49 = vector.extract_strided_slice %42 {offsets = [2, 0, 0], sizes = [10, 18, 128], strides = [1, 1, 1]} : vector<12x20x128xbf16> to vector<10x18x128xbf16>
    %50 = vector.extract_strided_slice %42 {offsets = [2, 1, 0], sizes = [10, 18, 128], strides = [1, 1, 1]} : vector<12x20x128xbf16> to vector<10x18x128xbf16>
    %51 = vector.extract_strided_slice %42 {offsets = [2, 2, 0], sizes = [10, 18, 128], strides = [1, 1, 1]} : vector<12x20x128xbf16> to vector<10x18x128xbf16>
    %52 = tpu.concatenate %43, %44, %45, %46, %47, %48, %49, %50, %51 in 2 : vector<10x18x128xbf16>, vector<10x18x128xbf16>, vector<10x18x128xbf16>, vector<10x18x128xbf16>, vector<10x18x128xbf16>, vector<10x18x128xbf16>, vector<10x18x128xbf16>, vector<10x18x128xbf16>, vector<10x18x128xbf16> -> vector<10x18x1152xbf16>
    %53 = vector.shape_cast %52 : vector<10x18x1152xbf16> to vector<180x1152xbf16>
    %c0_9 = arith.constant 0 : index
    %c0_10 = arith.constant 0 : index
    %54 = vector.load %arg5[%c0_9, %c0_10] : memref<1152x128xbf16, #tpu.memory_space<vmem>>, vector<1152x128xbf16>
    %cst_11 = arith.constant dense<0.000000e+00> : vector<180x128xf32>
    %55 = tpu.matmul %53, %54, %cst_11 {dimension_numbers = #tpu.dot_dimension_numbers<[1], [0], [0], [1], [0, 0, 1, 1], [], []>} : vector<180x1152xbf16>, vector<1152x128xbf16>, vector<180x128xf32> -> vector<180x128xf32>
    %c0_12 = arith.constant 0 : index
    %c0_13 = arith.constant 0 : index
    %56 = vector.load %arg6[%c0_12, %c0_13] : memref<1x128xf32, #tpu.memory_space<vmem>>, vector<1x128xf32>
    %57 = vector.broadcast %56 : vector<1x128xf32> to vector<180x128xf32>
    %58 = arith.addf %55, %57 : vector<180x128xf32>
    %c1_i32 = arith.constant 1 : i32
    %59 = arith.subi %1, %c1_i32 : i32
    %60 = vector.shape_cast %58 : vector<180x128xf32> to vector<10x18x128xf32>
    %61 = tpu.iota {dimensions = array<i32: 0>} : vector<10x18x128xi32>
    %62 = tpu.iota {dimensions = array<i32: 1>} : vector<10x18x128xi32>
    %63 = vector.broadcast %59 : i32 to vector<10x18x128xi32>
    %64 = arith.addi %61, %63 : vector<10x18x128xi32>
    %c0_i32_14 = arith.constant 0 : i32
    %65 = vector.broadcast %c0_i32_14 : i32 to vector<10x18x128xi32>
    %66 = arith.cmpi sge, %64, %65 : vector<10x18x128xi32>
    %c16_i32_15 = arith.constant 16 : i32
    %67 = vector.broadcast %c16_i32_15 : i32 to vector<10x18x128xi32>
    %68 = arith.cmpi slt, %64, %67 : vector<10x18x128xi32>
    %69 = arith.andi %66, %68 : vector<10x18x128xi1>
    %c1_i32_16 = arith.constant 1 : i32
    %70 = vector.broadcast %c1_i32_16 : i32 to vector<10x18x128xi32>
    %71 = arith.cmpi sge, %62, %70 : vector<10x18x128xi32>
    %72 = arith.andi %69, %71 : vector<10x18x128xi1>
    %c17_i32 = arith.constant 17 : i32
    %73 = vector.broadcast %c17_i32 : i32 to vector<10x18x128xi32>
    %74 = arith.cmpi slt, %62, %73 : vector<10x18x128xi32>
    %75 = arith.andi %72, %74 : vector<10x18x128xi1>
    %cst_17 = arith.constant 0.000000e+00 : f32
    %76 = vector.broadcast %cst_17 : f32 to vector<10x18x128xf32>
    %77 = arith.maximumf %60, %76 : vector<10x18x128xf32>
    %cst_18 = arith.constant 0.000000e+00 : f32
    %78 = vector.broadcast %cst_18 : f32 to vector<10x18x128xf32>
    %79 = arith.select %75, %77, %78 : vector<10x18x128xi1>, vector<10x18x128xf32>
    %80 = arith.truncf %79 : vector<10x18x128xf32> to vector<10x18x128xbf16>
    %81 = vector.extract_strided_slice %80 {offsets = [0, 0, 0], sizes = [8, 16, 128], strides = [1, 1, 1]} : vector<10x18x128xbf16> to vector<8x16x128xbf16>
    %82 = vector.extract_strided_slice %80 {offsets = [0, 1, 0], sizes = [8, 16, 128], strides = [1, 1, 1]} : vector<10x18x128xbf16> to vector<8x16x128xbf16>
    %83 = vector.extract_strided_slice %80 {offsets = [0, 2, 0], sizes = [8, 16, 128], strides = [1, 1, 1]} : vector<10x18x128xbf16> to vector<8x16x128xbf16>
    %84 = vector.extract_strided_slice %80 {offsets = [1, 0, 0], sizes = [8, 16, 128], strides = [1, 1, 1]} : vector<10x18x128xbf16> to vector<8x16x128xbf16>
    %85 = vector.extract_strided_slice %80 {offsets = [1, 1, 0], sizes = [8, 16, 128], strides = [1, 1, 1]} : vector<10x18x128xbf16> to vector<8x16x128xbf16>
    %86 = vector.extract_strided_slice %80 {offsets = [1, 2, 0], sizes = [8, 16, 128], strides = [1, 1, 1]} : vector<10x18x128xbf16> to vector<8x16x128xbf16>
    %87 = vector.extract_strided_slice %80 {offsets = [2, 0, 0], sizes = [8, 16, 128], strides = [1, 1, 1]} : vector<10x18x128xbf16> to vector<8x16x128xbf16>
    %88 = vector.extract_strided_slice %80 {offsets = [2, 1, 0], sizes = [8, 16, 128], strides = [1, 1, 1]} : vector<10x18x128xbf16> to vector<8x16x128xbf16>
    %89 = vector.extract_strided_slice %80 {offsets = [2, 2, 0], sizes = [8, 16, 128], strides = [1, 1, 1]} : vector<10x18x128xbf16> to vector<8x16x128xbf16>
    %90 = tpu.concatenate %81, %82, %83, %84, %85, %86, %87, %88, %89 in 2 : vector<8x16x128xbf16>, vector<8x16x128xbf16>, vector<8x16x128xbf16>, vector<8x16x128xbf16>, vector<8x16x128xbf16>, vector<8x16x128xbf16>, vector<8x16x128xbf16>, vector<8x16x128xbf16>, vector<8x16x128xbf16> -> vector<8x16x1152xbf16>
    %91 = vector.shape_cast %90 : vector<8x16x1152xbf16> to vector<128x1152xbf16>
    %c0_19 = arith.constant 0 : index
    %c0_20 = arith.constant 0 : index
    %92 = vector.load %arg7[%c0_19, %c0_20] : memref<1152x32xbf16, #tpu.memory_space<vmem>>, vector<1152x32xbf16>
    %cst_21 = arith.constant dense<0.000000e+00> : vector<128x32xf32>
    %93 = tpu.matmul %91, %92, %cst_21 {dimension_numbers = #tpu.dot_dimension_numbers<[1], [0], [0], [1], [0, 0, 1, 1], [], []>} : vector<128x1152xbf16>, vector<1152x32xbf16>, vector<128x32xf32> -> vector<128x32xf32>
    %c0_22 = arith.constant 0 : index
    %c0_23 = arith.constant 0 : index
    %94 = vector.load %arg8[%c0_22, %c0_23] : memref<1x32xf32, #tpu.memory_space<vmem>>, vector<1x32xf32>
    %95 = vector.broadcast %94 : vector<1x32xf32> to vector<128x32xf32>
    %96 = arith.addf %93, %95 : vector<128x32xf32>
    %c0_24 = arith.constant 0 : index
    %c0_25 = arith.constant 0 : index
    %c0_26 = arith.constant 0 : index
    %97 = vector.load %arg9[%c0_24, %c0_25, %c0_26] : memref<1x128x32xf32, #tpu.memory_space<vmem>>, vector<1x128x32xf32>
    %98 = vector.shape_cast %97 : vector<1x128x32xf32> to vector<128x32xf32>
    %99 = vector.shape_cast %96 : vector<128x32xf32> to vector<1x128x32xf32>
    tpu.vector_store %arg9[%c0_24, %c0_25, %c0_26], %99 {strides = array<i32>} : memref<1x128x32xf32, #tpu.memory_space<vmem>>, vector<1x128x32xf32>,
    return
  }
  func.func @transform_0(%arg0: i32, %arg1: i32) -> (i32, i32, i32, i32) {
    %c0_i32 = arith.constant 0 : i32
    %c0_i32_0 = arith.constant 0 : i32
    %c0_i32_1 = arith.constant 0 : i32
    %c0_i32_2 = arith.constant 0 : i32
    return %arg0, %c0_i32, %c0_i32_0, %c0_i32_1 : i32, i32, i32, i32
  }
  func.func @transform_1(%arg0: i32, %arg1: i32) -> (i32, i32) {
    %c0_i32 = arith.constant 0 : i32
    %c0_i32_0 = arith.constant 0 : i32
    %c0_i32_1 = arith.constant 0 : i32
    return %c0_i32, %c0_i32_0 : i32, i32
  }
  func.func @transform_2(%arg0: i32, %arg1: i32) -> (i32, i32) {
    %c0_i32 = arith.constant 0 : i32
    %c0_i32_0 = arith.constant 0 : i32
    %c0_i32_1 = arith.constant 0 : i32
    return %c0_i32, %c0_i32_0 : i32, i32
  }
  func.func @transform_3(%arg0: i32, %arg1: i32) -> (i32, i32) {
    %c0_i32 = arith.constant 0 : i32
    %c0_i32_0 = arith.constant 0 : i32
    %c0_i32_1 = arith.constant 0 : i32
    return %c0_i32, %c0_i32_0 : i32, i32
  }
  func.func @transform_4(%arg0: i32, %arg1: i32) -> (i32, i32) {
    %c0_i32 = arith.constant 0 : i32
    %c0_i32_0 = arith.constant 0 : i32
    %c0_i32_1 = arith.constant 0 : i32
    return %c0_i32, %c0_i32_0 : i32, i32
  }
  func.func @transform_5(%arg0: i32, %arg1: i32) -> (i32, i32) {
    %c0_i32 = arith.constant 0 : i32
    %c0_i32_0 = arith.constant 0 : i32
    %c0_i32_1 = arith.constant 0 : i32
    return %c0_i32, %c0_i32_0 : i32, i32
  }
  func.func @transform_6(%arg0: i32, %arg1: i32) -> (i32, i32) {
    %c0_i32 = arith.constant 0 : i32
    %c0_i32_0 = arith.constant 0 : i32
    %c0_i32_1 = arith.constant 0 : i32
    return %c0_i32, %c0_i32_0 : i32, i32
  }
  func.func @transform_7(%arg0: i32, %arg1: i32) -> (i32, i32, i32) {
    %c0_i32 = arith.constant 0 : i32
    %c0_i32_0 = arith.constant 0 : i32
    return %arg0, %arg1, %c0_i32 : i32, i32, i32
  }
}

</mosaic_0001>

<bundles_post_ra>
// kernel: classification_model_forward.1
= control target key start
LH: loop header
LB: loop body
LE: loop exit
PB: predicated region body
PF: predicated region fallthrough
CT: control target
= control target key end

     0   :  { %s16054_s24 = smov 0   ;;  %s16056_s25 = smov 0   ;;  %s22407_s0 = inlined_call_operand.vmem [shape: bf16[2,22,22,128], index: 0, kind: input, shape index: {}]   ;;  %s22408_s1 = inlined_call_operand.vmem [shape: bf16[1152,128], index: 1, kind: input, shape index: {}]   ;;  %s22409_s2 = inlined_call_operand.vmem [shape: f32[1,128], index: 2, kind: input, shape index: {}]   ;;  %s22410_s3 = inlined_call_operand.vmem [shape: bf16[1152,128], index: 3, kind: input, shape index: {}]   ;;  %s22411_s4 = inlined_call_operand.vmem [shape: f32[1,128], index: 4, kind: input, shape index: {}]   ;;  %s22412_s5 = inlined_call_operand.vmem [shape: bf16[1152,32], index: 5, kind: input, shape index: {}]   ;;  %s22413_s6 = inlined_call_operand.vmem [shape: f32[1,32], index: 6, kind: input, shape index: {}]   ;;  %s22414_s7 = inlined_call_operand.vmem [shape: f32[2,256,32], index: 7, kind: output, shape index: {}]  }
   0x1   :  { %s16058_s26 = smov 0   ;;  %s16060_s27 = smov 0  }
   0x2   :  { %s16062_s28 = smov 0  }
   0x3 LB: > { %s26_s29 = sadd.s32 1, %s16000_s26  ;;  %s29_s30 = sadd.s32 1, %s16004_s27  ;;  %s16008_s28 = sphi %s16062_s28, %s17_s28   ;;  %s16004_s27 = sphi %s16060_s27, %s23290_s27   ;;  %s16000_s26 = sphi %s16058_s26, %s23289_s26   ;;  %s15996_s25 = sphi %s16056_s25, %s23288_s25   ;;  %s15992_s24 = sphi %s16054_s24, %s23287_s24  }
   0x4   : > { %p27_p0 = scmp.ge.s32.totalorder %s26_s29, 2  ;;  %p13886_p1 = scmp.ge.s32.totalorder %s16008_s28, 1 }
   0x5   : > { %p251_p2 = scmp.lt.s32.totalorder %s16008_s28, 5 }
   0x6   : > { %s23292_s29 = smov (%p27_p0, %s26_s29), 0  ;;  %s23294_s30 = smov (!%p27_p0, %s29_s30), %s16004_s27 }
   0x7   : > { %p252_p3 = pnand %p13886_p1, %p251_p2  ;;  %p31_p4 = scmp.ge.s32.totalorder %s23294_s30, 2 }
   0x9   : > { %s23296_s30 = smov (%p31_p4, %s23294_s30), 0  ;;  %255 = sbr.rel (%p252_p3) target bundleno = 1557 (0x615), region = 48 }
   0xe   : > { %v15726_v0 = vld [vmem:[%s22408_s1 + $0x78] sm:$0xff]   ;;  %v15730_v4 = vld [vmem:[%s22408_s1 + $0x70] sm:$0xff]   ;;  %v15734_v8 = vld [vmem:[%s22408_s1 + $0x68] sm:$0xff]   ;;  %p287_p5 = scmp.lt.s32.totalorder %s15996_s25, 1  ;;  %s14441_s11 = smul.u32 96, %s15992_s24  ;;  %v722_v27 = vlaneseq  ;;  %vm626_vm0 = vcmask 1046528  }
   0xf   : > { %v15727_v1 = vld [vmem:[%s22408_s1 + $0x38] sm:$0xff]   ;;  %14442 = vmatprep.subr.bf16.mxu0 %v15726_v0  ;;  %v15731_v5 = vld [vmem:[%s22408_s1 + $0x30] sm:$0xff]   ;;  %v15735_v9 = vld [vmem:[%s22408_s1 + $0x28] sm:$0xff]   ;;  %vm445_vm1 = vsmask.f32 7424  ;;  %vm16012_vm2 = vmmov 0  }
  0x10   : > { %v15728_v2 = vld [vmem:[%s22408_s1 + $0xf8] sm:$0xff]   ;;  %14443 = vmatpush3.bf16.msra.mxu0 %v15727_v1  ;;  %v15732_v6 = vld [vmem:[%s22408_s1 + $0xf0] sm:$0xff]   ;;  %v15736_v10 = vld [vmem:[%s22408_s1 + $0xe8] sm:$0xff]   ;;  %s23298_s25 = smov (!%p287_p5, %s15996_s25), 1  ;;  %v16192_v32 = vshrl.u32 %v722_v27, 7  ;;  %s13891_s23 = sshll.u32 %s15992_s24, 3 }
  0x11   : > { %v15729_v3 = vld [vmem:[%s22408_s1 + $0xb8] sm:$0xff]   ;;  %14548 = vmatprep.subr.bf16.mxu1 %v15728_v2  ;;  %14444 = vmatprep.subr.bf16.mxu0 %v15730_v4  ;;  %v15733_v7 = vld [vmem:[%s22408_s1 + $0xb0] sm:$0xff]   ;;  %v15737_v11 = vld [vmem:[%s22408_s1 + $0xa8] sm:$0xff]   ;;  %s15681_s20 = smul.u32 264, %s23298_s25  ;;  %v16010_v38 = vmov 1983009808  }
  0x12   : > { %14549 = vmatpush3.bf16.msra.mxu1 %v15729_v3  ;;  %v15738_v12 = vld [vmem:[%s22408_s1 + $0x60] sm:$0xff]   ;;  %v15742_v16 = vld [vmem:[%s22408_s1 + $0x58] sm:$0xff]   ;;  %v15746_v20 = vld [vmem:[%s22408_s1 + $0x50] sm:$0xff]   ;;  %22611 = vst [vmem:[#allocation2_spill] sm:$0xff] %v16192_v32  ;;  %v720_v39 = vunpack.c.l.s4 %v16010_v38  ;;  %s14293_s22 = sadd.s32 4294967295, %s13891_s23  ;;  %s13888_s21 = sshll.u32 %s15992_s24, 4 }
  0x13   : > { %14550 = vmatprep.subr.bf16.mxu1 %v15732_v6  ;;  %v15739_v13 = vld [vmem:[%s22408_s1 + $0x20] sm:$0xff]   ;;  %v15743_v17 = vld [vmem:[%s22408_s1 + $0x18] sm:$0xff]   ;;  %v15747_v21 = vld [vmem:[%s22408_s1 + $0x10] sm:$0xff]   ;;  %s291_s16 = scalar_lea.vmem %s22407_s0, %s15681_s20  ;;  %s14119_s20 = sadd.s32 4294967294, %s13891_s23 }
  0x14   : > { %14445 = vmatpush3.bf16.msra.mxu0 %v15731_v5  ;;  %v15740_v14 = vld [vmem:[%s22408_s1 + $0xe0] sm:$0xff]   ;;  %v15744_v18 = vld [vmem:[%s22408_s1 + $0xd8] sm:$0xff]   ;;  %v15748_v22 = vld [vmem:[%s22408_s1 + $0xd0] sm:$0xff]   ;;  %s16184_s8 = scalar_lea.vmem %s291_s16, %s14441_s11  ;;  %v721_v46 = vunpack.c.0.s8 %v720_v39  ;;  %p295_p6 = scmp.lt.s32.totalorder %s13888_s21, 31 }
  0x15   : > { %14446 = vmatprep.subr.bf16.mxu0 %v15734_v8  ;;  %v15741_v15 = vld [vmem:[%s22408_s1 + $0xa0] sm:$0xff]   ;;  %v15745_v19 = vld [vmem:[%s22408_s1 + $0x98] sm:$0xff]   ;;  %v15749_v23 = vld [vmem:[%s22408_s1 + $0x90] sm:$0xff]  }
  0x16   : > { %14551 = vmatpush3.bf16.msra.mxu1 %v15733_v7  ;;  %v15750_v24 = vld [vmem:[%s22408_s1 + $0x48] sm:$0xff]   ;;  %v15754_v29 = vld [vmem:[%s22408_s1 + $0x40] sm:$0xff]   ;;  %v15760_v41 = vld [vmem:[%s22408_s1 + $0x178] sm:$0xff]   ;;  %v16213_v57 = vsub.s32 %v721_v46, %v16192_v32  ;;  %s23300_s21 = smov (!%p295_p6, %s13888_s21), 31 }
  0x17   : > { %14552 = vmatprep.subr.bf16.mxu1 %v15736_v10  ;;  %v15751_v25 = vld [vmem:[%s22408_s1 + $0x8] sm:$0xff]   ;;  %v15755_v30 = vld [vmem:[%s22408_s1] sm:$0xff]   ;;  %v311_v48 = vld [vmem:[%s16184_s8 + $0x10] sm:$0xf] }
  0x18   : > { %14447 = vmatpush3.bf16.msra.mxu0 %v15735_v9  ;;  %v15752_v26 = vld [vmem:[%s22408_s1 + $0xc8] sm:$0xff]   ;;  %v15756_v31 = vld [vmem:[%s22408_s1 + $0xc0] sm:$0xff]   ;;  %v16206_v51 = vld [vmem:[%s16184_s8 + $0x14] sm:$0x7]  ;;  %22612 = vst [vmem:[#allocation3_spill] sm:$0xff] %v16213_v57 }
  0x19   : > { %14448 = vmatprep.subr.bf16.mxu0 %v15738_v12  ;;  %v15753_v28 = vld [vmem:[%s22408_s1 + $0x88] sm:$0xff]   ;;  %v307_v33 = vld [vmem:[%s16184_s8] sm:$0xf]  ;;  %v308_v34 = vld [vmem:[%s16184_s8 + $0x4] sm:$0xf]  ;;  %v16210_v54 = vcombine.low %v16206_v51, %v16206_v51 }
  0x1a   : > { %14553 = vmatpush3.bf16.msra.mxu1 %v15737_v11  ;;  %v309_v35 = vld [vmem:[%s16184_s8 + $0x8] sm:$0x7]  ;;  %v13894_v36 = vcombine.low %v307_v33, %v308_v34  ;;  %v15759_v40 = vld [vmem:[%s22408_s1 + $0x80] sm:$0xff]   ;;  %v310_v47 = vld [vmem:[%s16184_s8 + $0xc] sm:$0xf] }
  0x1b   : > { %14554 = vmatprep.subr.bf16.mxu1 %v15740_v14  ;;  %v13895_v37 = vcombine.low %v309_v35, %v309_v35  ;;  %v13896_v52 = vcombine.low %v310_v47, %v311_v48  ;;  %v16216_v60 = vld [vmem:[%s16184_s8 + $0x18] sm:$0xf]  ;;  %v314_v61 = vld [vmem:[%s16184_s8 + $0x1c] sm:$0xf]  ;;  %v469_v63 = vshll.u32 %v16210_v54, 16 }
  0x1c   : > { %14449 = vmatpush3.bf16.msra.mxu0 %v15739_v13  ;;  %v447_v42 = vshrl.u32 %v13894_v36, 16  ;;  %v449_v43 = vshll.u32 %v13894_v36, 16  ;;  %v627_v53 = vrot.slane %v13894_v36, 1  ;;  %v16223_v9 = vcombine.low %v16216_v60, %v314_v61  ;;  %v15763_v34 = vld [vmem:[%s22408_s1 + $0x138] sm:$0xff]  }
  0x1d   : > { %14450 = vmatprep.subr.bf16.mxu0 %v15742_v16  ;;  %v454_v44 = vshll.u32 %v13895_v37, 16  ;;  %v458_v45 = vshrl.u32 %v13895_v37, 16  ;;  %v628_v55 = vrot.slane %v13895_v37, 1  ;;  %v462_v58 = vshrl.u32 %v13896_v52, 16 }
  0x1e   : > { %14555 = vmatpush3.bf16.msra.mxu1 %v15741_v15  ;;  %v451_v49 = vrot.slane %v449_v43, 1  ;;  %v464_v59 = vshll.u32 %v13896_v52, 16  ;;  %v630_v1 = vrot.slane %v13896_v52, 1  ;;  %v471_v8 = vrot.slane %v469_v63, 1  ;;  %v317_v43 = vld [vmem:[%s16184_s8 + $0x28] sm:$0xf] }
  0x1f   : > { %14556 = vmatprep.subr.bf16.mxu1 %v15744_v18  ;;  %v456_v50 = vrot.slane %v454_v44, 1  ;;  %v629_v0 = vsel %vm626_vm0, %v627_v53, %v628_v55  ;;  %v16228_v13 = vrot.slane %v16210_v54, 1  ;;  %v477_v46 = vshrl.u32 %v16223_v9, 16  ;;  %v16280_v53 = vld [vmem:[%s16184_s8 + $0x2c] sm:$0x7] }
  0x20   : > { %14451 = vmatpush3.bf16.msra.mxu0 %v15743_v17  ;;  %v452_v56 = vor.u32 %v451_v49, %v447_v42  ;;  %v466_v3 = vrot.slane %v464_v59, 1  ;;  %v13923_v4 = vcombine.low %v629_v0, %v310_v47  ;;  %v718_v5 = vcombine.high %v629_v0, %v13896_v52  ;;  %v16269_v42 = vld [vmem:[%s16184_s8 + $0x24] sm:$0xf] }
  0x21   : > { %14452 = vmatprep.subr.bf16.mxu0 %v15746_v20  ;;  %v460_v62 = vor.u32 %v458_v45, %v456_v50  ;;  %v13926_v17 = vcombine.low %v628_v55, %v16206_v51  ;;  %v473_v45 = vshrl.u32 %v16210_v54, 16  ;;  %v16289_v59 = vcombine.low %v16269_v42, %v317_v43 }
  0x22   : > { %14557 = vmatpush3.bf16.msra.mxu1 %v15745_v19  ;;  %v457_v2 = vsel %vm445_vm1, %v452_v56, %v456_v50  ;;  %v467_v10 = vor.u32 %v466_v3, %v462_v58  ;;  %v739_v11 = vrot.slane %v13923_v4, %v16213_v57  ;;  %v746_v12 = vrot.slane %v718_v5, %v16213_v57  ;;  %v15767_v58 = vld [vmem:[%s22408_s1 + $0x130] sm:$0xff]  }
  0x23   : > { %14558 = vmatprep.subr.bf16.mxu1 %v15748_v22  ;;  %v13922_v6 = vcombine.low %v307_v33, %v457_v2  ;;  %v716_v7 = vcombine.high %v13894_v36, %v457_v2  ;;  %v13925_v16 = vcombine.low %v309_v35, %v460_v62  ;;  %v819_v36 = vrot.slane %v13926_v17, %v16213_v57 }
  0x24   : > { %14453 = vmatpush3.bf16.msra.mxu0 %v15747_v21  ;;  %v16234_v18 = vsel %vm445_vm1, %v467_v10, %v471_v8  ;;  %v2203_v19 = vrot.slane %v739_v11, %v16213_v57  ;;  %v2217_v20 = vrot.slane %v746_v12, %v16213_v57  ;;  %v16240_v21 = vsel %vm626_vm0, %v630_v1, %v16228_v13  ;;  %v15771_v1 = vld [vmem:[%s22408_s1 + $0x168] sm:$0xff]  }
  0x25   : > { %14454 = vmatprep.subr.bf16.mxu0 %v15750_v24  ;;  %v725_v14 = vrot.slane %v13922_v6, %v16213_v57  ;;  %v732_v15 = vrot.slane %v716_v7, %v16213_v57  ;;  %v13928_v24 = vcombine.low %v310_v47, %v16234_v18  ;;  %v848_v39 = vcombine.high %v16240_v21, %v16223_v9 }
  0x26   : > { %14559 = vmatpush3.bf16.msra.mxu1 %v15749_v23  ;;  %v2221_v27 = vcombine.high %v2203_v19, %v2217_v20  ;;  %v479_v47 = vshll.u32 %v16223_v9, 16  ;;  %v16283_v56 = vor.u32 %v473_v45, %v471_v8  ;;  %v16301_v5 = vcombine.low %v16280_v53, %v16280_v53 }
  0x27   : > { %14560 = vmatprep.subr.bf16.mxu1 %v15752_v26  ;;  %v2196_v22 = vrot.slane %v725_v14, %v16213_v57  ;;  %v2210_v23 = vrot.slane %v732_v15, %v16213_v57  ;;  %v16247_v26 = vld [vmem:[%s16184_s8 + $0x20] sm:$0x7]  ;;  %v855_v35 = vrot.slane %v13928_v24, %v16213_v57  ;;  %v16276_v49 = vrot.slane %v848_v39, %v16213_v57 }
  0x28   : > { %14455 = vmatpush3.bf16.msra.mxu0 %v15751_v25  ;;  %v812_v25 = vrot.slane %v13925_v16, %v16213_v57  ;;  %4273 = vmatprep.mubr.bf16.mxu1 %v2221_v27  ;;  %v481_v54 = vrot.slane %v479_v47, 1  ;;  %v13931_v4 = vcombine.low %v16206_v51, %v16283_v56  ;;  %v492_v8 = vshrl.u32 %v16289_v59, 16  ;;  %v15776_v27 = vld [vmem:[%s22408_s1 + $0x160] sm:$0xff]  }
  0x29   : > { %14456 = vmatprep.subr.bf16.mxu0 %v15754_v29  ;;  %v846_v29 = vcombine.high %v13896_v52, %v16234_v18  ;;  %v2218_v33 = vcombine.low %v2196_v22, %v2210_v23  ;;  %v494_v10 = vshll.u32 %v16289_v59, 16  ;;  %v499_v14 = vshll.u32 %v16301_v5, 16  ;;  %v15777_v39 = vld [vmem:[%s22408_s1 + $0x120] sm:$0xff]  }
  0x2a   : > { %14561 = vmatpush3.bf16.msra.mxu1 %v15753_v28  ;;  %v2220_v28 = vcombine.low %v2203_v19, %v2217_v20  ;;  %v13975_v44 = vcombine.low %v812_v25, %v855_v35  ;;  %v482_v2 = vor.u32 %v481_v54, %v477_v46  ;;  %v942_v12 = vrot.slane %v13931_v4, %v16213_v57  ;;  %v15772_v20 = vld [vmem:[%s22408_s1 + $0x128] sm:$0xff]   ;;  %v15782_v46 = vld [vmem:[%s22408_s1 + $0x158] sm:$0xff]  }
  0x2b   : > { %14562 = vmatprep.subr.bf16.mxu1 %v15756_v31  ;;  %v2219_v31 = vcombine.high %v2196_v22, %v2210_v23  ;;  %v862_v37 = vrot.slane %v846_v29, %v16213_v57  ;;  %v633_v51 = vrot.slane %v16223_v9, 1  ;;  %v496_v23 = vrot.slane %v494_v10, 1 }
  0x2c   : > { %14457 = vmatpush3.bf16.msra.mxu0 %v15755_v30  ;;  %v13929_v30 = vcombine.low %v16240_v21, %v16216_v60  ;;  %v2285_v55 = vrot.slane %v13975_v44, %v16213_v57  ;;  %v16318_v24 = vrot.slane %v499_v14, 1 }
  0x2d   : > { %14654 = vmatprep.subr.bf16.mxu0 %v15760_v41  ;;  %v15766_v41 = vld [vmem:[%s22408_s1 + $0x170] sm:$0xff]   ;;  %4120 = vmatprep.mubr.bf16.mxu0 %v2219_v31  ;;  %v879_v62 = vcombine.low %v862_v37, %v16276_v49  ;;  %v880_v3 = vcombine.high %v862_v37, %v16276_v49 }
  0x2e   : > { %14563 = vmatpush3.bf16.msra.mxu1 %v15759_v40  ;;  %v869_v38 = vrot.slane %v13929_v30, %v16213_v57  ;;  %v16263_v40 = vcombine.low %v16247_v26, %v16247_v26  ;;  %v636_v30 = vrot.slane %v16289_v59, 1  ;;  %v16329_v31 = vld [vmem:[%s16184_s8 + $0x30] sm:$0xf] }
  0x2f   : > { %4121 = vmatmul.mubr.bf16.vlgmr.msra.gmra.mxu0 %v2218_v33  ;;  %v13983_v22 = vcombine.low %v880_v3, %v942_v12  ;;  %v320_v33 = vld [vmem:[%s16184_s8 + $0x34] sm:$0xf] }
  0x30   : > { %v878_v48 = vcombine.high %v855_v35, %v869_v38  ;;  %v13976_v50 = vcombine.low %v819_v36, %v869_v38  ;;  %v484_v52 = vshll.u32 %v16263_v40, 16  ;;  %14655 = vmatpush3.bf16.msra.mxu0 %v15763_v34  ;;  %v13978_v7 = vcombine.high %v869_v38, %v879_v62  ;;  %v15792_v34 = vld [vmem:[%s22408_s1 + $0x1f8] sm:$0xff]  }
  0x31   : > { %4274 = vmatmul.mubr.bf16.vlgmr.msra.gmra.mxu1 %v2220_v28  ;;  %14656 = vmatprep.subr.bf16.mxu0 %v15766_v41  ;;  %v16321_v25 = vrot.slane %v16263_v40, 1  ;;  %v2374_v35 = vrot.slane %v13983_v22, %v16213_v57  ;;  %v497_v36 = vor.u32 %v496_v23, %v492_v8  ;;  %v13932_v38 = vcombine.low %v16228_v13, %v16247_v26 }
  0x32   : > { %v13977_v61 = vcombine.low %v878_v48, %v862_v37  ;;  %v2292_v63 = vrot.slane %v13976_v50, %v16213_v57  ;;  %v486_v0 = vrot.slane %v484_v52, 1  ;;  %v2306_v17 = vrot.slane %v13978_v7, %v16213_v57  ;;  %14760 = vmatprep.subr.bf16.mxu1 %v15792_v34  ;;  %v15797_v7 = vld [vmem:[%s22408_s1 + $0x1b0] sm:$0xff]  }
  0x33   : > { %v16338_v37 = vsel %vm626_vm0, %v633_v51, %v16321_v25  ;;  %v488_v44 = vshrl.u32 %v16263_v40, 16  ;;  %v16358_v47 = vsel %vm445_vm1, %v497_v36, %v16318_v24  ;;  %v949_v48 = vrot.slane %v13932_v38, %v16213_v57  ;;  %v15786_v51 = vld [vmem:[%s22408_s1 + $0x150] sm:$0xff]  }
  0x34   : > { %v2299_v6 = vrot.slane %v13977_v61, %v16213_v57  ;;  %v16307_v11 = vsel %vm445_vm1, %v482_v2, %v486_v0  ;;  %14657 = vmatpush3.bf16.msra.mxu0 %v15767_v58  ;;  %v2310_v28 = vcombine.high %v2292_v63, %v2306_v17  ;;  %v2309_v29 = vcombine.low %v2292_v63, %v2306_v17  ;;  %v15795_v2 = vld [vmem:[%s22408_s1 + $0x1f0] sm:$0xff]   ;;  %v15800_v17 = vld [vmem:[%s22408_s1 + $0x1e8] sm:$0xff]  }
  0x35   : > { %v13924_v19 = vcombine.low %v16216_v60, %v16307_v11  ;;  %14658 = vmatprep.subr.bf16.mxu0 %v15771_v1  ;;  %v13934_v43 = vcombine.low %v16338_v37, %v16269_v42  ;;  %v754_v45 = vcombine.high %v16223_v9, %v16307_v11  ;;  %v16362_v50 = vcombine.low %v16329_v31, %v320_v33  ;;  %v15794_v9 = vld [vmem:[%s22408_s1 + $0x1b8] sm:$0xff]  }
  0x36   : > { %v2308_v15 = vcombine.high %v2285_v55, %v2299_v6  ;;  %v2307_v16 = vcombine.low %v2285_v55, %v2299_v6  ;;  %4281 = vmatprep.mubr.bf16.mxu1 %v2310_v28  ;;  %v16365_v40 = vrot.slane %v16301_v5, 1  ;;  %v13930_v54 = vcombine.low %v16269_v42, %v16358_v47  ;;  %14761 = vmatpush3.bf16.msra.mxu1 %v15794_v9  ;;  %v16396_v6 = vld [vmem:[%s16184_s8 + $0x38] sm:$0x7]  ;;  %v323_v9 = vld [vmem:[%s16184_s8 + $0x40] sm:$0xf] }
  0x37   : > { %v775_v60 = vrot.slane %v13924_v19, %v16213_v57  ;;  %v884_v58 = vcombine.high %v16289_v59, %v16358_v47  ;;  %v950_v61 = vcombine.low %v942_v12, %v949_v48  ;;  %v983_v62 = vrot.slane %v13934_v43, %v16213_v57  ;;  %14762 = vmatprep.subr.bf16.mxu1 %v15795_v2  ;;  %v15791_v43 = vld [vmem:[%s22408_s1 + $0x148] sm:$0xff]   ;;  %v16464_v48 = vld [vmem:[%s16184_s8 + $0x3c] sm:$0xf] }
  0x38   : > { %4128 = vmatprep.mubr.bf16.mxu0 %v2308_v15  ;;  %14659 = vmatpush3.bf16.msra.mxu0 %v15772_v20  ;;  %v16377_v63 = vor.u32 %v488_v44, %v486_v0  ;;  %v782_v1 = vrot.slane %v754_v45, %v16213_v57  ;;  %v16384_v3 = vrot.slane %v13930_v54, %v16213_v57  ;;  %v15801_v54 = vld [vmem:[%s22408_s1 + $0x1a8] sm:$0xff]  }
  0x39   : > { %4129 = vmatmul.mubr.bf16.gmra.mxu0 %v2307_v16  ;;  %v16346_v41 = vrot.slane %v775_v60, %v16213_v57  ;;  %4282 = vmatmul.mubr.bf16.gmra.mxu1 %v2309_v29  ;;  %v16387_v42 = vrot.slane %v884_v58, %v16213_v57  ;;  %v16391_v4 = vsel %vm626_vm0, %v636_v30, %v16365_v40  ;;  %v503_v16 = vshrl.u32 %v16301_v5, 16  ;;  %v16484_v2 = vld [vmem:[%s16184_s8 + $0x48] sm:$0xf] }
  0x3a   : > { %14660 = vmatprep.subr.bf16.mxu0 %v15776_v27  ;;  %v976_v0 = vcombine.high %v16338_v37, %v16289_v59  ;;  %v13984_v8 = vcombine.high %v16276_v49, %v950_v61  ;;  %v2395_v10 = vrot.slane %v983_v62, %v16213_v57  ;;  %v13927_v12 = vcombine.low %v16247_v26, %v16377_v63  ;;  %v15783_v59 = vld [vmem:[%s22408_s1 + $0x118] sm:$0xff]  }
  0x3b   : > { %v2397_v52 = vcombine.high %v2374_v35, %v16346_v41  ;;  %v2396_v55 = vcombine.low %v2374_v35, %v16346_v41  ;;  %v16406_v14 = vrot.slane %v782_v1, %v16213_v57  ;;  %v13936_v49 = vcombine.low %v16321_v25, %v16280_v53  ;;  %14763 = vmatpush3.bf16.msra.mxu1 %v15797_v7  ;;  %v15787_v35 = vld [vmem:[%s22408_s1 + $0x110] sm:$0xff]   ;;  %v15802_v7 = vld [vmem:[%s22408_s1 + $0x1e0] sm:$0xff]  }
  0x3c   : > { %14661 = vmatpush3.bf16.msra.mxu0 %v15777_v39  ;;  %v990_v15 = vrot.slane %v976_v0, %v16213_v57  ;;  %v13938_v26 = vcombine.low %v16391_v4, %v16329_v31  ;;  %v2381_v19 = vrot.slane %v13984_v8, %v16213_v57  ;;  %v836_v20 = vrot.slane %v13927_v12, %v16213_v57  ;;  %v326_v0 = vld [vmem:[%s16184_s8 + $0x4c] sm:$0xf] }
  0x3d   : > { %4136 = vmatprep.mubr.bf16.mxu0 %v2397_v52  ;;  %14662 = vmatprep.subr.bf16.mxu0 %v15782_v46  ;;  %v1082_v22 = vcombine.high %v16391_v4, %v16362_v50  ;;  %v16429_v23 = vcombine.low %v16396_v6, %v16396_v6  ;;  %v1055_v5 = vrot.slane %v13936_v49, %v16213_v57  ;;  %v16468_v52 = vld [vmem:[%s16184_s8 + $0x44] sm:$0x7] }
  0x3e   : > { %v1089_v27 = vrot.slane %v13938_v26, %v16213_v57  ;;  %v16434_v28 = vrot.slane %v990_v15, %v16213_v57  ;;  %v16437_v29 = vor.u32 %v503_v16, %v16318_v24  ;;  %v2399_v60 = vcombine.high %v2381_v19, %v2395_v10  ;;  %14764 = vmatprep.subr.bf16.mxu1 %v15800_v17  ;;  %v15805_v16 = vld [vmem:[%s22408_s1 + $0x140] sm:$0xff]  }
  0x3f   : > { %v2398_v30 = vcombine.low %v2381_v19, %v2395_v10  ;;  %v13980_v33 = vcombine.low %v836_v20, %v16384_v3  ;;  %v16441_v34 = vrot.slane %v1082_v22, %v16213_v57  ;;  %v514_v39 = vshll.u32 %v16429_v23, 16  ;;  %14765 = vmatpush3.bf16.msra.mxu1 %v15801_v54 }
  0x40   : > { %14663 = vmatpush3.bf16.msra.mxu0 %v15783_v59  ;;  %v13988_v36 = vcombine.low %v1055_v5, %v1089_v27  ;;  %v13933_v24 = vcombine.low %v16280_v53, %v16437_v29  ;;  %v1098_v38 = vcombine.high %v16384_v3, %v1089_v27  ;;  %4289 = vmatprep.mubr.bf16.mxu1 %v2399_v60  ;;  %v16459_v53 = vrot.slane %v16429_v23, 1  ;;  %v15803_v5 = vld [vmem:[%s22408_s1 + $0x1a0] sm:$0xff]  }
  0x41   : > { %4137 = vmatmul.mubr.bf16.gmra.mxu0 %v2396_v55  ;;  %14664 = vmatprep.subr.bf16.mxu0 %v15786_v51  ;;  %v16454_v44 = vrot.slane %v13980_v33, %v16213_v57  ;;  %v1100_v45 = vcombine.high %v16387_v42, %v16441_v34  ;;  %v1099_v46 = vcombine.low %v16387_v42, %v16441_v34  ;;  %v15793_v55 = vld [vmem:[%s22408_s1 + $0x108] sm:$0xff]   ;;  %v16481_v1 = vrot.slane %v514_v39, 1  ;;  %v15806_v33 = vld [vmem:[%s22408_s1 + $0x100] sm:$0xff]  }
  0x42   : > { %4290 = vmatmul.mubr.bf16.gmra.mxu1 %v2398_v30  ;;  %v2484_v58 = vrot.slane %v13988_v36, %v16213_v57  ;;  %v16478_v61 = vrot.slane %v13933_v24, %v16213_v57  ;;  %v13991_v62 = vcombine.low %v1098_v38, %v16387_v42  ;;  %v13940_v12 = vcombine.low %v16365_v40, %v16396_v6 }
  0x43   : > { %v2486_v8 = vcombine.high %v16406_v14, %v16454_v44  ;;  %v2485_v10 = vcombine.low %v16406_v14, %v16454_v44  ;;  %v13992_v59 = vcombine.high %v1089_v27, %v1099_v46  ;;  %v507_v20 = vshrl.u32 %v16362_v50, 16  ;;  %14766 = vmatprep.subr.bf16.mxu1 %v15802_v7 }
  0x44   : > { %14665 = vmatpush3.bf16.msra.mxu0 %v15787_v35  ;;  %v2488_v51 = vcombine.high %v16434_v28, %v2484_v58  ;;  %v2487_v15 = vcombine.low %v16434_v28, %v2484_v58  ;;  %v13993_v49 = vcombine.low %v1100_v45, %v16478_v61  ;;  %v2552_v26 = vrot.slane %v13991_v62, %v16213_v57  ;;  %v15807_v35 = vld [vmem:[%s22408_s1 + $0x1d8] sm:$0xff]  }
  0x45   : > { %14666 = vmatprep.subr.bf16.mxu0 %v15791_v43  ;;  %4144 = vmatprep.mubr.bf16.mxu0 %v2486_v8  ;;  %v1161_v17 = vrot.slane %v13940_v12, %v16213_v57  ;;  %v16505_v19 = vrot.slane %v13992_v59, %v16213_v57  ;;  %v509_v22 = vshll.u32 %v16362_v50, 16  ;;  %v16514_v28 = vcombine.low %v16464_v48, %v323_v9 }
  0x46   : > { %4297 = vmatprep.mubr.bf16.mxu1 %v2488_v51  ;;  %v2566_v27 = vrot.slane %v13993_v49, %v16213_v57  ;;  %v16518_v60 = vcombine.low %v16468_v52, %v16468_v52  ;;  %v639_v30 = vrot.slane %v16362_v50, 1  ;;  %v16529_v38 = vcombine.low %v16484_v2, %v326_v0  ;;  %14767 = vmatpush3.bf16.msra.mxu1 %v15803_v5 }
  0x47   : > { %v1162_v36 = vcombine.low %v16478_v61, %v1161_v17  ;;  %v511_v24 = vrot.slane %v509_v22, 1  ;;  %v518_v39 = vshrl.u32 %v16429_v23, 16  ;;  %v522_v46 = vshrl.u32 %v16514_v28, 16  ;;  %v15808_v23 = vld [vmem:[%s22408_s1 + $0x198] sm:$0xff]   ;;  %14768 = vmatprep.subr.bf16.mxu1 %v15807_v35  ;;  %v15809_v17 = vld [vmem:[%s22408_s1 + $0x1d0] sm:$0xff]  }
  0x48   : > { %14667 = vmatpush3.bf16.msra.mxu0 %v15793_v55  ;;  %v2575_v43 = vcombine.high %v2552_v26, %v2566_v27  ;;  %v2574_v45 = vcombine.low %v2552_v26, %v2566_v27  ;;  %v524_v9 = vshll.u32 %v16514_v28, 16  ;;  %v529_v62 = vshll.u32 %v16518_v60, 16  ;;  %v16582_v35 = vld [vmem:[%s16184_s8 + $0x50] sm:$0x7] }
  0x49   : > { %4145 = vmatmul.mubr.bf16.gmra.mxu0 %v2485_v10  ;;  %14668 = vmatprep.subr.bf16.mxu0 %v15805_v16  ;;  %v13994_v54 = vcombine.high %v16441_v34, %v1162_v36  ;;  %v512_v58 = vor.u32 %v511_v24, %v507_v20  ;;  %v16538_v0 = vsel %vm626_vm0, %v639_v30, %v16459_v53  ;;  %v642_v7 = vrot.slane %v16514_v28, 1 }
  0x4a   : > { %4298 = vmatmul.mubr.bf16.gmra.mxu1 %v2487_v15  ;;  %4152 = vmatprep.mubr.bf16.mxu0 %v2575_v43  ;;  %v526_v55 = vrot.slane %v524_v9, 1  ;;  %v16545_v8 = vrot.slane %v16518_v60, 1  ;;  %v13942_v34 = vcombine.low %v16538_v0, %v16464_v48  ;;  %v531_v59 = vrot.slane %v529_v62, 1 }
  0x4b   : > { %v2573_v10 = vrot.slane %v13994_v54, %v16213_v57  ;;  %v16552_v12 = vsel %vm445_vm1, %v512_v58, %v16481_v1  ;;  %v1188_v51 = vcombine.high %v16538_v0, %v16514_v28  ;;  %v16568_v27 = vor.u32 %v518_v39, %v16481_v1  ;;  %14769 = vmatpush3.bf16.msra.mxu1 %v15808_v23  ;;  %v15812_v1 = vld [vmem:[%s22408_s1 + $0x1c8] sm:$0xff]   ;;  %v15814_v54 = vld [vmem:[%s22408_s1 + $0x1c0] sm:$0xff]  }
  0x4c   : > { %22613 = vst [vmem:[#allocation4_spill] sm:$0xff] %v16545_v8  ;;  %14669 = vmatpush3.bf16.msra.mxu0 %v15806_v33  ;;  %v13935_v15 = vcombine.low %v16329_v31, %v16552_v12  ;;  %v998_v49 = vcombine.high %v16362_v50, %v16552_v12  ;;  %v527_v26 = vor.u32 %v526_v55, %v522_v46  ;;  %v15810_v31 = vld [vmem:[%s22408_s1 + $0x190] sm:$0xff]  }
  0x4d   : > { %v1195_v16 = vrot.slane %v13942_v34, %v16213_v57  ;;  %v2577_v20 = vcombine.high %v16505_v19, %v2573_v10  ;;  %v2576_v22 = vcombine.low %v16505_v19, %v2573_v10  ;;  %v1202_v5 = vrot.slane %v1188_v51, %v16213_v57  ;;  %14770 = vmatprep.subr.bf16.mxu1 %v15809_v17 }
  0x4e   : > { %v1019_v50 = vrot.slane %v13935_v15, %v16213_v57  ;;  %v1026_v30 = vrot.slane %v998_v49, %v16213_v57  ;;  %v16576_v33 = vsel %vm445_vm1, %v527_v26, %v531_v59  ;;  %v16594_v43 = vsel %vm626_vm0, %v642_v7, %v16545_v8  ;;  %v16621_v7 = vld [vmem:[%s16184_s8 + $0x54] sm:$0xf] }
  0x4f   : > { %v16579_v19 = vrot.slane %v1195_v16, %v16213_v57  ;;  %4305 = vmatprep.mubr.bf16.mxu1 %v2577_v20  ;;  %v13939_v36 = vcombine.low %v16464_v48, %v16576_v33  ;;  %v1104_v24 = vcombine.high %v16514_v28, %v16576_v33  ;;  %v2662_v39 = vrot.slane %v1202_v5, %v16213_v57 }
  0x50   : > { %v16600_v46 = vrot.slane %v1019_v50, %v16213_v57  ;;  %v16603_v9 = vrot.slane %v1026_v30, %v16213_v57  ;;  %v13937_v48 = vcombine.low %v16396_v6, %v16568_v27  ;;  %v13946_v28 = vcombine.low %v16594_v43, %v16484_v2  ;;  %v329_v6 = vld [vmem:[%s16184_s8 + $0x58] sm:$0xf]  ;;  %14771 = vmatpush3.bf16.msra.mxu1 %v15810_v31  ;;  %v16644_v50 = vld [vmem:[%s16184_s8 + $0x5c] sm:$0x7] }
  0x51   : > { %4153 = vmatmul.mubr.bf16.gmra.mxu0 %v2574_v45  ;;  %v15813_v45 = vld [vmem:[%s22408_s1 + $0x188] sm:$0xff]   ;;  %v16613_v58 = vrot.slane %v13939_v36, %v16213_v57  ;;  %v16616_v62 = vrot.slane %v1104_v24, %v16213_v57  ;;  %v2666_v23 = vcombine.high %v16579_v19, %v2662_v39  ;;  %v2665_v55 = vcombine.low %v16579_v19, %v2662_v39 }
  0x52   : > { %22614 = vst [vmem:[#allocation5_spill] sm:$0xff] %v16603_v9  ;;  %4306 = vmatmul.mubr.bf16.gmra.mxu1 %v2576_v22  ;;  %v2664_v34 = vcombine.high %v16600_v46, %v16603_v9  ;;  %v2663_v10 = vcombine.low %v16600_v46, %v16603_v9  ;;  %v1072_v51 = vrot.slane %v13937_v48, %v16213_v57  ;;  %v533_v17 = vshrl.u32 %v16518_v60, 16 }
  0x53   : > { %v1301_v15 = vrot.slane %v13946_v28, %v16213_v57  ;;  %4313 = vmatprep.mubr.bf16.mxu1 %v2666_v23  ;;  %v13944_v49 = vcombine.low %v16459_v53, %v16468_v52  ;;  %v1294_v26 = vcombine.high %v16594_v43, %v16529_v38  ;;  %v16636_v16 = vcombine.low %v16582_v35, %v16582_v35 }
  0x54   : > { %14772 = vmatprep.subr.bf16.mxu1 %v15812_v1  ;;  %4160 = vmatprep.mubr.bf16.mxu0 %v2664_v34  ;;  %v13990_v22 = vcombine.low %v1072_v51, %v16613_v58  ;;  %v537_v5 = vshrl.u32 %v16529_v38, 16  ;;  %v539_v31 = vshll.u32 %v16529_v38, 16  ;;  %v16650_v36 = vor.u32 %v533_v17, %v531_v59  ;;  %v15815_v1 = vld [vmem:[%s22408_s1 + $0x180] sm:$0xff]  }
  0x55   : > { %v1310_v20 = vcombine.high %v16613_v58, %v1301_v15  ;;  %v1267_v30 = vrot.slane %v13944_v49, %v16213_v57  ;;  %v16648_v19 = vrot.slane %v1294_v26, %v16213_v57  ;;  %v544_v60 = vshll.u32 %v16636_v16, 16  ;;  %14773 = vmatpush3.bf16.msra.mxu1 %v15813_v45 }
  0x56   : > { %22615 = vst [vmem:[#allocation6_spill] sm:$0xff] %v16650_v36  ;;  %v16657_v24 = vrot.slane %v13990_v22, %v16213_v57  ;;  %v541_v48 = vrot.slane %v539_v31, 1  ;;  %v16661_v28 = vcombine.low %v16621_v7, %v329_v6  ;;  %14774 = vmatprep.subr.bf16.mxu1 %v15814_v54  ;;  %v13941_v34 = vcombine.low %v16468_v52, %v16650_v36 }
  0x57   : > { %v14001_v39 = vcombine.low %v1310_v20, %v16616_v62  ;;  %v1311_v59 = vcombine.low %v16616_v62, %v16648_v19  ;;  %v14000_v23 = vcombine.low %v1267_v30, %v1301_v15  ;;  %v546_v45 = vrot.slane %v544_v60, 1 }
  0x58   : > { %22616 = vst [vmem:[#allocation7_spill] sm:$0xff] %v16657_v24  ;;  %v542_v51 = vor.u32 %v541_v48, %v537_v5  ;;  %v1312_v49 = vcombine.high %v16616_v62, %v16648_v19  ;;  %v16672_v6 = vcombine.low %v16644_v50, %v16644_v50  ;;  %v16676_v17 = vrot.slane %v13941_v34, %v16213_v57 }
  0x59   : > { %4161 = vmatmul.mubr.bf16.gmra.mxu0 %v2663_v10  ;;  %v2744_v10 = vrot.slane %v14001_v39, %v16213_v57  ;;  %v14002_v54 = vcombine.high %v1301_v15, %v1311_v59  ;;  %v2737_v26 = vrot.slane %v14000_v23, %v16213_v57  ;;  %v552_v20 = vshrl.u32 %v16661_v28, 16  ;;  %14775 = vmatpush3.bf16.msra.mxu1 %v15815_v1 }
  0x5a   : > { %4314 = vmatmul.mubr.bf16.gmra.mxu1 %v2665_v55  ;;  %v16682_v5 = vsel %vm445_vm1, %v542_v51, %v546_v45  ;;  %v554_v31 = vshll.u32 %v16661_v28, 16  ;;  %v14007_v60 = vcombine.low %v1312_v49, %v16676_v17  ;;  %v559_v1 = vshll.u32 %v16672_v6, 16  ;;  %v332_v55 = vld [vmem:[%s16184_s8 + $0x64] sm:$0xf] }
  0x5b   : > { %v2753_v52 = vcombine.high %v16657_v24, %v2744_v10  ;;  %v2752_v22 = vcombine.low %v16657_v24, %v2744_v10  ;;  %22617 = vst [vmem:[#allocation8_spill] sm:$0xff] %v16682_v5  ;;  %v2751_v15 = vrot.slane %v14002_v54, %v16213_v57  ;;  %v13943_v30 = vcombine.low %v16484_v2, %v16682_v5  ;;  %v16699_v54 = vld [vmem:[%s16184_s8 + $0x60] sm:$0xf] }
  0x5c   : > { %v556_v39 = vrot.slane %v554_v31, 1  ;;  %v645_v48 = vrot.slane %v16529_v38, 1  ;;  %v16693_v59 = vrot.slane %v16636_v16, 1  ;;  %v648_v23 = vrot.slane %v16661_v28, 1 }
  0x5d   : > { %4168 = vmatprep.mubr.bf16.mxu0 %v2753_v52  ;;  %v2755_v34 = vcombine.high %v2737_v26, %v2751_v15  ;;  %v2754_v10 = vcombine.low %v2737_v26, %v2751_v15  ;;  %v1231_v51 = vrot.slane %v13943_v30, %v16213_v57  ;;  %v2819_v2 = vrot.slane %v14007_v60, %v16213_v57 }
  0x5e   : > { %22618 = vst [vmem:[#allocation9_spill] sm:$0xff] %v16693_v59  ;;  %v557_v49 = vor.u32 %v556_v39, %v552_v20  ;;  %v561_v32 = vrot.slane %v559_v1, 1  ;;  %v16703_v52 = vsel %vm626_vm0, %v645_v48, %v16693_v59  ;;  %v13948_v31 = vcombine.low %v16545_v8, %v16582_v35 }
  0x5f   : > { %22619 = vst [vmem:[#allocation10_spill] sm:$0xff] %v16703_v52  ;;  %4321 = vmatprep.mubr.bf16.mxu1 %v2755_v34  ;;  %v16708_v36 = vrot.slane %v1231_v51, %v16213_v57  ;;  %v13950_v26 = vcombine.low %v16703_v52, %v16621_v7  ;;  %v548_v15 = vshrl.u32 %v16636_v16, 16  ;;  %v1210_v20 = vcombine.high %v16529_v38, %v16682_v5 }
  0x60   : > { %v1373_v30 = vrot.slane %v13948_v31, %v16213_v57  ;;  %v16720_v60 = vcombine.low %v16699_v54, %v332_v55  ;;  %v16723_v1 = vrot.slane %v16672_v6, 1 }
  0x61   : > { %4169 = vmatmul.mubr.bf16.gmra.mxu0 %v2752_v22  ;;  %22620 = vst [vmem:[#allocation11_spill] sm:$0xff] %v16708_v36  ;;  %v16716_v22 = vsel %vm445_vm1, %v557_v49, %v561_v32  ;;  %v2842_v39 = vcombine.high %v2819_v2, %v16708_v36  ;;  %v2841_v48 = vcombine.low %v2819_v2, %v16708_v36 }
  0x62   : > { %22621 = vst [vmem:[#allocation12_spill] sm:$0xff] %v16716_v22  ;;  %22622 = vst [vmem:[#allocation13_spill] sm:$0xff] %v16723_v1  ;;  %v13947_v16 = vcombine.low %v16621_v7, %v16716_v22  ;;  %v1316_v38 = vcombine.high %v16661_v28, %v16716_v22  ;;  %4322 = vmatmul.mubr.bf16.gmra.mxu1 %v2754_v10  ;;  %v1374_v34 = vcombine.low %v16676_v17, %v1373_v30  ;;  %v16756_v30 = vld [vmem:[%s16184_s8 + $0x68] sm:$0x7] }
  0x63   : > { %v1407_v55 = vrot.slane %v13950_v26, %v16213_v57  ;;  %v16733_v51 = vor.u32 %v548_v15, %v546_v45  ;;  %v1238_v49 = vrot.slane %v1210_v20, %v16213_v57  ;;  %4176 = vmatprep.mubr.bf16.mxu0 %v2842_v39  ;;  %v16744_v7 = vsel %vm626_vm0, %v648_v23, %v16723_v1 }
  0x64   : > { %v16737_v31 = vrot.slane %v13947_v16, %v16213_v57  ;;  %v16740_v2 = vrot.slane %v1316_v38, %v16213_v57  ;;  %22626 = vst [vmem:[#allocation17_spill] sm:$0xff] %v16744_v7  ;;  %v1400_v10 = vcombine.high %v16703_v52, %v16661_v28  ;;  %v14008_v26 = vcombine.high %v16648_v19, %v1374_v34 }
  0x65   : > { %22623 = vst [vmem:[#allocation14_spill] sm:$0xff] %v16733_v51  ;;  %v2840_v45 = vrot.slane %v1407_v55, %v16213_v57  ;;  %v13945_v15 = vcombine.low %v16582_v35, %v16733_v51  ;;  %v16753_v20 = vrot.slane %v1238_v49, %v16213_v57  ;;  %v13952_v23 = vcombine.low %v16693_v59, %v16644_v50 }
  0x66   : > { %22624 = vst [vmem:[#allocation15_spill] sm:$0xff] %v16737_v31  ;;  %22625 = vst [vmem:[#allocation16_spill] sm:$0xff] %v16740_v2  ;;  %v1414_v39 = vrot.slane %v1400_v10, %v16213_v57  ;;  %v13954_v28 = vcombine.low %v16744_v7, %v16699_v54  ;;  %v563_v19 = vshrl.u32 %v16672_v6, 16  ;;  %v2826_v16 = vrot.slane %v14008_v26, %v16213_v57 }
  0x67   : > { %22627 = vst [vmem:[#allocation18_spill] sm:$0xff] %v16753_v20  ;;  %v1284_v35 = vrot.slane %v13945_v15, %v16213_v57  ;;  %v1506_v38 = vcombine.high %v16744_v7, %v16720_v60  ;;  %v16770_v34 = vcombine.low %v16756_v30, %v16756_v30  ;;  %v1479_v55 = vrot.slane %v13952_v23, %v16213_v57 }
  0x68   : > { %v1513_v49 = vrot.slane %v13954_v28, %v16213_v57  ;;  %v2915_v10 = vrot.slane %v1414_v39, %v16213_v57  ;;  %v16775_v6 = vor.u32 %v563_v19, %v561_v32  ;;  %v2843_v26 = vcombine.low %v2826_v16, %v2840_v45 }
  0x69   : > { %4177 = vmatmul.mubr.bf16.gmra.mxu0 %v2841_v48  ;;  %v2844_v48 = vcombine.high %v2826_v16, %v2840_v45  ;;  %v14004_v15 = vcombine.low %v1284_v35, %v16737_v31  ;;  %v1520_v22 = vrot.slane %v1506_v38, %v16213_v57  ;;  %v574_v39 = vshll.u32 %v16770_v34, 16  ;;  %v16792_v16 = vld [vmem:[%s16184_s8 + $0x6c] sm:$0xf]  ;;  %v16796_v35 = vld [vmem:[%s16184_s8 + $0x74] sm:$0x7] }
  0x6a   : > { %22628 = vst [vmem:[#allocation19_spill] sm:$0xff] %v16775_v6  ;;  %v14012_v7 = vcombine.low %v1479_v55, %v1513_v49  ;;  %v13949_v51 = vcombine.low %v16644_v50, %v16775_v6  ;;  %v1522_v23 = vcombine.high %v16737_v31, %v1513_v49  ;;  %v16788_v28 = vrot.slane %v16770_v34, 1  ;;  %v335_v50 = vld [vmem:[%s16184_s8 + $0x70] sm:$0xf]  ;;  %v16804_v6 = vld [vmem:[%s16184_s8 + $0x78] sm:$0xf] }
  0x6b   : > { %4329 = vmatprep.mubr.bf16.mxu1 %v2844_v48  ;;  %v16784_v32 = vrot.slane %v14004_v15, %v16213_v57  ;;  %v1524_v45 = vcombine.high %v16740_v2, %v1520_v22  ;;  %v1523_v19 = vcombine.low %v16740_v2, %v1520_v22  ;;  %v576_v15 = vrot.slane %v574_v39, 1  ;;  %v338_v31 = vld [vmem:[%s16184_s8 + $0x7c] sm:$0xf] }
  0x6c   : > { %22630 = vst [vmem:[#allocation21_spill] sm:$0xff] %v16788_v28  ;;  %4330 = vmatmul.mubr.bf16.gmra.mxu1 %v2843_v26  ;;  %v2929_v38 = vrot.slane %v14012_v7, %v16213_v57  ;;  %v16800_v55 = vrot.slane %v13949_v51, %v16213_v57  ;;  %v14015_v48 = vcombine.low %v1522_v23, %v16740_v2  ;;  %v567_v24 = vshrl.u32 %v16720_v60, 16 }
  0x6d   : > { %22629 = vst [vmem:[#allocation20_spill] sm:$0xff] %v16784_v32  ;;  %v2931_v59 = vcombine.high %v16753_v20, %v16784_v32  ;;  %v2930_v8 = vcombine.low %v16753_v20, %v16784_v32  ;;  %v13956_v26 = vcombine.low %v16723_v1, %v16756_v30  ;;  %v14016_v36 = vcombine.high %v1513_v49, %v1523_v19 }
  0x6e   : > { %22631 = vst [vmem:[#allocation22_spill] sm:$0xff] %v16800_v55  ;;  %v2933_v7 = vcombine.high %v2915_v10, %v2929_v38  ;;  %v2932_v9 = vcombine.low %v2915_v10, %v2929_v38  ;;  %v14017_v51 = vcombine.low %v1524_v45, %v16800_v55  ;;  %v2997_v23 = vrot.slane %v14015_v48, %v16213_v57 }
  0x6f   : > { %4184 = vmatprep.mubr.bf16.mxu0 %v2931_v59  ;;  %v1585_v39 = vrot.slane %v13956_v26, %v16213_v57  ;;  %v3004_v2 = vrot.slane %v14016_v36, %v16213_v57  ;;  %v569_v5 = vshll.u32 %v16720_v60, 16  ;;  %v13912_v49 = vcombine.low %v16792_v16, %v335_v50 }
  0x70   : > { %4337 = vmatprep.mubr.bf16.mxu1 %v2933_v7  ;;  %v3011_v32 = vrot.slane %v14017_v51, %v16213_v57  ;;  %v16823_v10 = vcombine.low %v16796_v35, %v16796_v35  ;;  %v651_v59 = vrot.slane %v16720_v60, 1  ;;  %v16828_v36 = vcombine.low %v16804_v6, %v338_v31 }
  0x71   : > { %4185 = vmatmul.mubr.bf16.gmra.mxu0 %v2930_v8  ;;  %v1586_v45 = vcombine.low %v16800_v55, %v1585_v39  ;;  %v571_v19 = vrot.slane %v569_v5, 1  ;;  %v578_v38 = vshrl.u32 %v16770_v34, 16  ;;  %v582_v26 = vshrl.u32 %v13912_v49, 16 }
  0x72   : > { %v3020_v8 = vcombine.high %v2997_v23, %v3011_v32  ;;  %v3019_v48 = vcombine.low %v2997_v23, %v3011_v32  ;;  %v584_v7 = vshll.u32 %v13912_v49, 16  ;;  %v589_v1 = vshll.u32 %v16823_v10, 16 }
  0x73   : > { %v14018_v51 = vcombine.high %v1520_v22, %v1586_v45  ;;  %v572_v50 = vor.u32 %v571_v19, %v567_v24  ;;  %v16834_v20 = vsel %vm626_vm0, %v651_v59, %v16788_v28  ;;  %v654_v39 = vrot.slane %v13912_v49, 1 }
  0x74   : > { %22632 = vst [vmem:[#allocation23_spill] sm:$0xff] %v16834_v20  ;;  %4338 = vmatmul.mubr.bf16.gmra.mxu1 %v2932_v9  ;;  %4192 = vmatprep.mubr.bf16.mxu0 %v3020_v8  ;;  %v586_v5 = vrot.slane %v584_v7, 1  ;;  %v16837_v31 = vrot.slane %v16823_v10, 1  ;;  %v13958_v34 = vcombine.low %v16834_v20, %v16792_v16  ;;  %v591_v22 = vrot.slane %v589_v1, 1 }
  0x75   : > { %v3018_v32 = vrot.slane %v14018_v51, %v16213_v57  ;;  %v16843_v24 = vsel %vm445_vm1, %v572_v50, %v576_v15  ;;  %v1612_v23 = vcombine.high %v16834_v20, %v13912_v49  ;;  %v16852_v55 = vor.u32 %v578_v38, %v576_v15 }
  0x76   : > { %22633 = vst [vmem:[#allocation24_spill] sm:$0xff] %v16837_v31  ;;  %22634 = vst [vmem:[#allocation25_spill] sm:$0xff] %v16843_v24  ;;  %v13951_v9 = vcombine.low %v16699_v54, %v16843_v24  ;;  %v1422_v59 = vcombine.high %v16720_v60, %v16843_v24  ;;  %v587_v45 = vor.u32 %v586_v5, %v582_v26  ;;  %v16861_v60 = vld [vmem:[%s16184_s8 + $0x80] sm:$0x7] }
  0x77   : > { %v1619_v19 = vrot.slane %v13958_v34, %v16213_v57  ;;  %v3022_v8 = vcombine.high %v3004_v2, %v3018_v32  ;;  %v3021_v7 = vcombine.low %v3004_v2, %v3018_v32  ;;  %v1626_v51 = vrot.slane %v1612_v23, %v16213_v57  ;;  %22635 = vst [vmem:[#allocation26_spill] sm:$0xff] %v16852_v55 }
  0x78   : > { %v1443_v1 = vrot.slane %v13951_v9, %v16213_v57  ;;  %v1450_v50 = vrot.slane %v1422_v59, %v16213_v57  ;;  %v16857_v20 = vsel %vm445_vm1, %v587_v45, %v591_v22  ;;  %v13953_v34 = vcombine.low %v16756_v30, %v16852_v55  ;;  %v16888_v9 = vld [vmem:[%s16184_s8 + $0x84] sm:$0xf]  ;;  %v341_v59 = vld [vmem:[%s16184_s8 + $0x88] sm:$0xf] }
  0x79   : > { %4193 = vmatmul.mubr.bf16.gmra.mxu0 %v3019_v48  ;;  %22636 = vst [vmem:[#allocation27_spill] sm:$0xff] %v16857_v20  ;;  %v3093_v54 = vrot.slane %v1619_v19, %v16213_v57  ;;  %4345 = vmatprep.mubr.bf16.mxu1 %v3022_v8  ;;  %v13955_v2 = vcombine.low %v16792_v16, %v16857_v20 }
  0x7a   : > { %v1528_v15 = vcombine.high %v13912_v49, %v16857_v20  ;;  %v3107_v38 = vrot.slane %v1626_v51, %v16213_v57  ;;  %v16869_v48 = vsel %vm626_vm0, %v654_v39, %v16837_v31  ;;  %v16872_v26 = vrot.slane %v1443_v1, %v16213_v57 }
  0x7b   : > { %22637 = vst [vmem:[#allocation28_spill] sm:$0xff] %v16869_v48  ;;  %v16875_v5 = vrot.slane %v1450_v50, %v16213_v57  ;;  %v13962_v16 = vcombine.low %v16869_v48, %v16804_v6  ;;  %v16882_v49 = vrot.slane %v13955_v2, %v16213_v57  ;;  %v1496_v19 = vrot.slane %v13953_v34, %v16213_v57 }
  0x7c   : > { %22638 = vst [vmem:[#allocation29_spill] sm:$0xff] %v16872_v26  ;;  %v16885_v32 = vrot.slane %v1528_v15, %v16213_v57  ;;  %v3111_v39 = vcombine.high %v3093_v54, %v3107_v38  ;;  %v3110_v23 = vcombine.low %v3093_v54, %v3107_v38  ;;  %4346 = vmatmul.mubr.bf16.gmra.mxu1 %v3021_v7  ;;  %v593_v50 = vshrl.u32 %v16823_v10, 16  ;;  %v16907_v54 = vld [vmem:[%s16184_s8 + $0x8c] sm:$0x7] }
  0x7d   : > { %22639 = vst [vmem:[#allocation30_spill] sm:$0xff] %v16875_v5  ;;  %22640 = vst [vmem:[#allocation31_spill] sm:$0xff] %v16882_v49  ;;  %v3109_v45 = vcombine.high %v16872_v26, %v16875_v5  ;;  %v3108_v30 = vcombine.low %v16872_v26, %v16875_v5  ;;  %v1725_v8 = vrot.slane %v13962_v16, %v16213_v57  ;;  %v597_v38 = vshrl.u32 %v16828_v36, 16 }
  0x7e   : > { %22641 = vst [vmem:[#allocation32_spill] sm:$0xff] %v16885_v32  ;;  %4353 = vmatprep.mubr.bf16.mxu1 %v3111_v39  ;;  %v13960_v51 = vcombine.low %v16788_v28, %v16796_v35  ;;  %v1718_v1 = vcombine.high %v16869_v48, %v16828_v36  ;;  %v16903_v7 = vcombine.low %v16861_v60, %v16861_v60  ;;  %v599_v34 = vshll.u32 %v16828_v36, 16 }
  0x7f   : > { %4200 = vmatprep.mubr.bf16.mxu0 %v3109_v45  ;;  %v1734_v2 = vcombine.high %v16882_v49, %v1725_v8  ;;  %v14014_v15 = vcombine.low %v1496_v19, %v16882_v49  ;;  %v16917_v20 = vor.u32 %v593_v50, %v591_v22  ;;  %v16925_v26 = vcombine.low %v16888_v9, %v341_v59 }
  0x80   : > { %v1691_v16 = vrot.slane %v13960_v51, %v16213_v57  ;;  %v16915_v39 = vrot.slane %v1718_v1, %v16213_v57  ;;  %v604_v10 = vshll.u32 %v16903_v7, 16  ;;  %v601_v19 = vrot.slane %v599_v34, 1 }
  0x81   : > { %22642 = vst [vmem:[#allocation33_spill] sm:$0xff] %v16917_v20  ;;  %4201 = vmatmul.mubr.bf16.gmra.mxu0 %v3108_v30  ;;  %v16921_v45 = vrot.slane %v14014_v15, %v16213_v57  ;;  %v14025_v48 = vcombine.low %v1734_v2, %v16885_v32  ;;  %v13957_v22 = vcombine.low %v16796_v35, %v16917_v20  ;;  %v660_v55 = vrot.slane %v16925_v26, 1  ;;  %v16963_v20 = vld [vmem:[%s16184_s8 + $0x90] sm:$0xf] }
  0x82   : > { %v1735_v51 = vcombine.low %v16885_v32, %v16915_v39  ;;  %v14024_v49 = vcombine.low %v1691_v16, %v1725_v8  ;;  %v606_v1 = vrot.slane %v604_v10, 1  ;;  %v602_v30 = vor.u32 %v601_v19, %v597_v38 }
  0x83   : > { %22643 = vst [vmem:[#allocation34_spill] sm:$0xff] %v16921_v45  ;;  %v3189_v50 = vrot.slane %v14025_v48, %v16213_v57  ;;  %v1736_v15 = vcombine.high %v16885_v32, %v16915_v39  ;;  %v16936_v2 = vcombine.low %v16907_v54, %v16907_v54  ;;  %v16940_v16 = vrot.slane %v13957_v22, %v16213_v57 }
  0x84   : > { %v14026_v59 = vcombine.high %v1725_v8, %v1735_v51  ;;  %v3182_v34 = vrot.slane %v14024_v49, %v16213_v57  ;;  %v612_v10 = vshrl.u32 %v16925_v26, 16  ;;  %4354 = vmatmul.mubr.bf16.gmra.mxu1 %v3110_v23  ;;  %v16946_v38 = vsel %vm445_vm1, %v602_v30, %v606_v1  ;;  %v344_v23 = vld [vmem:[%s16184_s8 + $0x94] sm:$0xf] }
  0x85   : > { %22644 = vst [vmem:[#allocation35_spill] sm:$0xff] %v16940_v16  ;;  %v3198_v35 = vcombine.high %v16921_v45, %v3189_v50  ;;  %v3197_v48 = vcombine.low %v16921_v45, %v3189_v50  ;;  %v614_v19 = vshll.u32 %v16925_v26, 16  ;;  %v13959_v49 = vcombine.low %v16804_v6, %v16946_v38 }
  0x86   : > { %v3196_v8 = vrot.slane %v14026_v59, %v16213_v57  ;;  %v14031_v51 = vcombine.low %v1736_v15, %v16940_v16  ;;  %v619_v22 = vshll.u32 %v16936_v2, 16  ;;  %v657_v50 = vrot.slane %v16828_v36, 1 }
  0x87   : > { %4208 = vmatprep.mubr.bf16.mxu0 %v3198_v35  ;;  %v616_v32 = vrot.slane %v614_v19, 1  ;;  %v16957_v30 = vrot.slane %v16903_v7, 1  ;;  %v1655_v59 = vrot.slane %v13959_v49, %v16213_v57  ;;  %v13964_v19 = vcombine.low %v16837_v31, %v16861_v60 }
  0x88   : > { %v3200_v28 = vcombine.high %v3182_v34, %v3196_v8  ;;  %v3199_v24 = vcombine.low %v3182_v34, %v3196_v8  ;;  %v3264_v6 = vrot.slane %v14031_v51, %v16213_v57  ;;  %v621_v5 = vrot.slane %v619_v22, 1 }
  0x89   : > { %22645 = vst [vmem:[#allocation36_spill] sm:$0xff] %v16957_v30  ;;  %4209 = vmatmul.mubr.bf16.gmra.mxu0 %v3197_v48  ;;  %v617_v15 = vor.u32 %v616_v32, %v612_v10  ;;  %v16967_v35 = vsel %vm626_vm0, %v657_v50, %v16957_v30  ;;  %v16972_v45 = vrot.slane %v1655_v59, %v16213_v57  ;;  %v608_v8 = vshrl.u32 %v16903_v7, 16 }
  0x8a   : > { %22646 = vst [vmem:[#allocation37_spill] sm:$0xff] %v16967_v35  ;;  %4361 = vmatprep.mubr.bf16.mxu1 %v3200_v28  ;;  %v13966_v34 = vcombine.low %v16967_v35, %v16888_v9  ;;  %v1634_v32 = vcombine.high %v16828_v36, %v16946_v38  ;;  %v1797_v48 = vrot.slane %v13964_v19, %v16213_v57  ;;  %v16984_v49 = vrot.slane %v16936_v2, 1 }
  0x8b   : > { %v16980_v10 = vsel %vm445_vm1, %v617_v15, %v621_v5  ;;  %v16987_v28 = vcombine.low %v16963_v20, %v344_v23  ;;  %v3287_v51 = vcombine.high %v3264_v6, %v16972_v45  ;;  %v3286_v22 = vcombine.low %v3264_v6, %v16972_v45 }
  0x8c   : > { %22647 = vst [vmem:[#allocation38_spill] sm:$0xff] %v16980_v10  ;;  %22648 = vst [vmem:[#allocation39_spill] sm:$0xff] %v16984_v49  ;;  %v13963_v7 = vcombine.low %v16888_v9, %v16980_v10  ;;  %v1740_v36 = vcombine.high %v16925_v26, %v16980_v10  ;;  %4362 = vmatmul.mubr.bf16.gmra.mxu1 %v3199_v24  ;;  %v1798_v50 = vcombine.low %v16940_v16, %v1797_v48 }
  0x8d   : > { %v1831_v59 = vrot.slane %v13966_v34, %v16213_v57  ;;  %v16997_v15 = vor.u32 %v608_v8, %v606_v1  ;;  %v1662_v23 = vrot.slane %v1634_v32, %v16213_v57  ;;  %4216 = vmatprep.mubr.bf16.mxu0 %v3287_v51  ;;  %v17005_v6 = vsel %vm626_vm0, %v660_v55, %v16984_v49  ;;  %v17017_v32 = vld [vmem:[%s16184_s8 + $0x98] sm:$0x7] }
  0x8e   : > { %v17001_v19 = vrot.slane %v13963_v7, %v16213_v57  ;;  %22649 = vst [vmem:[#allocation40_spill] sm:$0xff] %v17005_v6  ;;  %v1824_v9 = vcombine.high %v16967_v35, %v16925_v26  ;;  %v17010_v24 = vrot.slane %v1740_v36, %v16213_v57  ;;  %v14032_v34 = vcombine.high %v16915_v39, %v1798_v50 }
  0x8f   : > { %v3285_v1 = vrot.slane %v1831_v59, %v16213_v57  ;;  %v13961_v8 = vcombine.low %v16861_v60, %v16997_v15  ;;  %v13968_v55 = vcombine.low %v16957_v30, %v16907_v54  ;;  %v13970_v26 = vcombine.low %v17005_v6, %v16963_v20 }
  0x90   : > { %v1838_v48 = vrot.slane %v1824_v9, %v16213_v57  ;;  %v623_v51 = vshrl.u32 %v16936_v2, 16  ;;  %v3271_v39 = vrot.slane %v14032_v34, %v16213_v57  ;;  %v17028_v36 = vrot.slane %v1662_v23, %v16213_v57 }
  0x91   : > { %4217 = vmatmul.mubr.bf16.gmra.mxu0 %v3286_v22  ;;  %v1708_v7 = vrot.slane %v13961_v8, %v16213_v57  ;;  %v1930_v60 = vcombine.high %v17005_v6, %v16987_v28  ;;  %v1903_v50 = vrot.slane %v13968_v55, %v16213_v57  ;;  %v1937_v59 = vrot.slane %v13970_v26, %v16213_v57 }
  0x92   : > { %v3360_v9 = vrot.slane %v1838_v48, %v16213_v57  ;;  %v17035_v10 = vor.u32 %v623_v51, %v621_v5  ;;  %v3289_v2 = vcombine.high %v3271_v39, %v3285_v1  ;;  %v3288_v22 = vcombine.low %v3271_v39, %v3285_v1 }
  0x93   : > { %v14028_v34 = vcombine.low %v1708_v7, %v17001_v19  ;;  %v1944_v8 = vrot.slane %v1930_v60, %v16213_v57  ;;  %v14036_v16 = vcombine.low %v1903_v50, %v1937_v59  ;;  %v1946_v6 = vcombine.high %v17001_v19, %v1937_v59 }
  0x94   : > { %22650 = vst [vmem:[#allocation41_spill] sm:$0xff] %v17035_v10  ;;  %v13965_v23 = vcombine.low %v16907_v54, %v17035_v10  ;;  %v13972_v55 = vcombine.low %v16984_v49, %v17017_v32  ;;  %4369 = vmatprep.mubr.bf16.mxu1 %v3289_v2  ;;  %v751_v26 = vcombine.low %v16234_v18, %v16240_v21 }
  0x95   : > { %v17045_v48 = vrot.slane %v14028_v34, %v16213_v57  ;;  %v1948_v5 = vcombine.high %v17010_v24, %v1944_v8  ;;  %v1947_v1 = vcombine.low %v17010_v24, %v1944_v8  ;;  %4370 = vmatmul.mubr.bf16.gmra.mxu1 %v3288_v22  ;;  %v3374_v51 = vrot.slane %v14036_v16, %v16213_v57 }
  0x96   : > { %v17053_v54 = vrot.slane %v13965_v23, %v16213_v57  ;;  %v14039_v39 = vcombine.low %v1946_v6, %v17010_v24  ;;  %v2009_v7 = vrot.slane %v13972_v55, %v16213_v57  ;;  %v752_v34 = vcombine.high %v16234_v18, %v16240_v21 }
  0x97   : > { %v3376_v60 = vcombine.high %v17028_v36, %v17045_v48  ;;  %v3375_v50 = vcombine.low %v17028_v36, %v17045_v48  ;;  %v14040_v2 = vcombine.high %v1937_v59, %v1947_v1  ;;  %v3378_v22 = vcombine.high %v3360_v9, %v3374_v51 }
  0x98   : > { %v14041_v16 = vcombine.low %v1948_v5, %v17053_v54  ;;  %v3442_v23 = vrot.slane %v14039_v39, %v16213_v57  ;;  %v2010_v6 = vcombine.low %v17053_v54, %v2009_v7  ;;  %v761_v55 = vrot.slane %v751_v26, %v16213_v57 }
  0x99   : > { %4224 = vmatprep.mubr.bf16.mxu0 %v3376_v60  ;;  %v768_v10 = vrot.slane %v752_v34, %v16213_v57  ;;  %4377 = vmatprep.mubr.bf16.mxu1 %v3378_v22  ;;  %v3377_v49 = vcombine.low %v3360_v9, %v3374_v51  ;;  %v3449_v1 = vrot.slane %v14040_v2, %v16213_v57  ;;  %v22477_v39 = vmov 0.0  }
  0x9a   : > { %4225 = vmatmul.mubr.bf16.gmra.mxu0 %v3375_v50  ;;  %v3456_v59 = vrot.slane %v14041_v16, %v16213_v57  ;;  %v14042_v18 = vcombine.high %v1944_v8, %v2010_v6  ;;  %v2232_v21 = vrot.slane %v761_v55, %v16213_v57  ;;  %15533 = vmatprep.subr.bf16.mxu0 %v22477_v39 }
  0x9b   : > { %v2246_v5 = vrot.slane %v768_v10, %v16213_v57  ;;  %v821_v26 = vcombine.low %v16283_v56, %v16228_v13  ;;  %v881_v60 = vcombine.low %v16307_v11, %v16338_v37  ;;  %v882_v9 = vcombine.high %v16307_v11, %v16338_v37 }
  0x9c   : > { %v3465_v7 = vcombine.high %v3442_v23, %v3456_v59  ;;  %v3464_v51 = vcombine.low %v3442_v23, %v3456_v59  ;;  %v3463_v8 = vrot.slane %v14042_v18, %v16213_v57  ;;  %v951_v13 = vcombine.low %v16377_v63, %v16321_v25 }
  0x9d   : > { %v829_v50 = vrot.slane %v821_v26, %v16213_v57  ;;  %4378 = vmatmul.mubr.bf16.gmra.mxu1 %v3377_v49  ;;  %v891_v10 = vrot.slane %v881_v60, %v16213_v57  ;;  %v898_v2 = vrot.slane %v882_v9, %v16213_v57  ;;  %v2255_v34 = vcombine.high %v2232_v21, %v2246_v5  ;;  %v15816_v60 = vld [vmem:[%s22408_s1 + $0x238] sm:$0xff]  }
  0x9e   : > { %4232 = vmatprep.mubr.bf16.mxu0 %v3465_v7  ;;  %v3467_v56 = vcombine.high %v3449_v1, %v3463_v8  ;;  %v3466_v23 = vcombine.low %v3449_v1, %v3463_v8  ;;  %v959_v55 = vrot.slane %v951_v13, %v16213_v57  ;;  %v995_v59 = vcombine.low %v16358_v47, %v16391_v4 }
  0x9f   : > { %v914_v22 = vcombine.high %v891_v10, %v16384_v3  ;;  %v13979_v16 = vcombine.low %v829_v50, %v891_v10  ;;  %v915_v11 = vcombine.low %v898_v2, %v16387_v42  ;;  %v916_v49 = vcombine.high %v898_v2, %v16387_v42 }
  0xa0   : > { %4385 = vmatprep.mubr.bf16.mxu1 %v3467_v56  ;;  %v2257_v63 = vcombine.high %v16346_v41, %v16406_v14  ;;  %v2254_v1 = vcombine.low %v2232_v21, %v2246_v5  ;;  %v1005_v9 = vrot.slane %v995_v59, %v16213_v57  ;;  %v1057_v8 = vcombine.low %v16437_v29, %v16365_v40 }
  0xa1   : > { %v13981_v6 = vcombine.low %v914_v22, %v898_v2  ;;  %v2321_v18 = vrot.slane %v13979_v16, %v16213_v57  ;;  %v13982_v26 = vcombine.high %v16384_v3, %v915_v11  ;;  %v1101_v50 = vcombine.low %v16552_v12, %v16538_v0 }
  0xa2   : > { %4233 = vmatmul.mubr.bf16.gmra.mxu0 %v3464_v51  ;;  %v13985_v51 = vcombine.low %v916_v49, %v959_v55  ;;  %v967_v21 = vcombine.low %v959_v55, %v16478_v61  ;;  %v2256_v5 = vcombine.low %v16346_v41, %v16406_v14  ;;  %v996_v2 = vcombine.high %v16358_v47, %v16391_v4  ;;  %v15817_v41 = vld [vmem:[%s22408_s1 + $0x230] sm:$0xff]  }
  0xa3   : > { %4426 = vmatprep.mubr.bf16.mxu0 %v2255_v34  ;;  %v2335_v7 = vrot.slane %v13981_v6, %v16213_v57  ;;  %v2342_v3 = vrot.slane %v13982_v26, %v16213_v57  ;;  %v2424_v29 = vrot.slane %v1005_v9, %v16213_v57  ;;  %v1065_v56 = vrot.slane %v1057_v8, %v16213_v57 }
  0xa4   : > { %v2410_v13 = vrot.slane %v13985_v51, %v16213_v57  ;;  %v1111_v34 = vrot.slane %v1101_v50, %v16213_v57  ;;  %v13986_v14 = vcombine.high %v16387_v42, %v967_v21  ;;  %v1102_v47 = vcombine.high %v16552_v12, %v16538_v0  ;;  %v15818_v12 = vld [vmem:[%s22408_s1 + $0x228] sm:$0xff]  }
  0xa5   : > { %4386 = vmatmul.mubr.bf16.gmra.mxu1 %v3466_v23  ;;  %v2344_v10 = vcombine.high %v2321_v18, %v2335_v7  ;;  %v2346_v22 = vcombine.high %v16454_v44, %v2342_v3  ;;  %v1012_v61 = vrot.slane %v996_v2, %v16213_v57  ;;  %v1163_v16 = vcombine.low %v16568_v27, %v16459_v53  ;;  %v15820_v2 = vld [vmem:[%s22408_s1 + $0x218] sm:$0xff]  }
  0xa6   : > { %4579 = vmatprep.mubr.bf16.mxu1 %v2257_v63  ;;  %v2343_v11 = vcombine.low %v2321_v18, %v2335_v7  ;;  %v13989_v23 = vcombine.low %v1065_v56, %v1111_v34  ;;  %v2433_v6 = vcombine.high %v2410_v13, %v2424_v29  ;;  %v2417_v49 = vrot.slane %v13986_v14, %v16213_v57 }
  0xa7   : > { %v1118_v42 = vrot.slane %v1102_v47, %v16213_v57  ;;  %v17134_v27 = vcombine.low %v17017_v32, %v17017_v32  ;;  %v17137_v59 = vrot.slane %v1012_v61, %v16213_v57  ;;  %v1171_v63 = vrot.slane %v1163_v16, %v16213_v57  ;;  %v22652_v47 = vld [vmem:[#allocation34_spill] sm:$0xff] }
  0xa8   : > { %v2345_v18 = vcombine.low %v16454_v44, %v2342_v3  ;;  %v17142_v26 = vrot.slane %v13989_v23, %v16213_v57  ;;  %v1207_v7 = vcombine.low %v16576_v33, %v16594_v43  ;;  %v1134_v9 = vcombine.high %v1111_v34, %v16613_v58  ;;  %v15819_v44 = vld [vmem:[%s22408_s1 + $0x220] sm:$0xff]  }
  0xa9   : > { %v1136_v51 = vcombine.high %v1118_v42, %v16616_v62  ;;  %v674_v8 = vshll.u32 %v16987_v28, 16  ;;  %v1135_v50 = vcombine.low %v1118_v42, %v16616_v62  ;;  %v22653_v61 = vld [vmem:[#allocation30_spill] sm:$0xff]  ;;  %v2434_v23 = vcombine.low %v2417_v49, %v16600_v46 }
  0xaa   : > { %4427 = vmatmul.mubr.bf16.vlgmr.msra.gmra.mxu0 %v2254_v1  ;;  %v1208_v1 = vcombine.high %v16576_v33, %v16594_v43  ;;  %v1179_v33 = vcombine.low %v1171_v63, %v16676_v17  ;;  %v2522_v3 = vcombine.high %v17137_v59, %v17142_v26  ;;  %v1217_v21 = vrot.slane %v1207_v7, %v16213_v57  ;;  %v22669_v17 = vld [vmem:[#allocation23_spill] sm:$0xff] }
  0xab   : > { %15534 = vmatpush3.bf16.msra.mxu0 %v15816_v60  ;;  %4434 = vmatprep.mubr.bf16.mxu0 %v2344_v10  ;;  %v2435_v60 = vcombine.high %v2417_v49, %v16600_v46  ;;  %v2432_v10 = vcombine.low %v2410_v13, %v2424_v29  ;;  %v13995_v56 = vcombine.low %v1134_v9, %v1118_v42  ;;  %v22651_v13 = vld [vmem:[#allocation8_spill] sm:$0xff]  ;;  %v22655_v42 = vld [vmem:[#allocation5_spill] sm:$0xff]  ;;  %v22656_v49 = vld [vmem:[#allocation18_spill] sm:$0xff] }
  0xac   : > { %15535 = vmatprep.subr.bf16.mxu0 %v22477_v39  ;;  %v13997_v34 = vcombine.low %v1136_v51, %v1171_v63  ;;  %v1313_v29 = vcombine.low %v22651_v13, %v16703_v52  ;;  %v13998_v14 = vcombine.high %v16616_v62, %v1179_v33  ;;  %v17192_v7 = vrot.slane %v1217_v21, %v16213_v57  ;;  %v22658_v9 = vld [vmem:[#allocation4_spill] sm:$0xff]  ;;  %v22659_v51 = vld [vmem:[#allocation6_spill] sm:$0xff] }
  0xad   : > { %4580 = vmatmul.mubr.bf16.vlgmr.msra.gmra.mxu1 %v2256_v5  ;;  %v1224_v5 = vrot.slane %v1208_v1, %v16213_v57  ;;  %v17186_v62 = vrot.slane %v13995_v56, %v16213_v57  ;;  %v22657_v1 = vld [vmem:[#allocation11_spill] sm:$0xff]  ;;  %v2521_v33 = vcombine.low %v17137_v59, %v17142_v26  ;;  %v22661_v56 = vld [vmem:[#allocation14_spill] sm:$0xff] }
  0xae   : > { %4587 = vmatprep.mubr.bf16.mxu1 %v2346_v22  ;;  %v17165_v22 = vrot.slane %v674_v8, 1  ;;  %v1314_v8 = vcombine.high %v22651_v13, %v16703_v52  ;;  %v22662_v13 = vld [vmem:[#allocation17_spill] sm:$0xff] }
  0xaf   : > { %15536 = vmatpush3.bf16.msra.mxu0 %v15817_v41  ;;  %v13996_v41 = vcombine.high %v16613_v58, %v1135_v50  ;;  %v15821_v58 = vld [vmem:[%s22408_s1 + $0x210] sm:$0xff]   ;;  %v17195_v46 = vrot.slane %v1224_v5, %v16213_v57  ;;  %v1323_v50 = vrot.slane %v1313_v29, %v16213_v57  ;;  %v22660_v5 = vld [vmem:[#allocation9_spill] sm:$0xff] }
  0xb0   : > { %15537 = vmatprep.subr.bf16.mxu0 %v22477_v39 }
  0xb2   : > { %4435 = vmatmul.mubr.bf16.gmra.mxu0 %v2343_v11 }
  0xb3   : > { %4442 = vmatprep.mubr.bf16.mxu0 %v2433_v6  ;;  %15538 = vmatpush3.bf16.msra.mxu0 %v15818_v12  ;;  %v22654_v6 = vld [vmem:[#allocation7_spill] sm:$0xff] }
  0xb4   : > { %15539 = vmatprep.subr.bf16.mxu0 %v22477_v39  ;;  %v2524_v12 = vcombine.high %v22655_v42, %v22654_v6  ;;  %v2523_v63 = vcombine.low %v22655_v42, %v22654_v6  ;;  %v1737_v42 = vcombine.low %v16946_v38, %v16967_v35  ;;  %v22666_v6 = vld [vmem:[#allocation13_spill] sm:$0xff] }
  0xb5   : > { %4588 = vmatmul.mubr.bf16.gmra.mxu1 %v2345_v18  ;;  %v17189_v18 = vrot.slane %v13997_v34, %v16213_v57  ;;  %v1375_v34 = vcombine.low %v22661_v56, %v22660_v5  ;;  %v17236_v56 = vrot.slane %v1314_v8, %v16213_v57 }
  0xb6   : > { %4595 = vmatprep.mubr.bf16.mxu1 %v2435_v60  ;;  %v1747_v55 = vrot.slane %v1737_v42, %v16213_v57  ;;  %v22671_v42 = vmov 0.0  }
  0xb7   : > { %15540 = vmatpush3.bf16.msra.mxu0 %v15819_v44  ;;  %v1269_v44 = vcombine.low %v22659_v51, %v22658_v9  ;;  %v2610_v16 = vcombine.low %v17186_v62, %v17189_v18  ;;  %v1383_v8 = vrot.slane %v1375_v34, %v16213_v57 }
  0xb8   : > { %15541 = vmatprep.subr.bf16.mxu0 %v22477_v39 }
  0xb9   : > { %v1277_v51 = vrot.slane %v1269_v44, %v16213_v57  ;;  %v1738_v44 = vcombine.high %v16946_v38, %v16967_v35  ;;  %v22667_v38 = vld [vmem:[#allocation19_spill] sm:$0xff] }
  0xba   : > { %4443 = vmatmul.mubr.bf16.gmra.mxu0 %v2432_v10  ;;  %v17207_v10 = vrot.slane %v13996_v41, %v16213_v57  ;;  %v15822_v41 = vld [vmem:[%s22408_s1 + $0x208] sm:$0xff]   ;;  %v1481_v60 = vcombine.low %v22667_v38, %v22666_v6 }
  0xbb   : > { %4450 = vmatprep.mubr.bf16.mxu0 %v2522_v3  ;;  %15542 = vmatpush3.bf16.msra.mxu0 %v15820_v2  ;;  %v17210_v3 = vrot.slane %v13998_v14, %v16213_v57  ;;  %v22663_v2 = vld [vmem:[#allocation12_spill] sm:$0xff]  ;;  %v2611_v14 = vcombine.high %v17186_v62, %v17189_v18  ;;  %v15825_v18 = vld [vmem:[%s22408_s1 + $0x200] sm:$0xff]  }
  0xbc   : > { %15543 = vmatprep.subr.bf16.mxu0 %v22477_v39  ;;  %v1419_v29 = vcombine.low %v22663_v2, %v22662_v13  ;;  %v1420_v59 = vcombine.high %v22663_v2, %v22662_v13  ;;  %v22664_v2 = vld [vmem:[#allocation15_spill] sm:$0xff] }
  0xbd   : > { %4596 = vmatmul.mubr.bf16.gmra.mxu1 %v2434_v23  ;;  %v2700_v23 = vcombine.high %v17192_v7, %v17195_v46  ;;  %v1346_v26 = vcombine.high %v1323_v50, %v22664_v2  ;;  %v2613_v21 = vcombine.high %v17207_v10, %v17210_v3 }
  0xbe   : > { %4603 = vmatprep.mubr.bf16.mxu1 %v2524_v12  ;;  %v22665_v12 = vld [vmem:[#allocation33_spill] sm:$0xff]  ;;  %v17255_v62 = vrot.slane %v1420_v59, %v16213_v57 }
  0xbf   : > { %15544 = vmatpush3.bf16.msra.mxu0 %v15821_v58  ;;  %v1693_v11 = vcombine.low %v22665_v12, %v16837_v31  ;;  %v2612_v58 = vcombine.low %v17207_v10, %v17210_v3  ;;  %v1429_v12 = vrot.slane %v1419_v29, %v16213_v57  ;;  %v1754_v10 = vrot.slane %v1738_v44, %v16213_v57  ;;  %v22668_v29 = vld [vmem:[#allocation16_spill] sm:$0xff] }
  0xc0   : > { %15545 = vmatprep.subr.bf16.mxu0 %v22477_v39  ;;  %v14003_v3 = vcombine.low %v1277_v51, %v1323_v50  ;;  %v14005_v34 = vcombine.low %v1346_v26, %v17236_v56  ;;  %v1347_v59 = vcombine.low %v17236_v56, %v22668_v29  ;;  %v22670_v39 = vld [vmem:[#allocation25_spill] sm:$0xff]  ;;  %v1348_v50 = vcombine.high %v17236_v56, %v22668_v29 }
  0xc1   : > { %v1525_v35 = vcombine.low %v22670_v39, %v22669_v17  ;;  %v1771_v38 = vcombine.low %v1754_v10, %v17010_v24  ;;  %v17277_v26 = vrot.slane %v1429_v12, %v16213_v57  ;;  %v1799_v51 = vcombine.low %v16997_v15, %v16957_v30 }
  0xc2   : > { %4451 = vmatmul.mubr.bf16.gmra.mxu0 %v2521_v33  ;;  %v1701_v33 = vrot.slane %v1693_v11, %v16213_v57  ;;  %v1772_v11 = vcombine.high %v1754_v10, %v17010_v24  ;;  %v17289_v56 = vrot.slane %v14003_v3, %v16213_v57  ;;  %v14006_v12 = vcombine.high %v22664_v2, %v1347_v59 }
  0xc3   : > { %4458 = vmatprep.mubr.bf16.mxu0 %v2611_v14  ;;  %15546 = vmatpush3.bf16.msra.mxu0 %v15822_v41  ;;  %v1770_v14 = vcombine.high %v1747_v55, %v17001_v19  ;;  %v22672_v41 = vshll.u32 %v17134_v27, 16  ;;  %v1807_v13 = vrot.slane %v1799_v51, %v16213_v57  ;;  %v22674_v15 = vshrl.u32 %v16987_v28, 16 }
  0xc4   : > { %v14027_v31 = vcombine.low %v1701_v33, %v1747_v55  ;;  %15547 = vmatprep.subr.bf16.mxu0 %v22671_v42  ;;  %v22673_v55 = vld [vmem:[#allocation22_spill] sm:$0xff] }
  0xc5   : > { %4604 = vmatmul.mubr.bf16.gmra.mxu1 %v2523_v63  ;;  %v681_v44 = vrot.slane %v22672_v41, 1  ;;  %v1391_v33 = vcombine.low %v1383_v8, %v22673_v55  ;;  %v14029_v6 = vcombine.low %v1770_v14, %v1754_v10  ;;  %v14030_v63 = vcombine.high %v17001_v19, %v1771_v38  ;;  %v17331_v38 = vld [vmem:[%s16184_s8 + $0x9c] sm:$0xf]  ;;  %v22675_v55 = vld [vmem:[#allocation39_spill] sm:$0xff] }
  0xc6   : > { %4611 = vmatprep.mubr.bf16.mxu1 %v2613_v21  ;;  %v17285_v5 = vrot.slane %v14027_v31, %v16213_v57  ;;  %v677_v41 = vor.u32 %v17165_v22, %v22674_v15  ;;  %v17297_v21 = vrot.slane %v14005_v34, %v16213_v57  ;;  %v686_v10 = vrot.slane %v16987_v28, 1 }
  0xc7   : > { %15548 = vmatpush3.bf16.msra.mxu0 %v15825_v18  ;;  %v17300_v31 = vrot.slane %v14029_v6, %v16213_v57  ;;  %v17303_v19 = vrot.slane %v14030_v63, %v16213_v57  ;;  %v17306_v2 = vcombine.low %v1772_v11, %v1807_v13  ;;  %v1815_v22 = vcombine.low %v1807_v13, %v17053_v54  ;;  %v22676_v63 = vld [vmem:[#allocation41_spill] sm:$0xff] }
  0xc8   : > { %v17309_v3 = vsel %vm445_vm1, %v677_v41, %v681_v44  ;;  %v17313_v18 = vrot.slane %v17134_v27, 1  ;;  %v1489_v14 = vrot.slane %v1481_v60, %v16213_v57  ;;  %v17325_v54 = vrot.slane %v1525_v35, %v16213_v57  ;;  %v347_v41 = vld [vmem:[%s16184_s8 + $0xa0] sm:$0xf]  ;;  %v17341_v60 = vld [vmem:[%s16184_s8 + $0xa4] sm:$0x7] }
  0xc9   : > { %v13967_v13 = vcombine.low %v16963_v20, %v17309_v3  ;;  %v14009_v11 = vcombine.low %v1348_v50, %v1383_v8  ;;  %v1905_v15 = vcombine.low %v22676_v63, %v22675_v55  ;;  %v683_v35 = vshrl.u32 %v17134_v27, 16 }
  0xca   : > { %4459 = vmatmul.mubr.bf16.gmra.mxu0 %v2610_v16  ;;  %v17335_v51 = vsel %vm626_vm0, %v686_v10, %v17313_v18  ;;  %v17345_v20 = vrot.slane %v14006_v12, %v16213_v57  ;;  %v22677_v10 = vcombine.high %v22657_v1, %v22656_v49  ;;  %v14013_v63 = vcombine.low %v1489_v14, %v17325_v54  ;;  %v22681_v16 = vld [vmem:[#allocation21_spill] sm:$0xff] }
  0xcb   : > { %4466 = vmatprep.mubr.bf16.mxu0 %v2700_v23  ;;  %v14034_v23 = vcombine.high %v17010_v24, %v1815_v22  ;;  %v14010_v24 = vcombine.high %v22668_v29, %v1391_v33  ;;  %v1867_v8 = vrot.slane %v13967_v13, %v16213_v57  ;;  %v2789_v22 = vcombine.high %v17289_v56, %v17297_v21 }
  0xcc   : > { %v17358_v27 = vrot.slane %v1905_v15, %v16213_v57  ;;  %v685_v12 = vor.u32 %v683_v35, %v681_v44  ;;  %v17366_v33 = vcombine.low %v17331_v38, %v347_v41  ;;  %v17370_v13 = vcombine.low %v17341_v60, %v17341_v60 }
  0xcd   : > { %4612 = vmatmul.mubr.bf16.gmra.mxu1 %v2612_v58  ;;  %v17350_v50 = vrot.slane %v14034_v23, %v16213_v57  ;;  %v1949_v58 = vcombine.low %v17309_v3, %v17335_v51  ;;  %v17363_v29 = vrot.slane %v1867_v8, %v16213_v57  ;;  %v1846_v23 = vcombine.high %v16987_v28, %v17309_v3 }
  0xce   : > { %4619 = vmatprep.mubr.bf16.mxu1 %v22677_v10  ;;  %v1526_v15 = vcombine.high %v22670_v39, %v22669_v17  ;;  %v1950_v35 = vcombine.high %v17309_v3, %v17335_v51  ;;  %v22678_v41 = vcombine.low %v17192_v7, %v17195_v46  ;;  %v698_v14 = vshrl.u32 %v17366_v33, 16  ;;  %v22679_v10 = vld [vmem:[#allocation20_spill] sm:$0xff]  ;;  %v22688_v17 = vld [vmem:[#allocation27_spill] sm:$0xff] }
  0xcf   : > { %v17378_v44 = vrot.slane %v1949_v58, %v16213_v57  ;;  %v700_v39 = vshll.u32 %v17366_v33, 16  ;;  %v2791_v58 = vcombine.high %v22679_v10, %v17345_v20  ;;  %v17394_v3 = vrot.slane %v14009_v11, %v16213_v57 }
  0xd0   : > { %v705_v46 = vshll.u32 %v17370_v13, 16  ;;  %v13969_v8 = vcombine.low %v17017_v32, %v685_v12  ;;  %v709_v28 = vshrl.u32 %v17370_v13, 16  ;;  %v2788_v59 = vcombine.low %v17289_v56, %v17297_v21 }
  0xd1   : > { %v22680_v11 = vcombine.low %v22657_v1, %v22656_v49  ;;  %v1542_v7 = vrot.slane %v1526_v15, %v16213_v57  ;;  %v2011_v55 = vcombine.low %v685_v12, %v17313_v18  ;;  %v2878_v56 = vcombine.high %v17394_v3, %v17277_v26  ;;  %v22683_v49 = vld [vmem:[#allocation31_spill] sm:$0xff] }
  0xd2   : > { %4467 = vmatmul.mubr.bf16.gmra.mxu0 %v22678_v41  ;;  %v702_v41 = vrot.slane %v700_v39, 1  ;;  %v707_v34 = vrot.slane %v705_v46, 1  ;;  %v22682_v39 = vld [vmem:[#allocation26_spill] sm:$0xff]  ;;  %v17418_v21 = vrot.slane %v14013_v63, %v16213_v57  ;;  %v1558_v1 = vcombine.high %v17325_v54, %v22683_v49 }
  0xd3   : > { %4474 = vmatprep.mubr.bf16.mxu0 %v2789_v22  ;;  %v17405_v22 = vrot.slane %v17255_v62, %v16213_v57  ;;  %v1587_v6 = vcombine.low %v22682_v39, %v22681_v16  ;;  %v2862_v62 = vrot.slane %v14010_v24, %v16213_v57  ;;  %v2790_v63 = vcombine.low %v22679_v10, %v17345_v20  ;;  %v22687_v16 = vld [vmem:[#allocation28_spill] sm:$0xff] }
  0xd4   : > { %v703_v32 = vor.u32 %v702_v41, %v698_v14  ;;  %v711_v46 = vor.u32 %v709_v28, %v707_v34  ;;  %v1920_v14 = vrot.slane %v13969_v8, %v16213_v57  ;;  %v1966_v41 = vrot.slane %v1950_v35, %v16213_v57  ;;  %v22684_v28 = vld [vmem:[#allocation32_spill] sm:$0xff]  ;;  %v22685_v8 = vld [vmem:[#allocation29_spill] sm:$0xff] }
  0xd5   : > { %4620 = vmatmul.mubr.bf16.gmra.mxu1 %v22680_v11  ;;  %v1874_v11 = vrot.slane %v1846_v23, %v16213_v57  ;;  %v1560_v54 = vcombine.high %v1542_v7, %v22684_v28  ;;  %v2019_v23 = vrot.slane %v2011_v55, %v16213_v57  ;;  %v2880_v39 = vcombine.high %v2862_v62, %v22685_v8 }
  0xd6   : > { %4627 = vmatprep.mubr.bf16.mxu1 %v2791_v58  ;;  %v708_v15 = vsel %vm445_vm1, %v703_v32, %v707_v34  ;;  %v13973_v24 = vcombine.low %v17341_v60, %v711_v46  ;;  %v1595_v34 = vrot.slane %v1587_v6, %v16213_v57  ;;  %v2967_v60 = vcombine.high %v17405_v22, %v17418_v21 }
  0xd7   : > { %v13971_v12 = vcombine.low %v17331_v38, %v708_v15  ;;  %v1952_v58 = vcombine.high %v17366_v33, %v708_v15  ;;  %v14019_v20 = vcombine.low %v1558_v1, %v1542_v7  ;;  %v17443_v6 = vrot.slane %v1874_v11, %v16213_v57 }
  0xd8   : > { %v2026_v35 = vrot.slane %v13973_v24, %v16213_v57  ;;  %v14021_v15 = vcombine.low %v1560_v54, %v1595_v34  ;;  %v1631_v52 = vcombine.low %v22688_v17, %v22687_v16 }
  0xd9   : > { %v1973_v38 = vrot.slane %v13971_v12, %v16213_v57  ;;  %v1980_v32 = vrot.slane %v1952_v58, %v16213_v57  ;;  %v1559_v12 = vcombine.low %v1542_v7, %v22684_v28  ;;  %v22686_v58 = vld [vmem:[#allocation35_spill] sm:$0xff] }
  0xda   : > { %4475 = vmatmul.mubr.bf16.gmra.mxu0 %v2788_v59  ;;  %v2877_v59 = vcombine.low %v17394_v3, %v17277_v26  ;;  %v1603_v24 = vcombine.low %v1595_v34, %v22686_v58  ;;  %v2027_v30 = vcombine.low %v2019_v23, %v2026_v35 }
  0xdb   : > { %4482 = vmatprep.mubr.bf16.mxu0 %v2878_v56  ;;  %v14038_v55 = vcombine.low %v1920_v14, %v1973_v38  ;;  %v1982_v10 = vcombine.high %v17378_v44, %v1973_v38  ;;  %v1984_v56 = vcombine.high %v1966_v41, %v1980_v32  ;;  %v1983_v46 = vcombine.low %v1966_v41, %v1980_v32 }
  0xdc   : > { %v2879_v14 = vcombine.low %v2862_v62, %v22685_v8  ;;  %v14046_v54 = vcombine.high %v1980_v32, %v2027_v30  ;;  %v3033_v62 = vrot.slane %v14019_v20, %v16213_v57  ;;  %v3047_v8 = vrot.slane %v14021_v15, %v16213_v57 }
  0xdd   : > { %4628 = vmatmul.mubr.bf16.gmra.mxu1 %v2790_v63  ;;  %v17449_v26 = vrot.slane %v14038_v55, %v16213_v57  ;;  %v14043_v3 = vcombine.low %v1982_v10, %v1966_v41  ;;  %v14045_v1 = vcombine.low %v1984_v56, %v2019_v23  ;;  %v14044_v11 = vcombine.high %v1973_v38, %v1983_v46 }
  0xde   : > { %4635 = vmatprep.mubr.bf16.mxu1 %v2880_v39  ;;  %v1632_v63 = vcombine.high %v22688_v17, %v22687_v16  ;;  %v14020_v23 = vcombine.high %v22683_v49, %v1559_v12  ;;  %v17472_v30 = vrot.slane %v14046_v54, %v16213_v57  ;;  %v14022_v38 = vcombine.high %v22684_v28, %v1603_v24 }
  0xdf   : > { %v3414_v7 = vcombine.high %v17443_v6, %v17449_v26  ;;  %v3413_v34 = vcombine.low %v17443_v6, %v17449_v26  ;;  %v17461_v39 = vrot.slane %v14043_v3, %v16213_v57  ;;  %v17464_v41 = vrot.slane %v14045_v1, %v16213_v57 }
  0xe0   : > { %v17469_v17 = vrot.slane %v14044_v11, %v16213_v57  ;;  %v1641_v20 = vrot.slane %v1631_v52, %v16213_v57  ;;  %v22689_v28 = vcombine.high %v22653_v61, %v22652_v47  ;;  %v3056_v55 = vcombine.high %v3033_v62, %v3047_v8  ;;  %v17501_v11 = vld [vmem:[%s22409_s2] ss:$0 sm:$0xff] }
  0xe1   : > { %v3501_v32 = vcombine.high %v17461_v39, %v17464_v41  ;;  %v3500_v35 = vcombine.low %v17461_v39, %v17464_v41  ;;  %v3040_v10 = vrot.slane %v14020_v23, %v16213_v57  ;;  %v3054_v56 = vrot.slane %v14022_v38, %v16213_v57 }
  0xe2   : > { %4483 = vmatmul.mubr.bf16.gmra.mxu0 %v2877_v59  ;;  %v3503_v49 = vcombine.high %v17469_v17, %v17472_v30  ;;  %v3502_v59 = vcombine.low %v17469_v17, %v17472_v30  ;;  %v1648_v46 = vrot.slane %v1632_v63, %v16213_v57  ;;  %v3122_v12 = vrot.slane %v1641_v20, %v16213_v57 }
  0xe3   : > { %4490 = vmatprep.mubr.bf16.mxu0 %v2967_v60  ;;  %v2966_v60 = vcombine.low %v17405_v22, %v17418_v21  ;;  %v3058_v15 = vcombine.high %v3040_v10, %v3054_v56  ;;  %v22690_v52 = vcombine.low %v22653_v61, %v22652_v47  ;;  %v3055_v24 = vcombine.low %v3033_v62, %v3047_v8  ;;  %v22691_v62 = vld [vmem:[#allocation40_spill] sm:$0xff]  ;;  %v22692_v8 = vld [vmem:[#allocation38_spill] sm:$0xff] }
  0xe4   : > { %v3136_v22 = vrot.slane %v1648_v46, %v16213_v57  ;;  %v3057_v38 = vcombine.low %v3040_v10, %v3054_v56  ;;  %v1843_v20 = vcombine.low %v22692_v8, %v22691_v62  ;;  %v22693_v10 = vcombine.high %v16972_v45, %v17028_v36 }
  0xe5   : > { %4636 = vmatmul.mubr.bf16.gmra.mxu1 %v2879_v14  ;;  %v974_v17 = vrot.slane %v16365_v40, %v16213_v57 }
  0xe6   : > { %4643 = vmatprep.mubr.bf16.mxu1 %v22689_v28  ;;  %v3145_v1 = vcombine.high %v3122_v12, %v3136_v22  ;;  %v1853_v56 = vrot.slane %v1843_v20, %v16213_v57 }
  0xea   : > { %4491 = vmatmul.mubr.bf16.gmra.mxu0 %v2966_v60 }
  0xeb   : > { %4498 = vmatprep.mubr.bf16.mxu0 %v3056_v55 }
  0xed   : > { %4644 = vmatmul.mubr.bf16.gmra.mxu1 %v22690_v52  ;;  %v3144_v52 = vcombine.low %v3122_v12, %v3136_v22  ;;  %v22694_v12 = vcombine.high %v17285_v5, %v17300_v31  ;;  %v3300_v22 = vrot.slane %v17306_v2, %v16213_v57  ;;  %v22696_v2 = vcombine.high %v17045_v48, %v17303_v19 }
  0xee   : > { %4651 = vmatprep.mubr.bf16.mxu1 %v3058_v15 }
  0xef   : > { %v14458_v58 = vpop.f32.mrf.mxu0 }
  0xf1   : > { %v14564_v21 = vpop.f32.mrf.mxu1  ;;  %v14459_v14 = vpop.f32.mrf.mxu0 }
  0xf2   : > { %v14460_v54 = vadd.f32 %v14459_v14, %v14458_v58  ;;  %4499 = vmatmul.mubr.bf16.gmra.mxu0 %v3055_v24 }
  0xf3   : > { %v14565_v3 = vpop.f32.mrf.mxu1  ;;  %v14461_v60 = vpop.f32.mrf.mxu0  ;;  %4506 = vmatprep.mubr.bf16.mxu0 %v3145_v1 }
  0xf4   : > { %v14566_v63 = vadd.f32 %v14565_v3, %v14564_v21  ;;  %v4123_v47 = vadd.f32 %v14460_v54, %v17501_v11 }
  0xf5   : > { %v14567_v23 = vpop.f32.mrf.mxu1  ;;  %v14462_v28 = vpop.f32.mrf.mxu0  ;;  %4652 = vmatmul.mubr.bf16.gmra.mxu1 %v3057_v38  ;;  %v1844_v38 = vcombine.high %v22692_v8, %v22691_v62 }
  0xf6   : > { %v17506_v46 = vadd.f32 %v14566_v63, %v4123_v47  ;;  %v14463_v15 = vadd.f32 %v14462_v28, %v14461_v60  ;;  %4659 = vmatprep.mubr.bf16.mxu1 %v22693_v10  ;;  %v22695_v28 = vcombine.low %v16972_v45, %v17028_v36  ;;  %v713_v45 = vrot.slane %v17370_v13, 1 }
  0xf7   : > { %v14568_v61 = vpop.f32.mrf.mxu1  ;;  %v1860_v8 = vrot.slane %v1844_v38, %v16213_v57  ;;  %v1879_v36 = vcombine.high %v17335_v51, %v17335_v51 }
  0xf8   : > { %v14569_v55 = vadd.f32 %v14568_v61, %v14567_v23  ;;  %v4126_v21 = vadd.f32 %v14463_v15, %v17501_v11  ;;  %v3314_v23 = vrot.slane %v1853_v56, %v16213_v57 }
  0xf9   : > { %v14464_v58 = vpop.f32.mrf.mxu0  ;;  %v14570_v1 = vpop.f32.mrf.mxu1  ;;  %v3389_v38 = vrot.slane %v1860_v8, %v16213_v57  ;;  %v22700_v8 = vcombine.high %v17350_v50, %v17363_v29 }
  0xfa   : > { %v17513_v24 = vadd.f32 %v14569_v55, %v4126_v21  ;;  %4507 = vmatmul.mubr.bf16.gmra.mxu0 %v3144_v52 }
  0xfb   : > { %v14465_v3 = vpop.f32.mrf.mxu0  ;;  %v14571_v54 = vpop.f32.mrf.mxu1  ;;  %4514 = vmatprep.mubr.bf16.mxu0 %v22694_v12 }
  0xfc   : > { %v14466_v14 = vadd.f32 %v14465_v3, %v14464_v58  ;;  %v14572_v47 = vadd.f32 %v14571_v54, %v14570_v1  ;;  %v3323_v58 = vcombine.high %v3300_v22, %v3314_v23  ;;  %v712_v1 = vrot.slane %v17366_v33, 1 }
  0xfd   : > { %v14467_v63 = vpop.f32.mrf.mxu0  ;;  %v14573_v20 = vpop.f32.mrf.mxu1  ;;  %4660 = vmatmul.mubr.bf16.gmra.mxu1 %v22695_v28  ;;  %v22698_v33 = vcombine.low %v17358_v27, %v17378_v44 }
  0xfe   : > { %v4131_v60 = vadd.f32 %v14466_v14, %v17501_v11  ;;  %4667 = vmatprep.mubr.bf16.mxu1 %v22696_v2  ;;  %v714_v13 = vsel %vm626_vm0, %v712_v1, %v713_v45 }
  0xff   : > { %v14468_v61 = vpop.f32.mrf.mxu0  ;;  %v14574_v21 = vpop.f32.mrf.mxu1 }
 0x100   : > { %v17527_v55 = vadd.f32 %v14572_v47, %v4131_v60  ;;  %v14469_v15 = vadd.f32 %v14468_v61, %v14467_v63  ;;  %v14575_v56 = vadd.f32 %v14574_v21, %v14573_v20  ;;  %v22697_v63 = vcombine.low %v17285_v5, %v17300_v31 }
 0x101   : > { %v14470_v52 = vpop.f32.mrf.mxu0  ;;  %v3403_v60 = vrot.slane %v22698_v33, %v16213_v57  ;;  %v1893_v47 = vrot.slane %v1879_v36, %v16213_v57  ;;  %v1928_v20 = vrot.slane %v17313_v18, %v16213_v57  ;;  %v1992_v5 = vrot.slane %v714_v13, %v16213_v57 }
 0x102   : > { %v4134_v10 = vadd.f32 %v14469_v15, %v17501_v11  ;;  %4515 = vmatmul.mubr.bf16.gmra.mxu0 %v22697_v63  ;;  %v14576_v61 = vpop.f32.mrf.mxu1  ;;  %v3322_v21 = vcombine.low %v3300_v22, %v3314_v23  ;;  %v1985_v36 = vcombine.high %v714_v13, %v714_v13 }
 0x103   : > { %v14471_v3 = vpop.f32.mrf.mxu0  ;;  %4522 = vmatprep.mubr.bf16.mxu0 %v3323_v58  ;;  %v1895_v15 = vcombine.high %v1893_v47, %v1893_v47  ;;  %v3416_v2 = vcombine.low %v1928_v20, %v1992_v5  ;;  %v3412_v18 = vcombine.high %v3389_v38, %v3403_v60 }
 0x104   : > { %v17538_v14 = vadd.f32 %v14575_v56, %v4134_v10  ;;  %v14472_v54 = vadd.f32 %v14471_v3, %v14470_v52  ;;  %v22699_v52 = vcombine.low %v17045_v48, %v17303_v19  ;;  %v14577_v27 = vpop.f32.mrf.mxu1 }
 0x105   : > { %v14473_v12 = vpop.f32.mrf.mxu0  ;;  %v14578_v58 = vadd.f32 %v14577_v27, %v14576_v61  ;;  %v3415_v10 = vcombine.low %v1893_v47, %v1895_v15  ;;  %v3430_v1 = vrot.slane %v3416_v2, %v16213_v57  ;;  %v2034_v15 = vrot.slane %v713_v45, %v16213_v57 }
 0x106   : > { %v4139_v31 = vadd.f32 %v14472_v54, %v17501_v11  ;;  %4668 = vmatmul.mubr.bf16.gmra.mxu1 %v22699_v52  ;;  %v14579_v56 = vpop.f32.mrf.mxu1  ;;  %v787_v54 = vcombine.high %v16338_v37, %v16338_v37 }
 0x107   : > { %v14474_v28 = vpop.f32.mrf.mxu0  ;;  %4675 = vmatprep.mubr.bf16.mxu1 %v22700_v8  ;;  %v3423_v19 = vrot.slane %v3415_v10, %v16213_v57  ;;  %v3411_v8 = vcombine.low %v3389_v38, %v3403_v60 }
 0x108   : > { %v14475_v44 = vadd.f32 %v14474_v28, %v14473_v12  ;;  %v17561_v63 = vadd.f32 %v14578_v58, %v4139_v31  ;;  %v14580_v22 = vpop.f32.mrf.mxu1  ;;  %v1999_v12 = vrot.slane %v1985_v36, %v16213_v57  ;;  %v2000_v31 = vcombine.high %v1992_v5, %v1992_v5 }
 0x109   : > { %v14476_v3 = vpop.f32.mrf.mxu0  ;;  %v14581_v33 = vadd.f32 %v14580_v22, %v14579_v56  ;;  %v17568_v61 = vcombine.low %v3423_v19, %v3430_v1 }
 0x10a   : > { %v4142_v48 = vadd.f32 %v14475_v44, %v17501_v11  ;;  %4523 = vmatmul.mubr.bf16.gmra.mxu0 %v3322_v21  ;;  %v14582_v13 = vpop.f32.mrf.mxu1  ;;  %v2001_v28 = vcombine.high %v1999_v12, %v1999_v12  ;;  %v794_v44 = vrot.slane %v16338_v37, %v16213_v57  ;;  %v22701_v21 = vcombine.low %v17350_v50, %v17363_v29 }
 0x10b   : > { %v14477_v23 = vpop.f32.mrf.mxu0  ;;  %4530 = vmatprep.mubr.bf16.mxu0 %v3412_v18  ;;  %v801_v18 = vrot.slane %v787_v54, %v16213_v57  ;;  %v3504_v5 = vcombine.low %v2000_v31, %v1999_v12 }
 0x10c   : > { %v14478_v47 = vadd.f32 %v14477_v23, %v14476_v3  ;;  %v17571_v52 = vadd.f32 %v14581_v33, %v4142_v48  ;;  %v14583_v2 = vpop.f32.mrf.mxu1  ;;  %v3505_v10 = vcombine.low %v2001_v28, %v2034_v15  ;;  %v802_v48 = vcombine.high %v794_v44, %v794_v44 }
 0x10d   : > { %v14479_v20 = vpop.f32.mrf.mxu0  ;;  %v14584_v56 = vadd.f32 %v14583_v2, %v14582_v13  ;;  %v3512_v37 = vrot.slane %v3504_v5, %v16213_v57  ;;  %v803_v19 = vcombine.high %v801_v18, %v801_v18  ;;  %v917_v15 = vcombine.high %v16391_v4, %v16391_v4 }
 0x10e   : > { %v4147_v27 = vadd.f32 %v14478_v47, %v17501_v11  ;;  %4676 = vmatmul.mubr.bf16.gmra.mxu1 %v22701_v21  ;;  %v14585_v3 = vpop.f32.mrf.mxu1  ;;  %v3519_v50 = vrot.slane %v3505_v10, %v16213_v57  ;;  %v2258_v31 = vcombine.low %v794_v44, %v802_v48 }
 0x10f   : > { %v14480_v58 = vpop.f32.mrf.mxu0  ;;  %4683 = vmatprep.mubr.bf16.mxu1 %v3414_v7  ;;  %v2259_v28 = vcombine.low %v801_v18, %v803_v19 }
 0x110   : > { %v14481_v45 = vadd.f32 %v14480_v58, %v14479_v20  ;;  %v17585_v29 = vadd.f32 %v14584_v56, %v4147_v27  ;;  %v14586_v60 = vpop.f32.mrf.mxu1  ;;  %v17588_v22 = vcombine.low %v3512_v37, %v3519_v50 }
 0x111   : > { %v14482_v1 = vpop.f32.mrf.mxu0  ;;  %v14587_v23 = vadd.f32 %v14586_v60, %v14585_v3  ;;  %v2273_v18 = vrot.slane %v2259_v28, %v16213_v57 }
 0x112   : > { %v4150_v38 = vadd.f32 %v14481_v45, %v17501_v11  ;;  %4531 = vmatmul.mubr.bf16.gmra.mxu0 %v3411_v8  ;;  %v14588_v7 = vpop.f32.mrf.mxu1  ;;  %v2266_v8 = vrot.slane %v2258_v31, %v16213_v57 }
 0x113   : > { %v14483_v36 = vpop.f32.mrf.mxu0  ;;  %4538 = vmatprep.mubr.bf16.mxu0 %v3501_v32  ;;  %v924_v32 = vrot.slane %v16391_v4, %v16213_v57 }
 0x114   : > { %v14484_v54 = vadd.f32 %v14483_v36, %v14482_v1  ;;  %v17593_v33 = vadd.f32 %v14587_v23, %v4150_v38  ;;  %v14589_v13 = vpop.f32.mrf.mxu1  ;;  %v2274_v1 = vcombine.low %v2266_v8, %v2273_v18  ;;  %v1038_v38 = vrot.slane %v16538_v0, %v16213_v57 }
 0x115   : > { %v14485_v12 = vpop.f32.mrf.mxu0  ;;  %v14590_v27 = vadd.f32 %v14589_v13, %v14588_v7  ;;  %v932_v5 = vcombine.high %v924_v32, %v924_v32 }
 0x116   : > { %v4155_v47 = vadd.f32 %v14484_v54, %v17501_v11  ;;  %4684 = vmatmul.mubr.bf16.gmra.mxu1 %v3413_v34  ;;  %v14591_v2 = vpop.f32.mrf.mxu1  ;;  %v844_v34 = vrot.slane %v16321_v25, %v16213_v57  ;;  %v1046_v13 = vcombine.high %v1038_v38, %v1038_v38 }
 0x117   : > { %v14486_v20 = vpop.f32.mrf.mxu0  ;;  %4691 = vmatprep.mubr.bf16.mxu1 %v3503_v49  ;;  %v931_v49 = vrot.slane %v917_v15, %v16213_v57 }
 0x118   : > { %v14487_v21 = vadd.f32 %v14486_v20, %v14485_v12  ;;  %v17606_v6 = vadd.f32 %v14590_v27, %v4155_v47  ;;  %v14592_v44 = vpop.f32.mrf.mxu1  ;;  %v2347_v37 = vcombine.low %v844_v34, %v924_v32  ;;  %v1031_v20 = vcombine.high %v16538_v0, %v16538_v0 }
 0x119   : > { %v14488_v58 = vpop.f32.mrf.mxu0  ;;  %v14593_v10 = vadd.f32 %v14592_v44, %v14591_v2  ;;  %v2348_v50 = vcombine.low %v932_v5, %v931_v49  ;;  %v933_v7 = vcombine.high %v931_v49, %v931_v49  ;;  %v2437_v34 = vcombine.low %v1038_v38, %v1046_v13 }
 0x11a   : > { %v4158_v26 = vadd.f32 %v14487_v21, %v17501_v11  ;;  %4539 = vmatmul.mubr.bf16.gmra.mxu0 %v3500_v35  ;;  %v14594_v25 = vpop.f32.mrf.mxu1  ;;  %v2355_v12 = vrot.slane %v2347_v37, %v16213_v57  ;;  %v1045_v44 = vrot.slane %v1031_v20, %v16213_v57 }
 0x11b   : > { %v14489_v4 = vpop.f32.mrf.mxu0  ;;  %15549 = vmatprep.mubr.msk.bf16.mxu0 %vm16012_vm2, %v22671_v42  ;;  %v2362_v47 = vrot.slane %v2348_v50, %v16213_v57 }
 0x11c   : > { %v14490_v56 = vadd.f32 %v14489_v4, %v14488_v58  ;;  %v17619_v3 = vadd.f32 %v14593_v10, %v4158_v26  ;;  %v14595_v41 = vpop.f32.mrf.mxu1  ;;  %v2436_v26 = vcombine.low %v933_v7, %v974_v17  ;;  %v1080_v10 = vrot.slane %v16459_v53, %v16213_v57 }
 0x11d   : > { %v14491_v45 = vpop.f32.mrf.mxu0  ;;  %v14596_v60 = vadd.f32 %v14595_v41, %v14594_v25  ;;  %v2363_v58 = vcombine.low %v2355_v12, %v2362_v47  ;;  %v2451_v41 = vrot.slane %v2437_v34, %v16213_v57 }
 0x11e   : > { %v4163_v39 = vadd.f32 %v14490_v56, %v17501_v11  ;;  %4692 = vmatmul.mubr.bf16.gmra.mxu1 %v3502_v59  ;;  %v14597_v48 = vpop.f32.mrf.mxu1  ;;  %v1144_v56 = vrot.slane %v16594_v43, %v16213_v57 }
 0x11f   : > { %v14492_v35 = vpop.f32.mrf.mxu0 }
 0x120   : > { %v14493_v36 = vadd.f32 %v14492_v35, %v14491_v45  ;;  %v17627_v23 = vadd.f32 %v14596_v60, %v4163_v39  ;;  %v14598_v30 = vpop.f32.mrf.mxu1  ;;  %v2444_v39 = vrot.slane %v2436_v26, %v16213_v57  ;;  %v1047_v35 = vcombine.high %v1045_v44, %v1045_v44 }
 0x121   : > { %v14494_v19 = vpop.f32.mrf.mxu0  ;;  %v14599_v31 = vadd.f32 %v14598_v30, %v14597_v48  ;;  %v1152_v20 = vcombine.high %v1144_v56, %v1144_v56 }
 0x122   : > { %v4166_v54 = vadd.f32 %v14493_v36, %v17501_v11  ;;  %15550 = vmatmul.mubr.bf16.vlgmr.msra.gmra.mxu0 %v2274_v1  ;;  %v14600_v15 = vpop.f32.mrf.mxu1  ;;  %v1137_v1 = vcombine.high %v16594_v43, %v16594_v43  ;;  %v2526_v36 = vcombine.low %v1080_v10, %v1144_v56  ;;  %v2525_v7 = vcombine.low %v1045_v44, %v1047_v35  ;;  %v15827_v35 = vld [vmem:[%s22410_s3 + $0x38] sm:$0xff]  }
 0x123   : > { %v14495_v59 = vpop.f32.mrf.mxu0  ;;  %15553 = vmatprep.mubr.msk.bf16.mxu0 %vm16012_vm2, %v22671_v42 }
 0x124   : > { %v14496_v28 = vadd.f32 %v14495_v59, %v14494_v19  ;;  %v17638_v27 = vadd.f32 %v14599_v31, %v4166_v54  ;;  %v14601_v21 = vpop.f32.mrf.mxu1  ;;  %v2452_v54 = vcombine.low %v2444_v39, %v2451_v41  ;;  %v1151_v17 = vrot.slane %v1137_v1, %v16213_v57  ;;  %v15826_v41 = vld [vmem:[%s22410_s3 + $0x78] sm:$0xff]  }
 0x125   : > { %v14497_v32 = vpop.f32.mrf.mxu0  ;;  %v14602_v4 = vadd.f32 %v14601_v21, %v14600_v15  ;;  %v2540_v13 = vrot.slane %v2526_v36, %v16213_v57  ;;  %v1186_v31 = vrot.slane %v22658_v9, %v16213_v57  ;;  %v2533_v21 = vrot.slane %v2525_v7, %v16213_v57  ;;  %14889 = vmatprep.subr.bf16.mxu1 %v15826_v41 }
 0x126   : > { %v4171_v40 = vadd.f32 %v14496_v28, %v17501_v11  ;;  %v14603_v8 = vpop.f32.mrf.mxu1  ;;  %v22702_v28 = vld [vmem:[#allocation10_spill] sm:$0xff]  ;;  %14890 = vmatpush3.bf16.msra.mxu1 %v15827_v35 }
 0x127   : > { %v14498_v2 = vpop.f32.mrf.mxu0  ;;  %v1243_v15 = vcombine.high %v22702_v28, %v22702_v28  ;;  %v2541_v56 = vcombine.low %v2533_v21, %v2540_v13 }
 0x128   : > { %v14499_v0 = vadd.f32 %v14498_v2, %v14497_v32  ;;  %v17642_v49 = vadd.f32 %v14602_v4, %v4171_v40  ;;  %v14604_v25 = vpop.f32.mrf.mxu1  ;;  %v1153_v2 = vcombine.high %v1151_v17, %v1151_v17 }
 0x129   : > { %v14500_v18 = vpop.f32.mrf.mxu0  ;;  %v14605_v37 = vadd.f32 %v14604_v25, %v14603_v8  ;;  %v1250_v8 = vrot.slane %v22702_v28, %v16213_v57 }
 0x12a   : > { %v4174_v5 = vadd.f32 %v14499_v0, %v17501_v11  ;;  %15554 = vmatmul.mubr.bf16.gmra.mxu0 %v2363_v58  ;;  %v2614_v0 = vcombine.low %v1152_v20, %v1151_v17  ;;  %v2615_v25 = vcombine.low %v1153_v2, %v1186_v31  ;;  %v22703_v20 = vld [vmem:[#allocation17_spill] sm:$0xff] }
 0x12b   : > { %v14501_v45 = vpop.f32.mrf.mxu0  ;;  %15557 = vmatprep.mubr.msk.bf16.mxu0 %vm16012_vm2, %v22671_v42  ;;  %v1258_v36 = vcombine.high %v1250_v8, %v1250_v8  ;;  %v1349_v31 = vcombine.high %v22703_v20, %v22703_v20  ;;  %v1356_v28 = vrot.slane %v22703_v20, %v16213_v57 }
 0x12c   : > { %v14502_v50 = vadd.f32 %v14501_v45, %v14500_v18  ;;  %v17655_v38 = vadd.f32 %v14605_v37, %v4174_v5  ;;  %v14606_v60 = vpop.f32.mrf.mxu1  ;;  %v1257_v18 = vrot.slane %v1243_v15, %v16213_v57  ;;  %v2629_v7 = vrot.slane %v2615_v25, %v16213_v57 }
 0x12d   : > { %v14503_v53 = vpop.f32.mrf.mxu0  ;;  %v2703_v13 = vcombine.low %v1250_v8, %v1258_v36  ;;  %v22704_v8 = vld [vmem:[#allocation9_spill] sm:$0xff]  ;;  %v22705_v36 = vld [vmem:[#allocation23_spill] sm:$0xff] }
 0x12e   : > { %v4179_v48 = vadd.f32 %v14502_v50, %v17501_v11  ;;  %v14607_v30 = vpop.f32.mrf.mxu1 }
 0x12f   : > { %v14504_v19 = vpop.f32.mrf.mxu0  ;;  %v14608_v43 = vadd.f32 %v14607_v30, %v14606_v60  ;;  %v2622_v60 = vrot.slane %v2614_v0, %v16213_v57  ;;  %v2711_v0 = vrot.slane %v2703_v13, %v16213_v57 }
 0x130   : > { %v14505_v59 = vadd.f32 %v14504_v19, %v14503_v53  ;;  %v14609_v12 = vpop.f32.mrf.mxu1 }
 0x131   : > { %v14506_v47 = vpop.f32.mrf.mxu0  ;;  %v17664_v32 = vadd.f32 %v14608_v43, %v4179_v48  ;;  %v1259_v48 = vcombine.high %v1257_v18, %v1257_v18  ;;  %v2630_v21 = vcombine.low %v2622_v60, %v2629_v7 }
 0x132   : > { %v4182_v40 = vadd.f32 %v14505_v59, %v17501_v11  ;;  %15558 = vmatmul.mubr.bf16.gmra.mxu0 %v2452_v54  ;;  %v14610_v58 = vpop.f32.mrf.mxu1 }
 0x133   : > { %v14507_v26 = vpop.f32.mrf.mxu0  ;;  %15561 = vmatprep.mubr.msk.bf16.mxu0 %vm16012_vm2, %v22671_v42  ;;  %v14611_v34 = vadd.f32 %v14610_v58, %v14609_v12  ;;  %v2704_v2 = vcombine.low %v1257_v18, %v1259_v48  ;;  %v1462_v48 = vrot.slane %v22705_v36, %v16213_v57 }
 0x134   : > { %v14508_v44 = vadd.f32 %v14507_v26, %v14506_v47  ;;  %v14612_v4 = vpop.f32.mrf.mxu1 }
 0x135   : > { %v14509_v9 = vpop.f32.mrf.mxu0  ;;  %v17673_v5 = vadd.f32 %v14611_v34, %v4182_v40  ;;  %v2718_v18 = vrot.slane %v2704_v2, %v16213_v57 }
 0x136   : > { %v4187_v10 = vadd.f32 %v14508_v44, %v17501_v11  ;;  %v14613_v45 = vpop.f32.mrf.mxu1 }
 0x137   : > { %v14510_v39 = vpop.f32.mrf.mxu0  ;;  %v14614_v1 = vadd.f32 %v14613_v45, %v14612_v4 }
 0x138   : > { %v14511_v37 = vadd.f32 %v14510_v39, %v14509_v9  ;;  %v14615_v50 = vpop.f32.mrf.mxu1  ;;  %v1364_v39 = vcombine.high %v1356_v28, %v1356_v28 }
 0x139   : > { %v14512_v53 = vpop.f32.mrf.mxu0  ;;  %v17683_v19 = vadd.f32 %v14614_v1, %v4187_v10  ;;  %v1292_v10 = vrot.slane %v22704_v8, %v16213_v57 }
 0x13a   : > { %v4190_v54 = vadd.f32 %v14511_v37, %v17501_v11  ;;  %15562 = vmatmul.mubr.bf16.gmra.mxu0 %v2541_v56  ;;  %v14616_v17 = vpop.f32.mrf.mxu1  ;;  %v1363_v56 = vrot.slane %v1349_v31, %v16213_v57 }
 0x13b   : > { %v14513_v30 = vpop.f32.mrf.mxu0  ;;  %15565 = vmatprep.mubr.msk.bf16.mxu0 %vm16012_vm2, %v22671_v42  ;;  %v14617_v59 = vadd.f32 %v14616_v17, %v14615_v50  ;;  %v2792_v60 = vcombine.low %v1292_v10, %v1356_v28 }
 0x13c   : > { %v14514_v43 = vadd.f32 %v14513_v30, %v14512_v53  ;;  %v14618_v12 = vpop.f32.mrf.mxu1  ;;  %v2719_v30 = vcombine.low %v2711_v0, %v2718_v18 }
 0x13d   : > { %v14515_v47 = vpop.f32.mrf.mxu0  ;;  %v17693_v15 = vadd.f32 %v14617_v59, %v4190_v54  ;;  %v15828_v54 = vld [vmem:[%s22410_s3 + $0x70] sm:$0xff]   ;;  %v2793_v59 = vcombine.low %v1364_v39, %v1363_v56 }
 0x13e   : > { %v4195_v40 = vadd.f32 %v14514_v43, %v17501_v11  ;;  %v14619_v58 = vpop.f32.mrf.mxu1  ;;  %14891 = vmatprep.subr.bf16.mxu1 %v15828_v54 }
 0x13f   : > { %v14516_v26 = vpop.f32.mrf.mxu0  ;;  %v14620_v34 = vadd.f32 %v14619_v58, %v14618_v12  ;;  %v1470_v58 = vcombine.high %v1462_v48, %v1462_v48 }
 0x140   : > { %v14517_v44 = vadd.f32 %v14516_v26, %v14515_v47  ;;  %v14621_v4 = vpop.f32.mrf.mxu1  ;;  %v15829_v47 = vld [vmem:[%s22410_s3 + $0x30] sm:$0xff]   ;;  %v1455_v26 = vcombine.high %v22705_v36, %v22705_v36 }
 0x141   : > { %v14518_v9 = vpop.f32.mrf.mxu0  ;;  %v17700_v25 = vadd.f32 %v14620_v34, %v4195_v40  ;;  %v1365_v40 = vcombine.high %v1363_v56, %v1363_v56  ;;  %14892 = vmatpush3.bf16.msra.mxu1 %v15829_v47  ;;  %v1561_v47 = vcombine.high %v22687_v16, %v22687_v16 }
 0x142   : > { %v4198_v45 = vadd.f32 %v14517_v44, %v17501_v11  ;;  %15566 = vmatmul.mubr.bf16.gmra.mxu0 %v2630_v21  ;;  %v14622_v41 = vpop.f32.mrf.mxu1  ;;  %v22706_v21 = vld [vmem:[#allocation13_spill] sm:$0xff] }
 0x143   : > { %v14519_v35 = vpop.f32.mrf.mxu0  ;;  %15569 = vmatprep.mubr.msk.bf16.mxu0 %vm16012_vm2, %v22671_v42  ;;  %v14623_v1 = vadd.f32 %v14622_v41, %v14621_v4  ;;  %v1398_v2 = vrot.slane %v22706_v21, %v16213_v57  ;;  %v2800_v4 = vrot.slane %v2792_v60, %v16213_v57  ;;  %v2882_v41 = vcombine.low %v1462_v48, %v1470_v58 }
 0x144   : > { %v14520_v37 = vadd.f32 %v14519_v35, %v14518_v9  ;;  %v14624_v50 = vpop.f32.mrf.mxu1  ;;  %v2807_v9 = vrot.slane %v2793_v59, %v16213_v57  ;;  %v1568_v48 = vrot.slane %v22687_v16, %v16213_v57  ;;  %v15830_v16 = vld [vmem:[%s22410_s3 + $0x68] sm:$0xff]  }
 0x145   : > { %v14521_v53 = vpop.f32.mrf.mxu0  ;;  %v17711_v7 = vadd.f32 %v14623_v1, %v4198_v45  ;;  %v2881_v39 = vcombine.low %v1365_v40, %v1398_v2  ;;  %14893 = vmatprep.subr.bf16.mxu1 %v15830_v16 }
 0x146   : > { %v4203_v17 = vadd.f32 %v14520_v37, %v17501_v11  ;;  %v14625_v43 = vpop.f32.mrf.mxu1  ;;  %v2808_v37 = vcombine.low %v2800_v4, %v2807_v9  ;;  %v15831_v4 = vld [vmem:[%s22410_s3 + $0x28] sm:$0xff]  }
 0x147   : > { %v14522_v12 = vpop.f32.mrf.mxu0  ;;  %v14626_v13 = vadd.f32 %v14625_v43, %v14624_v50  ;;  %v1469_v50 = vrot.slane %v1455_v26, %v16213_v57  ;;  %v2889_v59 = vrot.slane %v2881_v39, %v16213_v57  ;;  %v22707_v43 = vld [vmem:[#allocation21_spill] sm:$0xff]  ;;  %14894 = vmatpush3.bf16.msra.mxu1 %v15831_v4 }
 0x148   : > { %v14523_v20 = vadd.f32 %v14522_v12, %v14521_v53  ;;  %v14627_v31 = vpop.f32.mrf.mxu1  ;;  %v1504_v12 = vrot.slane %v22707_v43, %v16213_v57 }
 0x149   : > { %v14524_v28 = vpop.f32.mrf.mxu0  ;;  %v17721_v34 = vadd.f32 %v14626_v13, %v4203_v17 }
 0x14a   : > { %v4206_v44 = vadd.f32 %v14523_v20, %v17501_v11  ;;  %15570 = vmatmul.mubr.bf16.gmra.mxu0 %v2719_v30  ;;  %v14628_v0 = vpop.f32.mrf.mxu1 }
 0x14b   : > { %v14525_v8 = vpop.f32.mrf.mxu0  ;;  %15573 = vmatprep.mubr.msk.bf16.mxu0 %vm16012_vm2, %v22671_v42  ;;  %v14629_v10 = vadd.f32 %v14628_v0, %v14627_v31  ;;  %v2896_v31 = vrot.slane %v2882_v41, %v16213_v57 }
 0x14c   : > { %v14526_v56 = vadd.f32 %v14525_v8, %v14524_v28  ;;  %v14630_v45 = vpop.f32.mrf.mxu1  ;;  %v1471_v28 = vcombine.high %v1469_v50, %v1469_v50 }
 0x14d   : > { %v14527_v18 = vpop.f32.mrf.mxu0  ;;  %v17728_v35 = vadd.f32 %v14629_v10, %v4206_v44  ;;  %v2971_v44 = vcombine.low %v1504_v12, %v1568_v48  ;;  %v2897_v8 = vcombine.low %v2889_v59, %v2896_v31  ;;  %v22709_v59 = vld [vmem:[#allocation37_spill] sm:$0xff] }
 0x14e   : > { %v4211_v1 = vadd.f32 %v14526_v56, %v17501_v11  ;;  %v14631_v53 = vpop.f32.mrf.mxu1  ;;  %v2970_v10 = vcombine.low %v1469_v50, %v1471_v28  ;;  %v1575_v56 = vrot.slane %v1561_v47, %v16213_v57  ;;  %v1667_v43 = vcombine.high %v22709_v59, %v22709_v59 }
 0x14f   : > { %v14528_v60 = vpop.f32.mrf.mxu0  ;;  %v14632_v36 = vadd.f32 %v14631_v53, %v14630_v45  ;;  %v22708_v53 = vld [vmem:[#allocation24_spill] sm:$0xff]  ;;  %v2985_v50 = vrot.slane %v2971_v44, %v16213_v57  ;;  %v1674_v44 = vrot.slane %v22709_v59, %v16213_v57 }
 0x150   : > { %v14529_v54 = vadd.f32 %v14528_v60, %v14527_v18  ;;  %v14633_v17 = vpop.f32.mrf.mxu1  ;;  %v1610_v60 = vrot.slane %v22708_v53, %v16213_v57  ;;  %v1681_v16 = vrot.slane %v1667_v43, %v16213_v57  ;;  %v1773_v43 = vcombine.high %v22691_v62, %v22691_v62 }
 0x151   : > { %v14530_v30 = vpop.f32.mrf.mxu0  ;;  %v17739_v13 = vadd.f32 %v14632_v36, %v4211_v1 }
 0x152   : > { %v4214_v20 = vadd.f32 %v14529_v54, %v17501_v11  ;;  %15574 = vmatmul.mubr.bf16.gmra.mxu0 %v2808_v37  ;;  %v14634_v40 = vpop.f32.mrf.mxu1  ;;  %v1576_v37 = vcombine.high %v1568_v48, %v1568_v48  ;;  %v1683_v53 = vcombine.high %v1681_v16, %v1681_v16 }
 0x153   : > { %v14531_v21 = vpop.f32.mrf.mxu0  ;;  %15577 = vmatprep.mubr.msk.bf16.mxu0 %vm16012_vm2, %v22671_v42  ;;  %v14635_v2 = vadd.f32 %v14634_v40, %v14633_v17  ;;  %v2978_v17 = vrot.slane %v2970_v10, %v16213_v57 }
 0x154   : > { %v14532_v58 = vadd.f32 %v14531_v21, %v14530_v30  ;;  %v1577_v30 = vcombine.high %v1575_v56, %v1575_v56  ;;  %v3059_v40 = vcombine.low %v1576_v37, %v1575_v56  ;;  %v1682_v37 = vcombine.high %v1674_v44, %v1674_v44 }
 0x155   : > { %v14533_v26 = vpop.f32.mrf.mxu0  ;;  %v17751_v9 = vadd.f32 %v14635_v2, %v4214_v20  ;;  %v14636_v0 = vpop.f32.mrf.mxu1 }
 0x156   : > { %v4219_v45 = vadd.f32 %v14532_v58, %v17501_v11  ;;  %v2986_v58 = vcombine.low %v2978_v17, %v2985_v50  ;;  %v3067_v56 = vrot.slane %v3059_v40, %v16213_v57  ;;  %v1780_v40 = vrot.slane %v22691_v62, %v16213_v57 }
 0x157   : > { %v14534_v18 = vpop.f32.mrf.mxu0  ;;  %v14637_v39 = vpop.f32.mrf.mxu1  ;;  %v1787_v62 = vrot.slane %v1773_v43, %v16213_v57 }
 0x158   : > { %v14535_v41 = vadd.f32 %v14534_v18, %v14533_v26  ;;  %v14638_v1 = vadd.f32 %v14637_v39, %v14636_v0  ;;  %v3060_v26 = vcombine.low %v1577_v30, %v1610_v60 }
 0x159   : > { %v14639_v36 = vpop.f32.mrf.mxu1 }
 0x15a   : > { %v14536_v54 = vpop.f32.mrf.mxu0  ;;  %15578 = vmatmul.mubr.bf16.gmra.mxu0 %v2897_v8  ;;  %v17761_v12 = vadd.f32 %v14638_v1, %v4219_v45  ;;  %v4222_v47 = vadd.f32 %v14535_v41, %v17501_v11  ;;  %v3074_v1 = vrot.slane %v3060_v26, %v16213_v57 }
 0x15b   : > { %15581 = vmatprep.mubr.msk.bf16.mxu0 %vm16012_vm2, %v22671_v42  ;;  %v14640_v48 = vpop.f32.mrf.mxu1 }
 0x15c   : > { %v14537_v20 = vpop.f32.mrf.mxu0  ;;  %v14641_v31 = vadd.f32 %v14640_v48, %v14639_v36 }
 0x15d   : > { %v14538_v28 = vadd.f32 %v14537_v20, %v14536_v54  ;;  %v14642_v21 = vpop.f32.mrf.mxu1  ;;  %v15832_v54 = vld [vmem:[%s22410_s3 + $0x60] sm:$0xff]   ;;  %v3075_v20 = vcombine.low %v3067_v56, %v3074_v1 }
 0x15e   : > { %v14539_v2 = vpop.f32.mrf.mxu0  ;;  %v17769_v4 = vadd.f32 %v14641_v31, %v4222_v47  ;;  %14895 = vmatprep.subr.bf16.mxu1 %v15832_v54  ;;  %v3148_v31 = vcombine.low %v1674_v44, %v1682_v37  ;;  %v15833_v37 = vld [vmem:[%s22410_s3 + $0x20] sm:$0xff]  }
 0x15f   : > { %v4227_v0 = vadd.f32 %v14538_v28, %v17501_v11  ;;  %v14643_v8 = vpop.f32.mrf.mxu1  ;;  %v3149_v28 = vcombine.low %v1681_v16, %v1683_v53  ;;  %14896 = vmatpush3.bf16.msra.mxu1 %v15833_v37 }
 0x160   : > { %v14540_v10 = vpop.f32.mrf.mxu0  ;;  %v14644_v45 = vadd.f32 %v14643_v8, %v14642_v21  ;;  %v3156_v44 = vrot.slane %v3148_v31, %v16213_v57 }
 0x161   : > { %v14541_v18 = vadd.f32 %v14540_v10, %v14539_v2  ;;  %v14645_v39 = vpop.f32.mrf.mxu1  ;;  %v22710_v10 = vld [vmem:[#allocation36_spill] sm:$0xff]  ;;  %v3163_v16 = vrot.slane %v3149_v28, %v16213_v57 }
 0x162   : > { %v14542_v41 = vpop.f32.mrf.mxu0  ;;  %15582 = vmatmul.mubr.bf16.gmra.mxu0 %v2986_v58  ;;  %v17774_v60 = vadd.f32 %v14644_v45, %v4227_v0  ;;  %v1716_v45 = vrot.slane %v22710_v10, %v16213_v57 }
 0x163   : > { %v4230_v36 = vadd.f32 %v14541_v18, %v17501_v11  ;;  %15585 = vmatprep.mubr.msk.bf16.mxu0 %vm16012_vm2, %v22671_v42  ;;  %v14646_v17 = vpop.f32.mrf.mxu1  ;;  %v3164_v43 = vcombine.low %v3156_v44, %v3163_v16 }
 0x164   : > { %v14543_v50 = vpop.f32.mrf.mxu0  ;;  %v14647_v30 = vadd.f32 %v14646_v17, %v14645_v39 }
 0x165   : > { %v14544_v59 = vadd.f32 %v14543_v50, %v14542_v41  ;;  %v14648_v47 = vpop.f32.mrf.mxu1  ;;  %v1788_v41 = vcombine.high %v1780_v40, %v1780_v40  ;;  %v3237_v50 = vcombine.low %v1716_v45, %v1780_v40 }
 0x166   : > { %v14545_v48 = vpop.f32.mrf.mxu0  ;;  %v17786_v21 = vadd.f32 %v14647_v30, %v4230_v36 }
 0x167   : > { %v4235_v2 = vadd.f32 %v14544_v59, %v17501_v11  ;;  %v14649_v58 = vpop.f32.mrf.mxu1  ;;  %v3245_v40 = vrot.slane %v3237_v50, %v16213_v57 }
 0x168   : > { %v14546_v26 = vpop.f32.mrf.mxu0  ;;  %v14650_v0 = vadd.f32 %v14649_v58, %v14648_v47  ;;  %v3238_v47 = vcombine.low %v1788_v41, %v1787_v62 }
 0x169   : > { %v14547_v8 = vadd.f32 %v14546_v26, %v14545_v48  ;;  %v14651_v18 = vpop.f32.mrf.mxu1 }
 0x16a   : > { %v14670_v39 = vpop.f32.mrf.mxu0  ;;  %15586 = vmatmul.mubr.bf16.gmra.mxu0 %v3075_v20  ;;  %v17794_v56 = vadd.f32 %v14650_v0, %v4235_v2  ;;  %v3252_v0 = vrot.slane %v3238_v47, %v16213_v57  ;;  %v15834_v47 = vld [vmem:[%s22410_s3 + $0x58] sm:$0xff]  }
 0x16b   : > { %v4238_v1 = vadd.f32 %v14547_v8, %v17501_v11  ;;  %15589 = vmatprep.mubr.msk.bf16.mxu0 %vm16012_vm2, %v22671_v42  ;;  %v14652_v53 = vpop.f32.mrf.mxu1  ;;  %v1886_v11 = vrot.slane %v17335_v51, %v16213_v57  ;;  %v1789_v8 = vcombine.high %v1787_v62, %v1787_v62  ;;  %v22711_v51 = vld [vmem:[#allocation39_spill] sm:$0xff]  ;;  %14897 = vmatprep.subr.bf16.mxu1 %v15834_v47 }
 0x16c   : > { %v14671_v36 = vpop.f32.mrf.mxu0  ;;  %v14653_v54 = vadd.f32 %v14652_v53, %v14651_v18  ;;  %v1822_v10 = vrot.slane %v22711_v51, %v16213_v57 }
 0x16d   : > { %v14672_v17 = vadd.f32 %v14671_v36, %v14670_v39  ;;  %v17802_v30 = vpop.f32.mrf.mxu1  ;;  %v1894_v45 = vcombine.high %v1886_v11, %v1886_v11 }
 0x16e   : > { %v14673_v59 = vpop.f32.mrf.mxu0  ;;  %v17806_v48 = vadd.f32 %v14653_v54, %v4238_v1  ;;  %v3253_v1 = vcombine.low %v3245_v40, %v3252_v0  ;;  %v3326_v37 = vcombine.low %v1789_v8, %v1822_v10 }
 0x16f   : > { %v17809_v20 = vadd.f32 %v14672_v17, %v17506_v46  ;;  %v17811_v31 = vpop.f32.mrf.mxu1  ;;  %v3327_v62 = vcombine.low %v1886_v11, %v1894_v45  ;;  %v15838_v45 = vld [vmem:[%s22410_s3 + $0x178] sm:$0xff]  }
 0x170   : > { %v14674_v28 = vpop.f32.mrf.mxu0  ;;  %15065 = vmatprep.subr.bf16.mxu0 %v15838_v45  ;;  %v15844_v45 = vld [vmem:[%s22410_s3 + $0x168] sm:$0xff]  }
 0x171   : > { %v14675_v2 = vadd.f32 %v14674_v28, %v14673_v59  ;;  %v17814_v58 = vpop.f32.mrf.mxu1  ;;  %v3334_v59 = vrot.slane %v3326_v37, %v16213_v57  ;;  %v15836_v37 = vld [vmem:[%s22410_s3 + $0x50] sm:$0xff]  }
 0x172   : > { %v14676_v26 = vpop.f32.mrf.mxu0  ;;  %15590 = vmatmul.mubr.bf16.gmra.mxu0 %v3164_v43  ;;  %v3341_v43 = vrot.slane %v3327_v62, %v16213_v57 }
 0x173   : > { %v17820_v46 = vadd.f32 %v14675_v2, %v17513_v24  ;;  %15593 = vmatprep.mubr.msk.bf16.mxu0 %vm16012_vm2, %v22671_v42  ;;  %v17824_v18 = vpop.f32.mrf.mxu1 }
 0x174   : > { %v14677_v39 = vpop.f32.mrf.mxu0  ;;  %v3342_v8 = vcombine.low %v3334_v59, %v3341_v43  ;;  %v15841_v59 = vld [vmem:[%s22410_s3 + $0x130] sm:$0xff]  }
 0x175   : > { %v14678_v44 = vadd.f32 %v14677_v39, %v14676_v26  ;;  %v17826_v16 = vpop.f32.mrf.mxu1 }
 0x176   : > { %v14679_v41 = vpop.f32.mrf.mxu0 }
 0x177   : > { %v17829_v53 = vadd.f32 %v14678_v44, %v17527_v55  ;;  %v17831_v36 = vpop.f32.mrf.mxu1  ;;  %v15835_v55 = vld [vmem:[%s22410_s3 + $0x18] sm:$0xff]  }
 0x178   : > { %v14680_v24 = vpop.f32.mrf.mxu0  ;;  %14898 = vmatpush3.bf16.msra.mxu1 %v15835_v55  ;;  %v15839_v44 = vld [vmem:[%s22410_s3 + $0x138] sm:$0xff]  }
 0x179   : > { %v14681_v54 = vadd.f32 %v14680_v24, %v14679_v41  ;;  %v17833_v17 = vpop.f32.mrf.mxu1  ;;  %15066 = vmatpush3.bf16.msra.mxu0 %v15839_v44  ;;  %14899 = vmatprep.subr.bf16.mxu1 %v15836_v37  ;;  %v15845_v44 = vld [vmem:[%s22410_s3 + $0x128] sm:$0xff]  }
 0x17a   : > { %v14682_v50 = vpop.f32.mrf.mxu0  ;;  %15594 = vmatmul.mubr.bf16.gmra.mxu0 %v3253_v1 }
 0x17b   : > { %v17844_v11 = vadd.f32 %v14681_v54, %v17538_v14  ;;  %15597 = vmatprep.mubr.msk.bf16.mxu0 %vm16012_vm2, %v22671_v42  ;;  %v17848_v28 = vpop.f32.mrf.mxu1  ;;  %v15837_v54 = vld [vmem:[%s22410_s3 + $0x10] sm:$0xff]  }
 0x17c   : > { %v14683_v2 = vpop.f32.mrf.mxu0  ;;  %14900 = vmatpush3.bf16.msra.mxu1 %v15837_v54 }
 0x17d   : > { %v14684_v40 = vadd.f32 %v14683_v2, %v14682_v50  ;;  %v17850_v26 = vpop.f32.mrf.mxu1 }
 0x17e   : > { %v14685_v0 = vpop.f32.mrf.mxu0 }
 0x17f   : > { %v17853_v51 = vadd.f32 %v14684_v40, %v17561_v63  ;;  %v17855_v10 = vpop.f32.mrf.mxu1 }
 0x180   : > { %v14686_v14 = vpop.f32.mrf.mxu0 }
 0x181   : > { %v14687_v39 = vadd.f32 %v14686_v14, %v14685_v0  ;;  %v17863_v41 = vpop.f32.mrf.mxu1  ;;  %v15842_v0 = vld [vmem:[%s22410_s3 + $0x48] sm:$0xff]  }
 0x182   : > { %v14688_v1 = vpop.f32.mrf.mxu0  ;;  %15598 = vmatmul.mubr.bf16.gmra.mxu0 %v3342_v8  ;;  %v15843_v14 = vld [vmem:[%s22410_s3 + $0x8] sm:$0xff]   ;;  %14901 = vmatprep.subr.bf16.mxu1 %v15842_v0 }
 0x183   : > { %v17866_v63 = vadd.f32 %v14687_v39, %v17571_v52  ;;  %15601 = vmatprep.mubr.msk.bf16.mxu0 %vm16012_vm2, %v22671_v42  ;;  %v17873_v62 = vpop.f32.mrf.mxu1  ;;  %v15840_v52 = vld [vmem:[%s22410_s3 + $0x170] sm:$0xff]   ;;  %14902 = vmatpush3.bf16.msra.mxu1 %v15843_v14 }
 0x184   : > { %v14689_v24 = vpop.f32.mrf.mxu0  ;;  %15067 = vmatprep.subr.bf16.mxu0 %v15840_v52  ;;  %v15847_v52 = vld [vmem:[%s22410_s3] sm:$0xff]  }
 0x185   : > { %v14690_v50 = vadd.f32 %v14689_v24, %v14688_v1  ;;  %v17884_v43 = vpop.f32.mrf.mxu1  ;;  %15068 = vmatpush3.bf16.msra.mxu0 %v15841_v59  ;;  %v15849_v59 = vld [vmem:[%s22410_s3 + $0x120] sm:$0xff]  }
 0x186   : > { %v14691_v47 = vpop.f32.mrf.mxu0  ;;  %15069 = vmatprep.subr.bf16.mxu0 %v15844_v45 }
 0x187   : > { %v17887_v55 = vadd.f32 %v14690_v50, %v17585_v29  ;;  %v17889_v2 = vpop.f32.mrf.mxu1 }
 0x188   : > { %v14692_v40 = vpop.f32.mrf.mxu0 }
 0x189   : > { %22712 = vst [vmem:[#allocation8_spill] sm:$0xff] %v17887_v55  ;;  %v14693_v8 = vadd.f32 %v14692_v40, %v14691_v47  ;;  %v17900_v39 = vpop.f32.mrf.mxu1  ;;  %15070 = vmatpush3.bf16.msra.mxu0 %v15845_v44 }
 0x18a   : > { %v14694_v29 = vpop.f32.mrf.mxu0  ;;  %15602 = vmatmul.mubr.bf16.gmra.mxu0 %v17568_v61  ;;  %v15846_v61 = vld [vmem:[%s22410_s3 + $0x40] sm:$0xff]  }
 0x18b   : > { %v17907_v1 = vadd.f32 %v14693_v8, %v17593_v33  ;;  %15605 = vmatprep.mubr.msk.bf16.mxu0 %vm16012_vm2, %v22671_v42  ;;  %v17911_v37 = vpop.f32.mrf.mxu1  ;;  %v15848_v33 = vld [vmem:[%s22410_s3 + $0x160] sm:$0xff]   ;;  %14903 = vmatprep.subr.bf16.mxu1 %v15846_v61 }
 0x18c   : > { %v14695_v24 = vpop.f32.mrf.mxu0  ;;  %14904 = vmatpush3.bf16.msra.mxu1 %v15847_v52  ;;  %15071 = vmatprep.subr.bf16.mxu0 %v15848_v33 }
 0x18d   : > { %22713 = vst [vmem:[#allocation34_spill] sm:$0xff] %v17907_v1  ;;  %v14696_v54 = vadd.f32 %v14695_v24, %v14694_v29  ;;  %v17922_v42 = vpop.f32.mrf.mxu1  ;;  %15072 = vmatpush3.bf16.msra.mxu0 %v15849_v59  ;;  %v15856_v1 = vld [vmem:[%s22410_s3 + $0x140] sm:$0xff]  }
 0x18e   : > { %v14697_v50 = vpop.f32.mrf.mxu0 }
 0x18f   : > { %v17928_v47 = vadd.f32 %v14696_v54, %v17606_v6  ;;  %v17930_v40 = vpop.f32.mrf.mxu1 }
 0x190   : > { %v14698_v0 = vpop.f32.mrf.mxu0 }
 0x191   : > { %22714 = vst [vmem:[#allocation30_spill] sm:$0xff] %v17928_v47  ;;  %v14699_v8 = vadd.f32 %v14698_v0, %v14697_v50  ;;  %v17932_v14 = vpop.f32.mrf.mxu1 }
 0x192   : > { %v14700_v45 = vpop.f32.mrf.mxu0  ;;  %15606 = vmatmul.mubr.bf16.gmra.mxu0 %v17588_v22 }
 0x193   : > { %v17936_v29 = vadd.f32 %v14699_v8, %v17619_v3  ;;  %v17938_v44 = vpop.f32.mrf.mxu1 }
 0x194   : > { %v14701_v24 = vpop.f32.mrf.mxu0 }
 0x195   : > { %22715 = vst [vmem:[#allocation7_spill] sm:$0xff] %v17936_v29  ;;  %v14702_v6 = vadd.f32 %v14701_v24, %v14700_v45  ;;  %v17940_v61 = vpop.f32.mrf.mxu1 }
 0x196   : > { %v14703_v54 = vpop.f32.mrf.mxu0 }
 0x197   : > { %v17943_v52 = vadd.f32 %v14702_v6, %v17627_v23  ;;  %v17945_v33 = vpop.f32.mrf.mxu1  ;;  %v15850_v6 = vld [vmem:[%s22410_s3 + $0x158] sm:$0xff]  }
 0x198   : > { %v14704_v50 = vpop.f32.mrf.mxu0  ;;  %15073 = vmatprep.subr.bf16.mxu0 %v15850_v6 }
 0x199   : > { %22716 = vst [vmem:[#allocation5_spill] sm:$0xff] %v17943_v52  ;;  %v14705_v59 = vadd.f32 %v14704_v50, %v14703_v54  ;;  %v17947_v0 = vpop.f32.mrf.mxu1  ;;  %v15853_v52 = vld [vmem:[%s22410_s3 + $0x110] sm:$0xff]  }
 0x19a   : > { %v14706_v22 = vpop.f32.mrf.mxu0 }
 0x19b   : > { %v17950_v3 = vadd.f32 %v14705_v59, %v17638_v27  ;;  %v17952_v8 = vpop.f32.mrf.mxu1  ;;  %v15851_v27 = vld [vmem:[%s22410_s3 + $0x118] sm:$0xff]  }
 0x19c   : > { %v14707_v57 = vpop.f32.mrf.mxu0  ;;  %15074 = vmatpush3.bf16.msra.mxu0 %v15851_v27  ;;  %v15855_v27 = vld [vmem:[%s22410_s3 + $0x108] sm:$0xff]  }
 0x19d   : > { %22717 = vst [vmem:[#allocation18_spill] sm:$0xff] %v17950_v3  ;;  %v14708_v45 = vadd.f32 %v14707_v57, %v14706_v22  ;;  %v17954_v24 = vpop.f32.mrf.mxu1 }
 0x19e   : > { %v14709_v29 = vpop.f32.mrf.mxu0 }
 0x19f   : > { %v17957_v23 = vadd.f32 %v14708_v45, %v17642_v49  ;;  %v17962_v54 = vpop.f32.mrf.mxu1  ;;  %v15852_v45 = vld [vmem:[%s22410_s3 + $0x150] sm:$0xff]  }
 0x1a0   : > { %v14710_v50 = vpop.f32.mrf.mxu0  ;;  %15075 = vmatprep.subr.bf16.mxu0 %v15852_v45 }
 0x1a1   : > { %22718 = vst [vmem:[#allocation11_spill] sm:$0xff] %v17957_v23  ;;  %v14711_v59 = vadd.f32 %v14710_v50, %v14709_v29  ;;  %v17967_v57 = vpop.f32.mrf.mxu1  ;;  %15076 = vmatpush3.bf16.msra.mxu0 %v15853_v52 }
 0x1a2   : > { %v14712_v22 = vpop.f32.mrf.mxu0 }
 0x1a3   : > { %v17970_v49 = vadd.f32 %v14711_v59, %v17655_v38  ;;  %v17975_v23 = vpop.f32.mrf.mxu1  ;;  %v15854_v38 = vld [vmem:[%s22410_s3 + $0x148] sm:$0xff]  }
 0x1a4   : > { %v14713_v3 = vpop.f32.mrf.mxu0  ;;  %15077 = vmatprep.subr.bf16.mxu0 %v15854_v38 }
 0x1a5   : > { %22719 = vst [vmem:[#allocation4_spill] sm:$0xff] %v17970_v49  ;;  %v14714_v29 = vadd.f32 %v14713_v3, %v14712_v22  ;;  %v17980_v6 = vpop.f32.mrf.mxu1  ;;  %15078 = vmatpush3.bf16.msra.mxu0 %v15855_v27 }
 0x1a6   : > { %v14715_v50 = vpop.f32.mrf.mxu0  ;;  %15079 = vmatprep.subr.bf16.mxu0 %v15856_v1 }
 0x1a7   : > { %v17989_v59 = vadd.f32 %v14714_v29, %v17664_v32  ;;  %v17991_v49 = vpop.f32.mrf.mxu1  ;;  %v15857_v29 = vld [vmem:[%s22410_s3 + $0x100] sm:$0xff]  }
 0x1a8   : > { %22721 = vst [vmem:[#allocation14_spill] sm:$0xff] %v17991_v49  ;;  %v14716_v47 = vpop.f32.mrf.mxu0 }
 0x1a9   : > { %22720 = vst [vmem:[#allocation6_spill] sm:$0xff] %v17989_v59  ;;  %v14717_v3 = vadd.f32 %v14716_v47, %v14715_v50  ;;  %v17993_v22 = vpop.f32.mrf.mxu1  ;;  %15080 = vmatpush3.bf16.msra.mxu0 %v15857_v29 }
 0x1aa   : > { %22722 = vst [vmem:[#allocation12_spill] sm:$0xff] %v17993_v22  ;;  %v14718_v45 = vpop.f32.mrf.mxu0 }
 0x1ab   : > { %v17996_v52 = vadd.f32 %v14717_v3, %v17673_v5  ;;  %v18001_v55 = vpop.f32.mrf.mxu1 }
 0x1ac   : > { %22724 = vst [vmem:[#allocation33_spill] sm:$0xff] %v18001_v55  ;;  %v14719_v32 = vpop.f32.mrf.mxu0 }
 0x1ad   : > { %22723 = vst [vmem:[#allocation15_spill] sm:$0xff] %v17996_v52  ;;  %v14720_v38 = vadd.f32 %v14719_v32, %v14718_v45  ;;  %v18006_v47 = vpop.f32.mrf.mxu1 }
 0x1ae   : > { %v14721_v50 = vpop.f32.mrf.mxu0 }
 0x1af   : > { %v18009_v5 = vadd.f32 %v14720_v38, %v17683_v19  ;;  %v18011_v27 = vpop.f32.mrf.mxu1 }
 0x1b0   : > { %v14722_v3 = vpop.f32.mrf.mxu0 }
 0x1b1   : > { %22725 = vst [vmem:[#allocation19_spill] sm:$0xff] %v18009_v5  ;;  %v14723_v52 = vadd.f32 %v14722_v3, %v14721_v50  ;;  %v18013_v59 = vpop.f32.mrf.mxu1 }
 0x1b2   : > { %22726 = vst [vmem:[#allocation16_spill] sm:$0xff] %v18013_v59  ;;  %v14724_v55 = vpop.f32.mrf.mxu0 }
 0x1b3   : > { %v18016_v22 = vadd.f32 %v14723_v52, %v17693_v15  ;;  %v18018_v49 = vpop.f32.mrf.mxu1 }
 0x1b4   : > { %v14725_v1 = vpop.f32.mrf.mxu0 }
 0x1b5   : > { %22727 = vst [vmem:[#allocation25_spill] sm:$0xff] %v18016_v22  ;;  %v14726_v45 = vadd.f32 %v14725_v1, %v14724_v55  ;;  %v18020_v32 = vpop.f32.mrf.mxu1 }
 0x1b6   : > { %22728 = vst [vmem:[#allocation22_spill] sm:$0xff] %v18020_v32  ;;  %v14727_v29 = vpop.f32.mrf.mxu0 }
 0x1b7   : > { %v18023_v19 = vadd.f32 %v14726_v45, %v17700_v25  ;;  %v18025_v38 = vpop.f32.mrf.mxu1 }
 0x1b8   : > { %v14728_v5 = vpop.f32.mrf.mxu0 }
 0x1b9   : > { %22729 = vst [vmem:[#allocation41_spill] sm:$0xff] %v18023_v19  ;;  %v14729_v50 = vadd.f32 %v14728_v5, %v14727_v29  ;;  %v18027_v3 = vpop.f32.mrf.mxu1 }
 0x1ba   : > { %22730 = vst [vmem:[#allocation20_spill] sm:$0xff] %v18027_v3  ;;  %v14730_v59 = vpop.f32.mrf.mxu0 }
 0x1bb   : > { %v18030_v15 = vadd.f32 %v14729_v50, %v17711_v7  ;;  %v18032_v52 = vpop.f32.mrf.mxu1 }
 0x1bc   : > { %v14731_v22 = vpop.f32.mrf.mxu0 }
 0x1bd   : > { %22731 = vst [vmem:[#allocation26_spill] sm:$0xff] %v18030_v15  ;;  %v14732_v55 = vadd.f32 %v14731_v22, %v14730_v59  ;;  %v18034_v1 = vpop.f32.mrf.mxu1 }
 0x1be   : > { %22732 = vst [vmem:[#allocation31_spill] sm:$0xff] %v18034_v1  ;;  %v14733_v32 = vpop.f32.mrf.mxu0 }
 0x1bf   : > { %v18037_v25 = vadd.f32 %v14732_v55, %v17721_v34  ;;  %v18039_v45 = vpop.f32.mrf.mxu1 }
 0x1c0   : > { %v14734_v19 = vpop.f32.mrf.mxu0 }
 0x1c1   : > { %22733 = vst [vmem:[#allocation32_spill] sm:$0xff] %v18037_v25  ;;  %v14735_v5 = vadd.f32 %v14734_v19, %v14733_v32  ;;  %v18041_v29 = vpop.f32.mrf.mxu1 }
 0x1c2   : > { %22734 = vst [vmem:[#allocation29_spill] sm:$0xff] %v18041_v29  ;;  %v14736_v3 = vpop.f32.mrf.mxu0 }
 0x1c3   : > { %v18044_v7 = vadd.f32 %v14735_v5, %v17728_v35  ;;  %v18046_v50 = vpop.f32.mrf.mxu1 }
 0x1c4   : > { %v14737_v15 = vpop.f32.mrf.mxu0 }
 0x1c5   : > { %22735 = vst [vmem:[#allocation35_spill] sm:$0xff] %v18044_v7  ;;  %v14738_v59 = vadd.f32 %v14737_v15, %v14736_v3 }
 0x1c6   : > { %v18048_v22 = vpop.f32.mrf.mxu1  ;;  %v14739_v1 = vpop.f32.mrf.mxu0 }
 0x1c7   : > { %22736 = vst [vmem:[#allocation28_spill] sm:$0xff] %v18048_v22  ;;  %v18051_v34 = vadd.f32 %v14738_v59, %v17739_v13 }
 0x1c8   : > { %v18053_v55 = vpop.f32.mrf.mxu1  ;;  %v14740_v25 = vpop.f32.mrf.mxu0 }
 0x1c9   : > { %22737 = vst [vmem:[#allocation27_spill] sm:$0xff] %v18051_v34  ;;  %v14741_v32 = vadd.f32 %v14740_v25, %v14739_v1 }
 0x1ca   : > { %v18055_v19 = vpop.f32.mrf.mxu1  ;;  %v14742_v29 = vpop.f32.mrf.mxu0 }
 0x1cb   : > { %v18058_v35 = vadd.f32 %v14741_v32, %v17751_v9 }
 0x1cc   : > { %v18060_v5 = vpop.f32.mrf.mxu1  ;;  %v14743_v7 = vpop.f32.mrf.mxu0 }
 0x1cd   : > { %22738 = vst [vmem:[#allocation40_spill] sm:$0xff] %v18058_v35  ;;  %v14744_v3 = vadd.f32 %v14743_v7, %v14742_v29  ;;  %v15858_v7 = vld [vmem:[%s22410_s3 + $0xf8] sm:$0xff]  }
 0x1ce   : > { %v18062_v15 = vpop.f32.mrf.mxu1  ;;  %v14745_v22 = vpop.f32.mrf.mxu0  ;;  %14977 = vmatprep.subr.bf16.mxu1 %v15858_v7  ;;  %v14787_v7 = vadd.f32 %v17848_v28, %v17833_v17  ;;  %v14793_v17 = vadd.f32 %v17873_v62, %v17863_v41 }
 0x1cf   : > { %v18065_v13 = vadd.f32 %v14744_v3, %v17761_v12  ;;  %v16013_v12 = vmov 1966171168  }
 0x1d0   : > { %v18067_v59 = vpop.f32.mrf.mxu1  ;;  %v14746_v1 = vpop.f32.mrf.mxu0  ;;  %v5539_v3 = vunpack.c.l.s4 %v16013_v12  ;;  %v18133_v41 = vadd.f32 %v14787_v7, %v17844_v11  ;;  %v14808_v11 = vadd.f32 %v17945_v33, %v17940_v61  ;;  %v22748_v61 = vld [vmem:[#allocation12_spill] sm:$0xff]  ;;  %v22749_v33 = vld [vmem:[#allocation33_spill] sm:$0xff] }
 0x1d1   : > { %22739 = vst [vmem:[#allocation38_spill] sm:$0xff] %v18065_v13  ;;  %22740 = vst [vmem:[#allocation10_spill] sm:$0xff] %v18067_v59  ;;  %v14747_v25 = vadd.f32 %v14746_v1, %v14745_v22 }
 0x1d2   : > { %v18069_v34 = vpop.f32.mrf.mxu1  ;;  %v14748_v9 = vpop.f32.mrf.mxu0 }
 0x1d3   : > { %22741 = vst [vmem:[#allocation17_spill] sm:$0xff] %v18069_v34  ;;  %v18072_v32 = vadd.f32 %v14747_v25, %v17769_v4  ;;  %v5540_v25 = vunpack.c.0.s8 %v5539_v3  ;;  %v22745_v3 = vld [vmem:[#allocation2_spill] sm:$0xff] }
 0x1d4   : > { %v18074_v35 = vpop.f32.mrf.mxu1  ;;  %v14749_v29 = vpop.f32.mrf.mxu0  ;;  %vm4996_vm5 = vcmp.ge.s32.totalorder %v22745_v3, 2 }
 0x1d5   : > { %22742 = vst [vmem:[#allocation9_spill] sm:$0xff] %v18072_v32  ;;  %22743 = vst [vmem:[#allocation23_spill] sm:$0xff] %v18074_v35  ;;  %v14750_v13 = vadd.f32 %v14749_v29, %v14748_v9  ;;  %v14778_v35 = vadd.f32 %v17811_v31, %v17802_v30  ;;  %v14781_v9 = vadd.f32 %v17824_v18, %v17814_v58  ;;  %v18108_v18 = vadd.s32 16, %v22745_v3 }
 0x1d6   : > { %v14751_v59 = vpop.f32.mrf.mxu0  ;;  %v18083_v1 = vpop.f32.mrf.mxu1  ;;  %v14784_v29 = vadd.f32 %v17831_v36, %v17826_v16  ;;  %v18103_v30 = vsub.s32 %v5540_v25, %v22745_v3  ;;  %v14790_v31 = vadd.f32 %v17855_v10, %v17850_v26  ;;  %v18161_v25 = vadd.f32 %v14793_v17, %v17866_v63  ;;  %v22755_v17 = vld [vmem:[#allocation18_spill] sm:$0xff] }
 0x1d7   : > { %v18081_v22 = vadd.f32 %v14750_v13, %v17774_v60  ;;  %v18096_v13 = vstv %s14119_s20  ;;  %22746 = vst [vmem:[#allocation21_spill] sm:$0xff] %v18108_v18  ;;  %v4582_v16 = vadd.f32 %v14778_v35, %v17809_v20  ;;  %v4585_v26 = vadd.f32 %v14781_v9, %v17820_v46 }
 0x1d8   : > { %v14752_v4 = vpop.f32.mrf.mxu0  ;;  %22744 = vst [vmem:[#allocation13_spill] sm:$0xff] %v18096_v13  ;;  %v18100_v12 = vpop.f32.mrf.mxu1  ;;  %vm4960_vm3 = vcmp.ge.s32.totalorder %v18096_v13, 0  ;;  %vm4972_vm4 = vcmp.lt.s32.totalorder %v18096_v13, 16  ;;  %v18114_v36 = vadd.s32 1, %v18096_v13  ;;  %v18123_v10 = vadd.f32 %v14784_v29, %v17829_v53  ;;  %v22752_v29 = vld [vmem:[#allocation30_spill] sm:$0xff] }
 0x1d9   : > { %v14753_v32 = vadd.f32 %v14752_v4, %v14751_v59  ;;  %v14796_v20 = vadd.f32 %v17889_v2, %v17884_v43  ;;  %v14802_v46 = vadd.f32 %v17930_v40, %v17922_v42  ;;  %vm5037_vm6 = vcmp.lt.s32.totalorder %v18108_v18, 18  ;;  %vm18211_vm7 = vmand %vm4960_vm3, %vm4972_vm4 }
 0x1da   : > { %v14754_v34 = vpop.f32.mrf.mxu0  ;;  %v18129_v35 = vpop.f32.mrf.mxu1  ;;  %v18142_v62 = vadd.f32 %v14790_v31, %v17853_v51  ;;  %v18145_v43 = vadd.s32 3, %v18096_v13  ;;  %v14805_v2 = vadd.f32 %v17938_v44, %v17932_v14  ;;  %v14817_v51 = vadd.f32 %v17975_v23, %v17967_v57  ;;  %v22747_v14 = vld [vmem:[#allocation14_spill] sm:$0xff]  ;;  %v22753_v31 = vld [vmem:[#allocation7_spill] sm:$0xff]  ;;  %vm18241_vm10 = vmand %vm18211_vm7, %vm4996_vm5 }
 0x1db   : > { %v18094_v60 = vadd.f32 %v14753_v32, %v17786_v21  ;;  %v14820_v44 = vadd.f32 %v22747_v14, %v17980_v6  ;;  %v22751_v23 = vld [vmem:[#allocation34_spill] sm:$0xff]  ;;  %v18178_v7 = vadd.f32 %v14802_v46, %v22752_v29  ;;  %v18181_v6 = vadd.s32 4, %v18096_v13  ;;  %v22757_v46 = vld [vmem:[#allocation4_spill] sm:$0xff]  ;;  %vm5040_vm11 = vmand %vm18211_vm7, %vm5037_vm6 }
 0x1dc   : > { %v14755_v59 = vpop.f32.mrf.mxu0  ;;  %v22758_v14 = vld [vmem:[#allocation16_spill] sm:$0xff]  ;;  %vm4961_vm8 = vcmp.ge.s32.totalorder %v18114_v36, 0  ;;  %vm4973_vm9 = vcmp.lt.s32.totalorder %v18114_v36, 16  ;;  %v22787_v36 = vld [vmem:[#allocation9_spill] sm:$0xff]  ;;  %vm4963_vm4 = vcmp.ge.s32.totalorder %v18145_v43, 0 }
 0x1dd   : > { %v14756_v58 = vadd.f32 %v14755_v59, %v14754_v34  ;;  %v14799_v34 = vadd.f32 %v17911_v37, %v17900_v39  ;;  %v14811_v39 = vadd.f32 %v17952_v8, %v17947_v0  ;;  %v14814_v37 = vadd.f32 %v17962_v54, %v17954_v24  ;;  %v18167_v8 = vpop.f32.mrf.mxu1  ;;  %v22750_v54 = vld [vmem:[#allocation8_spill] sm:$0xff]  ;;  %vm18307_vm14 = vmand %vm4961_vm8, %vm4973_vm9 }
 0x1de   : > { %v14757_v21 = vpop.f32.mrf.mxu0  ;;  %v14823_v0 = vadd.f32 %v22749_v33, %v22748_v61  ;;  %v18170_v9 = vadd.f32 %v14796_v20, %v22750_v54  ;;  %v22759_v61 = vld [vmem:[#allocation22_spill] sm:$0xff]  ;;  %vm18324_vm15 = vmand %vm18307_vm14, %vm4996_vm5 }
 0x1df   : > { %v18119_v28 = vadd.f32 %v14756_v58, %v17794_v56  ;;  %v18136_v56 = vadd.s32 2, %v18096_v13  ;;  %v18173_v57 = vadd.f32 %v14799_v34, %v22751_v23  ;;  %v18184_v58 = vadd.f32 %v14805_v2, %v22753_v31  ;;  %v22756_v34 = vld [vmem:[#allocation11_spill] sm:$0xff]  ;;  %v18205_v33 = vpop.f32.mrf.mxu1  ;;  %vm5043_vm2 = vmand %vm18307_vm14, %vm5037_vm6 }
 0x1e0   : > { %v14758_v32 = vpop.f32.mrf.mxu0  ;;  %v18190_v20 = vadd.f32 %v14811_v39, %v22755_v17  ;;  %v14829_v2 = vadd.f32 %v18018_v49, %v22758_v14  ;;  %v18224_v23 = vadd.s32 6, %v18096_v13 }
 0x1e1   : > { %v14759_v53 = vadd.f32 %v14758_v32, %v14757_v21  ;;  %v22754_v21 = vld [vmem:[#allocation5_spill] sm:$0xff]  ;;  %v18193_v32 = vadd.f32 %v14814_v37, %v22756_v34  ;;  %v22762_v37 = vld [vmem:[#allocation6_spill] sm:$0xff]  ;;  %vm4962_vm12 = vcmp.ge.s32.totalorder %v18136_v56, 0  ;;  %vm4974_vm13 = vcmp.lt.s32.totalorder %v18136_v56, 16 }
 0x1e2   : > { %v4734_v42 = vpop.f32.mrf.mxu0  ;;  %v18218_v49 = vadd.f32 %v14820_v44, %v22762_v37  ;;  %v22767_v34 = vld [vmem:[#allocation29_spill] sm:$0xff]  ;;  %v14861_v37 = vpop.f32.mrf.mxu1  ;;  %vm18365_vm3 = vmand %vm4962_vm12, %vm4974_vm13  ;;  %vm4976_vm12 = vcmp.lt.s32.totalorder %v18181_v6, 16 }
 0x1e3   : > { %v18158_v40 = vadd.f32 %v14759_v53, %v17806_v48  ;;  %v4735_v4 = vadd.f32 %v4734_v42, %v4582_v16  ;;  %v14826_v48 = vadd.f32 %v18011_v27, %v18006_v47  ;;  %v18187_v16 = vadd.f32 %v14808_v11, %v22754_v21  ;;  %v22766_v21 = vld [vmem:[#allocation31_spill] sm:$0xff]  ;;  %vm18397_vm8 = vmand %vm18365_vm3, %vm4996_vm5 }
 0x1e4   : > { %v15551_v24 = vpop.f32.mrf.mxu0  ;;  %v18196_v53 = vadd.f32 %v14817_v51, %v22757_v46  ;;  %v18199_v42 = vadd.s32 5, %v18096_v13  ;;  %v14832_v11 = vadd.f32 %v18025_v38, %v22759_v61  ;;  %v22763_v51 = vld [vmem:[#allocation15_spill] sm:$0xff]  ;;  %v14838_v17 = vadd.f32 %v18039_v45, %v22766_v21  ;;  %v22768_v46 = vld [vmem:[#allocation28_spill] sm:$0xff]  ;;  %vm5046_vm9 = vmand %vm18365_vm3, %vm5037_vm6 }
 0x1e5   : > { %v4884_v63 = vcombine.high %v4735_v4, %v4735_v4  ;;  %v18221_v38 = vadd.f32 %v14823_v0, %v22763_v51  ;;  %v5074_v24 = vmax.f32 %v4735_v4, 0.0  ;;  %v14841_v44 = vadd.f32 %v18046_v50, %v22767_v34  ;;  %v22775_v34 = vld [vmem:[#allocation32_spill] sm:$0xff] }
 0x1e6   : > { %v4737_v59 = vpop.f32.mrf.mxu0  ;;  %v14844_v0 = vadd.f32 %v18053_v55, %v22768_v46  ;;  %v14847_v50 = vadd.f32 %v18060_v5, %v18055_v19  ;;  %v18261_v19 = vadd.s32 7, %v18096_v13  ;;  %v18267_v46 = vadd.f32 %v14838_v17, %v22775_v34 }
 0x1e7   : > { %v5075_v47 = vmax.f32 %v4884_v63, 0.0  ;;  %v4738_v27 = vadd.f32 %v4737_v59, %v4585_v26  ;;  %v22764_v63 = vld [vmem:[#allocation19_spill] sm:$0xff]  ;;  %v22765_v59 = vld [vmem:[#allocation20_spill] sm:$0xff] }
 0x1e8   : > { %v15552_v39 = vpop.f32.mrf.mxu0  ;;  %v18227_v29 = vadd.f32 %v14826_v48, %v22764_v63  ;;  %v14835_v31 = vadd.f32 %v18032_v52, %v22765_v59  ;;  %v22772_v63 = vld [vmem:[#allocation25_spill] sm:$0xff] }
 0x1e9   : > { %v4885_v54 = vcombine.high %v4738_v27, %v4738_v27  ;;  %v5182_v14 = vcombine.low %v5074_v24, %v5075_v47  ;;  %v5076_v52 = vmax.f32 %v4738_v27, 0.0  ;;  %v22771_v39 = vld [vmem:[#allocation10_spill] sm:$0xff]  ;;  %v18255_v59 = vadd.f32 %v14829_v2, %v22772_v63  ;;  %v22773_v47 = vld [vmem:[#allocation41_spill] sm:$0xff]  ;;  %v22777_v2 = vld [vmem:[#allocation27_spill] sm:$0xff] }
 0x1ea   : > { %v4742_v4 = vpop.f32.mrf.mxu0  ;;  %v14850_v55 = vadd.f32 %v22771_v39, %v18062_v15  ;;  %v18258_v27 = vadd.f32 %v14832_v11, %v22773_v47  ;;  %v22774_v15 = vld [vmem:[#allocation26_spill] sm:$0xff]  ;;  %v22783_v48 = vld [vmem:[#allocation17_spill] sm:$0xff] }
 0x1eb   : > { %v5077_v61 = vmax.f32 %v4885_v54, 0.0  ;;  %v4743_v45 = vadd.f32 %v4742_v4, %v18123_v10  ;;  %v18264_v21 = vadd.f32 %v14835_v31, %v22774_v15  ;;  %v22776_v4 = vld [vmem:[#allocation35_spill] sm:$0xff]  ;;  %v5230_v11 = vsel %vm18241_vm10, %v5182_v14, 0.0  ;;  %v14863_v31 = vpop.f32.mrf.mxu1 }
 0x1ec   : > { %v15555_v51 = vpop.f32.mrf.mxu0  ;;  %v18270_v39 = vadd.f32 %v14841_v44, %v22776_v4  ;;  %v22779_v44 = vld [vmem:[#allocation40_spill] sm:$0xff]  ;;  %v22784_v14 = vld [vmem:[#allocation23_spill] sm:$0xff] }
 0x1ed   : > { %v5183_v10 = vcombine.low %v5076_v52, %v5077_v61  ;;  %v4886_v24 = vcombine.high %v4743_v45, %v4743_v45  ;;  %v5078_v54 = vmax.f32 %v4743_v45, 0.0  ;;  %v18273_v51 = vadd.f32 %v14844_v0, %v22777_v2  ;;  %v22781_v0 = vld [vmem:[#allocation38_spill] sm:$0xff] }
 0x1ee   : > { %v4745_v5 = vpop.f32.mrf.mxu0  ;;  %v18285_v15 = vadd.f32 %v14847_v50, %v22779_v44  ;;  %v18288_v34 = vadd.f32 %v14850_v55, %v22781_v0  ;;  %v14853_v4 = vadd.f32 %v22784_v14, %v22783_v48  ;;  %v14862_v0 = vadd.f32 %v14861_v37, %v18205_v33 }
 0x1ef   : > { %22778 = vst [vmem:[#allocation24_spill] sm:$0xff] %v18273_v51  ;;  %v5231_v52 = vsel %vm18211_vm7, %v5183_v10, 0.0  ;;  %v5232_v61 = vsel %vm5040_vm11, %v5078_v54, 0.0  ;;  %v4746_v45 = vadd.f32 %v4745_v5, %v18133_v41  ;;  %v5079_v26 = vmax.f32 %v4886_v24, 0.0 }
 0x1f0   : > { %v18280_v63 = vpack.c.bf16 %v5231_v52, %v5230_v11  ;;  %v18282_v17 = vpack.c.bf16 %v5232_v61, %v5232_v61  ;;  %v15556_v47 = vpop.f32.mrf.mxu0  ;;  %22780 = vst [vmem:[#allocation37_spill] sm:$0xff] %v18285_v15  ;;  %22782 = vst [vmem:[#allocation36_spill] sm:$0xff] %v18288_v34  ;;  %v14856_v41 = vadd.f32 %v18100_v12, %v18083_v1  ;;  %v14864_v61 = vpop.f32.mrf.mxu1  ;;  %vm4975_vm7 = vcmp.lt.s32.totalorder %v18145_v43, 16 }
 0x1f1   : > { %v4887_v10 = vcombine.high %v4746_v45, %v4746_v45  ;;  %v5080_v54 = vmax.f32 %v4746_v45, 0.0  ;;  %v14859_v11 = vadd.f32 %v18167_v8, %v18129_v35  ;;  %v18318_v34 = vadd.f32 %v14853_v4, %v22787_v36  ;;  %vm18447_vm10 = vmand %vm4963_vm4, %vm4975_vm7 }
 0x1f2   : > { %v5293_v5 = vshll.u32 %v18280_v63, 16  ;;  %v5460_v50 = vrot.slane %v18280_v63, 1  ;;  %v5298_v55 = vshll.u32 %v18282_v17, 16  ;;  %v4750_v2 = vpop.f32.mrf.mxu0  ;;  %v5291_v24 = vshrl.u32 %v18280_v63, 16  ;;  %vm18470_vm13 = vmand %vm18447_vm10, %vm4996_vm5 }
 0x1f3   : > { %v5461_v52 = vrot.slane %v18282_v17, 1  ;;  %v5184_v12 = vcombine.low %v5079_v26, %v5080_v54  ;;  %v5302_v44 = vshrl.u32 %v18282_v17, 16  ;;  %v4751_v35 = vadd.f32 %v4750_v2, %v18142_v62  ;;  %22788 = vst [vmem:[#allocation39_spill] sm:$0xff] %v18318_v34 }
 0x1f4   : > { %v5295_v45 = vrot.slane %v5293_v5, 1  ;;  %v5300_v47 = vrot.slane %v5298_v55, 1  ;;  %v15559_v8 = vpop.f32.mrf.mxu0  ;;  %v5081_v14 = vmax.f32 %v4887_v10, 0.0  ;;  %v14865_v37 = vadd.f32 %v14864_v61, %v14863_v31 }
 0x1f5   : > { %v18315_v48 = vsel %vm626_vm0, %v5460_v50, %v5461_v52  ;;  %v4888_v62 = vcombine.high %v4751_v35, %v4751_v35  ;;  %v5082_v54 = vmax.f32 %v4751_v35, 0.0  ;;  %v18334_v10 = vadd.f32 %v14856_v41, %v18081_v22 }
 0x1f6   : > { %v5296_v15 = vor.u32 %v5295_v45, %v5291_v24  ;;  %v5304_v51 = vor.u32 %v5302_v44, %v5300_v47  ;;  %v4753_v33 = vpop.f32.mrf.mxu0  ;;  %v18337_v5 = vadd.f32 %v14859_v11, %v18094_v60  ;;  %v5233_v22 = vsel %vm18324_vm15, %v5184_v12, 0.0 }
 0x1f7   : > { %v4754_v4 = vadd.f32 %v4753_v33, %v18161_v25  ;;  %22791 = vst [vmem:[#allocation14_spill] sm:$0xff] %v18334_v10  ;;  %v5083_v2 = vmax.f32 %v4888_v62, 0.0  ;;  %v5185_v24 = vcombine.low %v5081_v14, %v5082_v54  ;;  %v18344_v25 = vadd.s32 8, %v18096_v13 }
 0x1f8   : > { %22792 = vst [vmem:[#allocation12_spill] sm:$0xff] %v18337_v5  ;;  %v5301_v50 = vsel %vm445_vm1, %v5296_v15, %v5300_v47  ;;  %v5715_v55 = vcombine.low %v18282_v17, %v5304_v51  ;;  %v15560_v31 = vpop.f32.mrf.mxu0  ;;  %v18351_v51 = vadd.f32 %v14862_v0, %v18119_v28  ;;  %v18372_v8 = vadd.s32 9, %v18096_v13 }
 0x1f9   : > { %v5530_v61 = vcombine.low %v18280_v63, %v5301_v50  ;;  %v5531_v45 = vcombine.high %v18280_v63, %v5301_v50  ;;  %v4889_v44 = vcombine.high %v4754_v4, %v4754_v4  ;;  %v5234_v60 = vsel %vm18307_vm14, %v5185_v24, 0.0  ;;  %vm5049_vm14 = vmand %vm18447_vm10, %vm5037_vm6 }
 0x1fa   : > { %v5235_v15 = vsel %vm5043_vm2, %v5083_v2, 0.0  ;;  %v4758_v41 = vpop.f32.mrf.mxu0  ;;  %22793 = vst [vmem:[#allocation33_spill] sm:$0xff] %v18351_v51  ;;  %v18353_v17 = vpack.c.bf16 %v5234_v60, %v5233_v22  ;;  %v18359_v35 = vrot.slane %v5715_v55, %v18103_v30  ;;  %v5084_v28 = vmax.f32 %v4754_v4, 0.0 }
 0x1fb   : > { %v18355_v11 = vpack.c.bf16 %v5235_v15, %v5235_v15  ;;  %v5085_v63 = vmax.f32 %v4889_v44, 0.0  ;;  %v4759_v47 = vadd.f32 %v4758_v41, %v18170_v9  ;;  %v18375_v9 = vadd.f32 %v14865_v37, %v18158_v40 }
 0x1fc   : > { %v15563_v12 = vpop.f32.mrf.mxu0  ;;  %v5308_v0 = vshll.u32 %v18353_v17, 16  ;;  %v18380_v14 = vrot.slane %v5530_v61, %v18103_v30  ;;  %v18383_v36 = vrot.slane %v5531_v45, %v18103_v30  ;;  %v5463_v26 = vrot.slane %v18353_v17, 1 }
 0x1fd   : > { %22796 = vst [vmem:[#allocation8_spill] sm:$0xff] %v18375_v9  ;;  %v5313_v56 = vshll.u32 %v18355_v11, 16  ;;  %v18387_v62 = vrot.slane %v18355_v11, 1  ;;  %v18390_v54 = vcombine.low %v5461_v52, %v18355_v11  ;;  %v5186_v40 = vcombine.low %v5084_v28, %v5085_v63 }
 0x1fe   : > { %v4761_v33 = vpop.f32.mrf.mxu0  ;;  %v5306_v37 = vshrl.u32 %v18353_v17, 16  ;;  %v5310_v4 = vrot.slane %v5308_v0, 1  ;;  %v4890_v2 = vcombine.high %v4759_v47, %v4759_v47  ;;  %v5317_v24 = vshrl.u32 %v18355_v11, 16 }
 0x1ff   : > { %v5315_v50 = vrot.slane %v5313_v56, 1  ;;  %v18404_v52 = vsel %vm626_vm0, %v5463_v26, %v18387_v62  ;;  %v4762_v31 = vadd.f32 %v4761_v33, %v18173_v57  ;;  %v5532_v45 = vcombine.low %v18315_v48, %v18353_v17 }
 0x200   : > { %v15564_v61 = vpop.f32.mrf.mxu0  ;;  %v5311_v44 = vor.u32 %v5310_v4, %v5306_v37  ;;  %v5086_v22 = vmax.f32 %v4759_v47, 0.0  ;;  %v5087_v60 = vmax.f32 %v4890_v2, 0.0  ;;  %v5533_v15 = vcombine.high %v18315_v48, %v18353_v17 }
 0x201   : > { %v18415_v41 = vor.u32 %v5317_v24, %v5315_v50  ;;  %v5236_v57 = vsel %vm18397_vm8, %v5186_v40, 0.0  ;;  %v5088_v63 = vmax.f32 %v4762_v31, 0.0  ;;  %v5558_v12 = vrot.slane %v5532_v45, %v18103_v30 }
 0x202   : > { %v4766_v28 = vpop.f32.mrf.mxu0  ;;  %v18421_v47 = vsel %vm445_vm1, %v5311_v44, %v5315_v50  ;;  %v5187_v0 = vcombine.low %v5086_v22, %v5087_v60  ;;  %v4891_v56 = vcombine.high %v4762_v31, %v4762_v31  ;;  %v5565_v48 = vrot.slane %v5533_v15, %v18103_v30 }
 0x203   : > { %v4767_v26 = vadd.f32 %v4766_v28, %v18178_v7  ;;  %v5238_v33 = vsel %vm5046_vm9, %v5088_v63, 0.0  ;;  %v5594_v4 = vcombine.low %v18380_v14, %v5558_v12  ;;  %v5595_v7 = vcombine.high %v18380_v14, %v5558_v12 }
 0x204   : > { %v15567_v37 = vpop.f32.mrf.mxu0  ;;  %v5237_v55 = vsel %vm18365_vm3, %v5187_v0, 0.0  ;;  %v18430_v2 = vpack.c.bf16 %v5238_v33, %v5238_v33  ;;  %v5596_v45 = vcombine.low %v18383_v36, %v5565_v48  ;;  %v5597_v44 = vcombine.high %v18383_v36, %v5565_v48 }
 0x205   : > { %v4892_v50 = vcombine.high %v4767_v26, %v4767_v26  ;;  %v5090_v24 = vmax.f32 %v4767_v26, 0.0  ;;  %v18432_v61 = vpack.c.bf16 %v5237_v55, %v5236_v57  ;;  %v5089_v22 = vmax.f32 %v4891_v56, 0.0 }
 0x206   : > { %v4769_v31 = vpop.f32.mrf.mxu0  ;;  %v5328_v60 = vshll.u32 %v18430_v2, 16  ;;  %v18439_v15 = vrot.slane %v18430_v2, 1  ;;  %vm4964_vm11 = vcmp.ge.s32.totalorder %v18181_v6, 0  ;;  %v5332_v63 = vshrl.u32 %v18430_v2, 16 }
 0x207   : > { %v5323_v36 = vshll.u32 %v18432_v61, 16  ;;  %v5466_v28 = vrot.slane %v18432_v61, 1  ;;  %v5188_v56 = vcombine.low %v5089_v22, %v5090_v24  ;;  %v4770_v26 = vadd.f32 %v4769_v31, %v18184_v58  ;;  %vm18511_vm15 = vmand %vm4964_vm11, %vm4976_vm12 }
 0x208   : > { %v15568_v12 = vpop.f32.mrf.mxu0  ;;  %v5330_v0 = vrot.slane %v5328_v60, 1  ;;  %v5770_v43 = vrot.slane %v18439_v15, %v18103_v30  ;;  %v5321_v33 = vshrl.u32 %v18432_v61, 16  ;;  %v5091_v60 = vmax.f32 %v4892_v50, 0.0  ;;  %vm18530_vm4 = vmand %vm18511_vm15, %vm4996_vm5 }
 0x209   : > { %v5325_v37 = vrot.slane %v5323_v36, 1  ;;  %v18464_v48 = vsel %vm626_vm0, %v5466_v28, %v18439_v15  ;;  %v4893_v58 = vcombine.high %v4770_v26, %v4770_v26  ;;  %v5608_v31 = vrot.slane %v5594_v4, %v18103_v30  ;;  %vm5052_vm7 = vmand %vm18511_vm15, %vm5037_vm6 }
 0x20a   : > { %22801 = vst [vmem:[#allocation34_spill] sm:$0xff] %v18464_v48  ;;  %v4774_v12 = vpop.f32.mrf.mxu0  ;;  %v18474_v24 = vor.u32 %v5332_v63, %v5330_v0  ;;  %v5615_v22 = vrot.slane %v5596_v45, %v18103_v30  ;;  %v5092_v28 = vmax.f32 %v4770_v26, 0.0  ;;  %v5622_v50 = vrot.slane %v5595_v7, %v18103_v30 }
 0x20b   : > { %v5326_v36 = vor.u32 %v5325_v37, %v5321_v33  ;;  %v4775_v1 = vadd.f32 %v4774_v12, %v18187_v16  ;;  %v18485_v63 = vrot.slane %v5770_v43, %v18103_v30  ;;  %v5239_v4 = vsel %vm18470_vm13, %v5188_v56, 0.0 }
 0x20c   : > { %v15571_v14 = vpop.f32.mrf.mxu0  ;;  %v5093_v40 = vmax.f32 %v4893_v58, 0.0  ;;  %v5629_v45 = vrot.slane %v5597_v44, %v18103_v30  ;;  %v5189_v37 = vcombine.low %v5091_v60, %v5092_v28  ;;  %v14121_v43 = vcombine.low %v5608_v31, %v5622_v50 }
 0x20d   : > { %22804 = vst [vmem:[#allocation30_spill] sm:$0xff] %v18485_v63  ;;  %v18491_v33 = vsel %vm445_vm1, %v5326_v36, %v5330_v0  ;;  %v4894_v16 = vcombine.high %v4775_v1, %v4775_v1  ;;  %v14123_v63 = vcombine.high %v5608_v31, %v5622_v50  ;;  %v5094_v9 = vmax.f32 %v4775_v1, 0.0 }
 0x20e   : > { %v4777_v14 = vpop.f32.mrf.mxu0  ;;  %v5241_v12 = vsel %vm5049_vm14, %v5093_v40, 0.0  ;;  %v5240_v56 = vsel %vm18447_vm10, %v5189_v37, 0.0  ;;  %v14125_v58 = vcombine.low %v5615_v22, %v5629_v45  ;;  %v14127_v60 = vcombine.high %v5615_v22, %v5629_v45 }
 0x20f   : > { %v4778_v7 = vadd.f32 %v4777_v14, %v18190_v20  ;;  %v18498_v55 = vpack.c.bf16 %v5241_v12, %v5241_v12  ;;  %v5095_v44 = vmax.f32 %v4894_v16, 0.0  ;;  %v18500_v36 = vpack.c.bf16 %v5240_v56, %v5239_v4 }
 0x210   : > { %v15572_v0 = vpop.f32.mrf.mxu0  ;;  %vm4965_vm2 = vcmp.ge.s32.totalorder %v18199_v42, 0  ;;  %vm4977_vm3 = vcmp.lt.s32.totalorder %v18199_v42, 16  ;;  %v7983_v16 = vrot.slane %v14121_v43, %v18103_v30  ;;  %v7997_v14 = vrot.slane %v14123_v63, %v18103_v30 }
 0x211   : > { %22805 = vst [vmem:[#allocation7_spill] sm:$0xff] %v18498_v55  ;;  %v4895_v26 = vcombine.high %v4778_v7, %v4778_v7  ;;  %v5343_v20 = vshll.u32 %v18498_v55, 16  ;;  %v5096_v28 = vmax.f32 %v4778_v7, 0.0  ;;  %v5338_v22 = vshll.u32 %v18500_v36, 16  ;;  %vm18595_vm10 = vmand %vm4965_vm2, %vm4977_vm3 }
 0x212   : > { %v4782_v1 = vpop.f32.mrf.mxu0  ;;  %v5347_v50 = vshrl.u32 %v18498_v55, 16  ;;  %v18518_v4 = vrot.slane %v18498_v55, 1  ;;  %v5190_v45 = vcombine.low %v5094_v9, %v5095_v44  ;;  %v5336_v7 = vshrl.u32 %v18500_v36, 16  ;;  %vm18619_vm11 = vmand %vm18595_vm10, %vm4996_vm5 }
 0x213   : > { %v5345_v37 = vrot.slane %v5343_v20, 1  ;;  %v5097_v6 = vmax.f32 %v4895_v26, 0.0  ;;  %v5340_v56 = vrot.slane %v5338_v22, 1  ;;  %v5469_v0 = vrot.slane %v18500_v36, 1  ;;  %vm18633_vm12 = vmand %vm18595_vm10, %vm5037_vm6 }
 0x214   : > { %22808 = vst [vmem:[#allocation5_spill] sm:$0xff] %v18518_v4  ;;  %v15575_v12 = vpop.f32.mrf.mxu0  ;;  %v8011_v26 = vrot.slane %v14125_v58, %v18103_v30  ;;  %v8025_v63 = vrot.slane %v14127_v60, %v18103_v30  ;;  %v8033_v20 = vcombine.low %v7983_v16, %v7997_v14  ;;  %v8034_v31 = vcombine.high %v7983_v16, %v7997_v14 }
 0x215   : > { %v18535_v44 = vor.u32 %v5347_v50, %v5345_v37  ;;  %v5191_v43 = vcombine.low %v5096_v28, %v5097_v6  ;;  %v5341_v22 = vor.u32 %v5340_v56, %v5336_v7  ;;  %v4783_v40 = vadd.f32 %v4782_v1, %v18193_v32 }
 0x216   : > { %v4785_v12 = vpop.f32.mrf.mxu0  ;;  %v5242_v5 = vsel %vm18530_vm4, %v5190_v45, 0.0  ;;  %v8037_v58 = vcombine.low %v8011_v26, %v8025_v63  ;;  %v8038_v50 = vcombine.high %v8011_v26, %v8025_v63  ;;  %v18550_v6 = vrot.slane %v8033_v20, %v18103_v30  ;;  %v15859_v63 = vld [vmem:[%s22410_s3 + $0xb8] sm:$0xff]  }
 0x217   : > { %22811 = vst [vmem:[#allocation18_spill] sm:$0xff] %v18535_v44  ;;  %v4786_v51 = vadd.f32 %v4785_v12, %v18196_v53  ;;  %v5243_v10 = vsel %vm18511_vm15, %v5191_v43, 0.0  ;;  %v18545_v28 = vsel %vm445_vm1, %v5341_v22, %v5345_v37  ;;  %v18553_v32 = vrot.slane %v8034_v31, %v18103_v30 }
 0x218   : > { %v15576_v13 = vpop.f32.mrf.mxu0  ;;  %v18547_v60 = vpack.c.bf16 %v5243_v10, %v5242_v5  ;;  %22812 = vst [vmem:[#allocation11_spill] sm:$0xff] %v18550_v6  ;;  %v18557_v53 = vsel %vm626_vm0, %v5469_v0, %v18518_v4  ;;  %v18564_v45 = vrot.slane %v8037_v58, %v18103_v30  ;;  %v5966_v5 = vcombine.low %v18498_v55, %v18535_v44 }
 0x219   : > { %22813 = vst [vmem:[#allocation4_spill] sm:$0xff] %v18553_v32  ;;  %22814 = vst [vmem:[#allocation16_spill] sm:$0xff] %v18557_v53  ;;  %v18573_v31 = vrot.slane %v8038_v50, %v18103_v30  ;;  %v4896_v37 = vcombine.high %v4783_v40, %v4783_v40  ;;  %v5098_v16 = vmax.f32 %v4783_v40, 0.0  ;;  %vm4966_vm8 = vcmp.ge.s32.totalorder %v18224_v23, 0 }
 0x21a   : > { %22815 = vst [vmem:[#allocation22_spill] sm:$0xff] %v18564_v45  ;;  %v4790_v10 = vpop.f32.mrf.mxu0  ;;  %v8097_v14 = vcombine.low %v18550_v6, %v18564_v45  ;;  %v5351_v56 = vshrl.u32 %v18547_v60, 16  ;;  %v5353_v57 = vshll.u32 %v18547_v60, 16  ;;  %vm4978_vm9 = vcmp.lt.s32.totalorder %v18224_v23, 16 }
 0x21b   : > { %22816 = vst [vmem:[#allocation6_spill] sm:$0xff] %v18573_v31  ;;  %v8101_v9 = vcombine.low %v18553_v32, %v18573_v31  ;;  %v5244_v26 = vsel %vm5052_vm7, %v5098_v16, 0.0  ;;  %v5472_v40 = vrot.slane %v18547_v60, 1  ;;  %v4897_v43 = vcombine.high %v4786_v51, %v4786_v51  ;;  %vm18674_vm13 = vmand %vm4966_vm8, %vm4978_vm9 }
 0x21c   : > { %v15579_v0 = vpop.f32.mrf.mxu0  ;;  %v18589_v20 = vpack.c.bf16 %v5244_v26, %v5244_v26  ;;  %v5355_v12 = vrot.slane %v5353_v57, 1  ;;  %v5100_v58 = vmax.f32 %v4786_v51, 0.0  ;;  %v4791_v50 = vadd.f32 %v4790_v10, %v18218_v49  ;;  %vm18705_vm14 = vmand %vm18674_vm13, %vm4996_vm5 }
 0x21d   : > { %v15860_v0 = vld [vmem:[%s22410_s3 + $0xf0] sm:$0xff]   ;;  %10641 = vmatprep.mubr.bf16.mxu1 %v8101_v9  ;;  %v5099_v26 = vmax.f32 %v4896_v37, 0.0  ;;  %v5534_v7 = vcombine.low %v18421_v47, %v18404_v52  ;;  %v5535_v42 = vcombine.high %v18421_v47, %v18404_v52  ;;  %v18609_v13 = vrot.slane %v5966_v5, %v18103_v30  ;;  %vm5058_vm3 = vmand %vm18674_vm13, %vm5037_vm6 }
 0x21e   : > { %22817 = vst [vmem:[#allocation15_spill] sm:$0xff] %v18589_v20  ;;  %v4793_v16 = vpop.f32.mrf.mxu0  ;;  %10642 = vmatmul.mubr.bf16.vlgmr.msra.gmra.mxu1 %v8097_v14  ;;  %v5356_v49 = vor.u32 %v5355_v12, %v5351_v56  ;;  %v5358_v51 = vshll.u32 %v18589_v20, 16  ;;  %v18613_v10 = vrot.slane %v18589_v20, 1  ;;  %v5101_v37 = vmax.f32 %v4897_v43, 0.0  ;;  %v15861_v14 = vld [vmem:[%s22410_s3 + $0xb0] sm:$0xff]  }
 0x21f   : > { %v4794_v57 = vadd.f32 %v4793_v16, %v18221_v38  ;;  %v5192_v16 = vcombine.low %v5099_v26, %v5100_v58  ;;  %v4898_v5 = vcombine.high %v4791_v50, %v4791_v50  ;;  %v5102_v1 = vmax.f32 %v4791_v50, 0.0  ;;  %14978 = vmatpush3.bf16.msra.mxu1 %v15859_v63  ;;  %v15862_v50 = vld [vmem:[%s22410_s3 + $0xe8] sm:$0xff]  }
 0x220   : > { %22820 = vst [vmem:[#allocation19_spill] sm:$0xff] %v18613_v10  ;;  %v15580_v9 = vpop.f32.mrf.mxu0  ;;  %v5360_v56 = vrot.slane %v5358_v51, 1  ;;  %v5362_v12 = vshrl.u32 %v18589_v20, 16  ;;  %14979 = vmatprep.subr.bf16.mxu1 %v15860_v0  ;;  %v18642_v26 = vsel %vm626_vm0, %v5472_v40, %v18613_v10  ;;  %v5536_v45 = vcombine.low %v18432_v61, %v18491_v33 }
 0x221   : > { %v4899_v58 = vcombine.high %v4794_v57, %v4794_v57  ;;  %22825 = vst [vmem:[#allocation20_spill] sm:$0xff] %v18642_v26  ;;  %v5103_v51 = vmax.f32 %v4898_v5, 0.0  ;;  %v5193_v9 = vcombine.low %v5101_v37, %v5102_v1  ;;  %v5537_v0 = vcombine.high %v18432_v61, %v18491_v33 }
 0x222   : > { %v4798_v63 = vpop.f32.mrf.mxu0  ;;  %v18647_v6 = vsel %vm445_vm1, %v5356_v49, %v5360_v56  ;;  %v18649_v32 = vor.u32 %v5362_v12, %v5360_v56  ;;  %v5245_v44 = vsel %vm18619_vm11, %v5192_v16, 0.0  ;;  %v5104_v37 = vmax.f32 %v4794_v57, 0.0  ;;  %v15863_v49 = vld [vmem:[%s22410_s3 + $0xa8] sm:$0xff]  }
 0x223   : > { %v5105_v31 = vmax.f32 %v4899_v58, 0.0  ;;  %v5246_v40 = vsel %vm18595_vm10, %v5193_v9, 0.0  ;;  %v5247_v1 = vsel %vm18633_vm12, %v5103_v51, 0.0  ;;  %14980 = vmatpush3.bf16.msra.mxu1 %v15861_v14  ;;  %v5579_v38 = vrot.slane %v5535_v42, %v18103_v30  ;;  %v15864_v58 = vld [vmem:[%s22410_s3 + $0xe0] sm:$0xff]  }
 0x224   : > { %22826 = vst [vmem:[#allocation31_spill] sm:$0xff] %v18649_v32  ;;  %v15583_v34 = vpop.f32.mrf.mxu0  ;;  %v18662_v5 = vpack.c.bf16 %v5246_v40, %v5245_v44  ;;  %v18664_v56 = vpack.c.bf16 %v5247_v1, %v5247_v1  ;;  %14981 = vmatprep.subr.bf16.mxu1 %v15862_v50  ;;  %v18679_v44 = vrot.slane %v5536_v45, %v18103_v30  ;;  %vm4967_vm15 = vcmp.ge.s32.totalorder %v18261_v19, 0 }
 0x225   : > { %v5572_v34 = vrot.slane %v5534_v7, %v18103_v30  ;;  %v18682_v7 = vrot.slane %v5537_v0, %v18103_v30  ;;  %v4799_v42 = vadd.f32 %v4798_v63, %v18227_v29  ;;  %v5194_v23 = vcombine.low %v5104_v37, %v5105_v31  ;;  %v15865_v63 = vld [vmem:[%s22410_s3 + $0xa0] sm:$0xff]  }
 0x226   : > { %22827 = vst [vmem:[#allocation29_spill] sm:$0xff] %v18664_v56  ;;  %v4801_v16 = vpop.f32.mrf.mxu0  ;;  %v5368_v12 = vshll.u32 %v18662_v5, 16  ;;  %v5373_v9 = vshll.u32 %v18664_v56, 16  ;;  %v5366_v45 = vshrl.u32 %v18662_v5, 16  ;;  %v5377_v50 = vshrl.u32 %v18664_v56, 16 }
 0x227   : > { %v5475_v51 = vrot.slane %v18662_v5, 1  ;;  %v18696_v29 = vrot.slane %v18664_v56, 1  ;;  %14982 = vmatpush3.bf16.msra.mxu1 %v15863_v49  ;;  %v5598_v1 = vcombine.low %v5572_v34, %v18679_v44  ;;  %v5599_v37 = vcombine.high %v5572_v34, %v18679_v44 }
 0x228   : > { %v15584_v43 = vpop.f32.mrf.mxu0  ;;  %v5370_v31 = vrot.slane %v5368_v12, 1  ;;  %v5375_v0 = vrot.slane %v5373_v9, 1  ;;  %14983 = vmatprep.subr.bf16.mxu1 %v15864_v58  ;;  %v5600_v12 = vcombine.low %v5579_v38, %v18682_v7  ;;  %v5601_v9 = vcombine.high %v5579_v38, %v18682_v7 }
 0x229   : > { %22830 = vst [vmem:[#allocation28_spill] sm:$0xff] %v18696_v29  ;;  %v4900_v14 = vcombine.high %v4799_v42, %v4799_v42  ;;  %vm4979_vm2 = vcmp.lt.s32.totalorder %v18261_v19, 16  ;;  %v5636_v20 = vrot.slane %v5598_v1, %v18103_v30  ;;  %v5650_v34 = vrot.slane %v5599_v37, %v18103_v30 }
 0x22a   : > { %v4806_v43 = vpop.f32.mrf.mxu0  ;;  %v5371_v22 = vor.u32 %v5370_v31, %v5366_v45  ;;  %v18717_v32 = vor.u32 %v5377_v50, %v5375_v0  ;;  %v5248_v49 = vsel %vm18705_vm14, %v5194_v23, 0.0  ;;  %v5643_v10 = vrot.slane %v5600_v12, %v18103_v30  ;;  %vm18782_vm4 = vmand %vm4967_vm15, %vm4979_vm2 }
 0x22b   : > { %v5657_v38 = vrot.slane %v5601_v9, %v18103_v30  ;;  %v5107_v4 = vmax.f32 %v4900_v14, 0.0  ;;  %14984 = vmatpush3.bf16.msra.mxu1 %v15865_v63  ;;  %v14122_v45 = vcombine.low %v5636_v20, %v5650_v34  ;;  %v14124_v50 = vcombine.high %v5636_v20, %v5650_v34  ;;  %vm18808_vm7 = vmand %vm18782_vm4, %vm4996_vm5 }
 0x22c   : > { %22833 = vst [vmem:[#allocation10_spill] sm:$0xff] %v18717_v32  ;;  %v15587_v58 = vpop.f32.mrf.mxu0  ;;  %v18726_v26 = vsel %vm445_vm1, %v5371_v22, %v5375_v0  ;;  %v5106_v31 = vmax.f32 %v4799_v42, 0.0  ;;  %v6421_v14 = vcombine.low %v18664_v56, %v18717_v32  ;;  %v4802_v9 = vadd.f32 %v4801_v16, %v18255_v59  ;;  %vm18987_vm10 = vmand %vm18782_vm4, %vm5037_vm6 }
 0x22d   : > { %v14126_v40 = vcombine.low %v5643_v10, %v5657_v38  ;;  %v14128_v37 = vcombine.high %v5643_v10, %v5657_v38  ;;  %v7990_v63 = vrot.slane %v14122_v45, %v18103_v30  ;;  %v8004_v22 = vrot.slane %v14124_v50, %v18103_v30 }
 0x22e   : > { %v18728_v55 = vpop.f32.mrf.mxu0  ;;  %v5195_v0 = vcombine.low %v5106_v31, %v5107_v4  ;;  %v4807_v34 = vadd.f32 %v4806_v43, %v18258_v27  ;;  %v22834_v38 = vrot.slane %v18390_v54, %v18103_v30  ;;  %v4901_v59 = vcombine.high %v4802_v9, %v4802_v9 }
 0x22f   : > { %v8018_v42 = vrot.slane %v14126_v40, %v18103_v30  ;;  %v8032_v12 = vrot.slane %v14128_v37, %v18103_v30  ;;  %v8035_v58 = vcombine.low %v7990_v63, %v8004_v22  ;;  %v8036_v23 = vcombine.high %v7990_v63, %v8004_v22 }
 0x230   : > { %v15588_v20 = vpop.f32.mrf.mxu0  ;;  %v5249_v10 = vsel %vm18674_vm13, %v5195_v0, 0.0  ;;  %v18748_v45 = vcombine.low %v18359_v35, %v22834_v38  ;;  %v18760_v27 = vsel %vm626_vm0, %v5475_v51, %v18696_v29  ;;  %v5108_v16 = vmax.f32 %v4802_v9, 0.0 }
 0x231   : > { %v8039_v50 = vcombine.low %v8018_v42, %v8032_v12  ;;  %v8040_v31 = vcombine.high %v8018_v42, %v8032_v12  ;;  %v18752_v40 = vpack.c.bf16 %v5249_v10, %v5248_v49  ;;  %22836 = vst [vmem:[#allocation41_spill] sm:$0xff] %v18760_v27  ;;  %v18763_v54 = vrot.slane %v8035_v58, %v18103_v30 }
 0x232   : > { %v18750_v4 = vpop.f32.mrf.mxu0  ;;  %v18766_v35 = vrot.slane %v8036_v23, %v18103_v30  ;;  %v18769_v49 = vrot.slane %v6421_v14, %v18103_v30  ;;  %v4902_v63 = vcombine.high %v4807_v34, %v4807_v34  ;;  %v5109_v51 = vmax.f32 %v4901_v59, 0.0 }
 0x233   : > { %22835 = vst [vmem:[#allocation25_spill] sm:$0xff] %v18752_v40  ;;  %22837 = vst [vmem:[#allocation26_spill] sm:$0xff] %v18763_v54  ;;  %v18772_v37 = vrot.slane %v8039_v50, %v18103_v30  ;;  %v18775_v57 = vrot.slane %v8040_v31, %v18103_v30  ;;  %v5250_v22 = vsel %vm5058_vm3, %v5108_v16, 0.0  ;;  %v5383_v0 = vshll.u32 %v18752_v40, 16 }
 0x234   : > { %22838 = vst [vmem:[#allocation32_spill] sm:$0xff] %v18766_v35  ;;  %v15591_v43 = vpop.f32.mrf.mxu0  ;;  %22839 = vst [vmem:[#allocation35_spill] sm:$0xff] %v18769_v49  ;;  %v5110_v14 = vmax.f32 %v4807_v34, 0.0  ;;  %v18794_v58 = vpack.c.bf16 %v5250_v22, %v5250_v22  ;;  %v5381_v19 = vshrl.u32 %v18752_v40, 16  ;;  %v5478_v38 = vrot.slane %v18752_v40, 1 }
 0x235   : > { %22840 = vst [vmem:[#allocation27_spill] sm:$0xff] %v18772_v37  ;;  %22841 = vst [vmem:[#allocation40_spill] sm:$0xff] %v18775_v57  ;;  %v8099_v42 = vcombine.low %v18763_v54, %v18772_v37  ;;  %v8103_v9 = vcombine.low %v18766_v35, %v18775_v57  ;;  %v5385_v10 = vrot.slane %v5383_v0, 1  ;;  %v18812_v43 = vmax.f32 %v4902_v63, 0.0 }
 0x236   : > { %v18786_v20 = vpop.f32.mrf.mxu0  ;;  %v18798_v50 = vcombine.low %v5109_v51, %v5110_v14  ;;  %v5388_v31 = vshll.u32 %v18794_v58, 16  ;;  %v18802_v59 = vrot.slane %v18794_v58, 1  ;;  %v5755_v51 = vrot.slane %v18748_v45, %v18103_v30 }
 0x237   : > { %10897 = vmatprep.mubr.bf16.mxu0 %v8103_v9  ;;  %v5386_v22 = vor.u32 %v5385_v10, %v5381_v19  ;;  %v5392_v0 = vshrl.u32 %v18794_v58, 16  ;;  %v5778_v14 = vcombine.low %v18353_v17, %v18421_v47  ;;  %v5779_v9 = vcombine.high %v18353_v17, %v18421_v47 }
 0x238   : > { %v15592_v34 = vpop.f32.mrf.mxu0  ;;  %10898 = vmatmul.mubr.bf16.vlgmr.msra.gmra.mxu0 %v8099_v42  ;;  %v5390_v12 = vrot.slane %v5388_v31, 1  ;;  %v5780_v1 = vcombine.low %v18404_v52, %v18432_v61  ;;  %v5781_v45 = vcombine.high %v18404_v52, %v18432_v61  ;;  %v18831_v42 = vsel %vm626_vm0, %v5478_v38, %v18802_v59 }
 0x239   : > { %22846 = vst [vmem:[#allocation38_spill] sm:$0xff] %v18831_v42  ;;  %v5782_v47 = vcombine.low %v18491_v33, %v18464_v48  ;;  %v5783_v19 = vcombine.high %v18491_v33, %v18464_v48  ;;  %v5792_v52 = vrot.slane %v5778_v14, %v18103_v30  ;;  %v5799_v63 = vrot.slane %v5779_v9, %v18103_v30 }
 0x23a   : > { %v18821_v34 = vpop.f32.mrf.mxu0  ;;  %v18841_v31 = vsel %vm445_vm1, %v5386_v22, %v5390_v12  ;;  %v5806_v61 = vrot.slane %v5780_v1, %v18103_v30  ;;  %v5813_v38 = vrot.slane %v5781_v45, %v18103_v30  ;;  %v22848_v37 = vcombine.low %v18500_v36, %v18545_v28 }
 0x23b   : > { %22847 = vst [vmem:[#allocation17_spill] sm:$0xff] %v18841_v31  ;;  %v5820_v17 = vrot.slane %v5782_v47, %v18103_v30  ;;  %v22849_v33 = vcombine.high %v18500_v36, %v18545_v28  ;;  %v18862_v1 = vor.u32 %v5392_v0, %v5390_v12  ;;  %v5827_v9 = vrot.slane %v5783_v19, %v18103_v30 }
 0x23c   : > { %v15595_v10 = vpop.f32.mrf.mxu0  ;;  %v18852_v54 = vrot.slane %v22848_v37, %v18103_v30  ;;  %v5842_v45 = vcombine.low %v5792_v52, %v5806_v61  ;;  %v5843_v47 = vcombine.high %v5792_v52, %v5806_v61  ;;  %v5845_v35 = vcombine.high %v5799_v63, %v5813_v38 }
 0x23d   : > { %v18858_v22 = vrot.slane %v22849_v33, %v18103_v30  ;;  %v5844_v10 = vcombine.low %v5799_v63, %v5813_v38  ;;  %v5717_v12 = vcombine.low %v18415_v41, %v18387_v62  ;;  %vm4968_vm8 = vcmp.ge.s32.totalorder %v18344_v25, 0 }
 0x23e   : > { %v18860_v14 = vpop.f32.mrf.mxu0  ;;  %v5846_v57 = vcombine.low %v5820_v17, %v18852_v54  ;;  %v5847_v37 = vcombine.high %v5820_v17, %v18852_v54  ;;  %v5856_v33 = vrot.slane %v5842_v45, %v18103_v30  ;;  %v5870_v42 = vrot.slane %v5843_v47, %v18103_v30 }
 0x23f   : > { %22850 = vst [vmem:[#allocation23_spill] sm:$0xff] %v18858_v22  ;;  %v5848_v29 = vcombine.low %v5827_v9, %v18858_v22  ;;  %v5863_v0 = vrot.slane %v5844_v10, %v18103_v30  ;;  %v18874_v19 = vrot.slane %v5845_v35, %v18103_v30  ;;  %v5739_v38 = vrot.slane %v5717_v12, %v18103_v30 }
 0x240   : > { %v15596_v32 = vpop.f32.mrf.mxu0  ;;  %v5884_v63 = vrot.slane %v5846_v57, %v18103_v30  ;;  %v5898_v52 = vrot.slane %v5847_v37, %v18103_v30  ;;  %v14131_v61 = vcombine.low %v5755_v51, %v5856_v33  ;;  %v22852_v45 = vcombine.low %v18430_v2, %v18474_v24 }
 0x241   : > { %v5891_v32 = vrot.slane %v5848_v29, %v18103_v30  ;;  %v5849_v56 = vcombine.high %v5827_v9, %v18858_v22  ;;  %vm4980_vm9 = vcmp.lt.s32.totalorder %v18344_v25, 16  ;;  %vm4969_vm13 = vcmp.ge.s32.totalorder %v18372_v8, 0 }
 0x242   : > { %v18878_v17 = vpop.f32.mrf.mxu0  ;;  %v18886_v47 = vrot.slane %v22852_v45, %v18103_v30  ;;  %v5907_v10 = vcombine.high %v5856_v33, %v5884_v63  ;;  %v5911_v35 = vcombine.high %v5870_v42, %v5898_v52  ;;  %v5910_v57 = vcombine.low %v5870_v42, %v5898_v52  ;;  %vm19030_vm11 = vmand %vm4968_vm8, %vm4980_vm9 }
 0x243   : > { %22851 = vst [vmem:[#allocation9_spill] sm:$0xff] %v18878_v17  ;;  %v5909_v37 = vcombine.high %v5863_v0, %v5891_v32  ;;  %v8168_v40 = vrot.slane %v14131_v61, %v18103_v30  ;;  %v5908_v51 = vcombine.low %v5863_v0, %v5891_v32  ;;  %v18892_v27 = vrot.slane %v5849_v56, %v18103_v30  ;;  %vm19055_vm12 = vmand %vm19030_vm11, %vm4996_vm5 }
 0x244   : > { %v15599_v49 = vpop.f32.mrf.mxu0  ;;  %v5748_v29 = vcombine.low %v5739_v38, %v18886_v47  ;;  %v14133_v31 = vcombine.low %v5870_v42, %v5907_v10  ;;  %v14135_v12 = vcombine.low %v5911_v35, %v5863_v0  ;;  %v14134_v17 = vcombine.high %v5910_v57, %v5884_v63  ;;  %vm5064_vm15 = vmand %vm19030_vm11, %vm5037_vm6 }
 0x245   : > { %v14137_v33 = vcombine.low %v18874_v19, %v5909_v37  ;;  %v14136_v22 = vcombine.high %v5898_v52, %v5908_v51  ;;  %v22853_v49 = vcombine.low %v18355_v11, %v18415_v41  ;;  %v5912_v56 = vcombine.low %v18874_v19, %v18892_v27 }
 0x246   : > { %v18894_v45 = vpop.f32.mrf.mxu0  ;;  %v5762_v9 = vrot.slane %v5748_v29, %v18103_v30  ;;  %v8182_v38 = vrot.slane %v14133_v31, %v18103_v30  ;;  %v8196_v42 = vrot.slane %v14135_v12, %v18103_v30  ;;  %v8189_v0 = vrot.slane %v14134_v17, %v18103_v30 }
 0x247   : > { %v5973_v61 = vrot.slane %v22853_v49, %v18103_v30  ;;  %v8210_v35 = vrot.slane %v14137_v33, %v18103_v30  ;;  %v8203_v52 = vrot.slane %v14136_v22, %v18103_v30  ;;  %v5913_v37 = vcombine.high %v18874_v19, %v18892_v27 }
 0x248   : > { %v15600_v10 = vpop.f32.mrf.mxu0  ;;  %v14132_v57 = vcombine.low %v5762_v9, %v5884_v63  ;;  %v8219_v11 = vcombine.high %v8168_v40, %v8182_v38  ;;  %v14138_v41 = vcombine.high %v5912_v56, %v5891_v32  ;;  %v8218_v29 = vcombine.low %v8168_v40, %v8182_v38 }
 0x249   : > { %v22854_v31 = vcombine.low %v18387_v62, %v18430_v2  ;;  %v8223_v17 = vcombine.high %v8196_v42, %v8210_v35  ;;  %v8222_v33 = vcombine.low %v8196_v42, %v8210_v35  ;;  %v6026_v22 = vcombine.low %v18464_v48, %v18500_v36 }
 0x24a   : > { %v18915_v12 = vpop.f32.mrf.mxu0  ;;  %v8175_v49 = vrot.slane %v14132_v57, %v18103_v30  ;;  %v18921_v63 = vrot.slane %v8219_v11, %v18103_v30  ;;  %v8217_v19 = vrot.slane %v14138_v41, %v18103_v30  ;;  %v18925_v40 = vrot.slane %v8218_v29, %v18103_v30 }
 0x24b   : > { %v5980_v51 = vrot.slane %v22854_v31, %v18103_v30  ;;  %v18928_v2 = vrot.slane %v8223_v17, %v18103_v30  ;;  %v18931_v38 = vrot.slane %v8222_v33, %v18103_v30  ;;  %v6027_v57 = vcombine.high %v18464_v48, %v18500_v36 }
 0x24c   : > { %22855 = vst [vmem:[#allocation42_spill] sm:$0xff] %v18921_v63  ;;  %22856 = vst [vmem:[#allocation43_spill] sm:$0xff] %v18925_v40  ;;  %v15603_v62 = vpop.f32.mrf.mxu0  ;;  %v8221_v9 = vcombine.high %v8175_v49, %v8189_v0  ;;  %v8220_v42 = vcombine.low %v8175_v49, %v8189_v0  ;;  %v8225_v56 = vcombine.high %v8203_v52, %v8217_v19  ;;  %vm4981_vm14 = vcmp.lt.s32.totalorder %v18372_v8, 16 }
 0x24d   : > { %v5995_v32 = vcombine.low %v5973_v61, %v5980_v51  ;;  %22857 = vst [vmem:[#allocation44_spill] sm:$0xff] %v18928_v2  ;;  %22858 = vst [vmem:[#allocation45_spill] sm:$0xff] %v18931_v38  ;;  %v8224_v10 = vcombine.low %v8203_v52, %v8217_v19  ;;  %v8286_v11 = vcombine.low %v18921_v63, %v18928_v2  ;;  %v15868_v2 = vld [vmem:[%s22410_s3 + $0xd0] sm:$0xff]  }
 0x24e   : > { %v18940_v61 = vpop.f32.mrf.mxu0  ;;  %v18945_v41 = vrot.slane %v8221_v9, %v18103_v30  ;;  %v8282_v0 = vcombine.low %v18925_v40, %v18931_v38  ;;  %v18950_v52 = vrot.slane %v8220_v42, %v18103_v30  ;;  %v18953_v36 = vrot.slane %v8225_v56, %v18103_v30  ;;  %vm19148_vm2 = vmand %vm4969_vm13, %vm4981_vm14 }
 0x24f   : > { %v18934_v35 = vrot.slane %v5995_v32, %v18103_v30  ;;  %v18956_v29 = vrot.slane %v8224_v10, %v18103_v30  ;;  %v6038_v31 = vrot.slane %v6026_v22, %v18103_v30  ;;  %v6045_v51 = vrot.slane %v6027_v57, %v18103_v30  ;;  %10649 = vmatprep.mubr.bf16.mxu1 %v8286_v11  ;;  %vm19178_vm3 = vmand %vm19148_vm2, %vm4996_vm5 }
 0x250   : > { %22859 = vst [vmem:[#allocation46_spill] sm:$0xff] %v18945_v41  ;;  %22860 = vst [vmem:[#allocation47_spill] sm:$0xff] %v18950_v52  ;;  %v15604_v17 = vpop.f32.mrf.mxu0  ;;  %v4810_v19 = vadd.f32 %v18728_v55, %v18264_v21  ;;  %v4815_v32 = vadd.f32 %v18750_v4, %v18267_v46  ;;  %v8288_v62 = vcombine.low %v18945_v41, %v18953_v36  ;;  %10650 = vmatmul.mubr.bf16.gmra.mxu1 %v8282_v0  ;;  %v15867_v41 = vld [vmem:[%s22410_s3 + $0x98] sm:$0xff]  }
 0x251   : > { %22861 = vst [vmem:[#allocation48_spill] sm:$0xff] %v18953_v36  ;;  %22862 = vst [vmem:[#allocation49_spill] sm:$0xff] %v18956_v29  ;;  %v14139_v33 = vcombine.low %v5913_v37, %v18934_v35  ;;  %v8284_v22 = vcombine.low %v18950_v52, %v18956_v29  ;;  %v6074_v9 = vcombine.low %v18679_v44, %v6038_v31 }
 0x252   : > { %v6075_v42 = vcombine.high %v18679_v44, %v6038_v31  ;;  %v18973_v56 = vpop.f32.mrf.mxu0  ;;  %v6076_v37 = vcombine.low %v18682_v7, %v6045_v51  ;;  %v6077_v21 = vcombine.high %v18682_v7, %v6045_v51  ;;  %v4903_v55 = vcombine.high %v4810_v19, %v4810_v19  ;;  %10905 = vmatprep.mubr.bf16.mxu0 %v8288_v62 }
 0x253   : > { %v22863_v46 = vcombine.low %v18474_v24, %v18439_v15  ;;  %v6088_v10 = vrot.slane %v6074_v9, %v18103_v30  ;;  %v5112_v7 = vmax.f32 %v4810_v19, 0.0  ;;  %v4904_v11 = vcombine.high %v4815_v32, %v4815_v32  ;;  %10906 = vmatmul.mubr.bf16.gmra.mxu0 %v8284_v22  ;;  %v15866_v19 = vld [vmem:[%s22410_s3 + $0xd8] sm:$0xff]  }
 0x254   : > { %v6102_v57 = vrot.slane %v6075_v42, %v18103_v30  ;;  %v15607_v0 = vpop.f32.mrf.mxu0  ;;  %v18992_v24 = vrot.slane %v6076_v37, %v18103_v30  ;;  %v18995_v31 = vrot.slane %v6077_v21, %v18103_v30  ;;  %v18998_v51 = vrot.slane %v14139_v33, %v18103_v30  ;;  %14985 = vmatprep.subr.bf16.mxu1 %v15866_v19 }
 0x255   : > { %v5987_v4 = vrot.slane %v22863_v46, %v18103_v30  ;;  %v5113_v17 = vmax.f32 %v4903_v55, 0.0  ;;  %v5197_v42 = vcombine.low %v18812_v43, %v5112_v7  ;;  %v5115_v46 = vmax.f32 %v4904_v11, 0.0  ;;  %14986 = vmatpush3.bf16.msra.mxu1 %v15867_v41  ;;  %v22878_v41 = vld [vmem:[#allocation37_spill] sm:$0xff] }
 0x256   : > { %v14141_v62 = vcombine.low %v6088_v10, %v6102_v57  ;;  %v14143_v9 = vcombine.high %v6088_v10, %v6102_v57  ;;  %v19001_v49 = vpop.f32.mrf.mxu0  ;;  %v14145_v22 = vcombine.low %v18992_v24, %v18995_v31  ;;  %v5114_v33 = vmax.f32 %v4815_v32, 0.0  ;;  %14987 = vmatprep.subr.bf16.mxu1 %v15868_v2 }
 0x257   : > { %v5253_v37 = vsel %vm18987_vm10, %v5113_v17, 0.0  ;;  %v5996_v21 = vcombine.low %v5987_v4, %v18609_v13  ;;  %v5252_v10 = vsel %vm18782_vm4, %v5197_v42, 0.0  ;;  %v22866_v32 = vsel %vm18808_vm7, %v18798_v50, 0.0  ;;  %vm19362_vm4 = vmand %vm19148_vm2, %vm5037_vm6 }
 0x258   : > { %v8367_v55 = vrot.slane %v14141_v62, %v18103_v30  ;;  %v8381_v43 = vrot.slane %v14143_v9, %v18103_v30  ;;  %v19015_v57 = vpack.c.bf16 %v5253_v37, %v5253_v37  ;;  %v15608_v7 = vpop.f32.mrf.mxu0  ;;  %v8395_v44 = vrot.slane %v14145_v22, %v18103_v30 }
 0x259   : > { %v19024_v4 = vpack.c.bf16 %v5252_v10, %v22866_v32  ;;  %v6010_v0 = vrot.slane %v5996_v21, %v18103_v30  ;;  %v19037_v9 = vcombine.low %v5114_v33, %v5115_v46  ;;  %v6028_v50 = vcombine.low %v18545_v28, %v18557_v53 }
 0x25a   : > { %v8404_v17 = vcombine.high %v18998_v51, %v8367_v55  ;;  %v5403_v62 = vshll.u32 %v19015_v57, 16  ;;  %v8408_v16 = vcombine.high %v8381_v43, %v8395_v44  ;;  %v5407_v25 = vshrl.u32 %v19015_v57, 16 }
 0x25b   : > { %v5398_v42 = vshll.u32 %v19024_v4, 16  ;;  %v19044_v19 = vrot.slane %v19015_v57, 1  ;;  %v5396_v37 = vshrl.u32 %v19024_v4, 16  ;;  %v5481_v46 = vrot.slane %v19024_v4, 1 }
 0x25c   : > { %v19047_v22 = vrot.slane %v8404_v17, %v18103_v30  ;;  %v5405_v21 = vrot.slane %v5403_v62, 1  ;;  %v19060_v10 = vrot.slane %v8408_v16, %v18103_v30  ;;  %v6011_v17 = vcombine.low %v18934_v35, %v6010_v0 }
 0x25d   : > { %22869 = vst [vmem:[#allocation50_spill] sm:$0xff] %v19044_v19  ;;  %v5400_v7 = vrot.slane %v5398_v42, 1  ;;  %v6029_v11 = vcombine.high %v18545_v28, %v18557_v53  ;;  %v6030_v52 = vcombine.low %v18547_v60, %v18647_v6  ;;  %v6031_v29 = vcombine.high %v18547_v60, %v18647_v6 }
 0x25e   : > { %22870 = vst [vmem:[#allocation51_spill] sm:$0xff] %v19047_v22  ;;  %22873 = vst [vmem:[#allocation52_spill] sm:$0xff] %v19060_v10  ;;  %v19065_v62 = vor.u32 %v5407_v25, %v5405_v21  ;;  %v8471_v16 = vcombine.low %v19047_v22, %v19060_v10  ;;  %v14140_v35 = vcombine.high %v18892_v27, %v6011_v17 }
 0x25f   : > { %v5401_v42 = vor.u32 %v5400_v7, %v5396_v37  ;;  %v6052_v0 = vrot.slane %v6028_v50, %v18103_v30  ;;  %v19085_v25 = vrot.slane %v6030_v52, %v18103_v30  ;;  %v19088_v37 = vrot.slane %v6031_v29, %v18103_v30  ;;  %v22877_v29 = vld [vmem:[#allocation24_spill] sm:$0xff] }
 0x260   : > { %22874 = vst [vmem:[#allocation53_spill] sm:$0xff] %v19065_v62  ;;  %v6869_v28 = vcombine.low %v19015_v57, %v19065_v62  ;;  %10657 = vmatprep.mubr.bf16.mxu1 %v8471_v16  ;;  %v6059_v27 = vrot.slane %v6029_v11, %v18103_v30  ;;  %v8403_v17 = vcombine.low %v18998_v51, %v8367_v55 }
 0x261   : > { %v19091_v7 = vsel %vm445_vm1, %v5401_v42, %v5405_v21  ;;  %v8407_v32 = vcombine.low %v8381_v43, %v8395_v44  ;;  %v6078_v50 = vcombine.low %v6052_v0, %v19085_v25  ;;  %v8360_v21 = vrot.slane %v14140_v35, %v18103_v30 }
 0x262   : > { %v6079_v16 = vcombine.high %v6052_v0, %v19085_v25  ;;  %v6080_v11 = vcombine.low %v6059_v27, %v19088_v37  ;;  %v6081_v51 = vcombine.high %v6059_v27, %v19088_v37  ;;  %v19108_v55 = vrot.slane %v8403_v17, %v18103_v30 }
 0x263   : > { %v6116_v43 = vrot.slane %v6078_v50, %v18103_v30  ;;  %v19112_v44 = vrot.slane %v8407_v32, %v18103_v30  ;;  %v4818_v42 = vadd.f32 %v18786_v20, %v18270_v39  ;;  %v4823_v35 = vadd.f32 %v18821_v34, %v22877_v29 }
 0x264   : > { %22875 = vst [vmem:[#allocation54_spill] sm:$0xff] %v19108_v55  ;;  %v19119_v0 = vrot.slane %v6080_v11, %v18103_v30  ;;  %v6130_v27 = vrot.slane %v6079_v16, %v18103_v30  ;;  %v19123_v17 = vrot.slane %v6081_v51, %v18103_v30  ;;  %v4826_v50 = vadd.f32 %v18860_v14, %v22878_v41 }
 0x265   : > { %22876 = vst [vmem:[#allocation55_spill] sm:$0xff] %v19112_v44  ;;  %v8467_v32 = vcombine.low %v19108_v55, %v19112_v44  ;;  %v4905_v52 = vcombine.high %v4818_v42, %v4818_v42  ;;  %v5116_v36 = vmax.f32 %v4818_v42, 0.0  ;;  %v4906_v39 = vcombine.high %v4823_v35, %v4823_v35 }
 0x266   : > { %v14142_v20 = vcombine.low %v6116_v43, %v6130_v27  ;;  %v14144_v34 = vcombine.high %v6116_v43, %v6130_v27  ;;  %v14146_v29 = vcombine.low %v19119_v0, %v19123_v17  ;;  %v5118_v16 = vmax.f32 %v4823_v35, 0.0 }
 0x267   : > { %10658 = vmatmul.mubr.bf16.gmra.mxu1 %v8467_v32  ;;  %v5117_v11 = vmax.f32 %v4905_v52, 0.0  ;;  %v5119_v14 = vmax.f32 %v4906_v39, 0.0  ;;  %v4907_v51 = vcombine.high %v4826_v50, %v4826_v50  ;;  %v5120_v41 = vmax.f32 %v4826_v50, 0.0 }
 0x268   : > { %v8374_v55 = vrot.slane %v14142_v20, %v18103_v30  ;;  %v8388_v42 = vrot.slane %v14144_v34, %v18103_v30  ;;  %v8402_v44 = vrot.slane %v14146_v29, %v18103_v30  ;;  %v5256_v22 = vsel %vm5064_vm15, %v5118_v16, 0.0 }
 0x269   : > { %v19140_v10 = vsel %vm626_vm0, %v5481_v46, %v19044_v19  ;;  %v5199_v43 = vcombine.low %v5116_v36, %v5117_v11  ;;  %v19142_v27 = vpack.c.bf16 %v5256_v22, %v5256_v22  ;;  %v19152_v35 = vcombine.low %v5119_v14, %v5120_v41 }
 0x26a   : > { %v8406_v50 = vcombine.high %v8360_v21, %v8374_v55  ;;  %v8410_v32 = vcombine.high %v8388_v42, %v8402_v44  ;;  %v8405_v39 = vcombine.low %v8360_v21, %v8374_v55  ;;  %v8409_v20 = vcombine.low %v8388_v42, %v8402_v44  ;;  %v22888_v42 = vld [vmem:[#allocation7_spill] sm:$0xff] }
 0x26b   : > { %v19155_v46 = vrot.slane %v6869_v28, %v18103_v30  ;;  %v5255_v36 = vsel %vm19030_vm11, %v5199_v43, 0.0  ;;  %v5418_v22 = vshll.u32 %v19142_v27, 16  ;;  %v19160_v34 = vmax.f32 %v4907_v51, 0.0 }
 0x26c   : > { %v19163_v8 = vrot.slane %v8406_v50, %v18103_v30  ;;  %v19166_v29 = vrot.slane %v8410_v32, %v18103_v30  ;;  %v19169_v16 = vrot.slane %v8405_v39, %v18103_v30  ;;  %v19172_v21 = vrot.slane %v8409_v20, %v18103_v30 }
 0x26d   : > { %v22887_v28 = vsel %vm19055_vm12, %v19037_v9, 0.0  ;;  %v5420_v44 = vrot.slane %v5418_v22, 1  ;;  %v5422_v11 = vshrl.u32 %v19142_v27, 16  ;;  %v19190_v14 = vrot.slane %v19142_v27, 1  ;;  %v22890_v22 = vld [vmem:[#allocation20_spill] sm:$0xff] }
 0x26e   : > { %22881 = vst [vmem:[#allocation24_spill] sm:$0xff] %v19163_v8  ;;  %22882 = vst [vmem:[#allocation37_spill] sm:$0xff] %v19166_v29  ;;  %v19186_v55 = vpack.c.bf16 %v5255_v36, %v22887_v28  ;;  %v8473_v51 = vcombine.low %v19163_v8, %v19166_v29  ;;  %v8469_v41 = vcombine.low %v19169_v16, %v19172_v21  ;;  %v22894_v8 = vld [vmem:[#allocation5_spill] sm:$0xff]  ;;  %v22895_v29 = vld [vmem:[#allocation18_spill] sm:$0xff] }
 0x26f   : > { %22883 = vst [vmem:[#allocation56_spill] sm:$0xff] %v19169_v16  ;;  %22884 = vst [vmem:[#allocation57_spill] sm:$0xff] %v19172_v21  ;;  %v22889_v33 = vcombine.low %v18439_v15, %v22888_v42  ;;  %v6250_v9 = vcombine.low %v18557_v53, %v18547_v60  ;;  %v6251_v15 = vcombine.high %v18557_v53, %v18547_v60  ;;  %v22893_v21 = vld [vmem:[#allocation23_spill] sm:$0xff] }
 0x270   : > { %v5413_v50 = vshll.u32 %v19186_v55, 16  ;;  %v5484_v32 = vrot.slane %v19186_v55, 1  ;;  %10913 = vmatprep.mubr.bf16.mxu0 %v8473_v51  ;;  %v6252_v28 = vcombine.low %v18647_v6, %v22890_v22  ;;  %v19216_v39 = vor.u32 %v5422_v11, %v5420_v44  ;;  %v22897_v53 = vld [vmem:[#allocation31_spill] sm:$0xff] }
 0x271   : > { %v6204_v43 = vrot.slane %v22889_v33, %v18103_v30  ;;  %v6262_v42 = vrot.slane %v6250_v9, %v18103_v30  ;;  %10914 = vmatmul.mubr.bf16.gmra.mxu0 %v8469_v41  ;;  %v5411_v33 = vshrl.u32 %v19186_v55, 16  ;;  %v6269_v51 = vrot.slane %v6251_v15, %v18103_v30 }
 0x272   : > { %v5415_v16 = vrot.slane %v5413_v50, 1  ;;  %v19220_v20 = vsel %vm626_vm0, %v5484_v32, %v19190_v14  ;;  %v6276_v60 = vrot.slane %v6252_v28, %v18103_v30  ;;  %v14148_v32 = vcombine.high %v18992_v24, %v18995_v31 }
 0x273   : > { %v6219_v36 = vcombine.low %v18886_v47, %v6204_v43  ;;  %22891 = vst [vmem:[#allocation7_spill] sm:$0xff] %v19220_v20  ;;  %v22892_v43 = vcombine.low %v18662_v5, %v18726_v26  ;;  %v6298_v11 = vcombine.low %v18852_v54, %v6262_v42  ;;  %v6299_v50 = vcombine.high %v18852_v54, %v6262_v42 }
 0x274   : > { %v5416_v9 = vor.u32 %v5415_v16, %v5411_v33  ;;  %v6196_v40 = vcombine.low %v22895_v29, %v22894_v8  ;;  %v8538_v54 = vrot.slane %v14148_v32, %v18103_v30  ;;  %v22896_v29 = vld [vmem:[#allocation15_spill] sm:$0xff] }
 0x275   : > { %v6227_v47 = vrot.slane %v6219_v36, %v18103_v30  ;;  %v19229_v41 = vrot.slane %v22892_v43, %v18103_v30  ;;  %v6300_v36 = vcombine.low %v22893_v21, %v6269_v51  ;;  %v6312_v16 = vrot.slane %v6298_v11, %v18103_v30 }
 0x276   : > { %v19241_v43 = vsel %vm445_vm1, %v5416_v9, %v5420_v44  ;;  %v6326_v33 = vrot.slane %v6299_v50, %v18103_v30  ;;  %v22898_v44 = vcombine.low %v22896_v29, %v22897_v53  ;;  %v6253_v11 = vcombine.high %v18647_v6, %v22890_v22 }
 0x277   : > { %v6302_v15 = vcombine.low %v6276_v60, %v19229_v41  ;;  %v6303_v28 = vcombine.high %v6276_v60, %v19229_v41  ;;  %v6319_v24 = vrot.slane %v6300_v36, %v18103_v30  ;;  %v6211_v60 = vrot.slane %v6196_v40, %v18103_v30 }
 0x278   : > { %v14150_v38 = vcombine.low %v6227_v47, %v6312_v16  ;;  %v19254_v9 = vrot.slane %v22898_v44, %v18103_v30  ;;  %v22899_v50 = vcombine.high %v18662_v5, %v18726_v26  ;;  %v14149_v40 = vcombine.high %v19119_v0, %v19123_v17 }
 0x279   : > { %v6340_v31 = vrot.slane %v6302_v15, %v18103_v30  ;;  %v6354_v42 = vrot.slane %v6303_v28, %v18103_v30  ;;  %v6283_v63 = vrot.slane %v6253_v11, %v18103_v30  ;;  %v6301_v6 = vcombine.high %v22893_v21, %v6269_v51 }
 0x27a   : > { %v19262_v32 = vrot.slane %v22899_v50, %v18103_v30  ;;  %v8552_v47 = vrot.slane %v14150_v38, %v18103_v30  ;;  %v6220_v44 = vcombine.low %v6211_v60, %v19254_v9  ;;  %v8545_v0 = vrot.slane %v14149_v40, %v18103_v30 }
 0x27b   : > { %v6363_v36 = vcombine.high %v6312_v16, %v6340_v31  ;;  %v6367_v15 = vcombine.high %v6326_v33, %v6354_v42  ;;  %v6366_v28 = vcombine.low %v6326_v33, %v6354_v42  ;;  %v15869_v16 = vld [vmem:[%s22410_s3 + $0x90] sm:$0xff]   ;;  %v19293_v40 = vrot.slane %v6301_v6, %v18103_v30 }
 0x27c   : > { %v8589_v38 = vcombine.high %v8538_v54, %v8552_v47  ;;  %v6234_v17 = vrot.slane %v6220_v44, %v18103_v30  ;;  %v6304_v60 = vcombine.low %v6283_v63, %v19262_v32  ;;  %v8588_v11 = vcombine.low %v8538_v54, %v8552_v47  ;;  %14988 = vmatpush3.bf16.msra.mxu1 %v15869_v16 }
 0x27d   : > { %v14152_v50 = vcombine.low %v6326_v33, %v6363_v36  ;;  %v14154_v48 = vcombine.low %v6367_v15, %v6319_v24  ;;  %v14153_v20 = vcombine.high %v6366_v28, %v6340_v31  ;;  %v6305_v19 = vcombine.high %v6283_v63, %v19262_v32  ;;  %v15870_v63 = vld [vmem:[%s22410_s3 + $0x238] sm:$0xff]  }
 0x27e   : > { %v19284_v33 = vrot.slane %v8589_v38, %v18103_v30  ;;  %v19287_v36 = vrot.slane %v6304_v60, %v18103_v30  ;;  %v14151_v15 = vcombine.low %v6234_v17, %v6340_v31  ;;  %v19290_v28 = vrot.slane %v8588_v11, %v18103_v30  ;;  %15609 = vmatprep.subr.bf16.mxu0 %v15870_v63 }
 0x27f   : > { %v8566_v21 = vrot.slane %v14152_v50, %v18103_v30  ;;  %v8580_v51 = vrot.slane %v14154_v48, %v18103_v30  ;;  %v8573_v62 = vrot.slane %v14153_v20, %v18103_v30  ;;  %v19296_v48 = vrot.slane %v6305_v19, %v18103_v30  ;;  %15610 = vmatpush3.bf16.msra.mxu0 %v15870_v63 }
 0x280   : > { %22900 = vst [vmem:[#allocation23_spill] sm:$0xff] %v19284_v33  ;;  %22901 = vst [vmem:[#allocation18_spill] sm:$0xff] %v19290_v28  ;;  %v6364_v20 = vcombine.low %v6319_v24, %v19287_v36  ;;  %v8559_v47 = vrot.slane %v14151_v15, %v18103_v30  ;;  %v6365_v31 = vcombine.high %v6319_v24, %v19287_v36 }
 0x281   : > { %v8593_v2 = vcombine.high %v8566_v21, %v8580_v51  ;;  %v8592_v54 = vcombine.low %v8566_v21, %v8580_v51  ;;  %v22902_v44 = vcombine.low %v22894_v8, %v22896_v29  ;;  %v6369_v50 = vcombine.high %v19293_v40, %v19296_v48 }
 0x282   : > { %v6474_v38 = vcombine.low %v22890_v22, %v18662_v5  ;;  %v14155_v17 = vcombine.high %v6354_v42, %v6364_v20  ;;  %v8591_v24 = vcombine.high %v8545_v0, %v8559_v47  ;;  %v8590_v60 = vcombine.low %v8545_v0, %v8559_v47  ;;  %v22907_v47 = vld [vmem:[#allocation36_spill] sm:$0xff] }
 0x283   : > { %v6428_v16 = vrot.slane %v22902_v44, %v18103_v30  ;;  %v19309_v6 = vrot.slane %v8593_v2, %v18103_v30  ;;  %v19312_v19 = vrot.slane %v8592_v54, %v18103_v30  ;;  %v14157_v15 = vcombine.low %v19293_v40, %v6365_v31  ;;  %v22908_v31 = vld [vmem:[#allocation9_spill] sm:$0xff] }
 0x284   : > { %v6486_v51 = vrot.slane %v6474_v38, %v18103_v30  ;;  %v8587_v2 = vrot.slane %v14155_v17, %v18103_v30  ;;  %v19327_v54 = vrot.slane %v8591_v24, %v18103_v30  ;;  %v19330_v42 = vrot.slane %v8590_v60, %v18103_v30  ;;  %v22909_v24 = vld [vmem:[#allocation39_spill] sm:$0xff] }
 0x285   : > { %22903 = vst [vmem:[#allocation15_spill] sm:$0xff] %v19309_v6  ;;  %22904 = vst [vmem:[#allocation31_spill] sm:$0xff] %v19312_v19  ;;  %v6443_v11 = vcombine.low %v18609_v13, %v6428_v16  ;;  %v8656_v29 = vcombine.low %v19284_v33, %v19309_v6  ;;  %v8652_v21 = vcombine.low %v19290_v28, %v19312_v19  ;;  %v22924_v33 = vld [vmem:[#allocation25_spill] sm:$0xff] }
 0x286   : > { %22905 = vst [vmem:[#allocation58_spill] sm:$0xff] %v19327_v54  ;;  %22906 = vst [vmem:[#allocation59_spill] sm:$0xff] %v19330_v42  ;;  %v6522_v0 = vcombine.low %v19085_v25, %v6486_v51  ;;  %v6523_v63 = vcombine.high %v19085_v25, %v6486_v51  ;;  %v19338_v20 = vrot.slane %v14157_v15, %v18103_v30 }
 0x287   : > { %v19333_v13 = vrot.slane %v6443_v11, %v18103_v30  ;;  %10665 = vmatprep.mubr.bf16.mxu1 %v8656_v29  ;;  %v4831_v44 = vadd.f32 %v22908_v31, %v22907_v47  ;;  %v8595_v16 = vcombine.high %v8573_v62, %v8587_v2  ;;  %v8594_v38 = vcombine.low %v8573_v62, %v8587_v2 }
 0x288   : > { %10666 = vmatmul.mubr.bf16.gmra.mxu1 %v8652_v21  ;;  %v19345_v60 = vadd.f32 %v18894_v45, %v22909_v24  ;;  %v6536_v11 = vrot.slane %v6522_v0, %v18103_v30  ;;  %v6550_v29 = vrot.slane %v6523_v63, %v18103_v30  ;;  %v15871_v24 = vld [vmem:[%s22410_s3 + $0x230] sm:$0xff]   ;;  %v6368_v52 = vcombine.low %v19293_v40, %v19296_v48 }
 0x289   : > { %v14159_v17 = vcombine.low %v6369_v50, %v19333_v13  ;;  %v4908_v25 = vcombine.high %v4831_v44, %v4831_v44  ;;  %v5122_v51 = vmax.f32 %v4831_v44, 0.0  ;;  %v19350_v15 = vrot.slane %v8595_v16, %v18103_v30  ;;  %15611 = vmatprep.subr.bf16.mxu0 %v15871_v24 }
 0x28a   : > { %v19353_v47 = vrot.slane %v8594_v38, %v18103_v30  ;;  %v4909_v50 = vcombine.high %v19345_v60, %v19345_v60  ;;  %v14161_v21 = vcombine.low %v6536_v11, %v6550_v29  ;;  %v14163_v2 = vcombine.high %v6536_v11, %v6550_v29  ;;  %v22914_v38 = vld [vmem:[#allocation13_spill] sm:$0xff]  ;;  %v15872_v11 = vld [vmem:[%s22410_s3 + $0xc8] sm:$0xff]   ;;  %15612 = vmatpush3.bf16.msra.mxu0 %v15871_v24 }
 0x28b   : > { %22910 = vst [vmem:[#allocation36_spill] sm:$0xff] %v19350_v15  ;;  %v19356_v62 = vrot.slane %v14159_v17, %v18103_v30  ;;  %v5123_v0 = vmax.f32 %v4908_v25, 0.0  ;;  %v5201_v63 = vcombine.low %v19160_v34, %v5122_v51  ;;  %v8658_v31 = vcombine.low %v19327_v54, %v19350_v15  ;;  %v15873_v34 = vld [vmem:[%s22410_s3 + $0x88] sm:$0xff]   ;;  %14989 = vmatprep.subr.bf16.mxu1 %v15872_v11 }
 0x28c   : > { %22911 = vst [vmem:[#allocation9_spill] sm:$0xff] %v19353_v47  ;;  %v8654_v44 = vcombine.low %v19330_v42, %v19353_v47  ;;  %v4958_v17 = vadd.s32 10, %v22914_v38  ;;  %v19386_v29 = vrot.slane %v14161_v21, %v18103_v30  ;;  %v19389_v25 = vrot.slane %v14163_v2, %v18103_v30  ;;  %v15874_v47 = vld [vmem:[%s22410_s3 + $0x228] sm:$0xff]   ;;  %14990 = vmatpush3.bf16.msra.mxu1 %v15873_v34 }
 0x28d   : > { %v8774_v16 = vcombine.high %v19338_v20, %v19356_v62  ;;  %v5258_v51 = vsel %vm19148_vm2, %v5201_v63, 0.0  ;;  %v5259_v42 = vsel %vm19362_vm4, %v5123_v0, 0.0  ;;  %10921 = vmatprep.mubr.bf16.mxu0 %v8658_v31  ;;  %v22915_v21 = vsel %vm19178_vm3, %v19152_v35, 0.0  ;;  %15613 = vmatprep.subr.bf16.mxu0 %v15874_v47 }
 0x28e   : > { %v19404_v2 = vpack.c.bf16 %v5258_v51, %v22915_v21  ;;  %v19406_v15 = vpack.c.bf16 %v5259_v42, %v5259_v42  ;;  %10922 = vmatmul.mubr.bf16.gmra.mxu0 %v8654_v44  ;;  %v8778_v45 = vcombine.high %v19386_v29, %v19389_v25  ;;  %vm4970_vm7 = vcmp.ge.s32.totalorder %v4958_v17, 0 }
 0x28f   : > { %v19413_v0 = vrot.slane %v8774_v16, %v18103_v30  ;;  %vm4982_vm8 = vcmp.lt.s32.totalorder %v4958_v17, 16  ;;  %v5124_v42 = vmax.f32 %v19345_v60, 0.0  ;;  %v5125_v16 = vmax.f32 %v4909_v50, 0.0  ;;  %v15875_v60 = vld [vmem:[%s22410_s3 + $0x220] sm:$0xff]   ;;  %v22918_v50 = vld [vmem:[#allocation19_spill] sm:$0xff]  ;;  %15614 = vmatpush3.bf16.msra.mxu0 %v15874_v47 }
 0x290   : > { %v5428_v23 = vshll.u32 %v19404_v2, 16  ;;  %v5433_v35 = vshll.u32 %v19406_v15, 16  ;;  %v19419_v63 = vrot.slane %v8778_v45, %v18103_v30  ;;  %v5426_v31 = vshrl.u32 %v19404_v2, 16  ;;  %vm19446_vm9 = vmand %vm4970_vm7, %vm4982_vm8  ;;  %15615 = vmatprep.subr.bf16.mxu0 %v15875_v60 }
 0x291   : > { %22916 = vst [vmem:[#allocation39_spill] sm:$0xff] %v19413_v0  ;;  %v5437_v44 = vshrl.u32 %v19406_v15, 16  ;;  %v5487_v21 = vrot.slane %v19404_v2, 1  ;;  %v19432_v34 = vrot.slane %v19406_v15, 1  ;;  %v22919_v45 = vcombine.low %v22897_v53, %v22918_v50  ;;  %vm19479_vm10 = vmand %vm19446_vm9, %vm4996_vm5 }
 0x292   : > { %22917 = vst [vmem:[#allocation13_spill] sm:$0xff] %v19419_v63  ;;  %v5430_v51 = vrot.slane %v5428_v23, 1  ;;  %v5435_v11 = vrot.slane %v5433_v35, 1  ;;  %v8841_v24 = vcombine.low %v19413_v0, %v19419_v63  ;;  %v22920_v35 = vld [vmem:[#allocation41_spill] sm:$0xff]  ;;  %v19452_v53 = vcombine.low %v5124_v42, %v5125_v16  ;;  %vm5070_vm11 = vmand %vm19446_vm9, %vm5037_vm6 }
 0x293   : > { %v6435_v23 = vrot.slane %v22919_v45, %v18103_v30  ;;  %v6476_v54 = vcombine.low %v18726_v26, %v22920_v35  ;;  %v22923_v63 = vld [vmem:[#allocation17_spill] sm:$0xff]  ;;  %v22925_v45 = vld [vmem:[#allocation35_spill] sm:$0xff]  ;;  %v8777_v47 = vcombine.low %v19386_v29, %v19389_v25  ;;  %v19469_v42 = vsel %vm626_vm0, %v5487_v21, %v19432_v34  ;;  %15616 = vmatpush3.bf16.msra.mxu0 %v15875_v60 }
 0x294   : > { %v5431_v28 = vor.u32 %v5430_v51, %v5426_v31  ;;  %v19440_v40 = vor.u32 %v5437_v44, %v5435_v11  ;;  %v6478_v6 = vcombine.low %v22924_v33, %v22923_v63  ;;  %10673 = vmatprep.mubr.bf16.mxu1 %v8841_v24  ;;  %v14158_v44 = vcombine.high %v6368_v52, %v19287_v36  ;;  %v22931_v24 = vld [vmem:[#allocation12_spill] sm:$0xff] }
 0x295   : > { %v6444_v31 = vcombine.low %v6435_v23, %v22925_v45  ;;  %v8773_v51 = vcombine.low %v19338_v20, %v19356_v62  ;;  %v6500_v19 = vrot.slane %v6476_v54, %v18103_v30  ;;  %v19493_v16 = vrot.slane %v8777_v47, %v18103_v30 }
 0x296   : > { %v19459_v17 = vsel %vm445_vm1, %v5431_v28, %v5435_v11  ;;  %v19463_v8 = vrot.slane %v6478_v6, %v18103_v30  ;;  %v7317_v20 = vcombine.low %v19406_v15, %v19440_v40  ;;  %v22930_v11 = vld [vmem:[#allocation14_spill] sm:$0xff]  ;;  %v4842_v23 = vadd.f32 %v18940_v61, %v22931_v24 }
 0x297   : > { %v6458_v54 = vrot.slane %v6444_v31, %v18103_v30  ;;  %v19489_v25 = vrot.slane %v8773_v51, %v18103_v30  ;;  %22929 = vst [vmem:[#allocation25_spill] sm:$0xff] %v19493_v16  ;;  %v4839_v21 = vadd.f32 %v18915_v12, %v22930_v11  ;;  %v5260_v31 = vsel %vm19479_vm10, %v19452_v53, 0.0  ;;  %v22932_v12 = vld [vmem:[#allocation33_spill] sm:$0xff] }
 0x298   : > { %v6526_v62 = vcombine.low %v6500_v19, %v19463_v8  ;;  %v6527_v29 = vcombine.high %v6500_v19, %v19463_v8  ;;  %v8730_v60 = vrot.slane %v14158_v44, %v18103_v30  ;;  %v4847_v61 = vadd.f32 %v18973_v56, %v22932_v12  ;;  %v15876_v56 = vld [vmem:[%s22410_s3 + $0x218] sm:$0xff]  }
 0x299   : > { %22928 = vst [vmem:[#allocation17_spill] sm:$0xff] %v19489_v25  ;;  %v6459_v52 = vcombine.low %v19333_v13, %v6458_v54  ;;  %v8837_v47 = vcombine.low %v19489_v25, %v19493_v16  ;;  %v4910_v54 = vcombine.high %v4839_v21, %v4839_v21  ;;  %v19515_v44 = vrot.slane %v7317_v20, %v18103_v30 }
 0x29a   : > { %v6564_v19 = vrot.slane %v6526_v62, %v18103_v30  ;;  %v6578_v51 = vrot.slane %v6527_v29, %v18103_v30  ;;  %v4911_v62 = vcombine.high %v4842_v23, %v4842_v23  ;;  %v5128_v29 = vmax.f32 %v4842_v23, 0.0  ;;  %15617 = vmatprep.subr.bf16.mxu0 %v15876_v56 }
 0x29b   : > { %v14160_v13 = vcombine.high %v19296_v48, %v6459_v52  ;;  %10674 = vmatmul.mubr.bf16.gmra.mxu1 %v8837_v47  ;;  %v5126_v52 = vmax.f32 %v4839_v21, 0.0  ;;  %v5127_v11 = vmax.f32 %v4910_v54, 0.0  ;;  %v19521_v25 = vadd.s32 11, %v22914_v38  ;;  %15618 = vmatpush3.bf16.msra.mxu0 %v15876_v56 }
 0x29c   : > { %v14162_v53 = vcombine.low %v6564_v19, %v6578_v51  ;;  %v14164_v6 = vcombine.high %v6564_v19, %v6578_v51  ;;  %v5262_v36 = vsel %vm5070_vm11, %v5128_v29, 0.0  ;;  %v5129_v47 = vmax.f32 %v4911_v62, 0.0 }
 0x29d   : > { %v8744_v48 = vrot.slane %v14160_v13, %v18103_v30  ;;  %v5203_v19 = vcombine.low %v5126_v52, %v5127_v11  ;;  %v19526_v51 = vpack.c.bf16 %v5262_v36, %v5262_v36  ;;  %v4912_v54 = vcombine.high %v4847_v61, %v4847_v61 }
 0x29e   : > { %v8758_v24 = vrot.slane %v14162_v53, %v18103_v30  ;;  %v8772_v28 = vrot.slane %v14164_v6, %v18103_v30  ;;  %v5130_v6 = vmax.f32 %v4847_v61, 0.0  ;;  %v22942_v61 = vld [vmem:[#allocation38_spill] sm:$0xff]  ;;  %vm4971_vm12 = vcmp.ge.s32.totalorder %v19521_v25, 0 }
 0x29f   : > { %v8776_v23 = vcombine.high %v8730_v60, %v8744_v48  ;;  %v8775_v20 = vcombine.low %v8730_v60, %v8744_v48  ;;  %22933 = vst [vmem:[#allocation35_spill] sm:$0xff] %v19526_v51  ;;  %v5261_v38 = vsel %vm19446_vm9, %v5203_v19, 0.0  ;;  %v5498_v53 = vshll.u32 %v19526_v51, 16 }
 0x2a0   : > { %v8780_v13 = vcombine.high %v8758_v24, %v8772_v28  ;;  %v8779_v21 = vcombine.low %v8758_v24, %v8772_v28  ;;  %v19543_v62 = vpack.c.bf16 %v5261_v38, %v5260_v31  ;;  %v5502_v48 = vshrl.u32 %v19526_v51, 16  ;;  %v15879_v38 = vld [vmem:[%s22410_s3 + $0x210] sm:$0xff]  }
 0x2a1   : > { %v19529_v12 = vrot.slane %v8776_v23, %v18103_v30  ;;  %v19538_v36 = vrot.slane %v8775_v20, %v18103_v30  ;;  %v5500_v29 = vrot.slane %v5498_v53, 1  ;;  %v19547_v0 = vrot.slane %v19526_v51, 1  ;;  %15619 = vmatprep.subr.bf16.mxu0 %v15879_v38 }
 0x2a2   : > { %v19535_v60 = vrot.slane %v8780_v13, %v18103_v30  ;;  %v19541_v28 = vrot.slane %v8779_v21, %v18103_v30  ;;  %v5491_v24 = vshrl.u32 %v19543_v62, 16  ;;  %v5493_v31 = vshll.u32 %v19543_v62, 16  ;;  %v15877_v13 = vld [vmem:[%s22410_s3 + $0xc0] sm:$0xff]   ;;  %15620 = vmatpush3.bf16.msra.mxu0 %v15879_v38 }
 0x2a3   : > { %22934 = vst [vmem:[#allocation14_spill] sm:$0xff] %v19529_v12  ;;  %22936 = vst [vmem:[#allocation33_spill] sm:$0xff] %v19538_v36  ;;  %v19557_v56 = vor.u32 %v5502_v48, %v5500_v29  ;;  %v5507_v23 = vrot.slane %v19543_v62, 1  ;;  %v19560_v20 = vcombine.low %v5129_v47, %v5130_v6  ;;  %v6475_v19 = vcombine.high %v22890_v22, %v18662_v5  ;;  %v15878_v21 = vld [vmem:[%s22410_s3 + $0x80] sm:$0xff]   ;;  %v22940_v47 = vld [vmem:[#allocation29_spill] sm:$0xff] }
 0x2a4   : > { %22935 = vst [vmem:[#allocation12_spill] sm:$0xff] %v19535_v60  ;;  %22937 = vst [vmem:[#allocation60_spill] sm:$0xff] %v19541_v28  ;;  %v8843_v52 = vcombine.low %v19529_v12, %v19535_v60  ;;  %v8839_v11 = vcombine.low %v19538_v36, %v19541_v28  ;;  %v5495_v53 = vrot.slane %v5493_v31, 1  ;;  %v22941_v6 = vcombine.low %v22918_v50, %v22940_v47  ;;  %v15880_v47 = vld [vmem:[%s22410_s3 + $0x208] sm:$0xff]   ;;  %v22945_v38 = vld [vmem:[#allocation10_spill] sm:$0xff] }
 0x2a5   : > { %22938 = vst [vmem:[#allocation61_spill] sm:$0xff] %v19547_v0  ;;  %22939 = vst [vmem:[#allocation62_spill] sm:$0xff] %v19557_v56  ;;  %v6698_v5 = vcombine.low %v22920_v35, %v22924_v33  ;;  %v6700_v36 = vcombine.low %v22923_v63, %v22942_v61  ;;  %v19583_v28 = vsel %vm626_vm0, %v5507_v23, %v19547_v0  ;;  %v19587_v31 = vmax.f32 %v4912_v54, 0.0 }
 0x2a6   : > { %10929 = vmatprep.mubr.bf16.mxu0 %v8843_v52  ;;  %v6652_v48 = vrot.slane %v22941_v6, %v18103_v30  ;;  %v6493_v12 = vrot.slane %v6475_v19, %v18103_v30  ;;  %14991 = vmatprep.subr.bf16.mxu1 %v15877_v13  ;;  %v5496_v6 = vor.u32 %v5495_v53, %v5491_v24  ;;  %vm4983_vm13 = vcmp.lt.s32.totalorder %v19521_v25, 16 }
 0x2a7   : > { %10930 = vmatmul.mubr.bf16.gmra.mxu0 %v8839_v11  ;;  %v6710_v11 = vrot.slane %v6698_v5, %v18103_v30  ;;  %v6724_v23 = vrot.slane %v6700_v36, %v18103_v30  ;;  %14992 = vmatpush3.bf16.msra.mxu1 %v15878_v21  ;;  %v22943_v19 = vcombine.low %v19024_v4, %v19091_v7  ;;  %vm19719_vm14 = vmand %vm4971_vm12, %vm4983_vm13 }
 0x2a8   : > { %v6667_v60 = vcombine.low %v19254_v9, %v6652_v48  ;;  %v6524_v16 = vcombine.low %v19088_v37, %v6493_v12  ;;  %v6525_v54 = vcombine.high %v19088_v37, %v6493_v12  ;;  %v6477_v24 = vcombine.high %v18726_v26, %v22920_v35  ;;  %v15882_v9 = vld [vmem:[%s22410_s3 + $0x1f8] sm:$0xff]   ;;  %15621 = vmatprep.subr.bf16.mxu0 %v15880_v47  ;;  %vm19750_vm15 = vmand %vm19719_vm14, %vm4996_vm5 }
 0x2a9   : > { %v19602_v13 = vrot.slane %v22943_v19, %v18103_v30  ;;  %v19610_v36 = vsel %vm445_vm1, %v5496_v6, %v5500_v29  ;;  %v6746_v37 = vcombine.low %v19229_v41, %v6710_v11  ;;  %v6747_v12 = vcombine.high %v19229_v41, %v6710_v11  ;;  %v15881_v29 = vld [vmem:[%s22410_s3 + $0x200] sm:$0xff]   ;;  %15153 = vmatprep.subr.bf16.mxu1 %v15882_v9  ;;  %vm5073_vm5 = vmand %vm19719_vm14, %vm5037_vm6 }
 0x2aa   : > { %v6675_v21 = vrot.slane %v6667_v60, %v18103_v30  ;;  %v6543_v53 = vrot.slane %v6524_v16, %v18103_v30  ;;  %v6557_v48 = vrot.slane %v6525_v54, %v18103_v30  ;;  %v6479_v5 = vcombine.high %v22924_v33, %v22923_v63  ;;  %v22944_v16 = vld [vmem:[#allocation28_spill] sm:$0xff]  ;;  %15622 = vmatpush3.bf16.msra.mxu0 %v15880_v47 }
 0x2ab   : > { %v6750_v26 = vcombine.low %v6724_v23, %v19602_v13  ;;  %v6760_v60 = vrot.slane %v6746_v37, %v18103_v30  ;;  %v19625_v6 = vrot.slane %v6747_v12, %v18103_v30  ;;  %v6507_v41 = vrot.slane %v6477_v24, %v18103_v30  ;;  %15623 = vmatprep.subr.bf16.mxu0 %v15881_v29 }
 0x2ac   : > { %v6644_v11 = vcombine.low %v22945_v38, %v22944_v16  ;;  %v14166_v19 = vcombine.low %v6543_v53, %v6557_v48  ;;  %v14168_v52 = vcombine.high %v6543_v53, %v6557_v48  ;;  %v19632_v50 = vrot.slane %v6479_v5, %v18103_v30 }
 0x2ad   : > { %v6788_v54 = vrot.slane %v6750_v26, %v18103_v30  ;;  %v14170_v22 = vcombine.low %v6675_v21, %v6760_v60  ;;  %v22946_v37 = vcombine.low %v18794_v58, %v18862_v1  ;;  %v6751_v24 = vcombine.high %v6724_v23, %v19602_v13 }
 0x2ae   : > { %v6659_v0 = vrot.slane %v6644_v11, %v18103_v30  ;;  %v8908_v26 = vrot.slane %v14166_v19, %v18103_v30  ;;  %v8922_v53 = vrot.slane %v14168_v52, %v18103_v30  ;;  %v6528_v48 = vcombine.low %v6507_v41, %v19632_v50  ;;  %15624 = vmatpush3.bf16.msra.mxu0 %v15881_v29 }
 0x2af   : > { %v19639_v12 = vrot.slane %v22946_v37, %v18103_v30  ;;  %v6811_v9 = vcombine.high %v6760_v60, %v6788_v54  ;;  %v8936_v21 = vrot.slane %v14170_v22, %v18103_v30  ;;  %v6529_v5 = vcombine.high %v6507_v41, %v19632_v50 }
 0x2b0   : > { %v19649_v11 = vrot.slane %v6751_v24, %v18103_v30  ;;  %v8959_v23 = vcombine.high %v8908_v26, %v8922_v53  ;;  %v6571_v52 = vrot.slane %v6528_v48, %v18103_v30  ;;  %v8958_v60 = vcombine.low %v8908_v26, %v8922_v53 }
 0x2b1   : > { %v6668_v38 = vcombine.low %v6659_v0, %v19639_v12  ;;  %v14172_v47 = vcombine.low %v19625_v6, %v6811_v9  ;;  %v6585_v19 = vrot.slane %v6529_v5, %v18103_v30  ;;  %v6699_v41 = vcombine.high %v22920_v35, %v22924_v33 }
 0x2b2   : > { %v6814_v0 = vcombine.low %v19625_v6, %v19649_v11  ;;  %v19663_v24 = vrot.slane %v8959_v23, %v18103_v30  ;;  %v19666_v9 = vrot.slane %v8958_v60, %v18103_v30  ;;  %v6701_v26 = vcombine.high %v22923_v63, %v22942_v61 }
 0x2b3   : > { %v6682_v22 = vrot.slane %v6668_v38, %v18103_v30  ;;  %v8950_v37 = vrot.slane %v14172_v47, %v18103_v30  ;;  %v14167_v53 = vcombine.low %v6571_v52, %v6585_v19  ;;  %v14169_v48 = vcombine.high %v6571_v52, %v6585_v19 }
 0x2b4   : > { %22947 = vst [vmem:[#allocation29_spill] sm:$0xff] %v19666_v9  ;;  %v14173_v38 = vcombine.high %v6814_v0, %v6788_v54  ;;  %v6717_v33 = vrot.slane %v6699_v41, %v18103_v30  ;;  %v6731_v29 = vrot.slane %v6701_v26, %v18103_v30 }
 0x2b5   : > { %v14171_v5 = vcombine.low %v6682_v22, %v6788_v54  ;;  %v8963_v56 = vcombine.high %v8936_v21, %v8950_v37  ;;  %v8962_v51 = vcombine.low %v8936_v21, %v8950_v37  ;;  %v8915_v47 = vrot.slane %v14167_v53, %v18103_v30 }
 0x2b6   : > { %v8929_v23 = vrot.slane %v14169_v48, %v18103_v30  ;;  %v8957_v35 = vrot.slane %v14173_v38, %v18103_v30  ;;  %v22949_v54 = vcombine.high %v19024_v4, %v19091_v7  ;;  %v6748_v19 = vcombine.low %v19262_v32, %v6717_v33 }
 0x2b7   : > { %v8943_v60 = vrot.slane %v14171_v5, %v18103_v30  ;;  %v19677_v63 = vrot.slane %v8963_v56, %v18103_v30  ;;  %v19680_v52 = vrot.slane %v8962_v51, %v18103_v30  ;;  %v6749_v51 = vcombine.high %v19262_v32, %v6717_v33 }
 0x2b8   : > { %v19686_v21 = vrot.slane %v22949_v54, %v18103_v30  ;;  %v8961_v22 = vcombine.high %v8915_v47, %v8929_v23  ;;  %v8960_v41 = vcombine.low %v8915_v47, %v8929_v23  ;;  %v19709_v23 = vrot.slane %v6748_v19, %v18103_v30 }
 0x2b9   : > { %22948 = vst [vmem:[#allocation38_spill] sm:$0xff] %v19680_v52  ;;  %v8965_v0 = vcombine.high %v8943_v60, %v8957_v35  ;;  %v8964_v37 = vcombine.low %v8943_v60, %v8957_v35  ;;  %v9026_v26 = vcombine.low %v19663_v24, %v19677_v63  ;;  %v9022_v56 = vcombine.low %v19666_v9, %v19680_v52 }
 0x2ba   : > { %v6752_v53 = vcombine.low %v6731_v29, %v19686_v21  ;;  %v19696_v48 = vrot.slane %v8961_v22, %v18103_v30  ;;  %v19702_v38 = vrot.slane %v8960_v41, %v18103_v30  ;;  %v6753_v47 = vcombine.high %v6731_v29, %v19686_v21 }
 0x2bb   : > { %v19699_v5 = vrot.slane %v8965_v0, %v18103_v30  ;;  %v19705_v35 = vrot.slane %v8964_v37, %v18103_v30  ;;  %10681 = vmatprep.mubr.bf16.mxu1 %v9026_v26  ;;  %v19712_v32 = vrot.slane %v6749_v51, %v18103_v30  ;;  %v6815_v19 = vcombine.high %v19625_v6, %v19649_v11  ;;  %v22957_v26 = vld [vmem:[#allocation8_spill] sm:$0xff] }
 0x2bc   : > { %22950 = vst [vmem:[#allocation28_spill] sm:$0xff] %v19696_v48  ;;  %22952 = vst [vmem:[#allocation63_spill] sm:$0xff] %v19702_v38  ;;  %v6795_v33 = vrot.slane %v6752_v53, %v18103_v30  ;;  %10682 = vmatmul.mubr.bf16.gmra.mxu1 %v9022_v56  ;;  %v22956_v22 = vcombine.low %v22944_v16, %v18794_v58  ;;  %v6809_v25 = vrot.slane %v6753_v47, %v18103_v30 }
 0x2bd   : > { %22951 = vst [vmem:[#allocation10_spill] sm:$0xff] %v19699_v5  ;;  %22953 = vst [vmem:[#allocation64_spill] sm:$0xff] %v19705_v35  ;;  %v9028_v54 = vcombine.low %v19696_v48, %v19699_v5  ;;  %v9024_v29 = vcombine.low %v19702_v38, %v19705_v35  ;;  %v6922_v37 = vcombine.low %v22942_v61, %v19024_v4 }
 0x2be   : > { %v6876_v0 = vrot.slane %v22956_v22, %v18103_v30  ;;  %v6813_v41 = vcombine.high %v19709_v23, %v6795_v33  ;;  %v4850_v56 = vadd.f32 %v19001_v49, %v22957_v26  ;;  %v14175_v6 = vcombine.low %v6815_v19, %v19709_v23 }
 0x2bf   : > { %10937 = vmatprep.mubr.bf16.mxu0 %v9028_v54  ;;  %v6812_v53 = vcombine.low %v19709_v23, %v6795_v33  ;;  %v22958_v58 = vcombine.low %v18862_v1, %v18802_v59  ;;  %v6817_v49 = vcombine.high %v19712_v32, %v6809_v25 }
 0x2c0   : > { %v6891_v51 = vcombine.low %v22925_v45, %v6876_v0  ;;  %10938 = vmatmul.mubr.bf16.gmra.mxu0 %v9024_v29  ;;  %v6934_v45 = vrot.slane %v6922_v37, %v18103_v30  ;;  %v14177_v23 = vcombine.low %v19712_v32, %v6813_v41  ;;  %v4913_v54 = vcombine.high %v4850_v56, %v4850_v56 }
 0x2c1   : > { %v6883_v47 = vrot.slane %v22958_v58, %v18103_v30  ;;  %v19759_v1 = vrot.slane %v14175_v6, %v18103_v30  ;;  %v5132_v0 = vmax.f32 %v4850_v56, 0.0  ;;  %v6816_v29 = vcombine.low %v19712_v32, %v6809_v25 }
 0x2c2   : > { %v6899_v19 = vrot.slane %v6891_v51, %v18103_v30  ;;  %v6970_v26 = vcombine.low %v19463_v8, %v6934_v45  ;;  %v6971_v37 = vcombine.high %v19463_v8, %v6934_v45  ;;  %v9107_v41 = vrot.slane %v14177_v23, %v18103_v30 }
 0x2c3   : > { %v5133_v58 = vmax.f32 %v4913_v54, 0.0  ;;  %v5263_v51 = vsel %vm19750_vm15, %v19560_v20, 0.0  ;;  %v5205_v18 = vcombine.low %v19587_v31, %v5132_v0  ;;  %v6892_v3 = vcombine.low %v6883_v47, %v19155_v46 }
 0x2c4   : > { %v14179_v6 = vcombine.low %v6817_v49, %v6899_v19  ;;  %v19775_v56 = vrot.slane %v6970_v26, %v18103_v30  ;;  %v19778_v32 = vrot.slane %v6971_v37, %v18103_v30  ;;  %v9144_v8 = vcombine.high %v19759_v1, %v9107_v41 }
 0x2c5   : > { %v5265_v45 = vsel %vm5073_vm5, %v5133_v58, 0.0  ;;  %v5264_v23 = vsel %vm19719_vm14, %v5205_v18, 0.0  ;;  %v6906_v20 = vrot.slane %v6892_v3, %v18103_v30  ;;  %v6924_v31 = vcombine.low %v19091_v7, %v19140_v10 }
 0x2c6   : > { %v19783_v54 = vpack.c.bf16 %v5265_v45, %v5265_v45  ;;  %v14181_v47 = vcombine.low %v19775_v56, %v19778_v32  ;;  %v9121_v22 = vrot.slane %v14179_v6, %v18103_v30  ;;  %v19791_v49 = vpack.c.bf16 %v5264_v23, %v5263_v51 }
 0x2c7   : > { %v6926_v0 = vcombine.low %v19186_v55, %v19241_v43  ;;  %v19796_v60 = vrot.slane %v9144_v8, %v18103_v30  ;;  %v6907_v26 = vcombine.low %v6899_v19, %v6906_v20  ;;  %v6948_v8 = vrot.slane %v6924_v31, %v18103_v30 }
 0x2c8   : > { %v5518_v18 = vshll.u32 %v19783_v54, 16  ;;  %v22581_v3 = vrot.slane %v19783_v54, 1  ;;  %v9135_v37 = vrot.slane %v14181_v47, %v18103_v30  ;;  %v5511_v58 = vshrl.u32 %v19791_v49, 16 }
 0x2c9   : > { %v5513_v45 = vshll.u32 %v19791_v49, 16  ;;  %v5522_v51 = vshrl.u32 %v19783_v54, 16  ;;  %v19811_v38 = vrot.slane %v6926_v0, %v18103_v30  ;;  %v14176_v47 = vcombine.high %v19649_v11, %v6812_v53 }
 0x2ca   : > { %v5520_v6 = vrot.slane %v5518_v18, 1  ;;  %v19807_v23 = vrot.slane %v22581_v3, %v18103_v30  ;;  %v9148_v19 = vcombine.high %v9121_v22, %v9135_v37  ;;  %v14178_v35 = vcombine.high %v6816_v29, %v6795_v33 }
 0x2cb   : > { %v5515_v20 = vrot.slane %v5513_v45, 1  ;;  %v6974_v5 = vcombine.low %v6948_v8, %v19811_v38  ;;  %v6975_v18 = vcombine.high %v6948_v8, %v19811_v38  ;;  %v14180_v9 = vcombine.high %v6809_v25, %v6907_v26 }
 0x2cc   : > { %22961 = vst [vmem:[#allocation8_spill] sm:$0xff] %v19807_v23  ;;  %v5524_v48 = vor.u32 %v5522_v51, %v5520_v6  ;;  %v19817_v52 = vrot.slane %v9148_v19, %v18103_v30  ;;  %v9100_v31 = vrot.slane %v14176_v47, %v18103_v30  ;;  %v9114_v0 = vrot.slane %v14178_v35, %v18103_v30 }
 0x2cd   : > { %v5516_v3 = vor.u32 %v5515_v20, %v5511_v58  ;;  %v19823_v45 = vrot.slane %v6974_v5, %v18103_v30  ;;  %v19826_v11 = vrot.slane %v6975_v18, %v18103_v30  ;;  %v9128_v33 = vrot.slane %v14180_v9, %v18103_v30 }
 0x2ce   : > { %v7765_v23 = vcombine.low %v19783_v54, %v5524_v48  ;;  %v9211_v25 = vcombine.low %v19796_v60, %v19817_v52  ;;  %v9146_v29 = vcombine.high %v9100_v31, %v9114_v0  ;;  %v9143_v26 = vcombine.low %v19759_v1, %v9107_v41 }
 0x2cf   : > { %v5521_v53 = vsel %vm445_vm1, %v5516_v3, %v5520_v6  ;;  %v14182_v58 = vcombine.low %v19823_v45, %v19826_v11  ;;  %v9147_v51 = vcombine.low %v9121_v22, %v9135_v37  ;;  %v9145_v6 = vcombine.low %v9100_v31, %v9114_v0 }
 0x2d0   : > { %v7598_v35 = vcombine.low %v19791_v49, %v5521_v53  ;;  %v7599_v48 = vcombine.high %v19791_v49, %v5521_v53  ;;  %v19836_v5 = vrot.slane %v7765_v23, %v18103_v30  ;;  %10689 = vmatprep.mubr.bf16.mxu1 %v9211_v25  ;;  %v19841_v9 = vrot.slane %v9146_v29, %v18103_v30 }
 0x2d1   : > { %v19844_v3 = vrot.slane %v9143_v26, %v18103_v30  ;;  %v9142_v23 = vrot.slane %v14182_v58, %v18103_v30  ;;  %v6923_v8 = vcombine.high %v22942_v61, %v19024_v4  ;;  %v19856_v19 = vrot.slane %v9147_v51, %v18103_v30 }
 0x2d2   : > { %22962 = vst [vmem:[#allocation65_spill] sm:$0xff] %v19841_v9  ;;  %v19847_v1 = vrot.slane %v7598_v35, %v18103_v30  ;;  %v19850_v41 = vrot.slane %v7599_v48, %v18103_v30  ;;  %v19859_v22 = vrot.slane %v9145_v6, %v18103_v30  ;;  %v22964_v37 = vcombine.low %v18802_v59, %v19015_v57 }
 0x2d3   : > { %v7146_v47 = vcombine.low %v19140_v10, %v19186_v55  ;;  %v9150_v18 = vcombine.high %v9128_v33, %v9142_v23  ;;  %v9149_v31 = vcombine.low %v9128_v33, %v9142_v23  ;;  %v6941_v0 = vrot.slane %v6923_v8, %v18103_v30 }
 0x2d4   : > { %22963 = vst [vmem:[#allocation66_spill] sm:$0xff] %v19859_v22  ;;  %v7100_v20 = vrot.slane %v22964_v37, %v18103_v30  ;;  %v14183_v4 = vcombine.high %v19775_v56, %v19778_v32  ;;  %v9207_v25 = vcombine.low %v19844_v3, %v19856_v19  ;;  %v6925_v57 = vcombine.high %v19091_v7, %v19140_v10 }
 0x2d5   : > { %v19874_v29 = vrot.slane %v7146_v47, %v18103_v30  ;;  %v19879_v26 = vrot.slane %v9150_v18, %v18103_v30  ;;  %v19882_v33 = vrot.slane %v9149_v31, %v18103_v30  ;;  %v6972_v35 = vcombine.low %v19632_v50, %v6941_v0  ;;  %v22968_v47 = vld [vmem:[#allocation53_spill] sm:$0xff] }
 0x2d6   : > { %v7115_v53 = vcombine.low %v19639_v12, %v7100_v20  ;;  %v6973_v56 = vcombine.high %v19632_v50, %v6941_v0  ;;  %10690 = vmatmul.mubr.bf16.gmra.mxu1 %v9207_v25  ;;  %v9278_v48 = vrot.slane %v14183_v4, %v18103_v30  ;;  %v6927_v7 = vcombine.high %v19186_v55, %v19241_v43  ;;  %v22967_v20 = vld [vmem:[#allocation50_spill] sm:$0xff] }
 0x2d7   : > { %22965 = vst [vmem:[#allocation67_spill] sm:$0xff] %v19879_v26  ;;  %22966 = vst [vmem:[#allocation68_spill] sm:$0xff] %v19882_v33  ;;  %v7194_v12 = vcombine.low %v19602_v13, %v19874_v29  ;;  %v9213_v58 = vcombine.low %v19841_v9, %v19879_v26  ;;  %v9209_v51 = vcombine.low %v19859_v22, %v19882_v33 }
 0x2d8   : > { %v7123_v32 = vrot.slane %v7115_v53, %v18103_v30  ;;  %v6991_v6 = vrot.slane %v6972_v35, %v18103_v30  ;;  %v7005_v50 = vrot.slane %v6973_v56, %v18103_v30  ;;  %v6955_v8 = vrot.slane %v6925_v57, %v18103_v30  ;;  %v22970_v53 = vld [vmem:[#allocation7_spill] sm:$0xff] }
 0x2d9   : > { %v19899_v23 = vrot.slane %v7194_v12, %v18103_v30  ;;  %v19903_v37 = vrot.slane %v6927_v7, %v18103_v30  ;;  %v7092_v18 = vcombine.low %v22968_v47, %v22967_v20  ;;  %10945 = vmatprep.mubr.bf16.mxu0 %v9213_v58  ;;  %v22969_v4 = vcombine.low %v19142_v27, %v19216_v39 }
 0x2da   : > { %v14185_v31 = vcombine.low %v6991_v6, %v7005_v50  ;;  %v14187_v0 = vcombine.high %v6991_v6, %v7005_v50  ;;  %v7148_v35 = vcombine.low %v19241_v43, %v22970_v53  ;;  %10946 = vmatmul.mubr.bf16.gmra.mxu0 %v9209_v51  ;;  %v22971_v47 = vcombine.low %v19404_v2, %v19459_v17 }
 0x2db   : > { %v19911_v25 = vrot.slane %v22969_v4, %v18103_v30  ;;  %v14189_v57 = vcombine.low %v7123_v32, %v19899_v23  ;;  %v6976_v56 = vcombine.low %v6955_v8, %v19903_v37  ;;  %v6977_v12 = vcombine.high %v6955_v8, %v19903_v37 }
 0x2dc   : > { %v7107_v7 = vrot.slane %v7092_v18, %v18103_v30  ;;  %v9292_v58 = vrot.slane %v14185_v31, %v18103_v30  ;;  %v9306_v6 = vrot.slane %v14187_v0, %v18103_v30  ;;  %v7172_v50 = vrot.slane %v7148_v35, %v18103_v30 }
 0x2dd   : > { %v19926_v4 = vrot.slane %v22971_v47, %v18103_v30  ;;  %v9320_v32 = vrot.slane %v14189_v57, %v18103_v30  ;;  %v7019_v51 = vrot.slane %v6976_v56, %v18103_v30  ;;  %v7033_v8 = vrot.slane %v6977_v12, %v18103_v30 }
 0x2de   : > { %v7116_v18 = vcombine.low %v7107_v7, %v19911_v25  ;;  %v9329_v22 = vcombine.high %v9278_v48, %v9292_v58  ;;  %v9328_v31 = vcombine.low %v9278_v48, %v9292_v58  ;;  %v14184_v35 = vcombine.high %v19823_v45, %v19826_v11 }
 0x2df   : > { %v7198_v0 = vcombine.low %v7172_v50, %v19926_v4  ;;  %v9333_v33 = vcombine.high %v9306_v6, %v9320_v32  ;;  %v9332_v9 = vcombine.low %v9306_v6, %v9320_v32  ;;  %v14186_v26 = vcombine.low %v7019_v51, %v7033_v8 }
 0x2e0   : > { %v7130_v47 = vrot.slane %v7116_v18, %v18103_v30  ;;  %v19937_v57 = vrot.slane %v9329_v22, %v18103_v30  ;;  %v19940_v56 = vrot.slane %v9328_v31, %v18103_v30  ;;  %v14188_v7 = vcombine.high %v7019_v51, %v7033_v8 }
 0x2e1   : > { %v7236_v12 = vrot.slane %v7198_v0, %v18103_v30  ;;  %v19944_v48 = vrot.slane %v9333_v33, %v18103_v30  ;;  %v19947_v58 = vrot.slane %v9332_v9, %v18103_v30  ;;  %v9285_v45 = vrot.slane %v14184_v35, %v18103_v30 }
 0x2e2   : > { %22972 = vst [vmem:[#allocation50_spill] sm:$0xff] %v19940_v56  ;;  %v9299_v11 = vrot.slane %v14186_v26, %v18103_v30  ;;  %v9313_v22 = vrot.slane %v14188_v7, %v18103_v30  ;;  %v7147_v32 = vcombine.high %v19140_v10, %v19186_v55  ;;  %v7149_v18 = vcombine.high %v19241_v43, %v22970_v53 }
 0x2e3   : > { %22973 = vst [vmem:[#allocation53_spill] sm:$0xff] %v19947_v58  ;;  %v14190_v6 = vcombine.low %v7130_v47, %v7236_v12  ;;  %v9396_v33 = vcombine.low %v19937_v57, %v19944_v48  ;;  %v9392_v9 = vcombine.low %v19940_v56, %v19947_v58  ;;  %v22974_v55 = vcombine.high %v19404_v2, %v19459_v17 }
 0x2e4   : > { %v9331_v51 = vcombine.high %v9285_v45, %v9299_v11  ;;  %v9330_v8 = vcombine.low %v9285_v45, %v9299_v11  ;;  %v7165_v26 = vrot.slane %v7147_v32, %v18103_v30  ;;  %v7179_v0 = vrot.slane %v7149_v18, %v18103_v30 }
 0x2e5   : > { %v9327_v31 = vrot.slane %v14190_v6, %v18103_v30  ;;  %v19967_v35 = vrot.slane %v22974_v55, %v18103_v30  ;;  %10697 = vmatprep.mubr.bf16.mxu1 %v9396_v33  ;;  %v7195_v7 = vcombine.high %v19602_v13, %v19874_v29  ;;  %v7199_v45 = vcombine.high %v7172_v50, %v19926_v4 }
 0x2e6   : > { %v19970_v43 = vrot.slane %v9331_v51, %v18103_v30  ;;  %v19973_v47 = vrot.slane %v9330_v8, %v18103_v30  ;;  %10698 = vmatmul.mubr.bf16.gmra.mxu1 %v9392_v9  ;;  %v7196_v32 = vcombine.low %v19686_v21, %v7165_v26  ;;  %v7197_v18 = vcombine.high %v19686_v21, %v7165_v26 }
 0x2e7   : > { %v9335_v11 = vcombine.high %v9313_v22, %v9327_v31  ;;  %v9334_v6 = vcombine.low %v9313_v22, %v9327_v31  ;;  %v7200_v33 = vcombine.low %v7179_v0, %v19967_v35  ;;  %v7201_v51 = vcombine.high %v7179_v0, %v19967_v35 }
 0x2e8   : > { %22975 = vst [vmem:[#allocation7_spill] sm:$0xff] %v19970_v43  ;;  %22976 = vst [vmem:[#allocation69_spill] sm:$0xff] %v19973_v47  ;;  %v7222_v55 = vrot.slane %v7195_v7, %v18103_v30  ;;  %v7250_v8 = vrot.slane %v7199_v45, %v18103_v30  ;;  %v7215_v29 = vrot.slane %v7196_v32, %v18103_v30 }
 0x2e9   : > { %v19985_v56 = vrot.slane %v9335_v11, %v18103_v30  ;;  %v19988_v13 = vrot.slane %v9334_v6, %v18103_v30  ;;  %v7229_v50 = vrot.slane %v7197_v18, %v18103_v30  ;;  %v7243_v21 = vrot.slane %v7200_v33, %v18103_v30 }
 0x2ea   : > { %v7257_v22 = vrot.slane %v7201_v51, %v18103_v30  ;;  %v7259_v9 = vcombine.high %v19899_v23, %v7236_v12  ;;  %v7263_v31 = vcombine.high %v7222_v55, %v7250_v8  ;;  %v22979_v7 = vcombine.low %v22967_v20, %v19142_v27 }
 0x2eb   : > { %22977 = vst [vmem:[#allocation70_spill] sm:$0xff] %v19985_v56  ;;  %22978 = vst [vmem:[#allocation71_spill] sm:$0xff] %v19988_v13  ;;  %v9398_v26 = vcombine.low %v19970_v43, %v19985_v56  ;;  %v9394_v0 = vcombine.low %v19973_v47, %v19988_v13  ;;  %v7262_v11 = vcombine.low %v7222_v55, %v7250_v8 }
 0x2ec   : > { %v7324_v45 = vrot.slane %v22979_v7, %v18103_v30  ;;  %v7261_v6 = vcombine.high %v7215_v29, %v7243_v21  ;;  %v7265_v32 = vcombine.high %v7229_v50, %v7257_v22  ;;  %v14193_v18 = vcombine.low %v7222_v55, %v7259_v9 }
 0x2ed   : > { %v14195_v33 = vcombine.low %v7263_v31, %v7215_v29  ;;  %10953 = vmatprep.mubr.bf16.mxu0 %v9398_v26  ;;  %v7260_v51 = vcombine.low %v7215_v29, %v7243_v21  ;;  %v7264_v58 = vcombine.low %v7229_v50, %v7257_v22  ;;  %v22980_v43 = vcombine.low %v19216_v39, %v19190_v14 }
 0x2ee   : > { %v7339_v23 = vcombine.low %v19155_v46, %v7324_v45  ;;  %10954 = vmatmul.mubr.bf16.gmra.mxu0 %v9394_v0  ;;  %v14197_v13 = vcombine.low %v7229_v50, %v7261_v6  ;;  %v9463_v27 = vrot.slane %v14193_v18, %v18103_v30  ;;  %v14194_v56 = vcombine.high %v7262_v11, %v7236_v12 }
 0x2ef   : > { %v7331_v47 = vrot.slane %v22980_v43, %v18103_v30  ;;  %v9477_v7 = vrot.slane %v14195_v33, %v18103_v30  ;;  %v14196_v31 = vcombine.high %v7250_v8, %v7260_v51  ;;  %v14198_v46 = vcombine.high %v7264_v58, %v7243_v21 }
 0x2f0   : > { %v7347_v55 = vrot.slane %v7339_v23, %v18103_v30  ;;  %v9491_v29 = vrot.slane %v14197_v13, %v18103_v30  ;;  %v9470_v45 = vrot.slane %v14194_v56, %v18103_v30  ;;  %v7370_v58 = vcombine.low %v22970_v53, %v19404_v2 }
 0x2f1   : > { %v7340_v9 = vcombine.low %v7331_v47, %v19515_v44  ;;  %v9514_v26 = vcombine.high %v9463_v27, %v9477_v7  ;;  %v9513_v39 = vcombine.low %v9463_v27, %v9477_v7  ;;  %v9484_v0 = vrot.slane %v14196_v31, %v18103_v30 }
 0x2f2   : > { %v14199_v43 = vcombine.low %v7265_v32, %v7347_v55  ;;  %v9498_v6 = vrot.slane %v14198_v46, %v18103_v30  ;;  %v7371_v56 = vcombine.high %v22970_v53, %v19404_v2  ;;  %v7382_v32 = vrot.slane %v7370_v58, %v18103_v30 }
 0x2f3   : > { %v7354_v50 = vrot.slane %v7340_v9, %v18103_v30  ;;  %v20018_v12 = vrot.slane %v9514_v26, %v18103_v30  ;;  %v20021_v47 = vrot.slane %v9513_v39, %v18103_v30  ;;  %v9516_v21 = vcombine.high %v9470_v45, %v9484_v0 }
 0x2f4   : > { %v9505_v8 = vrot.slane %v14199_v43, %v18103_v30  ;;  %v9515_v11 = vcombine.low %v9470_v45, %v9484_v0  ;;  %v7389_v18 = vrot.slane %v7371_v56, %v18103_v30  ;;  %v7372_v33 = vcombine.low %v19459_v17, %v19469_v42 }
 0x2f5   : > { %v7355_v13 = vcombine.low %v7347_v55, %v7354_v50  ;;  %v7373_v23 = vcombine.high %v19459_v17, %v19469_v42  ;;  %v20035_v7 = vrot.slane %v9516_v21, %v18103_v30  ;;  %v7418_v55 = vcombine.low %v19811_v38, %v7382_v32 }
 0x2f6   : > { %v9518_v51 = vcombine.high %v9491_v29, %v9505_v8  ;;  %v9517_v2 = vcombine.low %v9491_v29, %v9505_v8  ;;  %v7419_v9 = vcombine.high %v19811_v38, %v7382_v32  ;;  %v7420_v31 = vcombine.low %v19903_v37, %v7389_v18 }
 0x2f7   : > { %v14200_v27 = vcombine.high %v7257_v22, %v7355_v13  ;;  %22981 = vst [vmem:[#allocation72_spill] sm:$0xff] %v20035_v7  ;;  %v7421_v46 = vcombine.high %v19903_v37, %v7389_v18  ;;  %v20049_v22 = vrot.slane %v9515_v11, %v18103_v30  ;;  %v7432_v29 = vrot.slane %v7418_v55, %v18103_v30 }
 0x2f8   : > { %v20042_v26 = vrot.slane %v9518_v51, %v18103_v30  ;;  %v20046_v17 = vrot.slane %v9517_v2, %v18103_v30  ;;  %v7439_v39 = vrot.slane %v7420_v31, %v18103_v30  ;;  %v7446_v38 = vrot.slane %v7419_v9, %v18103_v30 }
 0x2f9   : > { %v9512_v45 = vrot.slane %v14200_v27, %v18103_v30  ;;  %22982 = vst [vmem:[#allocation73_spill] sm:$0xff] %v20049_v22  ;;  %v7453_v43 = vrot.slane %v7421_v46, %v18103_v30  ;;  %v7374_v18 = vcombine.low %v19543_v62, %v19610_v36  ;;  %v7375_v51 = vcombine.high %v19543_v62, %v19610_v36 }
 0x2fa   : > { %v9581_v37 = vcombine.low %v20018_v12, %v20042_v26  ;;  %v9577_v0 = vcombine.low %v20021_v47, %v20046_v17  ;;  %v14201_v56 = vcombine.low %v7432_v29, %v7446_v38  ;;  %v14203_v8 = vcombine.high %v7432_v29, %v7446_v38 }
 0x2fb   : > { %v9520_v50 = vcombine.high %v9498_v6, %v9512_v45  ;;  %v9519_v58 = vcombine.low %v9498_v6, %v9512_v45  ;;  %v14205_v13 = vcombine.low %v7439_v39, %v7453_v43  ;;  %v14207_v21 = vcombine.high %v7439_v39, %v7453_v43 }
 0x2fc   : > { %10705 = vmatprep.mubr.bf16.mxu1 %v9581_v37  ;;  %v9648_v6 = vrot.slane %v14201_v56, %v18103_v30  ;;  %v9662_v27 = vrot.slane %v14203_v8, %v18103_v30  ;;  %v7396_v46 = vrot.slane %v7372_v33, %v18103_v30  ;;  %v7403_v45 = vrot.slane %v7373_v23, %v18103_v30 }
 0x2fd   : > { %v20060_v11 = vrot.slane %v9520_v50, %v18103_v30  ;;  %v20063_v32 = vrot.slane %v9519_v58, %v18103_v30  ;;  %10706 = vmatmul.mubr.bf16.gmra.mxu1 %v9577_v0  ;;  %v9676_v2 = vrot.slane %v14205_v13, %v18103_v30  ;;  %v9690_v55 = vrot.slane %v14207_v21, %v18103_v30 }
 0x2fe   : > { %v9699_v29 = vcombine.high %v9648_v6, %v9662_v27  ;;  %v7410_v38 = vrot.slane %v7374_v18, %v18103_v30  ;;  %v7417_v43 = vrot.slane %v7375_v51, %v18103_v30  ;;  %v9698_v37 = vcombine.low %v9648_v6, %v9662_v27 }
 0x2ff   : > { %22983 = vst [vmem:[#allocation74_spill] sm:$0xff] %v20063_v32  ;;  %v9583_v9 = vcombine.low %v20035_v7, %v20060_v11  ;;  %v9579_v31 = vcombine.low %v20049_v22, %v20063_v32  ;;  %v9703_v39 = vcombine.high %v9676_v2, %v9690_v55  ;;  %v9702_v50 = vcombine.low %v9676_v2, %v9690_v55 }
 0x300   : > { %v22984_v0 = vcombine.low %v19190_v14, %v19406_v15  ;;  %v7594_v56 = vcombine.low %v19469_v42, %v19543_v62  ;;  %v20088_v33 = vrot.slane %v9699_v29, %v18103_v30  ;;  %v7422_v8 = vcombine.low %v7396_v46, %v7410_v38 }
 0x301   : > { %10961 = vmatprep.mubr.bf16.mxu0 %v9583_v9  ;;  %v20091_v23 = vrot.slane %v9703_v39, %v18103_v30  ;;  %v7423_v13 = vcombine.high %v7396_v46, %v7410_v38  ;;  %v7424_v21 = vcombine.low %v7403_v45, %v7417_v43  ;;  %v7425_v18 = vcombine.high %v7403_v45, %v7417_v43 }
 0x302   : > { %v7548_v58 = vrot.slane %v22984_v0, %v18103_v30  ;;  %10962 = vmatmul.mubr.bf16.gmra.mxu0 %v9579_v31  ;;  %v20094_v51 = vrot.slane %v9698_v37, %v18103_v30  ;;  %v20097_v15 = vrot.slane %v9702_v50, %v18103_v30  ;;  %v7460_v27 = vrot.slane %v7422_v8, %v18103_v30 }
 0x303   : > { %v9766_v6 = vcombine.low %v20088_v33, %v20091_v23  ;;  %v7474_v2 = vrot.slane %v7423_v13, %v18103_v30  ;;  %v7467_v9 = vrot.slane %v7424_v21, %v18103_v30  ;;  %v7481_v31 = vrot.slane %v7425_v18, %v18103_v30 }
 0x304   : > { %v7563_v55 = vcombine.low %v19911_v25, %v7548_v58  ;;  %v9762_v46 = vcombine.low %v20094_v51, %v20097_v15  ;;  %v7595_v45 = vcombine.high %v19469_v42, %v19543_v62  ;;  %v7596_v43 = vcombine.low %v19610_v36, %v19583_v28 }
 0x305   : > { %10713 = vmatprep.mubr.bf16.mxu1 %v9766_v6  ;;  %v14202_v29 = vcombine.low %v7460_v27, %v7474_v2  ;;  %v14204_v39 = vcombine.high %v7460_v27, %v7474_v2  ;;  %v14206_v37 = vcombine.low %v7467_v9, %v7481_v31  ;;  %v14208_v25 = vcombine.high %v7467_v9, %v7481_v31 }
 0x306   : > { %v7571_v38 = vrot.slane %v7563_v55, %v18103_v30  ;;  %10714 = vmatmul.mubr.bf16.gmra.mxu1 %v9762_v46  ;;  %v7597_v50 = vcombine.high %v19610_v36, %v19583_v28  ;;  %v7606_v0 = vrot.slane %v7594_v56, %v18103_v30  ;;  %v7613_v8 = vrot.slane %v7595_v45, %v18103_v30 }
 0x307   : > { %v9655_v58 = vrot.slane %v14202_v29, %v18103_v30  ;;  %v9669_v62 = vrot.slane %v14204_v39, %v18103_v30  ;;  %v7620_v13 = vrot.slane %v7596_v43, %v18103_v30  ;;  %v9683_v21 = vrot.slane %v14206_v37, %v18103_v30 }
 0x308   : > { %v9697_v18 = vrot.slane %v14208_v25, %v18103_v30  ;;  %v7627_v6 = vrot.slane %v7597_v50, %v18103_v30  ;;  %v7642_v27 = vcombine.low %v19926_v4, %v7606_v0  ;;  %v7643_v56 = vcombine.high %v19926_v4, %v7606_v0 }
 0x309   : > { %v9701_v2 = vcombine.high %v9655_v58, %v9669_v62  ;;  %v9700_v36 = vcombine.low %v9655_v58, %v9669_v62  ;;  %v7644_v55 = vcombine.low %v19967_v35, %v7613_v8  ;;  %v7645_v46 = vcombine.high %v19967_v35, %v7613_v8 }
 0x30a   : > { %v9705_v9 = vcombine.high %v9683_v21, %v9697_v18  ;;  %v9704_v31 = vcombine.low %v9683_v21, %v9697_v18  ;;  %v7646_v45 = vcombine.low %v7620_v13, %v19847_v1  ;;  %v7647_v43 = vcombine.high %v7620_v13, %v19847_v1 }
 0x30b   : > { %v20129_v29 = vrot.slane %v9701_v2, %v18103_v30  ;;  %v20132_v39 = vrot.slane %v9700_v36, %v18103_v30  ;;  %v7648_v37 = vcombine.low %v7627_v6, %v19850_v41  ;;  %v7656_v35 = vrot.slane %v7642_v27, %v18103_v30 }
 0x30c   : > { %v20137_v4 = vrot.slane %v9705_v9, %v18103_v30  ;;  %v20140_v25 = vrot.slane %v9704_v31, %v18103_v30  ;;  %v7663_v50 = vrot.slane %v7644_v55, %v18103_v30  ;;  %v7670_v0 = vrot.slane %v7643_v56, %v18103_v30  ;;  %v22989_v56 = vld [vmem:[#allocation35_spill] sm:$0xff]  ;;  %v22990_v55 = vld [vmem:[#allocation62_spill] sm:$0xff] }
 0x30d   : > { %22985 = vst [vmem:[#allocation75_spill] sm:$0xff] %v20129_v29  ;;  %22986 = vst [vmem:[#allocation76_spill] sm:$0xff] %v20132_v39  ;;  %v7677_v58 = vrot.slane %v7645_v46, %v18103_v30  ;;  %v7684_v62 = vrot.slane %v7646_v45, %v18103_v30  ;;  %v7691_v1 = vrot.slane %v7648_v37, %v18103_v30 }
 0x30e   : > { %22987 = vst [vmem:[#allocation77_spill] sm:$0xff] %v20137_v4  ;;  %22988 = vst [vmem:[#allocation78_spill] sm:$0xff] %v20140_v25  ;;  %v9768_v8 = vcombine.low %v20129_v29, %v20137_v4  ;;  %v9764_v13 = vcombine.low %v20132_v39, %v20140_v25  ;;  %v7698_v21 = vrot.slane %v7647_v43, %v18103_v30 }
 0x30f   : > { %v14211_v18 = vcombine.low %v7571_v38, %v7656_v35  ;;  %v7707_v27 = vcombine.high %v7656_v35, %v7684_v62  ;;  %v7709_v2 = vcombine.high %v7663_v50, %v7691_v1  ;;  %v7540_v36 = vcombine.low %v19440_v40, %v19432_v34 }
 0x310   : > { %v22991_v9 = vcombine.low %v22989_v56, %v22990_v55  ;;  %10969 = vmatprep.mubr.bf16.mxu0 %v9768_v8  ;;  %v7711_v46 = vcombine.high %v7670_v0, %v7698_v21  ;;  %v7649_v37 = vcombine.high %v7627_v6, %v19850_v41  ;;  %v7708_v39 = vcombine.low %v7663_v50, %v7691_v1 }
 0x311   : > { %v9833_v45 = vrot.slane %v14211_v18, %v18103_v30  ;;  %10970 = vmatmul.mubr.bf16.gmra.mxu0 %v9764_v13  ;;  %v14213_v43 = vcombine.low %v7670_v0, %v7707_v27  ;;  %v14217_v38 = vcombine.low %v7677_v58, %v7709_v2  ;;  %v7555_v35 = vrot.slane %v7540_v36, %v18103_v30 }
 0x312   : > { %v7562_v31 = vrot.slane %v22991_v9, %v18103_v30  ;;  %v7710_v25 = vcombine.low %v7670_v0, %v7698_v21  ;;  %v14215_v29 = vcombine.low %v7711_v46, %v7663_v50  ;;  %v7705_v40 = vrot.slane %v7649_v37, %v18103_v30 }
 0x313   : > { %v14216_v4 = vcombine.high %v7698_v21, %v7708_v39  ;;  %v22992_v8 = vcombine.low %v19432_v34, %v22989_v56  ;;  %v9847_v18 = vrot.slane %v14213_v43, %v18103_v30  ;;  %v9875_v41 = vrot.slane %v14217_v38, %v18103_v30 }
 0x314   : > { %v7564_v6 = vcombine.low %v7555_v35, %v7562_v31  ;;  %v14214_v13 = vcombine.high %v7710_v25, %v7684_v62  ;;  %v9861_v27 = vrot.slane %v14215_v29, %v18103_v30  ;;  %v7712_v2 = vcombine.low %v7677_v58, %v7705_v40 }
 0x315   : > { %v7772_v9 = vrot.slane %v22992_v8, %v18103_v30  ;;  %v9868_v0 = vrot.slane %v14216_v4, %v18103_v30  ;;  %v7713_v50 = vcombine.high %v7677_v58, %v7705_v40  ;;  %v9884_v36 = vcombine.high %v9833_v45, %v9847_v18  ;;  %v22993_v4 = vld [vmem:[#allocation61_spill] sm:$0xff] }
 0x316   : > { %v7578_v39 = vrot.slane %v7564_v6, %v18103_v30  ;;  %v9854_v21 = vrot.slane %v14214_v13, %v18103_v30  ;;  %v9883_v46 = vcombine.low %v9833_v45, %v9847_v18  ;;  %v9888_v56 = vcombine.high %v9861_v27, %v9875_v41  ;;  %v22995_v18 = vld [vmem:[#allocation4_spill] sm:$0xff]  ;;  %v22996_v6 = vld [vmem:[#allocation34_spill] sm:$0xff] }
 0x317   : > { %v14218_v37 = vcombine.high %v7712_v2, %v7691_v1  ;;  %v9887_v8 = vcombine.low %v9861_v27, %v9875_v41  ;;  %v7787_v43 = vcombine.low %v19515_v44, %v7772_v9  ;;  %v20175_v31 = vrot.slane %v9884_v36, %v18103_v30  ;;  %v22994_v9 = vld [vmem:[#allocation6_spill] sm:$0xff] }
 0x318   : > { %v14212_v25 = vcombine.low %v7578_v39, %v7684_v62  ;;  %v20178_v29 = vrot.slane %v9883_v46, %v18103_v30  ;;  %v7764_v58 = vcombine.low %v22990_v55, %v22993_v4  ;;  %v20183_v38 = vrot.slane %v9888_v56, %v18103_v30 }
 0x319   : > { %v9882_v45 = vrot.slane %v14218_v37, %v18103_v30  ;;  %v20187_v1 = vrot.slane %v9887_v8, %v18103_v30  ;;  %v7795_v44 = vrot.slane %v7787_v43, %v18103_v30  ;;  %v8102_v41 = vcombine.high %v22995_v18, %v22994_v9 }
 0x31a   : > { %v9840_v35 = vrot.slane %v14212_v25, %v18103_v30  ;;  %v7779_v62 = vrot.slane %v7764_v58, %v18103_v30  ;;  %v5666_v55 = vcombine.high %v22996_v6, %v22996_v6  ;;  %v9951_v13 = vcombine.low %v20175_v31, %v20183_v38 }
 0x31b   : > { %v9890_v27 = vcombine.high %v9868_v0, %v9882_v45  ;;  %v9947_v2 = vcombine.low %v20178_v29, %v20187_v1  ;;  %v14219_v36 = vcombine.low %v7713_v50, %v7795_v44  ;;  %v9889_v56 = vcombine.low %v9868_v0, %v9882_v45 }
 0x31c   : > { %v9886_v39 = vcombine.high %v9840_v35, %v9854_v21  ;;  %v9885_v46 = vcombine.low %v9840_v35, %v9854_v21  ;;  %v7788_v37 = vcombine.low %v7779_v62, %v19836_v5  ;;  %10721 = vmatprep.mubr.bf16.mxu1 %v9951_v13  ;;  %v5673_v25 = vrot.slane %v22996_v6, %v18103_v30 }
 0x31d   : > { %v20202_v8 = vrot.slane %v9890_v27, %v18103_v30  ;;  %v10012_v43 = vrot.slane %v14219_v36, %v18103_v30  ;;  %v5680_v58 = vrot.slane %v5666_v55, %v18103_v30  ;;  %10722 = vmatmul.mubr.bf16.gmra.mxu1 %v9947_v2  ;;  %v20215_v5 = vrot.slane %v9889_v56, %v18103_v30  ;;  %v23001_v56 = vld [vmem:[#allocation44_spill] sm:$0xff] }
 0x31e   : > { %v20209_v9 = vrot.slane %v9886_v39, %v18103_v30  ;;  %v20212_v50 = vrot.slane %v9885_v46, %v18103_v30  ;;  %v7802_v0 = vrot.slane %v7788_v37, %v18103_v30  ;;  %v5681_v35 = vcombine.high %v5673_v25, %v5673_v25  ;;  %v23002_v37 = vld [vmem:[#allocation42_spill] sm:$0xff] }
 0x31f   : > { %22997 = vst [vmem:[#allocation35_spill] sm:$0xff] %v20202_v8  ;;  %23000 = vst [vmem:[#allocation6_spill] sm:$0xff] %v20215_v5  ;;  %v10020_v21 = vcombine.high %v10012_v43, %v10012_v43  ;;  %v20219_v45 = vrot.slane %v10012_v43, %v18103_v30  ;;  %v5682_v62 = vcombine.high %v5680_v58, %v5680_v58 }
 0x320   : > { %22998 = vst [vmem:[#allocation62_spill] sm:$0xff] %v20209_v9  ;;  %22999 = vst [vmem:[#allocation61_spill] sm:$0xff] %v20212_v50  ;;  %v9953_v18 = vcombine.low %v20209_v9, %v20202_v8  ;;  %v9949_v6 = vcombine.low %v20212_v50, %v20215_v5  ;;  %v7803_v55 = vcombine.low %v7795_v44, %v7802_v0  ;;  %v23003_v9 = vld [vmem:[#allocation16_spill] sm:$0xff] }
 0x321   : > { %v5689_v13 = vrot.slane %v5673_v25, %v18103_v30  ;;  %v20227_v27 = vrot.slane %v10020_v21, %v18103_v30  ;;  %v5696_v2 = vrot.slane %v5680_v58, %v18103_v30  ;;  %v5703_v36 = vrot.slane %v5681_v35, %v18103_v30 }
 0x322   : > { %v5710_v39 = vrot.slane %v5682_v62, %v18103_v30  ;;  %10977 = vmatprep.mubr.bf16.mxu0 %v9953_v18  ;;  %v14220_v46 = vcombine.high %v7705_v40, %v7803_v55  ;;  %v8287_v43 = vcombine.high %v23002_v37, %v23001_v56  ;;  %v5914_v50 = vcombine.high %v23003_v9, %v23003_v9 }
 0x323   : > { %v5921_v44 = vrot.slane %v23003_v9, %v18103_v30  ;;  %10729 = vmatprep.mubr.bf16.mxu1 %v20227_v27  ;;  %10978 = vmatmul.mubr.bf16.gmra.mxu0 %v9949_v6  ;;  %v8105_v25 = vcombine.low %v5689_v13, %v5703_v36  ;;  %v14129_v58 = vcombine.high %v5689_v13, %v5703_v36 }
 0x324   : > { %v8107_v0 = vcombine.low %v5696_v2, %v5710_v39  ;;  %v10019_v21 = vrot.slane %v14220_v46, %v18103_v30  ;;  %v14130_v35 = vcombine.high %v5696_v2, %v5710_v39  ;;  %v5928_v40 = vrot.slane %v5914_v50, %v18103_v30 }
 0x325   : > { %v5929_v62 = vcombine.high %v5921_v44, %v5921_v44  ;;  %v8115_v18 = vrot.slane %v8105_v25, %v18103_v30  ;;  %v8122_v55 = vrot.slane %v14129_v58, %v18103_v30  ;;  %v5937_v9 = vrot.slane %v5921_v44, %v18103_v30  ;;  %10730 = vmatmul.mubr.bf16.gmra.mxu1 %v20219_v45 }
 0x326   : > { %v8129_v56 = vrot.slane %v8107_v0, %v18103_v30  ;;  %v10021_v37 = vcombine.high %v10019_v21, %v10019_v21  ;;  %v20247_v6 = vrot.slane %v10019_v21, %v18103_v30  ;;  %v8136_v13 = vrot.slane %v14130_v35, %v18103_v30  ;;  %10769 = vmatprep.mubr.bf16.mxu1 %v8102_v41  ;;  %v23006_v0 = vld [vmem:[#allocation30_spill] sm:$0xff] }
 0x327   : > { %v5930_v2 = vcombine.high %v5928_v40, %v5928_v40  ;;  %v8137_v50 = vcombine.low %v8115_v18, %v8122_v55  ;;  %v5944_v36 = vrot.slane %v5928_v40, %v18103_v30  ;;  %v5951_v39 = vrot.slane %v5929_v62, %v18103_v30  ;;  %v23007_v18 = vld [vmem:[#allocation5_spill] sm:$0xff] }
 0x328   : > { %23004 = vst [vmem:[#allocation4_spill] sm:$0xff] %v20247_v6  ;;  %v5959_v46 = vcombine.high %v5937_v9, %v5937_v9  ;;  %v20253_v25 = vrot.slane %v10021_v37, %v18103_v30  ;;  %v8138_v44 = vcombine.low %v8129_v56, %v8136_v13  ;;  %v8290_v5 = vcombine.low %v23006_v0, %v5937_v9  ;;  %v15883_v56 = vld [vmem:[%s22410_s3 + $0x1b8] sm:$0xff]   ;;  %v23010_v0 = vld [vmem:[#allocation43_spill] sm:$0xff] }
 0x329   : > { %v5958_v58 = vrot.slane %v5930_v2, %v18103_v30  ;;  %v8145_v21 = vrot.slane %v8137_v50, %v18103_v30  ;;  %v5960_v8 = vcombine.high %v5944_v36, %v5944_v36  ;;  %v5961_v35 = vcombine.high %v5951_v39, %v5951_v39  ;;  %v23008_v2 = vld [vmem:[#allocation20_spill] sm:$0xff] }
 0x32a   : > { %23005 = vst [vmem:[#allocation34_spill] sm:$0xff] %v20253_v25  ;;  %v8291_v22 = vcombine.low %v5951_v39, %v5959_v46  ;;  %10985 = vmatprep.mubr.bf16.mxu0 %v20253_v25  ;;  %v8152_v41 = vrot.slane %v8138_v44, %v18103_v30  ;;  %v8300_v40 = vrot.slane %v8290_v5, %v18103_v30  ;;  %v23009_v44 = vld [vmem:[#allocation45_spill] sm:$0xff] }
 0x32b   : > { %v5962_v62 = vcombine.high %v5958_v58, %v5958_v58  ;;  %v6018_v55 = vrot.slane %v23007_v18, %v18103_v30  ;;  %10986 = vmatmul.mubr.bf16.gmra.mxu0 %v20247_v6  ;;  %v8292_v9 = vcombine.low %v5961_v35, %v5944_v36  ;;  %v8293_v37 = vcombine.low %v5958_v58, %v5960_v8  ;;  %v15884_v6 = vld [vmem:[%s22410_s3 + $0x1f0] sm:$0xff]   ;;  %v23012_v35 = vld [vmem:[#allocation22_spill] sm:$0xff] }
 0x32c   : > { %v8307_v13 = vrot.slane %v8291_v22, %v18103_v30  ;;  %v6146_v50 = vcombine.high %v23008_v2, %v23008_v2  ;;  %v8153_v39 = vcombine.low %v8145_v21, %v8152_v41  ;;  %v6153_v46 = vrot.slane %v23008_v2, %v18103_v30  ;;  %v23011_v21 = vld [vmem:[#allocation11_spill] sm:$0xff] }
 0x32d   : > { %v6025_v5 = vrot.slane %v6018_v55, %v18103_v30  ;;  %v8283_v18 = vcombine.high %v23010_v0, %v23009_v44  ;;  %v8314_v8 = vrot.slane %v8292_v9, %v18103_v30  ;;  %v8321_v22 = vrot.slane %v8293_v37, %v18103_v30 }
 0x32e   : > { %v8322_v36 = vcombine.low %v8300_v40, %v8307_v13  ;;  %v6160_v58 = vrot.slane %v6146_v50, %v18103_v30  ;;  %15625 = vmatprep.mubr.bf16.mxu0 %v8153_v39  ;;  %v23013_v41 = vcombine.high %v23011_v21, %v23012_v35  ;;  %v6161_v55 = vcombine.high %v6153_v46, %v6153_v46  ;;  %v15885_v40 = vld [vmem:[%s22410_s3 + $0x1b0] sm:$0xff]   ;;  %v23018_v21 = vld [vmem:[#allocation41_spill] sm:$0xff] }
 0x32f   : > { %v6169_v2 = vrot.slane %v6153_v46, %v18103_v30  ;;  %v8475_v44 = vcombine.low %v5962_v62, %v6025_v5  ;;  %v8323_v25 = vcombine.low %v8314_v8, %v8321_v22  ;;  %v23014_v46 = vld [vmem:[#allocation52_spill] sm:$0xff]  ;;  %v23015_v62 = vld [vmem:[#allocation51_spill] sm:$0xff]  ;;  %v6370_v35 = vcombine.high %v23018_v21, %v23018_v21 }
 0x330   : > { %10770 = vmatmul.mubr.bf16.vlgmr.msra.gmra.mxu1 %v23013_v41  ;;  %v8330_v9 = vrot.slane %v8322_v36, %v18103_v30  ;;  %v6162_v37 = vcombine.high %v6160_v58, %v6160_v58  ;;  %v6176_v13 = vrot.slane %v6160_v58, %v18103_v30  ;;  %v6183_v50 = vrot.slane %v6161_v55, %v18103_v30  ;;  %v23017_v36 = vld [vmem:[#allocation19_spill] sm:$0xff]  ;;  %v20306_v41 = vpop.f32.mrf.mxu0 }
 0x331   : > { %10777 = vmatprep.mubr.bf16.mxu1 %v8287_v43  ;;  %15154 = vmatpush3.bf16.msra.mxu1 %v15883_v56  ;;  %v8485_v39 = vrot.slane %v8475_v44, %v18103_v30  ;;  %v8472_v5 = vcombine.high %v23015_v62, %v23014_v46  ;;  %v15886_v43 = vld [vmem:[%s22410_s3 + $0x1e8] sm:$0xff]   ;;  %v20298_v56 = vpop.f32.mrf.mxu1  ;;  %v8337_v8 = vrot.slane %v8323_v25, %v18103_v30 }
 0x332   : > { %15155 = vmatprep.subr.bf16.mxu1 %v15884_v6  ;;  %23016 = vst [vmem:[#allocation44_spill] sm:$0xff] %v20298_v56  ;;  %v6190_v22 = vrot.slane %v6162_v37, %v18103_v30  ;;  %v6242_v58 = vrot.slane %v23017_v36, %v18103_v30  ;;  %23019 = vst [vmem:[#allocation42_spill] sm:$0xff] %v20306_v41  ;;  %v8476_v55 = vcombine.low %v6169_v2, %v6183_v50 }
 0x333   : > { %v14147_v6 = vcombine.high %v6169_v2, %v6183_v50  ;;  %v6377_v44 = vrot.slane %v23018_v21, %v18103_v30  ;;  %v6466_v46 = vrot.slane %v22944_v16, %v18103_v30  ;;  %v8338_v62 = vcombine.low %v8330_v9, %v8337_v8  ;;  %v15887_v50 = vld [vmem:[%s22410_s3 + $0x1a8] sm:$0xff]   ;;  %v20320_v16 = vpop.f32.mrf.mxu1  ;;  %v15888_v21 = vld [vmem:[%s22410_s3 + $0x1e0] sm:$0xff]  }
 0x334   : > { %v8478_v25 = vcombine.low %v6176_v13, %v6190_v22  ;;  %v6249_v37 = vrot.slane %v6242_v58, %v18103_v30  ;;  %v6384_v0 = vrot.slane %v6370_v35, %v18103_v30  ;;  %v8492_v36 = vrot.slane %v8476_v55, %v18103_v30  ;;  %23020 = vst [vmem:[#allocation16_spill] sm:$0xff] %v20320_v16  ;;  %v20327_v35 = vpop.f32.mrf.mxu0 }
 0x335   : > { %15156 = vmatpush3.bf16.msra.mxu1 %v15885_v40  ;;  %v8499_v56 = vrot.slane %v14147_v6, %v18103_v30  ;;  %v6385_v41 = vcombine.high %v6377_v44, %v6377_v44  ;;  %v6393_v2 = vrot.slane %v6377_v44, %v18103_v30  ;;  %15626 = vmatmul.mubr.bf16.vlgmr.msra.gmra.mxu0 %v8338_v62 }
 0x336   : > { %15157 = vmatprep.subr.bf16.mxu1 %v15886_v43  ;;  %v8506_v9 = vrot.slane %v8478_v25, %v18103_v30  ;;  %v6400_v8 = vrot.slane %v6384_v0, %v18103_v30  ;;  %v14156_v40 = vcombine.high %v6176_v13, %v6190_v22  ;;  %v6386_v58 = vcombine.high %v6384_v0, %v6384_v0 }
 0x337   : > { %23021 = vst [vmem:[#allocation30_spill] sm:$0xff] %v20327_v35  ;;  %v8507_v43 = vcombine.low %v8485_v39, %v8492_v36  ;;  %v6407_v55 = vrot.slane %v6385_v41, %v18103_v30  ;;  %v6415_v6 = vcombine.high %v6393_v2, %v6393_v2  ;;  %v8661_v44 = vcombine.low %v6249_v37, %v6393_v2  ;;  %v20337_v39 = vpop.f32.mrf.mxu1  ;;  %v20343_v36 = vpop.f32.mrf.mxu0  ;;  %v23024_v35 = vld [vmem:[#allocation55_spill] sm:$0xff] }
 0x338   : > { %10778 = vmatmul.mubr.bf16.gmra.mxu1 %v8283_v18  ;;  %v8508_v16 = vcombine.low %v8499_v56, %v8506_v9  ;;  %v8670_v62 = vrot.slane %v14156_v40, %v18103_v30  ;;  %v6414_v25 = vrot.slane %v6386_v58, %v18103_v30  ;;  %v6416_v13 = vcombine.high %v6400_v8, %v6400_v8  ;;  %v15889_v18 = vld [vmem:[%s22410_s3 + $0x1a0] sm:$0xff]  }
 0x339   : > { %10785 = vmatprep.mubr.bf16.mxu1 %v8472_v5  ;;  %v8515_v0 = vrot.slane %v8507_v43, %v18103_v30  ;;  %v6417_v22 = vcombine.high %v6407_v55, %v6407_v55  ;;  %v8662_v32 = vcombine.low %v6407_v55, %v6415_v6  ;;  %v8677_v7 = vrot.slane %v8661_v44, %v18103_v30 }
 0x33a   : > { %15158 = vmatpush3.bf16.msra.mxu1 %v15887_v50  ;;  %23022 = vst [vmem:[#allocation5_spill] sm:$0xff] %v20337_v39  ;;  %v8522_v5 = vrot.slane %v8508_v16, %v18103_v30  ;;  %v6418_v56 = vcombine.high %v6414_v25, %v6414_v25  ;;  %v6473_v41 = vrot.slane %v6466_v46, %v18103_v30  ;;  %23023 = vst [vmem:[#allocation20_spill] sm:$0xff] %v20343_v36 }
 0x33b   : > { %v6601_v37 = vrot.slane %v22942_v61, %v18103_v30  ;;  %15159 = vmatprep.subr.bf16.mxu1 %v15888_v21  ;;  %v8663_v2 = vcombine.low %v6417_v22, %v6400_v8  ;;  %v8684_v50 = vrot.slane %v8662_v32, %v18103_v30  ;;  %v8692_v9 = vcombine.low %v8670_v62, %v8677_v7  ;;  %v23025_v21 = vld [vmem:[#allocation54_spill] sm:$0xff]  ;;  %v15890_v7 = vld [vmem:[%s22410_s3 + $0x1d8] sm:$0xff]   ;;  %v20355_v32 = vpop.f32.mrf.mxu1 }
 0x33c   : > { %v8845_v40 = vcombine.low %v6414_v25, %v6416_v13  ;;  %v8523_v58 = vcombine.low %v8515_v0, %v8522_v5  ;;  %v8846_v6 = vcombine.low %v6418_v56, %v6473_v41  ;;  %v8468_v39 = vcombine.high %v23025_v21, %v23024_v35  ;;  %23026 = vst [vmem:[#allocation45_spill] sm:$0xff] %v20355_v32  ;;  %v23027_v25 = vld [vmem:[#allocation15_spill] sm:$0xff]  ;;  %v15891_v35 = vld [vmem:[%s22410_s3 + $0x198] sm:$0xff]  }
 0x33d   : > { %v6609_v43 = vcombine.high %v6601_v37, %v6601_v37  ;;  %v6617_v55 = vrot.slane %v6601_v37, %v18103_v30  ;;  %v8691_v16 = vrot.slane %v8663_v2, %v18103_v30  ;;  %v8700_v46 = vrot.slane %v8692_v9, %v18103_v30  ;;  %v23028_v13 = vld [vmem:[#allocation23_spill] sm:$0xff]  ;;  %v20377_v2 = vpop.f32.mrf.mxu1 }
 0x33e   : > { %v8855_v44 = vrot.slane %v8845_v40, %v18103_v30  ;;  %15160 = vmatpush3.bf16.msra.mxu1 %v15889_v18  ;;  %15629 = vmatprep.mubr.bf16.mxu0 %v8523_v58  ;;  %v8862_v62 = vrot.slane %v8846_v6, %v18103_v30  ;;  %v8657_v0 = vcombine.high %v23028_v13, %v23027_v25  ;;  %v20366_v18 = vpop.f32.mrf.mxu0 }
 0x33f   : > { %v6631_v8 = vrot.slane %v6609_v43, %v18103_v30  ;;  %v6594_v22 = vcombine.high %v22942_v61, %v22942_v61  ;;  %23029 = vst [vmem:[#allocation43_spill] sm:$0xff] %v20366_v18  ;;  %v8693_v5 = vcombine.low %v8684_v50, %v8691_v16  ;;  %v6690_v56 = vrot.slane %v18802_v59, %v18103_v30  ;;  %v15892_v61 = vld [vmem:[%s22410_s3 + $0x1d0] sm:$0xff]  }
 0x340   : > { %10786 = vmatmul.mubr.bf16.gmra.mxu1 %v8468_v39  ;;  %v6825_v41 = vrot.slane %v19140_v10, %v18103_v30  ;;  %v6818_v37 = vcombine.high %v19140_v10, %v19140_v10  ;;  %23030 = vst [vmem:[#allocation11_spill] sm:$0xff] %v20377_v2  ;;  %v8877_v58 = vcombine.low %v8855_v44, %v8862_v62  ;;  %v20380_v50 = vpop.f32.mrf.mxu0 }
 0x341   : > { %v8847_v9 = vcombine.low %v6617_v55, %v6631_v8  ;;  %v14165_v40 = vcombine.high %v6617_v55, %v6631_v8  ;;  %10793 = vmatprep.mubr.bf16.mxu1 %v8657_v0  ;;  %v6608_v39 = vrot.slane %v6594_v22, %v18103_v30  ;;  %23031 = vst [vmem:[#allocation22_spill] sm:$0xff] %v20380_v50  ;;  %v15893_v8 = vld [vmem:[%s22410_s3 + $0x190] sm:$0xff]   ;;  %v20396_v22 = vpop.f32.mrf.mxu1 }
 0x342   : > { %v8707_v59 = vrot.slane %v8693_v5, %v18103_v30  ;;  %v6697_v43 = vrot.slane %v6690_v56, %v18103_v30  ;;  %v6833_v6 = vcombine.high %v6825_v41, %v6825_v41  ;;  %v6841_v10 = vrot.slane %v6825_v41, %v18103_v30  ;;  %15161 = vmatprep.subr.bf16.mxu1 %v15890_v7  ;;  %v15894_v7 = vld [vmem:[%s22410_s3 + $0x1c8] sm:$0xff]  }
 0x343   : > { %v8869_v16 = vrot.slane %v8847_v9, %v18103_v30  ;;  %v8876_v21 = vrot.slane %v14165_v40, %v18103_v30  ;;  %v8885_v55 = vrot.slane %v8877_v58, %v18103_v30  ;;  %v6610_v44 = vcombine.high %v6608_v39, %v6608_v39  ;;  %15162 = vmatpush3.bf16.msra.mxu1 %v15891_v35  ;;  %v20400_v9 = vpop.f32.mrf.mxu0 }
 0x344   : > { %v8708_v62 = vcombine.low %v8700_v46, %v8707_v59  ;;  %v6624_v25 = vrot.slane %v6608_v39, %v18103_v30  ;;  %v6855_v13 = vrot.slane %v6833_v6, %v18103_v30  ;;  %v6863_v0 = vcombine.high %v6841_v10, %v6841_v10  ;;  %15163 = vmatprep.subr.bf16.mxu1 %v15892_v61 }
 0x345   : > { %23032 = vst [vmem:[#allocation52_spill] sm:$0xff] %v20396_v22  ;;  %v8878_v5 = vcombine.low %v8869_v16, %v8876_v21  ;;  %v6638_v35 = vrot.slane %v6610_v44, %v18103_v30  ;;  %v9032_v56 = vcombine.low %v6697_v43, %v6841_v10  ;;  %v6832_v41 = vrot.slane %v6818_v37, %v18103_v30  ;;  %v20414_v44 = vpop.f32.mrf.mxu1  ;;  %v23098_v22 = vld [vmem:[#allocation61_spill] sm:$0xff] }
 0x346   : > { %23033 = vst [vmem:[#allocation51_spill] sm:$0xff] %v20400_v9  ;;  %15630 = vmatmul.mubr.bf16.gmra.mxu0 %v8708_v62  ;;  %v9033_v46 = vcombine.low %v6855_v13, %v6863_v0  ;;  %v6865_v40 = vcombine.high %v6855_v13, %v6855_v13  ;;  %v6914_v61 = vrot.slane %v22967_v20, %v18103_v30  ;;  %v15895_v20 = vld [vmem:[%s22410_s3 + $0x188] sm:$0xff]   ;;  %23034 = vst [vmem:[#allocation19_spill] sm:$0xff] %v20414_v44  ;;  %v20418_v0 = vpop.f32.mrf.mxu0  ;;  %v23097_v44 = vld [vmem:[#allocation6_spill] sm:$0xff] }
 0x347   : > { %v7049_v58 = vrot.slane %v22970_v53, %v18103_v30  ;;  %v8892_v39 = vrot.slane %v8878_v5, %v18103_v30  ;;  %v9030_v59 = vcombine.low %v6624_v25, %v6638_v35  ;;  %v14174_v6 = vcombine.high %v6624_v25, %v6638_v35  ;;  %15164 = vmatpush3.bf16.msra.mxu1 %v15893_v8  ;;  %v23036_v9 = vld [vmem:[#allocation31_spill] sm:$0xff] }
 0x348   : > { %v9054_v16 = vrot.slane %v9032_v56, %v18103_v30  ;;  %v9061_v37 = vrot.slane %v9033_v46, %v18103_v30  ;;  %v6834_v43 = vcombine.high %v6832_v41, %v6832_v41  ;;  %v6848_v10 = vrot.slane %v6832_v41, %v18103_v30  ;;  %15165 = vmatprep.subr.bf16.mxu1 %v15894_v7 }
 0x349   : > { %v6921_v21 = vrot.slane %v6914_v61, %v18103_v30  ;;  %v8893_v62 = vcombine.low %v8885_v55, %v8892_v39  ;;  %v9040_v25 = vrot.slane %v9030_v59, %v18103_v30  ;;  %v9047_v13 = vrot.slane %v14174_v6, %v18103_v30  ;;  %23035 = vst [vmem:[#allocation41_spill] sm:$0xff] %v20418_v0  ;;  %v23037_v55 = vld [vmem:[#allocation18_spill] sm:$0xff]  ;;  %v23039_v0 = vld [vmem:[#allocation39_spill] sm:$0xff] }
 0x34a   : > { %v7057_v8 = vcombine.high %v7049_v58, %v7049_v58  ;;  %v9063_v5 = vcombine.low %v9054_v16, %v9061_v37  ;;  %v6862_v35 = vrot.slane %v6834_v43, %v18103_v30  ;;  %v6864_v56 = vcombine.high %v6848_v10, %v6848_v10  ;;  %v15896_v59 = vld [vmem:[%s22410_s3 + $0x1c0] sm:$0xff]   ;;  %v23038_v43 = vld [vmem:[#allocation13_spill] sm:$0xff] }
 0x34b   : > { %v7065_v7 = vrot.slane %v7049_v58, %v18103_v30  ;;  %15633 = vmatprep.mubr.bf16.mxu0 %v8893_v62  ;;  %v9062_v41 = vcombine.low %v9040_v25, %v9047_v13  ;;  %v9215_v61 = vcombine.low %v6865_v40, %v6848_v10  ;;  %v8653_v39 = vcombine.high %v23037_v55, %v23036_v9  ;;  %v15897_v58 = vld [vmem:[%s22410_s3 + $0x180] sm:$0xff]   ;;  %v20434_v40 = vpop.f32.mrf.mxu1  ;;  %v20440_v13 = vpop.f32.mrf.mxu0 }
 0x34c   : > { %v7079_v46 = vrot.slane %v7057_v8, %v18103_v30  ;;  %v9077_v6 = vrot.slane %v9063_v5, %v18103_v30  ;;  %v6866_v16 = vcombine.high %v6862_v35, %v6862_v35  ;;  %v9216_v37 = vcombine.low %v6862_v35, %v6864_v56  ;;  %15166 = vmatpush3.bf16.msra.mxu1 %v15895_v20 }
 0x34d   : > { %v8842_v50 = vcombine.high %v23039_v0, %v23038_v43  ;;  %23040 = vst [vmem:[#allocation55_spill] sm:$0xff] %v20434_v40  ;;  %v9070_v9 = vrot.slane %v9062_v41, %v18103_v30  ;;  %v9225_v62 = vrot.slane %v9215_v61, %v18103_v30  ;;  %10794 = vmatmul.mubr.bf16.gmra.mxu1 %v8653_v39  ;;  %23041 = vst [vmem:[#allocation54_spill] sm:$0xff] %v20440_v13  ;;  %v20452_v39 = vpop.f32.mrf.mxu1 }
 0x34e   : > { %v9218_v10 = vcombine.low %v7065_v7, %v7079_v46  ;;  %v7042_v25 = vcombine.high %v22970_v53, %v22970_v53  ;;  %v9217_v8 = vcombine.low %v6866_v16, %v6921_v21  ;;  %v9232_v20 = vrot.slane %v9216_v37, %v18103_v30  ;;  %15167 = vmatprep.subr.bf16.mxu1 %v15896_v59 }
 0x34f   : > { %10801 = vmatprep.mubr.bf16.mxu1 %v8842_v50  ;;  %v7138_v0 = vrot.slane %v19190_v14, %v18103_v30  ;;  %v7273_v5 = vrot.slane %v19469_v42, %v18103_v30  ;;  %v9078_v35 = vcombine.low %v9070_v9, %v9077_v6  ;;  %v14191_v61 = vcombine.high %v7065_v7, %v7079_v46  ;;  %v20458_v46 = vpop.f32.mrf.mxu0 }
 0x350   : > { %v9246_v56 = vrot.slane %v9218_v10, %v18103_v30  ;;  %v7056_v41 = vrot.slane %v7042_v25, %v18103_v30  ;;  %v9239_v53 = vrot.slane %v9217_v8, %v18103_v30  ;;  %v9247_v55 = vcombine.low %v9225_v62, %v9232_v20  ;;  %15168 = vmatpush3.bf16.msra.mxu1 %v15897_v58 }
 0x351   : > { %v7145_v21 = vrot.slane %v7138_v0, %v18103_v30  ;;  %v7289_v50 = vrot.slane %v7273_v5, %v18103_v30  ;;  %15634 = vmatmul.mubr.bf16.gmra.mxu0 %v9078_v35  ;;  %v9410_v16 = vrot.slane %v14191_v61, %v18103_v30  ;;  %v7266_v7 = vcombine.high %v19469_v42, %v19469_v42  ;;  %v23042_v0 = vld [vmem:[#allocation25_spill] sm:$0xff] }
 0x352   : > { %v7058_v14 = vcombine.high %v7056_v41, %v7056_v41  ;;  %v7072_v6 = vrot.slane %v7056_v41, %v18103_v30  ;;  %v9248_v59 = vcombine.low %v9239_v53, %v9246_v56  ;;  %v9255_v37 = vrot.slane %v9247_v55, %v18103_v30  ;;  %v23043_v35 = vld [vmem:[#allocation17_spill] sm:$0xff]  ;;  %v20470_v41 = vpop.f32.mrf.mxu1 }
 0x353   : > { %v9403_v43 = vcombine.low %v7145_v21, %v7289_v50  ;;  %v7281_v9 = vcombine.high %v7273_v5, %v7273_v5  ;;  %v7280_v10 = vrot.slane %v7266_v7, %v18103_v30  ;;  %v7311_v62 = vcombine.high %v7289_v50, %v7289_v50  ;;  %v20473_v21 = vpop.f32.mrf.mxu0 }
 0x354   : > { %v7086_v58 = vrot.slane %v7058_v14, %v18103_v30  ;;  %v7362_v25 = vrot.slane %v19432_v34, %v18103_v30  ;;  %v9262_v8 = vrot.slane %v9248_v59, %v18103_v30  ;;  %v8838_v56 = vcombine.high %v23043_v35, %v23042_v0 }
 0x355   : > { %v9431_v20 = vrot.slane %v9403_v43, %v18103_v30  ;;  %v7303_v42 = vrot.slane %v7281_v9, %v18103_v30  ;;  %v7282_v53 = vcombine.high %v7280_v10, %v7280_v10  ;;  %v7296_v55 = vrot.slane %v7280_v10, %v18103_v30 }
 0x356   : > { %v9401_v5 = vcombine.low %v7072_v6, %v7086_v58  ;;  %v14192_v61 = vcombine.high %v7072_v6, %v7086_v58  ;;  %v9263_v50 = vcombine.low %v9255_v37, %v9262_v8  ;;  %v7369_v14 = vrot.slane %v7362_v25, %v18103_v30  ;;  %10802 = vmatmul.mubr.bf16.gmra.mxu1 %v8838_v56  ;;  %v20484_v25 = vpop.f32.mrf.mxu1  ;;  %v20486_v56 = vpop.f32.mrf.mxu0 }
 0x357   : > { %v7313_v34 = vcombine.high %v7303_v42, %v7303_v42  ;;  %v9585_v7 = vcombine.low %v7303_v42, %v7311_v62  ;;  %v7310_v9 = vrot.slane %v7282_v53, %v18103_v30  ;;  %v7312_v0 = vcombine.high %v7296_v55, %v7296_v55 }
 0x358   : > { %v9417_v59 = vrot.slane %v9401_v5, %v18103_v30  ;;  %v9424_v43 = vrot.slane %v14192_v61, %v18103_v30  ;;  %15637 = vmatprep.mubr.bf16.mxu0 %v9263_v50  ;;  %v9027_v10 = vcombine.high %v19663_v24, %v19677_v63  ;;  %v7490_v37 = vcombine.high %v19583_v28, %v19583_v28 }
 0x359   : > { %v9586_v6 = vcombine.low %v7313_v34, %v7296_v55  ;;  %v9595_v58 = vrot.slane %v9585_v7, %v18103_v30  ;;  %v7314_v42 = vcombine.high %v7310_v9, %v7310_v9  ;;  %v9587_v35 = vcombine.low %v7310_v9, %v7312_v0  ;;  %v20501_v9 = vpop.f32.mrf.mxu1 }
 0x35a   : > { %v9432_v62 = vcombine.low %v9410_v16, %v9417_v59  ;;  %v9433_v8 = vcombine.low %v9424_v43, %v9431_v20  ;;  %10809 = vmatprep.mubr.bf16.mxu1 %v9027_v10  ;;  %v7497_v61 = vrot.slane %v19583_v28, %v18103_v30  ;;  %v7504_v53 = vrot.slane %v7490_v37, %v18103_v30  ;;  %v20507_v10 = vpop.f32.mrf.mxu0 }
 0x35b   : > { %v9602_v5 = vrot.slane %v9586_v6, %v18103_v30  ;;  %v23044_v24 = vrot.slane %v19783_v54, 1  ;;  %v23045_v63 = vrot.slane %v19791_v49, 1  ;;  %v9588_v50 = vcombine.low %v7314_v42, %v7369_v14 }
 0x35c   : > { %v9440_v16 = vrot.slane %v9432_v62, %v18103_v30  ;;  %v9447_v20 = vrot.slane %v9433_v8, %v18103_v30  ;;  %v9609_v34 = vrot.slane %v9587_v35, %v18103_v30  ;;  %v7505_v59 = vcombine.high %v7497_v61, %v7497_v61  ;;  %v20512_v8 = vpop.f32.mrf.mxu1 }
 0x35d   : > { %v5529_v55 = vsel %vm626_vm0, %v23045_v63, %v23044_v24  ;;  %v9617_v7 = vcombine.low %v9595_v58, %v9602_v5  ;;  %v7506_v43 = vcombine.high %v7504_v53, %v7504_v53  ;;  %v7513_v28 = vrot.slane %v7497_v61, %v18103_v30  ;;  %v23046_v61 = vld [vmem:[#allocation38_spill] sm:$0xff]  ;;  %v20518_v24 = vpop.f32.mrf.mxu0 }
 0x35e   : > { %v9448_v0 = vcombine.low %v9440_v16, %v9447_v20  ;;  %v9616_v54 = vrot.slane %v9588_v50, %v18103_v30  ;;  %v7520_v49 = vrot.slane %v7504_v53, %v18103_v30  ;;  %v7586_v6 = vrot.slane %v22993_v4, %v18103_v30  ;;  %v23047_v53 = vld [vmem:[#allocation29_spill] sm:$0xff] }
 0x35f   : > { %v9625_v14 = vrot.slane %v9617_v7, %v18103_v30  ;;  %v7527_v58 = vrot.slane %v7505_v59, %v18103_v30  ;;  %v7534_v37 = vrot.slane %v7506_v43, %v18103_v30  ;;  %v7714_v62 = vcombine.high %v5529_v55, %v5529_v55 }
 0x360   : > { %15638 = vmatmul.mubr.bf16.gmra.mxu0 %v9448_v0  ;;  %v9618_v42 = vcombine.low %v9609_v34, %v9616_v54  ;;  %v7593_v35 = vrot.slane %v7586_v6, %v18103_v30  ;;  %v7721_v5 = vrot.slane %v5529_v55, %v18103_v30  ;;  %v9023_v4 = vcombine.high %v23047_v53, %v23046_v61  ;;  %v14924_v61 = vpop.f32.mrf.mxu1 }
 0x361   : > { %v9770_v63 = vcombine.low %v7513_v28, %v7527_v58  ;;  %v14209_v16 = vcombine.high %v7513_v28, %v7527_v58  ;;  %v9772_v20 = vcombine.low %v7520_v49, %v7534_v37  ;;  %v14210_v50 = vcombine.high %v7520_v49, %v7534_v37 }
 0x362   : > { %v9632_v7 = vrot.slane %v9618_v42, %v18103_v30  ;;  %v7728_v59 = vrot.slane %v7714_v62, %v18103_v30  ;;  %v7729_v43 = vcombine.high %v7721_v5, %v7721_v5  ;;  %v7737_v34 = vrot.slane %v7721_v5, %v18103_v30  ;;  %10810 = vmatmul.mubr.bf16.gmra.mxu1 %v9023_v4  ;;  %v15100_v62 = vpop.f32.mrf.mxu0 }
 0x363   : > { %v9780_v0 = vrot.slane %v9770_v63, %v18103_v30  ;;  %v9787_v55 = vrot.slane %v14209_v16, %v18103_v30  ;;  %v9794_v54 = vrot.slane %v9772_v20, %v18103_v30  ;;  %v9801_v6 = vrot.slane %v14210_v50, %v18103_v30 }
 0x364   : > { %v9633_v28 = vcombine.low %v9625_v14, %v9632_v7  ;;  %v7730_v58 = vcombine.high %v7728_v59, %v7728_v59  ;;  %v7744_v49 = vrot.slane %v7728_v59, %v18103_v30  ;;  %v7751_v37 = vrot.slane %v7729_v43, %v18103_v30  ;;  %v20534_v59 = vpop.f32.mrf.mxu1 }
 0x365   : > { %v9802_v42 = vcombine.low %v9780_v0, %v9787_v55  ;;  %v9803_v53 = vcombine.low %v9794_v54, %v9801_v6  ;;  %v7759_v5 = vcombine.high %v7737_v34, %v7737_v34  ;;  %v9955_v4 = vcombine.low %v7593_v35, %v7737_v34  ;;  %v23048_v35 = vld [vmem:[#allocation8_spill] sm:$0xff]  ;;  %v20538_v54 = vpop.f32.mrf.mxu0 }
 0x366   : > { %15641 = vmatprep.mubr.bf16.mxu0 %v9633_v28  ;;  %v7758_v63 = vrot.slane %v7730_v58, %v18103_v30  ;;  %v7760_v16 = vcombine.high %v7744_v49, %v7744_v49  ;;  %v7761_v13 = vcombine.high %v7751_v37, %v7751_v37  ;;  %v9212_v20 = vcombine.high %v19796_v60, %v19817_v52 }
 0x367   : > { %v9810_v14 = vrot.slane %v9802_v42, %v18103_v30  ;;  %v9817_v50 = vrot.slane %v9803_v53, %v18103_v30  ;;  %v9956_v7 = vcombine.low %v7751_v37, %v7759_v5  ;;  %v7817_v34 = vrot.slane %v23048_v35, %v18103_v30  ;;  %v20548_v53 = vpop.f32.mrf.mxu1 }
 0x368   : > { %v9957_v43 = vcombine.low %v7761_v13, %v7744_v49  ;;  %v9958_v0 = vcombine.low %v7758_v63, %v7760_v16  ;;  %10817 = vmatprep.mubr.bf16.mxu1 %v9212_v20  ;;  %v7762_v55 = vcombine.high %v7758_v63, %v7758_v63  ;;  %v9965_v28 = vrot.slane %v9955_v4, %v18103_v30  ;;  %v20550_v4 = vpop.f32.mrf.mxu0 }
 0x369   : > { %v9818_v6 = vcombine.low %v9810_v14, %v9817_v50  ;;  %v9972_v52 = vrot.slane %v9956_v7, %v18103_v30  ;;  %v9208_v60 = vcombine.high %v19844_v3, %v19856_v19  ;;  %v9397_v37 = vcombine.high %v19937_v57, %v19944_v48  ;;  %v14929_v16 = vpop.f32.mrf.mxu1  ;;  %v23049_v48 = vld [vmem:[#allocation53_spill] sm:$0xff]  ;;  %v23050_v50 = vld [vmem:[#allocation50_spill] sm:$0xff] }
 0x36a   : > { %v9979_v58 = vrot.slane %v9957_v43, %v18103_v30  ;;  %v9986_v13 = vrot.slane %v9958_v0, %v18103_v30  ;;  %v10054_v49 = vcombine.low %v7762_v55, %v7817_v34  ;;  %v15105_v14 = vpop.f32.mrf.mxu0  ;;  %v9393_v7 = vcombine.high %v23050_v50, %v23049_v48  ;;  %v23060_v50 = vld [vmem:[#allocation37_spill] sm:$0xff] }
 0x36b   : > { %15642 = vmatmul.mubr.bf16.gmra.mxu0 %v9818_v6  ;;  %v9987_v42 = vcombine.low %v9965_v28, %v9972_v52  ;;  %10818 = vmatmul.mubr.bf16.gmra.mxu1 %v9208_v60  ;;  %v9582_v43 = vcombine.high %v20018_v12, %v20042_v26  ;;  %v20562_v0 = vadd.f32 %v20470_v41, %v20452_v39  ;;  %v14930_v35 = vpop.f32.mrf.mxu1  ;;  %v23052_v60 = vld [vmem:[#allocation32_spill] sm:$0xff] }
 0x36c   : > { %v9988_v5 = vcombine.low %v9979_v58, %v9986_v13  ;;  %10825 = vmatprep.mubr.bf16.mxu1 %v9397_v37  ;;  %v10061_v63 = vrot.slane %v10054_v49, %v18103_v30  ;;  %v20566_v55 = vadd.f32 %v20473_v21, %v20458_v46  ;;  %v20569_v34 = vadd.f32 %v14924_v61, %v20512_v8 }
 0x36d   : > { %v9995_v3 = vrot.slane %v9987_v42, %v18103_v30  ;;  %v20572_v6 = vadd.f32 %v15100_v62, %v20518_v24  ;;  %v20574_v12 = vadd.f32 %v14930_v35, %v14929_v16  ;;  %v9578_v39 = vcombine.high %v20021_v47, %v20046_v17  ;;  %v20582_v41 = vpop.f32.mrf.mxu1  ;;  %v23055_v42 = vld [vmem:[#allocation26_spill] sm:$0xff] }
 0x36e   : > { %v10002_v19 = vrot.slane %v9988_v5, %v18103_v30  ;;  %v10068_v57 = vrot.slane %v10061_v63, %v18103_v30  ;;  %v15106_v30 = vpop.f32.mrf.mxu0  ;;  %v9767_v46 = vcombine.high %v20088_v33, %v20091_v23  ;;  %v9763_v21 = vcombine.high %v20094_v51, %v20097_v15  ;;  %v23056_v5 = vld [vmem:[#allocation27_spill] sm:$0xff] }
 0x36f   : > { %v20576_v26 = vadd.f32 %v15106_v30, %v15105_v14  ;;  %v9952_v24 = vcombine.high %v20175_v31, %v20183_v38  ;;  %v20590_v61 = vpop.f32.mrf.mxu1  ;;  %v9948_v28 = vcombine.high %v20178_v29, %v20187_v1  ;;  %v10052_v15 = vcombine.high %v20227_v27, %v20227_v27  ;;  %v23051_v38 = vld [vmem:[#allocation40_spill] sm:$0xff]  ;;  %v23054_v27 = vld [vmem:[#allocation46_spill] sm:$0xff]  ;;  %v23059_v14 = vld [vmem:[#allocation47_spill] sm:$0xff] }
 0x370   : > { %v10003_v20 = vcombine.low %v9995_v3, %v10002_v19  ;;  %v20586_v8 = vpop.f32.mrf.mxu0  ;;  %v10050_v31 = vcombine.high %v20219_v45, %v20219_v45  ;;  %v8104_v58 = vcombine.high %v23052_v60, %v23051_v38  ;;  %v23053_v1 = vld [vmem:[#allocation48_spill] sm:$0xff]  ;;  %v23057_v63 = vcombine.high %v23055_v42, %v23056_v5  ;;  %v23069_v5 = vld [vmem:[#allocation14_spill] sm:$0xff] }
 0x371   : > { %v8289_v37 = vcombine.high %v23054_v27, %v23053_v1  ;;  %v23067_v1 = vld [vmem:[#allocation59_spill] sm:$0xff]  ;;  %v23068_v42 = vld [vmem:[#allocation12_spill] sm:$0xff] }
 0x372   : > { %15645 = vmatprep.mubr.bf16.mxu0 %v10003_v20  ;;  %v20592_v17 = vpop.f32.mrf.mxu0  ;;  %v23058_v20 = vld [vmem:[#allocation49_spill] sm:$0xff] }
 0x373   : > { %15646 = vmatmul.mubr.bf16.gmra.mxu0 %v10068_v57  ;;  %10826 = vmatmul.mubr.bf16.gmra.mxu1 %v9393_v7  ;;  %v8285_v57 = vcombine.high %v23059_v14, %v23058_v20  ;;  %v23061_v7 = vld [vmem:[#allocation24_spill] sm:$0xff] }
 0x374   : > { %10833 = vmatprep.mubr.bf16.mxu1 %v9582_v43  ;;  %v8474_v43 = vcombine.high %v23061_v7, %v23060_v50  ;;  %v23071_v50 = vld [vmem:[#allocation33_spill] sm:$0xff] }
 0x37b   : > { %10834 = vmatmul.mubr.bf16.gmra.mxu1 %v9578_v39 }
 0x37c   : > { %10841 = vmatprep.mubr.bf16.mxu1 %v9767_v46  ;;  %v14935_v47 = vpop.f32.mrf.mxu1 }
 0x37e   : > { %v14936_v33 = vpop.f32.mrf.mxu1 }
 0x37f   : > { %v20594_v62 = vadd.f32 %v14936_v33, %v14935_v47  ;;  %v23064_v33 = vld [vmem:[#allocation36_spill] sm:$0xff] }
 0x380   : > { %v15111_v23 = vpop.f32.mrf.mxu0  ;;  %v20606_v13 = vpop.f32.mrf.mxu1 }
 0x382   : > { %v15112_v51 = vpop.f32.mrf.mxu0  ;;  %v20610_v29 = vpop.f32.mrf.mxu1 }
 0x383   : > { %10842 = vmatmul.mubr.bf16.gmra.mxu1 %v9763_v21  ;;  %v20600_v52 = vadd.f32 %v15112_v51, %v15111_v23  ;;  %v23062_v21 = vld [vmem:[#allocation57_spill] sm:$0xff]  ;;  %v23065_v23 = vld [vmem:[#allocation58_spill] sm:$0xff] }
 0x384   : > { %10849 = vmatprep.mubr.bf16.mxu1 %v9952_v24  ;;  %v20608_v49 = vpop.f32.mrf.mxu0  ;;  %v23063_v24 = vld [vmem:[#allocation56_spill] sm:$0xff] }
 0x385   : > { %v8470_v47 = vcombine.high %v23063_v24, %v23062_v21 }
 0x386   : > { %v20617_v45 = vpop.f32.mrf.mxu0 }
 0x38b   : > { %10850 = vmatmul.mubr.bf16.gmra.mxu1 %v9948_v28  ;;  %v8659_v28 = vcombine.high %v23065_v23, %v23064_v33  ;;  %v23075_v33 = vld [vmem:[#allocation63_spill] sm:$0xff] }
 0x38c   : > { %10857 = vmatprep.mubr.bf16.mxu1 %v10052_v15 }
 0x393   : > { %10858 = vmatmul.mubr.bf16.gmra.mxu1 %v10050_v31 }
 0x394   : > { %11025 = vmatprep.mubr.bf16.mxu1 %v8104_v58  ;;  %v23066_v58 = vld [vmem:[#allocation9_spill] sm:$0xff] }
 0x395   : > { %v8655_v27 = vcombine.high %v23067_v1, %v23066_v58 }
 0x396   : > { %v14941_v3 = vpop.f32.mrf.mxu1 }
 0x398   : > { %v14942_v19 = vpop.f32.mrf.mxu1 }
 0x399   : > { %v20619_v16 = vadd.f32 %v14942_v19, %v14941_v3 }
 0x39a   : > { %v15117_v48 = vpop.f32.mrf.mxu0  ;;  %v20627_v39 = vpop.f32.mrf.mxu1 }
 0x39b   : > { %11026 = vmatmul.mubr.bf16.vlgmr.msra.gmra.mxu1 %v23057_v63  ;;  %v8844_v63 = vcombine.high %v23069_v5, %v23068_v42  ;;  %v15898_v42 = vld [vmem:[%s22412_s5 + $0xf8] sm:$0xff]  }
 0x39c   : > { %11033 = vmatprep.mubr.bf16.mxu1 %v8289_v37  ;;  %v15118_v35 = vpop.f32.mrf.mxu0  ;;  %v20629_v46 = vpop.f32.mrf.mxu1  ;;  %v15899_v5 = vld [vmem:[%s22412_s5 + $0xb8] sm:$0xff]   ;;  %15325 = vmatprep.subr.bf16.mxu1 %v15898_v42 }
 0x39d   : > { %v20625_v30 = vadd.f32 %v15118_v35, %v15117_v48  ;;  %v23070_v48 = vld [vmem:[#allocation60_spill] sm:$0xff]  ;;  %15326 = vmatpush3.bf16.msra.mxu1 %v15899_v5  ;;  %v23083_v42 = vld [vmem:[#allocation69_spill] sm:$0xff] }
 0x39e   : > { %v20635_v15 = vpop.f32.mrf.mxu0  ;;  %v8840_v7 = vcombine.high %v23071_v50, %v23070_v48  ;;  %v23073_v35 = vld [vmem:[#allocation28_spill] sm:$0xff] }
 0x39f   : > { %v23078_v50 = vld [vmem:[#allocation68_spill] sm:$0xff] }
 0x3a0   : > { %v20641_v37 = vpop.f32.mrf.mxu0 }
 0x3a3   : > { %11034 = vmatmul.mubr.bf16.gmra.mxu1 %v8285_v57 }
 0x3a4   : > { %11041 = vmatprep.mubr.bf16.mxu1 %v8474_v43  ;;  %v23072_v43 = vld [vmem:[#allocation10_spill] sm:$0xff] }
 0x3a5   : > { %v9029_v21 = vcombine.high %v23073_v35, %v23072_v43  ;;  %v23080_v35 = vld [vmem:[#allocation70_spill] sm:$0xff] }
 0x3a6   : > { %v14947_v51 = vpop.f32.mrf.mxu1 }
 0x3a8   : > { %v14948_v31 = vpop.f32.mrf.mxu1 }
 0x3a9   : > { %v20637_v38 = vadd.f32 %v14948_v31, %v14947_v51  ;;  %v23076_v31 = vld [vmem:[#allocation67_spill] sm:$0xff] }
 0x3aa   : > { %v14950_v60 = vpop.f32.mrf.mxu1 }
 0x3ab   : > { %11042 = vmatmul.mubr.bf16.gmra.mxu1 %v8470_v47  ;;  %v23074_v47 = vld [vmem:[#allocation64_spill] sm:$0xff] }
 0x3ac   : > { %11049 = vmatprep.mubr.bf16.mxu1 %v8659_v28  ;;  %v14951_v3 = vpop.f32.mrf.mxu1  ;;  %v9025_v23 = vcombine.high %v23075_v33, %v23074_v47 }
 0x3ad   : > { %v20645_v20 = vadd.f32 %v14951_v3, %v14950_v60  ;;  %v23077_v60 = vld [vmem:[#allocation65_spill] sm:$0xff] }
 0x3ae   : > { %v15123_v19 = vpop.f32.mrf.mxu0  ;;  %v9214_v58 = vcombine.high %v23077_v60, %v23076_v31  ;;  %v15900_v60 = vld [vmem:[%s22412_s5 + $0xf0] sm:$0xff]  }
 0x3af   : > { %15327 = vmatprep.subr.bf16.mxu1 %v15900_v60  ;;  %v23087_v60 = vld [vmem:[#allocation77_spill] sm:$0xff] }
 0x3b0   : > { %v15124_v14 = vpop.f32.mrf.mxu0 }
 0x3b1   : > { %v20647_v57 = vadd.f32 %v15124_v14, %v15123_v19 }
 0x3b2   : > { %v20653_v24 = vpop.f32.mrf.mxu0 }
 0x3b3   : > { %11050 = vmatmul.mubr.bf16.gmra.mxu1 %v8655_v27 }
 0x3b4   : > { %11057 = vmatprep.mubr.bf16.mxu1 %v8844_v63  ;;  %v20657_v51 = vpop.f32.mrf.mxu0 }
 0x3bb   : > { %11058 = vmatmul.mubr.bf16.gmra.mxu1 %v8840_v7  ;;  %v23079_v7 = vld [vmem:[#allocation66_spill] sm:$0xff] }
 0x3bc   : > { %11065 = vmatprep.mubr.bf16.mxu1 %v9029_v21  ;;  %v9210_v43 = vcombine.high %v23079_v7, %v23078_v50  ;;  %v23081_v21 = vld [vmem:[#allocation7_spill] sm:$0xff] }
 0x3bd   : > { %v14953_v28 = vpop.f32.mrf.mxu1  ;;  %v9399_v47 = vcombine.high %v23081_v21, %v23080_v35  ;;  %v15902_v21 = vld [vmem:[%s22412_s5 + $0x78] sm:$0xff]  }
 0x3be   : > { %15261 = vmatprep.subr.bf16.mxu0 %v15902_v21 }
 0x3bf   : > { %v14954_v1 = vpop.f32.mrf.mxu1 }
 0x3c0   : > { %v20661_v27 = vadd.f32 %v14954_v1, %v14953_v28  ;;  %v23082_v1 = vld [vmem:[#allocation71_spill] sm:$0xff] }
 0x3c1   : > { %v20669_v3 = vpop.f32.mrf.mxu1  ;;  %v9395_v5 = vcombine.high %v23083_v42, %v23082_v1  ;;  %v23088_v42 = vld [vmem:[#allocation75_spill] sm:$0xff] }
 0x3c2   : > { %v15129_v63 = vpop.f32.mrf.mxu0 }
 0x3c3   : > { %11066 = vmatmul.mubr.bf16.gmra.mxu1 %v9025_v23  ;;  %v20671_v14 = vpop.f32.mrf.mxu1 }
 0x3c4   : > { %11073 = vmatprep.mubr.bf16.mxu1 %v9214_v58  ;;  %v15130_v19 = vpop.f32.mrf.mxu0  ;;  %v15901_v58 = vld [vmem:[%s22412_s5 + $0xb0] sm:$0xff]  }
 0x3c5   : > { %v20673_v48 = vadd.f32 %v15130_v19, %v15129_v63  ;;  %v23084_v19 = vld [vmem:[#allocation72_spill] sm:$0xff]  ;;  %15328 = vmatpush3.bf16.msra.mxu1 %v15901_v58  ;;  %v9769_v58 = vcombine.high %v23088_v42, %v23087_v60 }
 0x3c6   : > { %v14959_v33 = vpop.f32.mrf.mxu1  ;;  %v20679_v28 = vpop.f32.mrf.mxu0  ;;  %v9584_v50 = vcombine.high %v23084_v19, %v20060_v11  ;;  %v15905_v19 = vld [vmem:[%s22412_s5 + $0xa8] sm:$0xff]  }
 0x3c8   : > { %v14960_v23 = vpop.f32.mrf.mxu1  ;;  %v20691_v63 = vpop.f32.mrf.mxu0 }
 0x3c9   : > { %v20681_v31 = vadd.f32 %v14960_v23, %v14959_v33  ;;  %v23085_v33 = vld [vmem:[#allocation74_spill] sm:$0xff]  ;;  %v23086_v23 = vld [vmem:[#allocation73_spill] sm:$0xff] }
 0x3ca   : > { %v9580_v1 = vcombine.high %v23086_v23, %v23085_v33  ;;  %v20705_v11 = vpop.f32.mrf.mxu1  ;;  %v23090_v33 = vld [vmem:[#allocation76_spill] sm:$0xff] }
 0x3cb   : > { %11074 = vmatmul.mubr.bf16.gmra.mxu1 %v9210_v43 }
 0x3cc   : > { %11081 = vmatprep.mubr.bf16.mxu1 %v9399_v47  ;;  %v15903_v47 = vld [vmem:[%s22412_s5 + $0x38] sm:$0xff]  }
 0x3cd   : > { %15262 = vmatpush3.bf16.msra.mxu0 %v15903_v47  ;;  %v23091_v47 = vld [vmem:[#allocation35_spill] sm:$0xff] }
 0x3d1   : > { %v15135_v7 = vpop.f32.mrf.mxu0 }
 0x3d3   : > { %11082 = vmatmul.mubr.bf16.gmra.mxu1 %v9395_v5  ;;  %v15136_v43 = vpop.f32.mrf.mxu0  ;;  %v15904_v5 = vld [vmem:[%s22412_s5 + $0xe8] sm:$0xff]  }
 0x3d4   : > { %11089 = vmatprep.mubr.bf16.mxu1 %v9584_v50  ;;  %v20695_v35 = vadd.f32 %v15136_v43, %v15135_v7  ;;  %v20715_v50 = vpop.f32.mrf.mxu1  ;;  %15329 = vmatprep.subr.bf16.mxu1 %v15904_v5  ;;  %v23089_v43 = vld [vmem:[#allocation78_spill] sm:$0xff] }
 0x3d5   : > { %v20717_v7 = vpop.f32.mrf.mxu0  ;;  %15330 = vmatpush3.bf16.msra.mxu1 %v15905_v19  ;;  %v9765_v21 = vcombine.high %v23090_v33, %v23089_v43  ;;  %v9950_v43 = vcombine.high %v23098_v22, %v23097_v44  ;;  %v15906_v22 = vld [vmem:[%s22412_s5 + $0x70] sm:$0xff]  }
 0x3d6   : > { %v15907_v44 = vld [vmem:[%s22412_s5 + $0x30] sm:$0xff]   ;;  %15263 = vmatprep.subr.bf16.mxu0 %v15906_v22  ;;  %v15911_v22 = vld [vmem:[%s22412_s5 + $0xa0] sm:$0xff]  }
 0x3d7   : > { %v20723_v42 = vpop.f32.mrf.mxu0  ;;  %15264 = vmatpush3.bf16.msra.mxu0 %v15907_v44 }
 0x3d8   : > { %23093 = vst [vmem:[#allocation15_spill] sm:$0xff] %v20723_v42 }
 0x3db   : > { %11090 = vmatmul.mubr.bf16.gmra.mxu1 %v9580_v1  ;;  %v23092_v1 = vld [vmem:[#allocation62_spill] sm:$0xff] }
 0x3dc   : > { %11097 = vmatprep.mubr.bf16.mxu1 %v9769_v58  ;;  %v9954_v60 = vcombine.high %v23092_v1, %v23091_v47  ;;  %v23099_v47 = vld [vmem:[#allocation34_spill] sm:$0xff] }
 0x3dd   : > { %v14965_v23 = vpop.f32.mrf.mxu1  ;;  %v10053_v1 = vcombine.high %v23099_v47, %v23099_v47 }
 0x3df   : > { %v14966_v18 = vpop.f32.mrf.mxu1 }
 0x3e0   : > { %v20725_v36 = vadd.f32 %v14966_v18, %v14965_v23 }
 0x3e1   : > { %v20727_v58 = vpop.f32.mrf.mxu1 }
 0x3e2   : > { %23094 = vst [vmem:[#allocation23_spill] sm:$0xff] %v20725_v36  ;;  %23095 = vst [vmem:[#allocation31_spill] sm:$0xff] %v20727_v58 }
 0x3e3   : > { %11098 = vmatmul.mubr.bf16.gmra.mxu1 %v9765_v21  ;;  %v15141_v5 = vpop.f32.mrf.mxu0  ;;  %v20729_v40 = vpop.f32.mrf.mxu1 }
 0x3e4   : > { %11105 = vmatprep.mubr.bf16.mxu1 %v9954_v60  ;;  %23096 = vst [vmem:[#allocation18_spill] sm:$0xff] %v20729_v40 }
 0x3e5   : > { %v15142_v19 = vpop.f32.mrf.mxu0  ;;  %v14971_v2 = vpop.f32.mrf.mxu1 }
 0x3e6   : > { %v20733_v33 = vadd.f32 %v15142_v19, %v15141_v5  ;;  %v23100_v5 = vld [vmem:[#allocation4_spill] sm:$0xff] }
 0x3e7   : > { %v15144_v21 = vpop.f32.mrf.mxu0  ;;  %v14972_v60 = vpop.f32.mrf.mxu1  ;;  %v10051_v19 = vcombine.high %v23100_v5, %v23100_v5  ;;  %v15912_v5 = vld [vmem:[%s22412_s5 + $0x60] sm:$0xff]  }
 0x3e8   : > { %v20737_v23 = vadd.f32 %v14972_v60, %v14971_v2  ;;  %v15908_v60 = vld [vmem:[%s22412_s5 + $0x68] sm:$0xff]  }
 0x3e9   : > { %v15145_v18 = vpop.f32.mrf.mxu0  ;;  %v14974_v40 = vpop.f32.mrf.mxu1  ;;  %15265 = vmatprep.subr.bf16.mxu0 %v15908_v60 }
 0x3ea   : > { %v20739_v32 = vadd.f32 %v15145_v18, %v15144_v21 }
 0x3eb   : > { %11106 = vmatmul.mubr.bf16.gmra.mxu1 %v9950_v43  ;;  %v15147_v58 = vpop.f32.mrf.mxu0  ;;  %v14975_v36 = vpop.f32.mrf.mxu1 }
 0x3ec   : > { %11113 = vmatprep.mubr.bf16.mxu1 %v10053_v1 }
 0x3ed   : > { %v15148_v42 = vpop.f32.mrf.mxu0 }
 0x3ee   : > { %v20749_v43 = vadd.f32 %v15148_v42, %v15147_v58  ;;  %v15909_v42 = vld [vmem:[%s22412_s5 + $0x28] sm:$0xff]   ;;  %v15910_v58 = vld [vmem:[%s22412_s5 + $0xe0] sm:$0xff]  }
 0x3ef   : > { %v15150_v47 = vpop.f32.mrf.mxu0  ;;  %15331 = vmatprep.subr.bf16.mxu1 %v15910_v58  ;;  %15266 = vmatpush3.bf16.msra.mxu0 %v15909_v42  ;;  %v15915_v42 = vld [vmem:[%s22412_s5 + $0x18] sm:$0xff]  }
 0x3f0   : > { %23101 = vst [vmem:[#allocation13_spill] sm:$0xff] %v20749_v43  ;;  %v14993_v2 = vpop.f32.mrf.mxu1  ;;  %15332 = vmatpush3.bf16.msra.mxu1 %v15911_v22  ;;  %15267 = vmatprep.subr.bf16.mxu0 %v15912_v5 }
 0x3f1   : > { %v15151_v36 = vpop.f32.mrf.mxu0 }
 0x3f2   : > { %v14994_v40 = vpop.f32.mrf.mxu1  ;;  %v15914_v36 = vld [vmem:[%s22412_s5 + $0x58] sm:$0xff]  }
 0x3f3   : > { %11114 = vmatmul.mubr.bf16.gmra.mxu1 %v10051_v19  ;;  %v20751_v1 = vadd.f32 %v14994_v40, %v14993_v2  ;;  %v15913_v2 = vld [vmem:[%s22412_s5 + $0x20] sm:$0xff]  }
 0x3f4   : > { %v20753_v21 = vpop.f32.mrf.mxu1  ;;  %15268 = vmatpush3.bf16.msra.mxu0 %v15913_v2  ;;  %v20802_v2 = vld [vmem:[%s22411_s4] ss:$0 sm:$0xff] }
 0x3f5   : > { %v20769_v44 = vpop.f32.mrf.mxu0  ;;  %15269 = vmatprep.subr.bf16.mxu0 %v15914_v36 }
 0x3f6   : > { %v20764_v18 = vpop.f32.mrf.mxu1  ;;  %23102 = vst [vmem:[#allocation39_spill] sm:$0xff] %v20769_v44 }
 0x3f7   : > { %v20777_v47 = vpop.f32.mrf.mxu0 }
 0x3f8   : > { %v14999_v19 = vpop.f32.mrf.mxu1  ;;  %23103 = vst [vmem:[#allocation25_spill] sm:$0xff] %v20777_v47  ;;  %15270 = vmatpush3.bf16.msra.mxu0 %v15915_v42  ;;  %v15916_v47 = vld [vmem:[%s22412_s5 + $0xd8] sm:$0xff]   ;;  %v14922_v42 = vadd.f32 %v20501_v9, %v20484_v25  ;;  %v15921_v25 = vld [vmem:[%s22412_s5 + $0x90] sm:$0xff]  }
 0x3f9   : > { %v20789_v22 = vpop.f32.mrf.mxu0  ;;  %15333 = vmatprep.subr.bf16.mxu1 %v15916_v47  ;;  %v15922_v47 = vld [vmem:[%s22412_s5 + $0x48] sm:$0xff]  }
 0x3fa   : > { %v15000_v40 = vpop.f32.mrf.mxu1  ;;  %23106 = vst [vmem:[#allocation29_spill] sm:$0xff] %v20789_v22  ;;  %v10660_v22 = vadd.f32 %v20562_v0, %v20802_v2 }
 0x3fb   : > { %v20782_v60 = vadd.f32 %v15000_v40, %v14999_v19  ;;  %v15917_v19 = vld [vmem:[%s22412_s5 + $0x98] sm:$0xff]   ;;  %v20804_v40 = vpop.f32.mrf.mxu0 }
 0x3fc   : > { %v20784_v58 = vpop.f32.mrf.mxu1  ;;  %23108 = vst [vmem:[#allocation53_spill] sm:$0xff] %v20804_v40  ;;  %15334 = vmatpush3.bf16.msra.mxu1 %v15917_v19  ;;  %v15920_v40 = vld [vmem:[%s22412_s5 + $0x10] sm:$0xff]   ;;  %v15923_v19 = vld [vmem:[%s22412_s5 + $0xc8] sm:$0xff]  }
 0x3fd   : > { %23104 = vst [vmem:[#allocation17_spill] sm:$0xff] %v20782_v60  ;;  %23105 = vst [vmem:[#allocation38_spill] sm:$0xff] %v20784_v58  ;;  %v15919_v58 = vld [vmem:[%s22412_s5 + $0xd0] sm:$0xff]  }
 0x3fe   : > { %v20791_v5 = vpop.f32.mrf.mxu1  ;;  %15335 = vmatprep.subr.bf16.mxu1 %v15919_v58 }
 0x3ff   : > { %23107 = vst [vmem:[#allocation8_spill] sm:$0xff] %v20791_v5  ;;  %v15918_v5 = vld [vmem:[%s22412_s5 + $0x50] sm:$0xff]  }
 0x400   : > { %v15005_v44 = vpop.f32.mrf.mxu1  ;;  %15271 = vmatprep.subr.bf16.mxu0 %v15918_v5  ;;  %v15924_v5 = vld [vmem:[%s22412_s5 + $0x8] sm:$0xff]   ;;  %15336 = vmatpush3.bf16.msra.mxu1 %v15921_v25  ;;  %v15927_v25 = vld [vmem:[%s22412_s5 + $0xc0] sm:$0xff]  }
 0x401   : > { %15272 = vmatpush3.bf16.msra.mxu0 %v15920_v40  ;;  %15337 = vmatprep.subr.bf16.mxu1 %v15923_v19 }
 0x402   : > { %v15006_v36 = vpop.f32.mrf.mxu1  ;;  %15273 = vmatprep.subr.bf16.mxu0 %v15922_v47 }
 0x403   : > { %v15007_v43 = vadd.f32 %v15006_v36, %v15005_v44  ;;  %v10663_v36 = vadd.f32 %v14922_v42, %v20802_v2  ;;  %v15098_v42 = vadd.f32 %v20507_v10, %v20486_v56  ;;  %v15929_v56 = vld [vmem:[%s22412_s5 + $0x80] sm:$0xff]  }
 0x404   : > { %v15008_v60 = vpop.f32.mrf.mxu1 }
 0x405   : > { %v10788_v0 = vadd.f32 %v15007_v43, %v10660_v22  ;;  %15274 = vmatpush3.bf16.msra.mxu0 %v15924_v5 }
 0x406   : > { %v20822_v9 = vpop.f32.mrf.mxu0  ;;  %v15009_v44 = vpop.f32.mrf.mxu1 }
 0x407   : > { %23109 = vst [vmem:[#allocation50_spill] sm:$0xff] %v20822_v9  ;;  %v15010_v43 = vadd.f32 %v15009_v44, %v15008_v60  ;;  %v20832_v22 = vadd.f32 %v20566_v55, %v10788_v0  ;;  %v15925_v9 = vld [vmem:[%s22412_s5 + $0x88] sm:$0xff]   ;;  %v15926_v0 = vld [vmem:[%s22412_s5 + $0x40] sm:$0xff]  }
 0x408   : > { %v20837_v58 = vpop.f32.mrf.mxu0  ;;  %v15928_v44 = vld [vmem:[%s22412_s5] sm:$0xff]   ;;  %15338 = vmatpush3.bf16.msra.mxu1 %v15925_v9  ;;  %15275 = vmatprep.subr.bf16.mxu0 %v15926_v0 }
 0x409   : > { %v10791_v60 = vadd.f32 %v15010_v43, %v10663_v36  ;;  %15339 = vmatprep.subr.bf16.mxu1 %v15927_v25  ;;  %15276 = vmatpush3.bf16.msra.mxu0 %v15928_v44  ;;  %v10668_v36 = vadd.f32 %v20569_v34, %v20802_v2  ;;  %v14928_v43 = vadd.f32 %v20548_v53, %v20534_v59 }
 0x40a   : > { %v20844_v55 = vpop.f32.mrf.mxu0  ;;  %v15104_v34 = vadd.f32 %v20550_v4, %v20538_v54 }
 0x40b   : > { %23110 = vst [vmem:[#allocation40_spill] sm:$0xff] %v20844_v55  ;;  %v20846_v40 = vadd.f32 %v15098_v42, %v10791_v60  ;;  %v10671_v0 = vadd.f32 %v14928_v43, %v20802_v2 }
 0x40c   : > { %v20860_v10 = vpop.f32.mrf.mxu0  ;;  %15340 = vmatpush3.bf16.msra.mxu1 %v15929_v56 }
 0x40d   : > { %23111 = vst [vmem:[#allocation32_spill] sm:$0xff] %v20846_v40  ;;  %23112 = vst [vmem:[#allocation48_spill] sm:$0xff] %v20860_v10  ;;  %v15011_v47 = vpop.f32.mrf.mxu1 }
 0x40f   : > { %v15012_v19 = vpop.f32.mrf.mxu1 }
 0x410   : > { %v15013_v5 = vadd.f32 %v15012_v19, %v15011_v47  ;;  %v10676_v19 = vadd.f32 %v20574_v12, %v20802_v2  ;;  %v15110_v12 = vadd.f32 %v20592_v17, %v20586_v8 }
 0x411   : > { %v20866_v9 = vpop.f32.mrf.mxu0  ;;  %v15014_v42 = vpop.f32.mrf.mxu1 }
 0x412   : > { %v10796_v60 = vadd.f32 %v15013_v5, %v10668_v36  ;;  %v14934_v36 = vadd.f32 %v20590_v61, %v20582_v41 }
 0x413   : > { %v20868_v55 = vpop.f32.mrf.mxu0  ;;  %v15015_v10 = vpop.f32.mrf.mxu1 }
 0x414   : > { %v15016_v25 = vadd.f32 %v15015_v10, %v15014_v42  ;;  %v20872_v44 = vadd.f32 %v20572_v6, %v10796_v60  ;;  %v15930_v6 = vld [vmem:[%s22412_s5 + $0x178] sm:$0xff]  }
 0x415   : > { %v20876_v53 = vpop.f32.mrf.mxu0  ;;  %15389 = vmatprep.subr.bf16.mxu0 %v15930_v6 }
 0x416   : > { %v10799_v40 = vadd.f32 %v15016_v25, %v10671_v0  ;;  %v15017_v59 = vpop.f32.mrf.mxu1 }
 0x417   : > { %v20887_v54 = vpop.f32.mrf.mxu0 }
 0x418   : > { %v15018_v56 = vpop.f32.mrf.mxu1  ;;  %v20878_v47 = vadd.f32 %v15104_v34, %v10799_v40  ;;  %v10679_v40 = vadd.f32 %v14934_v36, %v20802_v2 }
 0x419   : > { %v15019_v10 = vadd.f32 %v15018_v56, %v15017_v59 }
 0x41a   : > { %v15020_v43 = vpop.f32.mrf.mxu1 }
 0x41b   : > { %v10804_v4 = vadd.f32 %v15019_v10, %v10676_v19  ;;  %v10684_v19 = vadd.f32 %v20594_v62, %v20802_v2 }
 0x41c   : > { %v15021_v5 = vpop.f32.mrf.mxu1 }
 0x41d   : > { %v15022_v42 = vadd.f32 %v15021_v5, %v15020_v43  ;;  %v20891_v60 = vadd.f32 %v20576_v26, %v10804_v4  ;;  %v14940_v26 = vadd.f32 %v20610_v29, %v20606_v13 }
 0x41f   : > { %v10807_v61 = vadd.f32 %v15022_v42, %v10679_v40  ;;  %v10687_v43 = vadd.f32 %v14940_v26, %v20802_v2  ;;  %v15116_v40 = vadd.f32 %v20617_v45, %v20608_v49 }
 0x420   : > { %v20895_v41 = vpop.f32.mrf.mxu0 }
 0x421   : > { %v20899_v34 = vadd.f32 %v15110_v12, %v10807_v61 }
 0x422   : > { %v20897_v0 = vpop.f32.mrf.mxu0  ;;  %v15023_v25 = vpop.f32.mrf.mxu1 }
 0x424   : > { %v20901_v59 = vpop.f32.mrf.mxu0  ;;  %v15024_v56 = vpop.f32.mrf.mxu1 }
 0x425   : > { %23113 = vst [vmem:[#allocation46_spill] sm:$0xff] %v20901_v59  ;;  %v15025_v36 = vadd.f32 %v15024_v56, %v15023_v25  ;;  %v10692_v25 = vadd.f32 %v20619_v16, %v20802_v2  ;;  %v14946_v56 = vadd.f32 %v20629_v46, %v20627_v39  ;;  %v15122_v39 = vadd.f32 %v20641_v37, %v20635_v15 }
 0x426   : > { %v15026_v10 = vpop.f32.mrf.mxu1  ;;  %v20907_v8 = vpop.f32.mrf.mxu0 }
 0x427   : > { %v10812_v17 = vadd.f32 %v15025_v36, %v10684_v19 }
 0x428   : > { %v15027_v6 = vpop.f32.mrf.mxu1 }
 0x429   : > { %v15028_v4 = vadd.f32 %v15027_v6, %v15026_v10  ;;  %v20911_v5 = vadd.f32 %v20600_v52, %v10812_v17  ;;  %v10695_v10 = vadd.f32 %v14946_v56, %v20802_v2 }
 0x42b   : > { %v20915_v42 = vpop.f32.mrf.mxu0  ;;  %v10815_v62 = vadd.f32 %v15028_v4, %v10687_v43  ;;  %v15029_v12 = vpop.f32.mrf.mxu1 }
 0x42c   : > { %23114 = vst [vmem:[#allocation26_spill] sm:$0xff] %v20915_v42  ;;  %v23169_v42 = vld [vmem:[#allocation50_spill] sm:$0xff] }
 0x42d   : > { %v20917_v13 = vpop.f32.mrf.mxu0  ;;  %v15030_v29 = vpop.f32.mrf.mxu1  ;;  %v20919_v61 = vadd.f32 %v15116_v40, %v10815_v62  ;;  %v10700_v62 = vadd.f32 %v20637_v38, %v20802_v2 }
 0x42e   : > { %23115 = vst [vmem:[#allocation27_spill] sm:$0xff] %v20917_v13  ;;  %v15031_v52 = vadd.f32 %v15030_v29, %v15029_v12 }
 0x42f   : > { %v20925_v19 = vpop.f32.mrf.mxu0  ;;  %v15032_v26 = vpop.f32.mrf.mxu1 }
 0x430   : > { %23116 = vst [vmem:[#allocation49_spill] sm:$0xff] %v20925_v19  ;;  %v10820_v49 = vadd.f32 %v15031_v52, %v10692_v25 }
 0x431   : > { %v20927_v45 = vpop.f32.mrf.mxu0  ;;  %v15033_v36 = vpop.f32.mrf.mxu1 }
 0x432   : > { %23117 = vst [vmem:[#allocation47_spill] sm:$0xff] %v20927_v45  ;;  %v15034_v17 = vadd.f32 %v15033_v36, %v15032_v26  ;;  %v20931_v6 = vadd.f32 %v20625_v30, %v10820_v49  ;;  %v10703_v26 = vadd.f32 %v20645_v20, %v20802_v2  ;;  %v15128_v36 = vadd.f32 %v20657_v51, %v20653_v24  ;;  %v15938_v24 = vld [vmem:[%s22412_s5 + $0x1f8] sm:$0xff]  }
 0x433   : > { %v20933_v43 = vpop.f32.mrf.mxu0  ;;  %v15035_v16 = vpop.f32.mrf.mxu1  ;;  %15453 = vmatprep.subr.bf16.mxu1 %v15938_v24 }
 0x434   : > { %23118 = vst [vmem:[#allocation37_spill] sm:$0xff] %v20933_v43  ;;  %v10823_v46 = vadd.f32 %v15034_v17, %v10695_v10  ;;  %v10708_v17 = vadd.f32 %v20661_v27, %v20802_v2  ;;  %v15134_v27 = vadd.f32 %v20691_v63, %v20679_v28 }
 0x435   : > { %v20937_v4 = vpop.f32.mrf.mxu0  ;;  %v15036_v40 = vpop.f32.mrf.mxu1 }
 0x436   : > { %23119 = vst [vmem:[#allocation24_spill] sm:$0xff] %v20937_v4  ;;  %v15037_v12 = vadd.f32 %v15036_v40, %v15035_v16  ;;  %v20941_v29 = vadd.f32 %v15122_v39, %v10823_v46  ;;  %v14958_v16 = vadd.f32 %v20671_v14, %v20669_v3 }
 0x437   : > { %v15648_v25 = vpop.f32.mrf.mxu0  ;;  %v15038_v56 = vpop.f32.mrf.mxu1 }
 0x438   : > { %v10828_v30 = vadd.f32 %v15037_v12, %v10700_v62 }
 0x439   : > { %v15039_v52 = vpop.f32.mrf.mxu1 }
 0x43a   : > { %v15040_v49 = vadd.f32 %v15039_v52, %v15038_v56  ;;  %v20946_v15 = vadd.f32 %v20647_v57, %v10828_v30  ;;  %v10711_v57 = vadd.f32 %v14958_v16, %v20802_v2  ;;  %v10716_v56 = vadd.f32 %v20681_v31, %v20802_v2 }
 0x43b   : > { %v15041_v37 = vpop.f32.mrf.mxu1  ;;  %v14964_v30 = vadd.f32 %v20715_v50, %v20705_v11  ;;  %v23124_v11 = vld [vmem:[#allocation23_spill] sm:$0xff] }
 0x43c   : > { %v10831_v10 = vadd.f32 %v15040_v49, %v10703_v26  ;;  %v10724_v50 = vadd.f32 %v23124_v11, %v20802_v2  ;;  %v23134_v11 = vld [vmem:[#allocation11_spill] sm:$0xff] }
 0x43d   : > { %v15042_v38 = vpop.f32.mrf.mxu1 }
 0x43e   : > { %v15043_v39 = vadd.f32 %v15042_v38, %v15041_v37  ;;  %v20954_v46 = vadd.f32 %v15128_v36, %v10831_v10  ;;  %v10719_v36 = vadd.f32 %v14964_v30, %v20802_v2  ;;  %v23123_v38 = vld [vmem:[#allocation15_spill] sm:$0xff] }
 0x43f   : > { %v15044_v20 = vpop.f32.mrf.mxu1 }
 0x440   : > { %v10836_v40 = vadd.f32 %v15043_v39, %v10708_v17  ;;  %v15140_v17 = vadd.f32 %v23123_v38, %v20717_v7  ;;  %v23125_v39 = vld [vmem:[#allocation31_spill] sm:$0xff]  ;;  %v23132_v38 = vld [vmem:[#allocation5_spill] sm:$0xff] }
 0x441   : > { %v15045_v62 = vpop.f32.mrf.mxu1 }
 0x442   : > { %v15046_v12 = vadd.f32 %v15045_v62, %v15044_v20  ;;  %v20958_v25 = vadd.f32 %v20673_v48, %v10836_v40  ;;  %v23126_v20 = vld [vmem:[#allocation18_spill] sm:$0xff] }
 0x443   : > { %v15047_v51 = vpop.f32.mrf.mxu1  ;;  %v14970_v40 = vadd.f32 %v23126_v20, %v23125_v39 }
 0x444   : > { %23120 = vst [vmem:[#allocation57_spill] sm:$0xff] %v20958_v25  ;;  %v10839_v3 = vadd.f32 %v15046_v12, %v10711_v57 }
 0x445   : > { %v15048_v14 = vpop.f32.mrf.mxu1 }
 0x446   : > { %v15049_v52 = vadd.f32 %v15048_v14, %v15047_v51  ;;  %v20969_v48 = vadd.f32 %v15134_v27, %v10839_v3  ;;  %v23129_v14 = vld [vmem:[#allocation44_spill] sm:$0xff] }
 0x447   : > { %v15050_v26 = vpop.f32.mrf.mxu1 }
 0x448   : > { %23121 = vst [vmem:[#allocation56_spill] sm:$0xff] %v20969_v48  ;;  %v10844_v49 = vadd.f32 %v15049_v52, %v10716_v56  ;;  %v23130_v56 = vld [vmem:[#allocation16_spill] sm:$0xff] }
 0x449   : > { %v15051_v37 = vpop.f32.mrf.mxu1  ;;  %v14907_v30 = vadd.f32 %v23130_v56, %v23129_v14  ;;  %v23141_v14 = vld [vmem:[#allocation8_spill] sm:$0xff] }
 0x44a   : > { %v15052_v10 = vadd.f32 %v15051_v37, %v15050_v26  ;;  %v20973_v28 = vadd.f32 %v20695_v35, %v10844_v49  ;;  %v10727_v35 = vadd.f32 %v14970_v40, %v20802_v2  ;;  %v10732_v49 = vadd.f32 %v20737_v23, %v20802_v2  ;;  %v23136_v40 = vld [vmem:[#allocation19_spill] sm:$0xff] }
 0x44b   : > { %v15053_v63 = vpop.f32.mrf.mxu1  ;;  %v14998_v23 = vadd.f32 %v20764_v18, %v20753_v21 }
 0x44c   : > { %23122 = vst [vmem:[#allocation36_spill] sm:$0xff] %v20973_v28  ;;  %v10847_v31 = vadd.f32 %v15052_v10, %v10719_v36 }
 0x44d   : > { %v15054_v16 = vpop.f32.mrf.mxu1 }
 0x44e   : > { %v15055_v62 = vadd.f32 %v15054_v16, %v15053_v63  ;;  %v20981_v57 = vadd.f32 %v15140_v17, %v10847_v31  ;;  %v10644_v63 = vadd.f32 %v14907_v30, %v20802_v2  ;;  %v23133_v17 = vld [vmem:[#allocation45_spill] sm:$0xff] }
 0x44f   : > { %v15056_v12 = vpop.f32.mrf.mxu1 }
 0x450   : > { %23127 = vst [vmem:[#allocation58_spill] sm:$0xff] %v20981_v57  ;;  %v10852_v24 = vadd.f32 %v15055_v62, %v10724_v50  ;;  %v23135_v50 = vld [vmem:[#allocation52_spill] sm:$0xff]  ;;  %v10772_v20 = vadd.f32 %v20751_v1, %v10644_v63  ;;  %v23137_v62 = vld [vmem:[#allocation55_spill] sm:$0xff] }
 0x451   : > { %v15057_v51 = vpop.f32.mrf.mxu1  ;;  %v14913_v39 = vadd.f32 %v23135_v50, %v23134_v11  ;;  %v23147_v50 = vld [vmem:[#allocation22_spill] sm:$0xff] }
 0x452   : > { %v15058_v27 = vadd.f32 %v15057_v51, %v15056_v12  ;;  %v20985_v3 = vadd.f32 %v20733_v33, %v10852_v24  ;;  %v14910_v33 = vadd.f32 %v23133_v17, %v23132_v38  ;;  %v23138_v51 = vld [vmem:[#allocation42_spill] sm:$0xff]  ;;  %v23144_v38 = vld [vmem:[#allocation17_spill] sm:$0xff] }
 0x453   : > { %v15059_v7 = vpop.f32.mrf.mxu1 }
 0x454   : > { %23128 = vst [vmem:[#allocation9_spill] sm:$0xff] %v20985_v3  ;;  %v10855_v52 = vadd.f32 %v15058_v27, %v10727_v35  ;;  %v10647_v24 = vadd.f32 %v14910_v33, %v20802_v2  ;;  %v23139_v35 = vld [vmem:[#allocation30_spill] sm:$0xff] }
 0x455   : > { %v15060_v26 = vpop.f32.mrf.mxu1  ;;  %v15083_v27 = vadd.f32 %v23139_v35, %v23138_v51  ;;  %v23151_v51 = vld [vmem:[#allocation41_spill] sm:$0xff]  ;;  %v23152_v35 = vld [vmem:[#allocation54_spill] sm:$0xff] }
 0x456   : > { %v15061_v37 = vadd.f32 %v15060_v26, %v15059_v7  ;;  %v20992_v10 = vadd.f32 %v20739_v32, %v10855_v52  ;;  %v14916_v32 = vadd.f32 %v23137_v62, %v23136_v40  ;;  %v23140_v7 = vld [vmem:[#allocation38_spill] sm:$0xff]  ;;  %v10652_v52 = vadd.f32 %v14913_v39, %v20802_v2  ;;  %v23148_v40 = vld [vmem:[#allocation51_spill] sm:$0xff]  ;;  %v23149_v62 = vld [vmem:[#allocation25_spill] sm:$0xff] }
 0x457   : > { %v15062_v36 = vpop.f32.mrf.mxu1  ;;  %v15004_v56 = vadd.f32 %v23141_v14, %v23140_v7  ;;  %v10775_v26 = vadd.f32 %v14998_v23, %v10647_v24  ;;  %v10900_v1 = vadd.f32 %v15083_v27, %v10772_v20  ;;  %v15089_v39 = vadd.f32 %v23148_v40, %v23147_v50 }
 0x458   : > { %23131 = vst [vmem:[#allocation59_spill] sm:$0xff] %v20992_v10  ;;  %v10860_v31 = vadd.f32 %v15061_v37, %v10732_v49  ;;  %v10655_v21 = vadd.f32 %v14916_v32, %v20802_v2  ;;  %v23142_v37 = vld [vmem:[#allocation20_spill] sm:$0xff]  ;;  %v23143_v36 = vld [vmem:[#allocation43_spill] sm:$0xff]  ;;  %v10780_v17 = vadd.f32 %v23144_v38, %v10652_v52  ;;  %v21022_v24 = vstv %s14293_s22  ;;  %s13889_s22 = sshll.u32 %s23298_s25, 5 }
 0x459   : > { %v15063_v16 = vpop.f32.mrf.mxu1  ;;  %v15086_v63 = vadd.f32 %v23143_v36, %v23142_v37  ;;  %23150 = vst [vmem:[#allocation14_spill] sm:$0xff] %v21022_v24  ;;  %v15092_v27 = vadd.f32 %v23152_v35, %v23151_v51  ;;  %vm11755_vm6 = vcmp.ge.s32.totalorder %v21022_v24, 0  ;;  %vm11765_vm2 = vcmp.lt.s32.totalorder %v21022_v24, 16  ;;  %s298_s24 = sadd.s32 %s13889_s22, %s23300_s21 }
 0x45a   : > { %v23145_v16 = vld [vmem:[#allocation13_spill] sm:$0xff]  ;;  %v10783_v23 = vadd.f32 %v15004_v56, %v10655_v21  ;;  %v21030_v56 = vadd.s32 1, %v21022_v24  ;;  %v21042_v50 = vadd.s32 4, %v21022_v24  ;;  %v21045_v40 = vadd.s32 5, %v21022_v24  ;;  %vm21068_vm7 = vmand %vm11755_vm6, %vm11765_vm2  ;;  %s13890_s25 = sshll.u32 %s298_s24, 3 }
 0x45b   : > { %v15169_v12 = vpop.f32.mrf.mxu1  ;;  %v21017_v11 = vadd.f32 %v23145_v16, %v10860_v31  ;;  %v10903_v2 = vadd.f32 %v15086_v63, %v10775_v26  ;;  %v21035_v63 = vadd.s32 2, %v21022_v24  ;;  %v21039_v16 = vadd.s32 3, %v21022_v24  ;;  %s22299_s9 = scalar_lea.vmem %s22414_s7, %s13890_s25 }
 0x45c   : > { %v10911_v37 = vadd.f32 %v15092_v27, %v10783_v23  ;;  %23156 = vst [vmem:[#allocation60_spill] sm:$0xff] %v21045_v40  ;;  %v21049_v35 = vadd.s32 6, %v21022_v24  ;;  %vm11756_vm10 = vcmp.ge.s32.totalorder %v21030_v56, 0  ;;  %vm11766_vm11 = vcmp.lt.s32.totalorder %v21030_v56, 16 }
 0x45d   : > { %v15170_v30 = vpop.f32.mrf.mxu1  ;;  %23146 = vst [vmem:[#allocation12_spill] sm:$0xff] %v21017_v11  ;;  %vm21178_vm13 = vmand %vm11756_vm10, %vm11766_vm11  ;;  %vm11757_vm5 = vcmp.ge.s32.totalorder %v21035_v63, 0  ;;  %vm11767_vm6 = vcmp.lt.s32.totalorder %v21035_v63, 16 }
 0x45e   : > { %v15171_v49 = vadd.f32 %v15170_v30, %v15169_v12  ;;  %v23153_v30 = vld [vmem:[#allocation3_spill] sm:$0xff]  ;;  %23157 = vst [vmem:[#allocation33_spill] sm:$0xff] %v21049_v35 }
 0x45f   : > { %v15172_v18 = vpop.f32.mrf.mxu1 }
 0x460   : > { %v11028_v33 = vadd.f32 %v15171_v49, %v10900_v1  ;;  %v10908_v1 = vadd.f32 %v15089_v39, %v10780_v17  ;;  %v23155_v17 = vld [vmem:[#allocation2_spill] sm:$0xff] }
 0x461   : > { %v15173_v20 = vpop.f32.mrf.mxu1  ;;  %vm11785_vm3 = vcmp.ge.s32.totalorder %v23155_v17, 1 }
 0x462   : > { %v11156_v12 = vadd.f32 %v23149_v62, %v11028_v33  ;;  %v15174_v32 = vadd.f32 %v15173_v20, %v15172_v18  ;;  %v23154_v18 = vld [vmem:[#allocation53_spill] sm:$0xff]  ;;  %vm21084_vm8 = vmand %vm21068_vm7, %vm11785_vm3 }
 0x463   : > { %v15175_v7 = vpop.f32.mrf.mxu1  ;;  %vm14367_vm12 = vmpackc.low %vm21068_vm7, %vm21084_vm8 }
 0x464   : > { %v11273_v14 = vcombine.high %v11156_v12, %v11156_v12  ;;  %v11280_v52 = vrot.slane %v11156_v12, %v23153_v30  ;;  %v11031_v31 = vadd.f32 %v15174_v32, %v10903_v2  ;;  %vm21209_vm14 = vmand %vm21178_vm13, %vm11785_vm3 }
 0x465   : > { %v15176_v49 = vpop.f32.mrf.mxu1  ;;  %vm14370_vm2 = vmpackc.low %vm21178_vm13, %vm21209_vm14 }
 0x466   : > { %v11287_v26 = vrot.slane %v11273_v14, %v23153_v30  ;;  %v11288_v21 = vcombine.high %v11280_v52, %v11280_v52  ;;  %v11159_v36 = vadd.f32 %v23154_v18, %v11031_v31  ;;  %v15177_v38 = vadd.f32 %v15176_v49, %v15175_v7  ;;  %v23158_v18 = vld [vmem:[#allocation39_spill] sm:$0xff] }
 0x467   : > { %v15178_v33 = vpop.f32.mrf.mxu1  ;;  %v11851_v23 = vmax.f32 %v11280_v52, 0.0  ;;  %v21054_v52 = vadd.s32 7, %v21022_v24 }
 0x468   : > { %v11289_v39 = vcombine.high %v11287_v26, %v11287_v26  ;;  %v11852_v20 = vmax.f32 %v11288_v21, 0.0  ;;  %v11290_v62 = vcombine.high %v11159_v36, %v11159_v36  ;;  %v11853_v12 = vmax.f32 %v11287_v26, 0.0 }
 0x469   : > { %v11297_v2 = vrot.slane %v11159_v36, %v23153_v30  ;;  %v11036_v32 = vadd.f32 %v15177_v38, %v10908_v1  ;;  %v15179_v51 = vpop.f32.mrf.mxu1  ;;  %23159 = vst [vmem:[#allocation10_spill] sm:$0xff] %v21054_v52  ;;  %v21057_v26 = vadd.s32 8, %v21022_v24 }
 0x46a   : > { %v11854_v27 = vmax.f32 %v11289_v39, 0.0  ;;  %v12031_v7 = vcombine.low %v11851_v23, %v11852_v20  ;;  %v11304_v14 = vrot.slane %v11290_v62, %v23153_v30  ;;  %v15180_v31 = vadd.f32 %v15179_v51, %v15178_v33  ;;  %v23161_v51 = vld [vmem:[#allocation21_spill] sm:$0xff] }
 0x46b   : > { %v11305_v49 = vcombine.high %v11297_v2, %v11297_v2  ;;  %v11164_v43 = vadd.f32 %v23158_v18, %v11036_v32  ;;  %v15181_v11 = vpop.f32.mrf.mxu1  ;;  %23160 = vst [vmem:[#allocation28_spill] sm:$0xff] %v21057_v26  ;;  %v11855_v38 = vmax.f32 %v11297_v2, 0.0  ;;  %vm11820_vm4 = vcmp.lt.s32.totalorder %v23161_v51, 17  ;;  %v15963_v51 = vld [vmem:[%s22412_s5 + $0x230] sm:$0xff]  }
 0x46c   : > { %v12032_v1 = vcombine.low %v11853_v12, %v11854_v27  ;;  %v12039_v21 = vrot.slane %v12031_v7, %v23153_v30  ;;  %v11306_v36 = vcombine.high %v11304_v14, %v11304_v14  ;;  %v11039_v33 = vadd.f32 %v15180_v31, %v10911_v37  ;;  %vm11823_vm9 = vmand %vm21068_vm7, %vm11820_vm4 }
 0x46d   : > { %v11856_v39 = vmax.f32 %v11305_v49, 0.0  ;;  %v11307_v23 = vcombine.high %v11164_v43, %v11164_v43  ;;  %v11314_v20 = vrot.slane %v11164_v43, %v23153_v30  ;;  %v15182_v62 = vpop.f32.mrf.mxu1  ;;  %v11857_v18 = vmax.f32 %v11304_v14, 0.0  ;;  %v23164_v14 = vld [vmem:[#allocation29_spill] sm:$0xff]  ;;  %vm21222_vm15 = vmand %vm21178_vm13, %vm11820_vm4 }
 0x46e   : > { %v12046_v32 = vrot.slane %v12032_v1, %v23153_v30  ;;  %v11858_v10 = vmax.f32 %v11306_v36, 0.0  ;;  %v15183_v4 = vadd.f32 %v15182_v62, %v15181_v11  ;;  %v11167_v31 = vadd.f32 %v23164_v14, %v11039_v33  ;;  %v23167_v14 = vld [vmem:[#allocation32_spill] sm:$0xff] }
 0x46f   : > { %v12048_v19 = vcombine.low %v11855_v38, %v11856_v39  ;;  %v11321_v12 = vrot.slane %v11307_v23, %v23153_v30  ;;  %v11322_v27 = vcombine.high %v11314_v20, %v11314_v20  ;;  %v11859_v7 = vmax.f32 %v11314_v20, 0.0  ;;  %v15184_v26 = vpop.f32.mrf.mxu1 }
 0x470   : > { %v21072_v37 = vcombine.low %v12039_v21, %v12046_v32  ;;  %v12049_v2 = vcombine.low %v11857_v18, %v11858_v10  ;;  %v11044_v11 = vadd.f32 %v15183_v4, %v20832_v22  ;;  %v11324_v62 = vcombine.high %v11167_v31, %v11167_v31 }
 0x471   : > { %v12056_v49 = vrot.slane %v12048_v19, %v23153_v30  ;;  %v11323_v1 = vcombine.high %v11321_v12, %v11321_v12  ;;  %v11860_v36 = vmax.f32 %v11322_v27, 0.0  ;;  %v11861_v38 = vmax.f32 %v11321_v12, 0.0  ;;  %v15185_v39 = vpop.f32.mrf.mxu1 }
 0x472   : > { %v12063_v23 = vrot.slane %v12049_v2, %v23153_v30  ;;  %v12071_v20 = vrot.slane %v11859_v7, %v23153_v30  ;;  %v11331_v24 = vrot.slane %v11167_v31, %v23153_v30  ;;  %v11172_v4 = vadd.f32 %v20837_v58, %v11044_v11 }
 0x473   : > { %v11862_v22 = vmax.f32 %v11323_v1, 0.0  ;;  %v21088_v19 = vcombine.low %v11860_v36, %v11861_v38  ;;  %v15186_v21 = vadd.f32 %v15185_v39, %v15184_v26  ;;  %v15187_v33 = vpop.f32.mrf.mxu1  ;;  %v11338_v18 = vrot.slane %v11324_v62, %v23153_v30 }
 0x474   : > { %v21091_v32 = vcombine.low %v12056_v49, %v12063_v23  ;;  %v11339_v12 = vcombine.high %v11331_v24, %v11331_v24  ;;  %v11863_v27 = vmax.f32 %v11331_v24, 0.0  ;;  %v11341_v7 = vcombine.high %v11172_v4, %v11172_v4 }
 0x475   : > { %v11348_v2 = vrot.slane %v11172_v4, %v23153_v30  ;;  %v11047_v31 = vadd.f32 %v15186_v21, %v23167_v14  ;;  %v15188_v52 = vpop.f32.mrf.mxu1  ;;  %v12471_v1 = vsel %vm21084_vm8, %v21072_v37, 0.0  ;;  %v11340_v26 = vcombine.high %v11338_v18, %v11338_v18  ;;  %v23168_v21 = vld [vmem:[#allocation48_spill] sm:$0xff] }
 0x476   : > { %v11864_v11 = vmax.f32 %v11339_v12, 0.0  ;;  %v11865_v49 = vmax.f32 %v11338_v18, 0.0  ;;  %v21101_v36 = vcombine.low %v11862_v22, %v11863_v27  ;;  %v21104_v24 = vrot.slane %v11341_v7, %v23153_v30 }
 0x477   : > { %v11356_v38 = vcombine.high %v11348_v2, %v11348_v2  ;;  %v11867_v39 = vmax.f32 %v11348_v2, 0.0  ;;  %v15190_v23 = vpop.f32.mrf.mxu1  ;;  %v11866_v62 = vmax.f32 %v11340_v26, 0.0  ;;  %v11175_v14 = vadd.f32 %v23168_v21, %v11047_v31 }
 0x478   : > { %v21106_v4 = vcombine.low %v11864_v11, %v11865_v49  ;;  %v15189_v3 = vadd.f32 %v15188_v52, %v15187_v33  ;;  %v11357_v22 = vcombine.high %v21104_v24, %v21104_v24  ;;  %v12472_v7 = vsel %vm21068_vm7, %v21091_v32, 0.0  ;;  %vm21332_vm7 = vmand %vm11757_vm5, %vm11767_vm6 }
 0x479   : > { %v21115_v18 = vmax.f32 %v11356_v38, 0.0  ;;  %v15191_v27 = vpop.f32.mrf.mxu1  ;;  %v21121_v2 = vcombine.low %v11866_v62, %v11867_v39  ;;  %v11358_v52 = vcombine.high %v11175_v14, %v11175_v14  ;;  %v11365_v33 = vrot.slane %v11175_v14, %v23153_v30  ;;  %vm21369_vm10 = vmand %vm21332_vm7, %vm11785_vm3 }
 0x47a   : > { %v11052_v31 = vadd.f32 %v15189_v3, %v20872_v44  ;;  %v21125_v26 = vmax.f32 %v11357_v22, 0.0  ;;  %v15192_v11 = vadd.f32 %v15191_v27, %v15190_v23  ;;  %v12473_v38 = vsel %vm11823_vm9, %v12071_v20, 0.0  ;;  %vm21400_vm11 = vmand %vm21332_vm7, %vm11820_vm4 }
 0x47b   : > { %v15193_v49 = vpop.f32.mrf.mxu1  ;;  %v21127_v21 = vpack.c.bf16 %v12472_v7, %v12471_v1  ;;  %v11372_v12 = vrot.slane %v11358_v52, %v23153_v30  ;;  %v11373_v58 = vcombine.high %v11365_v33, %v11365_v33  ;;  %v11871_v57 = vmax.f32 %v11365_v33, 0.0 }
 0x47c   : > { %v11180_v28 = vadd.f32 %v23169_v42, %v11052_v31  ;;  %v11055_v39 = vadd.f32 %v15192_v11, %v20878_v47  ;;  %v21134_v3 = vpack.c.bf16 %v12473_v38, %v12473_v38  ;;  %v23170_v42 = vld [vmem:[#allocation40_spill] sm:$0xff]  ;;  %v12097_v56 = vrot.slane %v21106_v4, %v23153_v30 }
 0x47d   : > { %v15194_v44 = vpop.f32.mrf.mxu1  ;;  %v12522_v23 = vshrl.u32 %v21127_v21, 16  ;;  %v12524_v20 = vshll.u32 %v21127_v21, 16  ;;  %v11374_v1 = vcombine.high %v11372_v12, %v11372_v12  ;;  %v11872_v62 = vmax.f32 %v11373_v58, 0.0 }
 0x47e   : > { %v11873_v14 = vmax.f32 %v11372_v12, 0.0  ;;  %v11375_v22 = vcombine.high %v11180_v28, %v11180_v28  ;;  %v11382_v27 = vrot.slane %v11180_v28, %v23153_v30  ;;  %v11183_v7 = vadd.f32 %v23170_v42, %v11055_v39 }
 0x47f   : > { %v15195_v52 = vadd.f32 %v15194_v44, %v15193_v49  ;;  %v15196_v33 = vpop.f32.mrf.mxu1  ;;  %v12526_v31 = vrot.slane %v12524_v20, 1  ;;  %v11874_v35 = vmax.f32 %v11374_v1, 0.0  ;;  %v21140_v47 = vcombine.low %v11871_v57, %v11872_v62 }
 0x480   : > { %v21143_v11 = vrot.slane %v11375_v22, %v23153_v30  ;;  %v12529_v38 = vshll.u32 %v21134_v3, 16  ;;  %v11390_v45 = vcombine.high %v11382_v27, %v11382_v27  ;;  %v11875_v48 = vmax.f32 %v11382_v27, 0.0 }
 0x481   : > { %v11392_v58 = vcombine.high %v11183_v7, %v11183_v7  ;;  %v11399_v12 = vrot.slane %v11183_v7, %v23153_v30  ;;  %v15197_v13 = vpop.f32.mrf.mxu1  ;;  %v21147_v28 = vcombine.low %v11873_v14, %v11874_v35  ;;  %v11060_v57 = vadd.f32 %v15195_v52, %v20891_v60 }
 0x482   : > { %v11391_v49 = vcombine.high %v21143_v11, %v21143_v11  ;;  %v11877_v39 = vmax.f32 %v21143_v11, 0.0  ;;  %v11876_v44 = vmax.f32 %v11390_v45, 0.0  ;;  %v12527_v7 = vor.u32 %v12526_v31, %v12522_v23  ;;  %v15931_v45 = vld [vmem:[%s22412_s5 + $0x138] sm:$0xff]   ;;  %v15932_v31 = vld [vmem:[%s22412_s5 + $0x170] sm:$0xff]  }
 0x483   : > { %v11406_v20 = vrot.slane %v11392_v58, %v23153_v30  ;;  %v11407_v1 = vcombine.high %v11399_v12, %v11399_v12  ;;  %v11879_v62 = vmax.f32 %v11399_v12, 0.0  ;;  %v15199_v22 = vpop.f32.mrf.mxu1  ;;  %v11188_v42 = vadd.f32 %v20868_v55, %v11060_v57 }
 0x484   : > { %v11878_v27 = vmax.f32 %v11391_v49, 0.0  ;;  %v12531_v25 = vrot.slane %v12529_v38, 1  ;;  %v21155_v35 = vcombine.low %v11875_v48, %v11876_v44  ;;  %v12642_v12 = vrot.slane %v21134_v3, 1 }
 0x485   : > { %v11408_v14 = vcombine.high %v11406_v20, %v11406_v20  ;;  %v11880_v40 = vmax.f32 %v11407_v1, 0.0  ;;  %v11881_v59 = vmax.f32 %v11406_v20, 0.0  ;;  %v15200_v60 = vpop.f32.mrf.mxu1  ;;  %v11409_v55 = vcombine.high %v11188_v42, %v11188_v42 }
 0x486   : > { %v21164_v52 = vcombine.low %v11878_v27, %v11879_v62  ;;  %v11416_v23 = vrot.slane %v11188_v42, %v23153_v30  ;;  %v12532_v48 = vsel %vm445_vm1, %v12527_v7, %v12531_v25  ;;  %v12080_v25 = vrot.slane %v21088_v19, %v23153_v30  ;;  %v15940_v7 = vld [vmem:[%s22412_s5 + $0x158] sm:$0xff]  }
 0x487   : > { %v11882_v38 = vmax.f32 %v11408_v14, 0.0  ;;  %v21171_v58 = vcombine.low %v11880_v40, %v11881_v59  ;;  %13326 = vmatprep.mubr.bf16.mxu0 %v12532_v48  ;;  %v15202_v57 = vpop.f32.mrf.mxu1  ;;  %v11423_v44 = vrot.slane %v11409_v55, %v23153_v30  ;;  %v12087_v40 = vrot.slane %v21101_v36, %v23153_v30 }
 0x488   : > { %v11424_v20 = vcombine.high %v11416_v23, %v11416_v23  ;;  %v11883_v59 = vmax.f32 %v11416_v23, 0.0  ;;  %v23173_v3 = vpack.c.bf16 %v21091_v32, %v21072_v37  ;;  %v12104_v19 = vrot.slane %v21121_v2, %v23153_v30  ;;  %v15933_v37 = vld [vmem:[%s22412_s5 + $0x130] sm:$0xff]  }
 0x489   : > { %v15198_v1 = vadd.f32 %v15197_v13, %v15196_v33  ;;  %v12641_v62 = vrot.slane %v21127_v21, 1  ;;  %v15203_v36 = vpop.f32.mrf.mxu1  ;;  %v11425_v43 = vcombine.high %v11423_v44, %v11423_v44  ;;  %v11885_v10 = vmax.f32 %v11423_v44, 0.0  ;;  %v15934_v13 = vld [vmem:[%s22412_s5 + $0x168] sm:$0xff]  }
 0x48a   : > { %14369 = vmatmul.mubr.msk.bf16.vlgmr.msra.gmra.mxu0 %vm14367_vm12, %v23173_v3  ;;  %v11884_v32 = vmax.f32 %v11424_v20, 0.0  ;;  %v21203_v27 = vcombine.low %v11882_v38, %v11883_v59  ;;  %v12088_v2 = vcombine.low %v12080_v25, %v12087_v40  ;;  %v12105_v21 = vcombine.low %v12097_v56, %v12104_v19  ;;  %v15942_v40 = vld [vmem:[%s22412_s5 + $0x1f0] sm:$0xff]   ;;  %vm21420_vm12 = vmpackc.low %vm21332_vm7, %vm21369_vm10 }
 0x48b   : > { %15390 = vmatpush3.bf16.msra.mxu0 %v15931_v45  ;;  %v11063_v33 = vadd.f32 %v15198_v1, %v20899_v34  ;;  %v12643_v42 = vsel %vm626_vm0, %v12641_v62, %v12642_v12  ;;  %v21228_v14 = vpop.f32.mrf.mxu1  ;;  %v21230_v45 = vmax.f32 %v11425_v43, 0.0  ;;  %v15201_v34 = vadd.f32 %v15200_v60, %v15199_v22  ;;  %v15935_v22 = vld [vmem:[%s22412_s5 + $0x128] sm:$0xff]  }
 0x48c   : > { %15391 = vmatprep.subr.bf16.mxu0 %v15932_v31  ;;  %v21232_v55 = vcombine.low %v11884_v32, %v11885_v10  ;;  %v12112_v23 = vrot.slane %v21115_v18, %v23153_v30  ;;  %v12474_v48 = vsel %vm21209_vm14, %v12088_v2, 0.0  ;;  %v12475_v31 = vsel %vm21178_vm13, %v12105_v21, 0.0  ;;  %v15939_v18 = vld [vmem:[%s22412_s5 + $0x1b8] sm:$0xff]  }
 0x48d   : > { %v21244_v38 = vpack.c.bf16 %v12105_v21, %v12088_v2  ;;  %v11191_v12 = vadd.f32 %v20887_v54, %v11063_v33  ;;  %v21247_v25 = vpop.f32.mrf.mxu1  ;;  %v21255_v60 = vpack.c.bf16 %v12475_v31, %v12474_v48  ;;  %v11068_v44 = vadd.f32 %v15201_v34, %v20911_v5  ;;  %v15936_v54 = vld [vmem:[%s22412_s5 + $0x160] sm:$0xff]   ;;  %v15943_v2 = vld [vmem:[%s22412_s5 + $0x1b0] sm:$0xff]   ;;  %v15946_v34 = vld [vmem:[%s22412_s5 + $0x1e8] sm:$0xff]  }
 0x48e   : > { %v12476_v20 = vsel %vm21222_vm15, %v12112_v23, 0.0  ;;  %v15204_v59 = vadd.f32 %v15203_v36, %v15202_v57  ;;  %v23178_v56 = vmax.f32 %v21104_v24, 0.0  ;;  %vm11758_vm8 = vcmp.ge.s32.totalorder %v21039_v16, 0 }
 0x48f   : > { %15392 = vmatpush3.bf16.msra.mxu0 %v15933_v37  ;;  %14393 = vmatprep.mubr.msk.bf16.mxu1 %vm14370_vm2, %v21244_v38  ;;  %v11426_v5 = vcombine.high %v11191_v12, %v11191_v12  ;;  %v11433_v3 = vrot.slane %v11191_v12, %v23153_v30  ;;  %v21273_v57 = vpack.c.bf16 %v12476_v20, %v12476_v20  ;;  %v21280_v1 = vpop.f32.mrf.mxu1  ;;  %v12534_v36 = vshrl.u32 %v21255_v60, 16 }
 0x490   : > { %15393 = vmatprep.subr.bf16.mxu0 %v15934_v13  ;;  %v21278_v19 = vcombine.low %v23178_v56, %v21125_v26  ;;  %13424 = vmatmul.mubr.bf16.vlgmr.msra.gmra.mxu1 %v12643_v42  ;;  %v11196_v62 = vadd.f32 %v20866_v9, %v11068_v44  ;;  %v12536_v37 = vshll.u32 %v21255_v60, 16  ;;  %v11071_v43 = vadd.f32 %v15204_v59, %v20919_v61  ;;  %v15937_v9 = vld [vmem:[%s22412_s5 + $0x120] sm:$0xff]   ;;  %v15941_v56 = vld [vmem:[%s22412_s5 + $0x118] sm:$0xff]  }
 0x491   : > { %v21287_v32 = vrot.slane %v11426_v5, %v23153_v30  ;;  %v11441_v10 = vcombine.high %v11433_v3, %v11433_v3  ;;  %v11887_v13 = vmax.f32 %v11433_v3, 0.0  ;;  %v12541_v24 = vshll.u32 %v21273_v57, 16  ;;  %v21290_v26 = vpop.f32.mrf.mxu1  ;;  %15454 = vmatpush3.bf16.msra.mxu1 %v15939_v18 }
 0x492   : > { %v11443_v61 = vcombine.high %v11196_v62, %v11196_v62  ;;  %v11450_v21 = vrot.slane %v11196_v62, %v23153_v30  ;;  %v12538_v33 = vrot.slane %v12536_v37, 1  ;;  %v11199_v42 = vadd.f32 %v20876_v53, %v11071_v43  ;;  %15455 = vmatprep.subr.bf16.mxu1 %v15942_v40  ;;  %v15947_v62 = vld [vmem:[%s22412_s5 + $0x1a8] sm:$0xff]  }
 0x493   : > { %15394 = vmatpush3.bf16.msra.mxu0 %v15935_v22  ;;  %v11442_v23 = vcombine.high %v21287_v32, %v21287_v32  ;;  %v11888_v48 = vmax.f32 %v11441_v10, 0.0  ;;  %v11889_v31 = vmax.f32 %v21287_v32, 0.0  ;;  %v12543_v12 = vrot.slane %v12541_v24, 1  ;;  %v21309_v22 = vpop.f32.mrf.mxu1  ;;  %v15944_v24 = vld [vmem:[%s22412_s5 + $0x150] sm:$0xff]  }
 0x494   : > { %15395 = vmatprep.subr.bf16.mxu0 %v15936_v54  ;;  %v11457_v53 = vrot.slane %v11443_v61, %v23153_v30  ;;  %v11458_v18 = vcombine.high %v11450_v21, %v11450_v21  ;;  %v11891_v44 = vmax.f32 %v11450_v21, 0.0  ;;  %v12539_v20 = vor.u32 %v12538_v33, %v12534_v36 }
 0x495   : > { %v21312_v59 = vmax.f32 %v11442_v23, 0.0  ;;  %v21314_v54 = vcombine.low %v11887_v13, %v11888_v48  ;;  %v11460_v40 = vcombine.high %v11199_v42, %v11199_v42  ;;  %v11467_v5 = vrot.slane %v11199_v42, %v23153_v30  ;;  %v21317_v3 = vpop.f32.mrf.mxu1  ;;  %15456 = vmatpush3.bf16.msra.mxu1 %v15943_v2 }
 0x496   : > { %v11459_v36 = vcombine.high %v11457_v53, %v11457_v53  ;;  %v11892_v37 = vmax.f32 %v11458_v18, 0.0  ;;  %v11893_v43 = vmax.f32 %v11457_v53, 0.0  ;;  %v21326_v10 = vsel %vm445_vm1, %v12539_v20, %v12543_v12  ;;  %15457 = vmatprep.subr.bf16.mxu1 %v15946_v34  ;;  %v15949_v20 = vld [vmem:[%s22412_s5 + $0x1a0] sm:$0xff]  }
 0x497   : > { %15396 = vmatpush3.bf16.msra.mxu0 %v15937_v9  ;;  %vm11768_vm9 = vcmp.lt.s32.totalorder %v21039_v16, 16  ;;  %v15948_v9 = vld [vmem:[%s22412_s5 + $0x1e0] sm:$0xff]   ;;  %13334 = vmatprep.mubr.bf16.mxu0 %v21326_v10  ;;  %v11474_v63 = vrot.slane %v11460_v40, %v23153_v30  ;;  %v11475_v2 = vcombine.high %v11467_v5, %v11467_v5  ;;  %v11895_v61 = vmax.f32 %v11467_v5, 0.0  ;;  %v21348_v33 = vpop.f32.mrf.mxu1  ;;  %v15950_v40 = vld [vmem:[%s22412_s5 + $0x148] sm:$0xff]  }
 0x498   : > { %15397 = vmatprep.subr.bf16.mxu0 %v15940_v7  ;;  %v12121_v21 = vrot.slane %v21278_v19, %v23153_v30  ;;  %v11894_v42 = vmax.f32 %v11459_v36, 0.0  ;;  %v21350_v7 = vcombine.low %v11891_v44, %v11892_v37  ;;  %14372 = vmatmul.mubr.msk.bf16.gmra.mxu0 %vm14370_vm2, %v21244_v38  ;;  %v12128_v34 = vrot.slane %v21140_v47, %v23153_v30  ;;  %v15945_v47 = vld [vmem:[%s22412_s5 + $0x110] sm:$0xff]   ;;  %v15952_v37 = vld [vmem:[%s22412_s5 + $0x1d8] sm:$0xff]   ;;  %vm21480_vm13 = vmand %vm11758_vm8, %vm11768_vm9 }
 0x499   : > { %v12138_v23 = vrot.slane %v21147_v28, %v23153_v30  ;;  %v11476_v48 = vcombine.high %v11474_v63, %v11474_v63  ;;  %v11896_v19 = vmax.f32 %v11475_v2, 0.0  ;;  %v11897_v12 = vmax.f32 %v11474_v63, 0.0  ;;  %v21373_v4 = vpop.f32.mrf.mxu1  ;;  %15458 = vmatpush3.bf16.msra.mxu1 %v15947_v62  ;;  %vm21514_vm5 = vmand %vm21480_vm13, %vm11785_vm3 }
 0x49a   : > { %v21363_v53 = vrot.slane %v11895_v61, %v23153_v30  ;;  %v21378_v28 = vcombine.low %v11893_v43, %v11894_v42  ;;  %v12129_v38 = vcombine.low %v12121_v21, %v12128_v34  ;;  %v12145_v18 = vrot.slane %v21155_v35, %v23153_v30  ;;  %15459 = vmatprep.subr.bf16.mxu1 %v15948_v9  ;;  %v15956_v21 = vld [vmem:[%s22412_s5 + $0x140] sm:$0xff]   ;;  %vm21540_vm6 = vmpackc.low %vm21480_vm13, %vm21514_vm5 }
 0x49b   : > { %15398 = vmatpush3.bf16.msra.mxu0 %v15941_v56  ;;  %v12644_v44 = vrot.slane %v21255_v60, 1  ;;  %v21389_v5 = vmax.f32 %v11476_v48, 0.0  ;;  %v21391_v56 = vcombine.low %v11896_v19, %v11897_v12  ;;  %v12645_v62 = vrot.slane %v21273_v57, 1  ;;  %v21404_v36 = vpop.f32.mrf.mxu1  ;;  %v15954_v48 = vld [vmem:[%s22412_s5 + $0x1d0] sm:$0xff]   ;;  %vm21572_vm2 = vmand %vm21480_vm13, %vm11820_vm4 }
 0x49c   : > { %15399 = vmatprep.subr.bf16.mxu0 %v15944_v24  ;;  %v15207_v35 = vadd.f32 %v21247_v25, %v21228_v14  ;;  %v12146_v43 = vcombine.low %v12138_v23, %v12145_v18  ;;  %v12477_v57 = vsel %vm21369_vm10, %v12129_v38, 0.0  ;;  %v15210_v14 = vadd.f32 %v21290_v26, %v21280_v1  ;;  %v15951_v26 = vld [vmem:[%s22412_s5 + $0x108] sm:$0xff]   ;;  %v15966_v24 = vld [vmem:[%s22412_s5 + $0x218] sm:$0xff]  }
 0x49d   : > { %v12153_v25 = vrot.slane %v11877_v39, %v23153_v30  ;;  %v21425_v9 = vsel %vm626_vm0, %v12644_v44, %v12645_v62  ;;  %v12162_v1 = vrot.slane %v21164_v52, %v23153_v30  ;;  %v12169_v11 = vrot.slane %v21171_v58, %v23153_v30  ;;  %v21432_v39 = vpop.f32.mrf.mxu1  ;;  %15460 = vmatpush3.bf16.msra.mxu1 %v15949_v20  ;;  %v15953_v58 = vld [vmem:[%s22412_s5 + $0x198] sm:$0xff]  }
 0x49e   : > { %v11076_v63 = vadd.f32 %v15207_v35, %v20931_v6  ;;  %v12478_v2 = vsel %vm21332_vm7, %v12146_v43, 0.0  ;;  %v21439_v61 = vpack.c.bf16 %v12146_v43, %v12129_v38  ;;  %v11079_v6 = vadd.f32 %v15210_v14, %v20941_v29  ;;  %15461 = vmatprep.subr.bf16.mxu1 %v15952_v37  ;;  %v21499_v62 = vld [vmem:[%s22412_s5 + $0x238] sm:$0xff]   ;;  %v15958_v14 = vld [vmem:[%s22412_s5 + $0x1c8] sm:$0xff]  }
 0x49f   : > { %15400 = vmatpush3.bf16.msra.mxu0 %v15945_v47  ;;  %v12479_v52 = vsel %vm21400_vm11, %v12153_v25, 0.0  ;;  %v21450_v42 = vpack.c.bf16 %v12478_v2, %v12477_v57  ;;  %v21455_v29 = vcombine.low %v12162_v1, %v12169_v11  ;;  %v21457_v23 = vpop.f32.mrf.mxu1  ;;  %v12186_v12 = vrot.slane %v21232_v55, %v23153_v30  ;;  %v15957_v55 = vld [vmem:[%s22412_s5 + $0x100] sm:$0xff]  }
 0x4a0   : > { %15401 = vmatprep.subr.bf16.mxu0 %v15950_v40  ;;  %v11204_v13 = vadd.f32 %v20897_v0, %v11076_v63  ;;  %v21453_v34 = vpack.c.bf16 %v12479_v52, %v12479_v52  ;;  %14396 = vmatprep.mubr.msk.bf16.mxu1 %vm21420_vm12, %v21439_v61  ;;  %v11207_v19 = vadd.f32 %v20907_v8, %v11079_v6  ;;  %vm11759_vm14 = vcmp.ge.s32.totalorder %v21042_v50, 0  ;;  %v15955_v40 = vld [vmem:[%s22412_s5 + $0x190] sm:$0xff]  }
 0x4a1   : > { %v12179_v0 = vrot.slane %v21203_v27, %v23153_v30  ;;  %v15213_v49 = vadd.f32 %v21317_v3, %v21309_v22  ;;  %13432 = vmatmul.mubr.bf16.gmra.mxu1 %v21425_v9  ;;  %v12546_v18 = vshrl.u32 %v21450_v42, 16  ;;  %v12548_v44 = vshll.u32 %v21450_v42, 16  ;;  %v21486_v27 = vpop.f32.mrf.mxu1 }
 0x4a2   : > { %v11477_v47 = vcombine.high %v11204_v13, %v11204_v13  ;;  %v11484_v38 = vrot.slane %v11204_v13, %v23153_v30  ;;  %vm11769_vm15 = vcmp.lt.s32.totalorder %v21042_v50, 16  ;;  %v11494_v22 = vcombine.high %v11207_v19, %v11207_v19  ;;  %15462 = vmatpush3.bf16.msra.mxu1 %v15953_v58 }
 0x4a3   : > { %15402 = vmatpush3.bf16.msra.mxu0 %v15951_v26  ;;  %v11501_v3 = vrot.slane %v11207_v19, %v23153_v30  ;;  %v12553_v16 = vshll.u32 %v21453_v34, 16  ;;  %v12187_v20 = vcombine.low %v12179_v0, %v12186_v12  ;;  %v12550_v43 = vrot.slane %v12548_v44, 1  ;;  %v21502_v57 = vpop.f32.mrf.mxu1  ;;  %15463 = vmatprep.subr.bf16.mxu1 %v15954_v48  ;;  %vm21612_vm7 = vmand %vm11759_vm14, %vm11769_vm15  ;;  %v15968_v44 = vld [vmem:[%s22412_s5 + $0x208] sm:$0xff]  }
 0x4a4   : > { %15403 = vmatprep.subr.bf16.mxu0 %v15956_v21  ;;  %v11491_v35 = vrot.slane %v11477_v47, %v23153_v30  ;;  %v11492_v60 = vcombine.high %v11484_v38, %v11484_v38  ;;  %v11899_v37 = vmax.f32 %v11484_v38, 0.0  ;;  %v21508_v25 = vrot.slane %v11494_v22, %v23153_v30  ;;  %vm21634_vm10 = vmand %vm21612_vm7, %vm11785_vm3 }
 0x4a5   : > { %v11509_v63 = vcombine.high %v11501_v3, %v11501_v3  ;;  %v11903_v1 = vmax.f32 %v11501_v3, 0.0  ;;  %v12555_v11 = vrot.slane %v12553_v16, 1  ;;  %v21521_v21 = vpop.f32.mrf.mxu1  ;;  %v12551_v0 = vor.u32 %v12550_v43, %v12546_v18  ;;  %vm21659_vm11 = vmpackc.low %vm21612_vm7, %vm21634_vm10 }
 0x4a6   : > { %v11493_v2 = vcombine.high %v11491_v35, %v11491_v35  ;;  %v11900_v6 = vmax.f32 %v11492_v60, 0.0  ;;  %v11901_v52 = vmax.f32 %v11491_v35, 0.0  ;;  %v21519_v58 = vcombine.low %v21389_v5, %v11899_v37  ;;  %15464 = vmatpush3.bf16.msra.mxu1 %v15955_v40  ;;  %v15960_v35 = vld [vmem:[%s22412_s5 + $0x1c0] sm:$0xff]  }
 0x4a7   : > { %15404 = vmatpush3.bf16.msra.mxu0 %v15957_v55  ;;  %v11510_v13 = vcombine.high %v21508_v25, %v21508_v25  ;;  %v21525_v48 = vmax.f32 %v11509_v63, 0.0  ;;  %v11905_v19 = vmax.f32 %v21508_v25, 0.0  ;;  %v12480_v5 = vsel %vm21514_vm5, %v21455_v29, 0.0  ;;  %v21544_v18 = vpop.f32.mrf.mxu1  ;;  %15465 = vmatprep.subr.bf16.mxu1 %v15958_v14  ;;  %v15959_v55 = vld [vmem:[%s22412_s5 + $0x188] sm:$0xff]   ;;  %v23219_v25 = vld [vmem:[#allocation49_spill] sm:$0xff] }
 0x4a8   : > { %15649 = vmatprep.subr.bf16.mxu0 %v21499_v62  ;;  %v11902_v12 = vmax.f32 %v11493_v2, 0.0  ;;  %v21529_v47 = vcombine.low %v11900_v6, %v11901_v52  ;;  %v12481_v38 = vsel %vm21480_vm13, %v12187_v20, 0.0  ;;  %v21552_v3 = vsel %vm445_vm1, %v12551_v0, %v12555_v11  ;;  %v23197_v52 = vld [vmem:[#allocation46_spill] sm:$0xff]  ;;  %vm11835_vm13 = vmand %vm21612_vm7, %vm11820_vm4 }
 0x4a9   : > { %v21549_v22 = vmax.f32 %v11510_v13, 0.0  ;;  %v21554_v16 = vpack.c.bf16 %v12481_v38, %v12480_v5  ;;  %v21557_v40 = vpack.c.bf16 %v12187_v20, %v21455_v29  ;;  %13342 = vmatprep.mubr.bf16.mxu0 %v21552_v3  ;;  %v12647_v37 = vrot.slane %v21450_v42, 1  ;;  %v21576_v20 = vpop.f32.mrf.mxu1  ;;  %v23198_v5 = vld [vmem:[#allocation60_spill] sm:$0xff] }
 0x4aa   : > { %v21562_v60 = vcombine.low %v11902_v12, %v11903_v1  ;;  %v12648_v43 = vrot.slane %v21453_v34, 1  ;;  %v11084_v14 = vadd.f32 %v15213_v49, %v20946_v15  ;;  %14375 = vmatmul.mubr.msk.bf16.gmra.mxu0 %vm21420_vm12, %v21439_v61  ;;  %v15216_v15 = vadd.f32 %v21373_v4, %v21348_v33  ;;  %15466 = vmatpush3.bf16.msra.mxu1 %v15959_v55 }
 0x4ab   : > { %14399 = vmatprep.mubr.msk.bf16.mxu1 %vm21540_vm6, %v21557_v40  ;;  %v12194_v42 = vrot.slane %v21230_v45, %v23153_v30  ;;  %v12558_v34 = vshrl.u32 %v21554_v16, 16  ;;  %v12560_v49 = vshll.u32 %v21554_v16, 16  ;;  %v12196_v1 = vcombine.low %v11889_v31, %v21312_v59  ;;  %v21599_v33 = vpop.f32.mrf.mxu1  ;;  %v15961_v45 = vld [vmem:[%s22412_s5 + $0x180] sm:$0xff]   ;;  %15467 = vmatprep.subr.bf16.mxu1 %v15960_v35 }
 0x4ac   : > { %v21591_v8 = vsel %vm626_vm0, %v12647_v37, %v12648_v43  ;;  %v11212_v63 = vadd.f32 %v20895_v41, %v11084_v14  ;;  %v12203_v11 = vrot.slane %v21314_v54, %v23153_v30  ;;  %v11087_v4 = vadd.f32 %v15216_v15, %v20954_v46 }
 0x4ad   : > { %13440 = vmatmul.mubr.bf16.gmra.mxu1 %v21591_v8  ;;  %v12482_v41 = vsel %vm21572_vm2, %v12194_v42, 0.0  ;;  %v12562_v26 = vrot.slane %v12560_v49, 1  ;;  %v12220_v31 = vrot.slane %v21350_v7, %v23153_v30  ;;  %v12210_v2 = vrot.slane %v12196_v1, %v23153_v30  ;;  %v21620_v6 = vpop.f32.mrf.mxu1 }
 0x4ae   : > { %v11511_v59 = vcombine.high %v11212_v63, %v11212_v63  ;;  %v11518_v54 = vrot.slane %v11212_v63, %v23153_v30  ;;  %v12508_v46 = vpack.c.bf16 %v12482_v41, %v12482_v41  ;;  %v11215_v13 = vadd.f32 %v23197_v52, %v11087_v4  ;;  %15468 = vmatpush3.bf16.msra.mxu1 %v15961_v45 }
 0x4af   : > { %v12563_v0 = vor.u32 %v12562_v26, %v12558_v34  ;;  %v12227_v50 = vrot.slane %v21378_v28, %v23153_v30  ;;  %v15219_v12 = vadd.f32 %v21432_v39, %v21404_v36  ;;  %vm11760_vm8 = vcmp.ge.s32.totalorder %v23198_v5, 0  ;;  %v21638_v28 = vpop.f32.mrf.mxu1 }
 0x4b0   : > { %vm11770_vm9 = vcmp.lt.s32.totalorder %v23198_v5, 16  ;;  %v11525_v7 = vrot.slane %v11511_v59, %v23153_v30  ;;  %v11526_v38 = vcombine.high %v11518_v54, %v11518_v54  ;;  %v11907_v55 = vmax.f32 %v11518_v54, 0.0 }
 0x4b1   : > { %v12565_v35 = vshll.u32 %v12508_v46, 16  ;;  %v11528_v36 = vcombine.high %v11215_v13, %v11215_v13  ;;  %v11535_v39 = vrot.slane %v11215_v13, %v23153_v30  ;;  %v12211_v43 = vcombine.low %v12203_v11, %v12210_v2  ;;  %v21641_v49 = vpop.f32.mrf.mxu1  ;;  %vm21711_vm14 = vmand %vm11760_vm8, %vm11770_vm9 }
 0x4b2   : > { %v12228_v14 = vcombine.low %v12220_v31, %v12227_v50  ;;  %v11527_v29 = vcombine.high %v11525_v7, %v11525_v7  ;;  %v11908_v15 = vmax.f32 %v11526_v38, 0.0  ;;  %v11909_v42 = vmax.f32 %v11525_v7, 0.0  ;;  %v23203_v38 = vld [vmem:[#allocation57_spill] sm:$0xff]  ;;  %vm21729_vm15 = vmand %vm21711_vm14, %vm11785_vm3 }
 0x4b3   : > { %v12567_v34 = vrot.slane %v12565_v35, 1  ;;  %v21644_v63 = vrot.slane %v11528_v36, %v23153_v30  ;;  %v11543_v1 = vcombine.high %v11535_v39, %v11535_v39  ;;  %v11911_v4 = vmax.f32 %v11535_v39, 0.0  ;;  %v21663_v54 = vpop.f32.mrf.mxu1  ;;  %vm21748_vm5 = vmpackc.low %vm21711_vm14, %vm21729_vm15 }
 0x4b4   : > { %v12483_v41 = vsel %vm21634_vm10, %v12211_v43, 0.0  ;;  %v11910_v45 = vmax.f32 %v11527_v29, 0.0  ;;  %v21648_v26 = vcombine.low %v11907_v55, %v11908_v15  ;;  %v12484_v31 = vsel %vm21612_vm7, %v12228_v14, 0.0  ;;  %v23204_v15 = vld [vmem:[#allocation27_spill] sm:$0xff]  ;;  %vm11838_vm8 = vmand %vm21711_vm14, %vm11820_vm4 }
 0x4b5   : > { %v21651_v11 = vsel %vm445_vm1, %v12563_v0, %v12567_v34  ;;  %v11544_v2 = vcombine.high %v21644_v63, %v21644_v63  ;;  %v11912_v52 = vmax.f32 %v11543_v1, 0.0  ;;  %v11913_v13 = vmax.f32 %v21644_v63, 0.0  ;;  %v21684_v37 = vpop.f32.mrf.mxu1 }
 0x4b6   : > { %13350 = vmatprep.mubr.bf16.mxu0 %v21651_v11  ;;  %v21669_v0 = vpack.c.bf16 %v12484_v31, %v12483_v41  ;;  %v21675_v50 = vcombine.low %v11909_v42, %v11910_v45  ;;  %v21680_v7 = vpack.c.bf16 %v12228_v14, %v12211_v43  ;;  %v11092_v55 = vadd.f32 %v15219_v12, %v23203_v38 }
 0x4b7   : > { %14378 = vmatmul.mubr.msk.bf16.gmra.mxu0 %vm21540_vm6, %v21557_v40  ;;  %v12650_v35 = vrot.slane %v21554_v16, 1  ;;  %v11914_v36 = vmax.f32 %v11544_v2, 0.0  ;;  %v21686_v39 = vcombine.low %v11911_v4, %v11912_v52  ;;  %v12651_v29 = vrot.slane %v12508_v46, 1  ;;  %v15238_v42 = vpop.f32.mrf.mxu1  ;;  %v23205_v46 = vld [vmem:[#allocation56_spill] sm:$0xff]  ;;  %v23208_v52 = vld [vmem:[#allocation47_spill] sm:$0xff] }
 0x4b8   : > { %v15222_v32 = vadd.f32 %v21486_v27, %v21457_v23  ;;  %14402 = vmatprep.mubr.msk.bf16.mxu1 %vm21659_vm11, %v21680_v7  ;;  %v11220_v43 = vadd.f32 %v23204_v15, %v11092_v55  ;;  %v12485_v14 = vsel %vm11835_vm13, %v21363_v53, 0.0  ;;  %v12570_v12 = vshrl.u32 %v21669_v0, 16 }
 0x4b9   : > { %v12572_v16 = vshll.u32 %v21669_v0, 16  ;;  %v21698_v34 = vsel %vm626_vm0, %v12650_v35, %v12651_v29  ;;  %v21701_v4 = vpack.c.bf16 %v12485_v14, %v12485_v14  ;;  %v12244_v23 = vrot.slane %v21391_v56, %v23153_v30  ;;  %v15239_v2 = vpop.f32.mrf.mxu1 }
 0x4ba   : > { %v11095_v1 = vadd.f32 %v15222_v32, %v23205_v46  ;;  %v11545_v27 = vcombine.high %v11220_v43, %v11220_v43  ;;  %v11552_v41 = vrot.slane %v11220_v43, %v23153_v30  ;;  %13448 = vmatmul.mubr.bf16.gmra.mxu1 %v21698_v34  ;;  %v12251_v31 = vrot.slane %v21519_v58, %v23153_v30 }
 0x4bb   : > { %v12574_v53 = vrot.slane %v12572_v16, 1  ;;  %v12577_v38 = vshll.u32 %v21701_v4, 16  ;;  %v12261_v55 = vrot.slane %v21529_v47, %v23153_v30  ;;  %v12268_v35 = vrot.slane %v21562_v60, %v23153_v30 }
 0x4bc   : > { %v11223_v56 = vadd.f32 %v23208_v52, %v11095_v1  ;;  %v11559_v5 = vrot.slane %v11545_v27, %v23153_v30  ;;  %v11560_v29 = vcombine.high %v11552_v41, %v11552_v41  ;;  %v11915_v32 = vmax.f32 %v11552_v41, 0.0 }
 0x4bd   : > { %v12575_v15 = vor.u32 %v12574_v53, %v12570_v12  ;;  %v12579_v58 = vrot.slane %v12577_v38, 1  ;;  %v12252_v47 = vcombine.low %v12244_v23, %v12251_v31 }
 0x4be   : > { %v11562_v43 = vcombine.high %v11223_v56, %v11223_v56  ;;  %v11569_v14 = vrot.slane %v11223_v56, %v23153_v30  ;;  %v11561_v42 = vcombine.high %v11559_v5, %v11559_v5  ;;  %v11916_v60 = vmax.f32 %v11560_v29, 0.0 }
 0x4bf   : > { %v11917_v46 = vmax.f32 %v11559_v5, 0.0  ;;  %v21733_v1 = vcombine.low %v11914_v36, %v11915_v32  ;;  %v21737_v53 = vsel %vm445_vm1, %v12575_v15, %v12579_v58  ;;  %v12269_v56 = vcombine.low %v12261_v55, %v12268_v35  ;;  %v23213_v55 = vld [vmem:[#allocation33_spill] sm:$0xff]  ;;  %v23214_v58 = vld [vmem:[#allocation36_spill] sm:$0xff] }
 0x4c0   : > { %v11576_v12 = vrot.slane %v11562_v43, %v23153_v30  ;;  %v11577_v27 = vcombine.high %v11569_v14, %v11569_v14  ;;  %v11919_v41 = vmax.f32 %v11569_v14, 0.0  ;;  %v11918_v2 = vmax.f32 %v11561_v42, 0.0  ;;  %13358 = vmatprep.mubr.bf16.mxu0 %v21737_v53 }
 0x4c1   : > { %v21739_v52 = vcombine.low %v11916_v60, %v11917_v46  ;;  %v12486_v23 = vsel %vm21729_vm15, %v12252_v47, 0.0  ;;  %v15225_v29 = vadd.f32 %v21521_v21, %v21502_v57  ;;  %14381 = vmatmul.mubr.msk.bf16.gmra.mxu0 %vm21659_vm11, %v21680_v7  ;;  %vm11761_vm2 = vcmp.ge.s32.totalorder %v23213_v55, 0  ;;  %v23215_v46 = vld [vmem:[#allocation26_spill] sm:$0xff] }
 0x4c2   : > { %v11578_v31 = vcombine.high %v11576_v12, %v11576_v12  ;;  %v11920_v38 = vmax.f32 %v11577_v27, 0.0  ;;  %v11921_v36 = vmax.f32 %v11576_v12, 0.0  ;;  %vm11771_vm7 = vcmp.lt.s32.totalorder %v23213_v55, 16 }
 0x4c3   : > { %v21759_v35 = vcombine.low %v11918_v2, %v11919_v41  ;;  %v12487_v32 = vsel %vm21711_vm14, %v12269_v56, 0.0  ;;  %v21763_v15 = vpack.c.bf16 %v12269_v56, %v12252_v47  ;;  %v12653_v43 = vrot.slane %v21669_v0, 1  ;;  %vm21823_vm13 = vmand %vm11761_vm2, %vm11771_vm7 }
 0x4c4   : > { %v21766_v14 = vmax.f32 %v11578_v31, 0.0  ;;  %v21768_v57 = vcombine.low %v11920_v38, %v11921_v36  ;;  %v21770_v21 = vpack.c.bf16 %v12487_v32, %v12486_v23  ;;  %v11100_v16 = vadd.f32 %v15225_v29, %v23214_v58  ;;  %v23218_v38 = vld [vmem:[#allocation10_spill] sm:$0xff]  ;;  %vm21840_vm14 = vmand %vm21823_vm13, %vm11785_vm3 }
 0x4c5   : > { %14405 = vmatprep.mubr.msk.bf16.mxu1 %vm21748_vm5, %v21763_v15  ;;  %v12654_v47 = vrot.slane %v21701_v4, 1  ;;  %v15228_v0 = vadd.f32 %v21576_v20, %v21544_v18  ;;  %v12276_v42 = vrot.slane %v21525_v48, %v23153_v30  ;;  %v15231_v60 = vadd.f32 %v21620_v6, %v21599_v33  ;;  %v23216_v18 = vld [vmem:[#allocation58_spill] sm:$0xff]  ;;  %v23217_v48 = vld [vmem:[#allocation9_spill] sm:$0xff]  ;;  %vm11841_vm2 = vmand %vm21823_vm13, %vm11820_vm4 }
 0x4c6   : > { %v11228_v12 = vadd.f32 %v23215_v46, %v11100_v16  ;;  %v12582_v45 = vshrl.u32 %v21770_v21, 16  ;;  %v12584_v27 = vshll.u32 %v21770_v21, 16  ;;  %v12277_v41 = vcombine.low %v11905_v19, %v21549_v22  ;;  %v23220_v22 = vld [vmem:[#allocation24_spill] sm:$0xff] }
 0x4c7   : > { %v21794_v4 = vsel %vm626_vm0, %v12653_v43, %v12654_v47  ;;  %v11103_v20 = vadd.f32 %v15228_v0, %v23216_v18  ;;  %v12488_v2 = vsel %vm11838_vm8, %v12276_v42, 0.0  ;;  %v11108_v56 = vadd.f32 %v15231_v60, %v23217_v48 }
 0x4c8   : > { %v11579_v23 = vcombine.high %v11228_v12, %v11228_v12  ;;  %v11586_v33 = vrot.slane %v11228_v12, %v23153_v30  ;;  %13456 = vmatmul.mubr.bf16.gmra.mxu1 %v21794_v4  ;;  %v21800_v6 = vpack.c.bf16 %v12488_v2, %v12488_v2  ;;  %v12586_v31 = vrot.slane %v12584_v27, 1 }
 0x4c9   : > { %vm11762_vm9 = vcmp.ge.s32.totalorder %v23218_v38, 0  ;;  %vm11772_vm10 = vcmp.lt.s32.totalorder %v23218_v38, 16  ;;  %v11231_v19 = vadd.f32 %v23219_v25, %v11103_v20  ;;  %v11236_v36 = vadd.f32 %v23220_v22, %v11108_v56 }
 0x4ca   : > { %v12285_v29 = vrot.slane %v12277_v41, %v23153_v30  ;;  %v12292_v32 = vrot.slane %v21648_v26, %v23153_v30  ;;  %v21810_v43 = vrot.slane %v11579_v23, %v23153_v30  ;;  %v11594_v58 = vcombine.high %v11586_v33, %v11586_v33  ;;  %vm21868_vm15 = vmand %vm11762_vm9, %vm11772_vm10 }
 0x4cb   : > { %v11923_v16 = vmax.f32 %v11586_v33, 0.0  ;;  %v12587_v47 = vor.u32 %v12586_v31, %v12582_v45  ;;  %v11596_v0 = vcombine.high %v11231_v19, %v11231_v19  ;;  %v11603_v42 = vrot.slane %v11231_v19, %v23153_v30  ;;  %vm21888_vm9 = vmpackc.low %vm21823_vm13, %vm21840_vm14 }
 0x4cc   : > { %v12589_v60 = vshll.u32 %v21800_v6, 16  ;;  %v11613_v46 = vcombine.high %v11236_v36, %v11236_v36  ;;  %v11595_v12 = vcombine.high %v21810_v43, %v21810_v43  ;;  %v11924_v27 = vmax.f32 %v11594_v58, 0.0  ;;  %vm21912_vm10 = vmand %vm21868_vm15, %vm11785_vm3 }
 0x4cd   : > { %v11925_v41 = vmax.f32 %v21810_v43, 0.0  ;;  %v11620_v26 = vrot.slane %v11236_v36, %v23153_v30  ;;  %v11610_v18 = vrot.slane %v11596_v0, %v23153_v30  ;;  %v11611_v20 = vcombine.high %v11603_v42, %v11603_v42 }
 0x4ce   : > { %v11927_v2 = vmax.f32 %v11603_v42, 0.0  ;;  %v12591_v48 = vrot.slane %v12589_v60, 1  ;;  %v21827_v56 = vmax.f32 %v11595_v12, 0.0  ;;  %v21829_v23 = vcombine.low %v11923_v16, %v11924_v27 }
 0x4cf   : > { %v11627_v33 = vrot.slane %v11613_v46, %v23153_v30  ;;  %v11628_v31 = vcombine.high %v11620_v26, %v11620_v26  ;;  %v11612_v25 = vcombine.high %v11610_v18, %v11610_v18  ;;  %v11928_v19 = vmax.f32 %v11611_v20, 0.0 }
 0x4d0   : > { %v11929_v22 = vmax.f32 %v11610_v18, 0.0  ;;  %v21833_v36 = vsel %vm445_vm1, %v12587_v47, %v12591_v48  ;;  %v11931_v58 = vmax.f32 %v11620_v26, 0.0  ;;  %v12293_v47 = vcombine.low %v12285_v29, %v12292_v32 }
 0x4d1   : > { %13366 = vmatprep.mubr.bf16.mxu0 %v21833_v36  ;;  %v11629_v55 = vcombine.high %v11627_v33, %v11627_v33  ;;  %v11932_v0 = vmax.f32 %v11628_v31, 0.0  ;;  %v11933_v42 = vmax.f32 %v11627_v33, 0.0  ;;  %v11930_v60 = vmax.f32 %v11612_v25, 0.0 }
 0x4d2   : > { %v21844_v46 = vcombine.low %v11927_v2, %v11928_v19  ;;  %14384 = vmatmul.mubr.msk.bf16.gmra.mxu0 %vm21748_vm5, %v21763_v15  ;;  %v12302_v12 = vrot.slane %v21675_v50, %v23153_v30  ;;  %v21852_v26 = vrot.slane %v11931_v58, %v23153_v30  ;;  %v12309_v20 = vrot.slane %v21686_v39, %v23153_v30  ;;  %v23231_v58 = vld [vmem:[#allocation12_spill] sm:$0xff] }
 0x4d3   : > { %v11934_v27 = vmax.f32 %v11629_v55, 0.0  ;;  %v21854_v18 = vcombine.low %v11932_v0, %v11933_v42  ;;  %v21858_v48 = vcombine.low %v11929_v22, %v11930_v60  ;;  %v12489_v2 = vsel %vm21840_vm14, %v12293_v47, 0.0  ;;  %v23230_v22 = vld [vmem:[#allocation59_spill] sm:$0xff]  ;;  %v23234_v60 = vld [vmem:[#allocation37_spill] sm:$0xff]  ;;  %vm11844_vm14 = vmand %vm21868_vm15, %vm11820_vm4 }
 0x4d4   : > { %v12656_v33 = vrot.slane %v21770_v21, 1  ;;  %v12657_v29 = vrot.slane %v21800_v6, 1  ;;  %v12310_v32 = vcombine.low %v12302_v12, %v12309_v20  ;;  %v15234_v31 = vadd.f32 %v21641_v49, %v21638_v28  ;;  %v23227_v6 = vld [vmem:[#allocation28_spill] sm:$0xff] }
 0x4d5   : > { %v12408_v39 = vrot.slane %v21854_v18, %v23153_v30  ;;  %v15237_v21 = vadd.f32 %v21684_v37, %v21663_v54  ;;  %vm11763_vm7 = vcmp.ge.s32.totalorder %v23227_v6, 0  ;;  %vm11773_vm8 = vcmp.lt.s32.totalorder %v23227_v6, 16 }
 0x4d6   : > { %v21893_v28 = vsel %vm626_vm0, %v12656_v33, %v12657_v29  ;;  %v12317_v49 = vrot.slane %v11913_v13, %v23153_v30  ;;  %v12326_v54 = vrot.slane %v21733_v1, %v23153_v30  ;;  %v12333_v37 = vrot.slane %v21739_v52, %v23153_v30  ;;  %v11238_v13 = vpop.f32.mrf.mxu0 }
 0x4d7   : > { %v12490_v25 = vsel %vm21823_vm13, %v12310_v32, 0.0  ;;  %v21904_v19 = vpack.c.bf16 %v12310_v32, %v12293_v47  ;;  %v11111_v55 = vadd.f32 %v15234_v31, %v23230_v22  ;;  %v11116_v0 = vadd.f32 %v15237_v21, %v23231_v58  ;;  %vm21938_vm13 = vmpackc.low %vm21868_vm15, %vm21912_vm10 }
 0x4d8   : > { %v12513_v1 = vpack.c.bf16 %v12490_v25, %v12489_v2  ;;  %v12491_v52 = vsel %vm11841_vm2, %v12317_v49, 0.0  ;;  %v12334_v42 = vcombine.low %v12326_v54, %v12333_v37  ;;  %v12343_v45 = vrot.slane %v21759_v35, %v23153_v30  ;;  %vm21957_vm2 = vmand %vm11763_vm7, %vm11773_vm8 }
 0x4d9   : > { %14408 = vmatprep.mubr.msk.bf16.mxu1 %vm21888_vm9, %v21904_v19  ;;  %v11239_v16 = vadd.f32 %v11238_v13, %v11111_v55  ;;  %v11244_v47 = vadd.f32 %v23234_v60, %v11116_v0  ;;  %v12514_v12 = vpack.c.bf16 %v12491_v52, %v12491_v52  ;;  %v12350_v20 = vrot.slane %v21768_v57, %v23153_v30  ;;  %vm21998_vm7 = vmand %vm21957_vm2, %vm11785_vm3 }
 0x4da   : > { %13464 = vmatmul.mubr.bf16.gmra.mxu1 %v21893_v28  ;;  %v12594_v33 = vshrl.u32 %v12513_v1, 16  ;;  %v12596_v2 = vshll.u32 %v12513_v1, 16  ;;  %v12492_v29 = vsel %vm21912_vm10, %v12334_v42, 0.0  ;;  %v12659_v32 = vrot.slane %v12513_v1, 1  ;;  %vm22610_vm8 = vmpackc.low %vm21957_vm2, %vm21998_vm7 }
 0x4db   : > { %v11630_v35 = vcombine.high %v11239_v16, %v11239_v16  ;;  %v11637_v31 = vrot.slane %v11239_v16, %v23153_v30  ;;  %v11653_v21 = vrot.slane %v11244_v47, %v23153_v30  ;;  %v12601_v49 = vshll.u32 %v12514_v12, 16 }
 0x4dc   : > { %v12598_v54 = vrot.slane %v12596_v2, 1  ;;  %v12351_v37 = vcombine.low %v12343_v45, %v12350_v20  ;;  %v12660_v25 = vrot.slane %v12514_v12, 1  ;;  %v12358_v57 = vrot.slane %v21766_v14, %v23153_v30 }
 0x4dd   : > { %v11644_v22 = vrot.slane %v11630_v35, %v23153_v30  ;;  %v11645_v55 = vcombine.high %v11637_v31, %v11637_v31  ;;  %v11935_v58 = vmax.f32 %v11637_v31, 0.0  ;;  %v11654_v0 = vcombine.high %v11653_v21, %v11653_v21 }
 0x4de   : > { %v11939_v13 = vmax.f32 %v11653_v21, 0.0  ;;  %v12599_v52 = vor.u32 %v12598_v54, %v12594_v33  ;;  %v12603_v1 = vrot.slane %v12601_v49, 1  ;;  %v12493_v16 = vsel %vm21868_vm15, %v12351_v37, 0.0  ;;  %vm11847_vm15 = vmand %vm21957_vm2, %vm11820_vm4 }
 0x4df   : > { %v11646_v14 = vcombine.high %v11644_v22, %v11644_v22  ;;  %v11936_v60 = vmax.f32 %v11645_v55, 0.0  ;;  %v11937_v47 = vmax.f32 %v11644_v22, 0.0  ;;  %v12401_v12 = vcombine.low %v11934_v27, %v11935_v58 }
 0x4e0   : > { %v21946_v20 = vmax.f32 %v11654_v0, 0.0  ;;  %v21949_v33 = vsel %vm445_vm1, %v12599_v52, %v12603_v1  ;;  %v12515_v63 = vpack.c.bf16 %v12493_v16, %v12492_v29  ;;  %v21951_v2 = vpack.c.bf16 %v12351_v37, %v12334_v42 }
 0x4e1   : > { %v11938_v27 = vmax.f32 %v11646_v14, 0.0  ;;  %v12415_v50 = vrot.slane %v12401_v12, %v23153_v30  ;;  %v12417_v31 = vcombine.low %v11936_v60, %v11937_v47  ;;  %13374 = vmatprep.mubr.bf16.mxu0 %v21949_v33  ;;  %v21964_v21 = vsel %vm626_vm0, %v12659_v32, %v12660_v25  ;;  %v23241_v60 = vld [vmem:[#allocation14_spill] sm:$0xff] }
 0x4e2   : > { %14411 = vmatprep.mubr.msk.bf16.mxu1 %vm21938_vm13, %v21951_v2  ;;  %14387 = vmatmul.mubr.msk.bf16.gmra.mxu0 %vm21888_vm9, %v21904_v19  ;;  %v12494_v6 = vsel %vm11844_vm14, %v12358_v57, 0.0  ;;  %v12606_v42 = vshrl.u32 %v12515_v63, 16  ;;  %v12608_v29 = vshll.u32 %v12515_v63, 16  ;;  %v12360_v49 = vcombine.low %v11925_v41, %v21827_v56 }
 0x4e3   : > { %v21978_v32 = vcombine.low %v12408_v39, %v12415_v50  ;;  %v12425_v54 = vrot.slane %v12417_v31, %v23153_v30  ;;  %v12418_v37 = vcombine.low %v11938_v27, %v11939_v13  ;;  %13472 = vmatmul.mubr.bf16.gmra.mxu1 %v21964_v21  ;;  %v12516_v25 = vpack.c.bf16 %v12494_v6, %v12494_v6 }
 0x4e4   : > { %v12610_v57 = vrot.slane %v12608_v29, 1  ;;  %v12367_v43 = vrot.slane %v21829_v23, %v23153_v30  ;;  %v12374_v41 = vrot.slane %v12360_v49, %v23153_v30  ;;  %v12384_v56 = vrot.slane %v21844_v46, %v23153_v30 }
 0x4e5   : > { %v12432_v18 = vrot.slane %v12418_v37, %v23153_v30  ;;  %v12613_v39 = vshll.u32 %v12516_v25, 16  ;;  %v12391_v22 = vrot.slane %v21858_v48, %v23153_v30  ;;  %v12662_v55 = vrot.slane %v12515_v63, 1 }
 0x4e6   : > { %v12611_v58 = vor.u32 %v12610_v57, %v12606_v42  ;;  %v12375_v23 = vcombine.low %v12367_v43, %v12374_v41  ;;  %v12663_v13 = vrot.slane %v12516_v25, 1  ;;  %v12497_v46 = vsel %vm11847_vm15, %v21852_v26, 0.0 }
 0x4e7   : > { %v22003_v52 = vcombine.low %v12425_v54, %v12432_v18  ;;  %v12615_v1 = vrot.slane %v12613_v39, 1  ;;  %v12392_v16 = vcombine.low %v12384_v56, %v12391_v22  ;;  %v12518_v14 = vpack.c.bf16 %v12497_v46, %v12497_v46 }
 0x4e8   : > { %v22010_v48 = vsel %vm626_vm0, %v12662_v55, %v12663_v13  ;;  %v11754_v47 = vadd.s32 9, %v23241_v60  ;;  %v12495_v26 = vsel %vm21998_vm7, %v12375_v23, 0.0  ;;  %v12440_v31 = vrot.slane %v21946_v20, %v23153_v30 }
 0x4e9   : > { %v22014_v12 = vsel %vm445_vm1, %v12611_v58, %v12615_v1  ;;  %v12496_v63 = vsel %vm21957_vm2, %v12392_v16, 0.0  ;;  %v22020_v27 = vpack.c.bf16 %v12392_v16, %v12375_v23  ;;  %v12681_v6 = vshll.u32 %v12518_v14, 16 }
 0x4ea   : > { %13382 = vmatprep.mubr.bf16.mxu0 %v22014_v12  ;;  %v12517_v50 = vpack.c.bf16 %v12496_v63, %v12495_v26  ;;  %vm11764_vm10 = vcmp.ge.s32.totalorder %v11754_v47, 0  ;;  %vm11774_vm14 = vcmp.lt.s32.totalorder %v11754_v47, 16  ;;  %v14437_v29 = vpack.c.bf16 %v22003_v52, %v21978_v32  ;;  %v15964_v47 = vld [vmem:[%s22412_s5 + $0x228] sm:$0xff]  }
 0x4eb   : > { %14390 = vmatmul.mubr.msk.bf16.gmra.mxu0 %vm21938_vm13, %v21951_v2  ;;  %14414 = vmatprep.mubr.msk.bf16.mxu1 %vm22610_vm8, %v22020_v27  ;;  %vm22034_vm15 = vmand %vm11764_vm10, %vm11774_vm14  ;;  %v12689_v49 = vrot.slane %v12518_v14, 1  ;;  %v12683_v39 = vrot.slane %v12681_v6, 1 }
 0x4ec   : > { %13520 = vmatprep.mubr.bf16.mxu0 %v21425_v9  ;;  %13480 = vmatmul.mubr.bf16.gmra.mxu1 %v22010_v48  ;;  %v12676_v30 = vshll.u32 %v12517_v50, 16  ;;  %v12688_v20 = vrot.slane %v12517_v50, 1  ;;  %vm22046_vm8 = vmand %vm22034_vm15, %vm11785_vm3  ;;  %v12499_v37 = vsel %vm22034_vm15, %v22003_v52, 0.0  ;;  %v12674_v9 = vshrl.u32 %v12517_v50, 16 }
 0x4ed   : > { %13617 = vmatprep.mubr.bf16.mxu1 %v21552_v3  ;;  %vm11850_vm10 = vmand %vm22034_vm15, %vm11820_vm4  ;;  %v12498_v17 = vsel %vm22046_vm8, %v21978_v32, 0.0  ;;  %vm13779_vm3 = vcmask 261120  }
 0x4ee   : > { %v12678_v25 = vrot.slane %v12676_v30, 1  ;;  %v22062_v57 = vsel %vm626_vm0, %v12688_v20, %v12689_v49  ;;  %v12500_v43 = vsel %vm11850_vm10, %v12440_v31, 0.0  ;;  %v12519_v41 = vpack.c.bf16 %v12499_v37, %v12498_v17 }
 0x4ef   : > { %v12520_v56 = vpack.c.bf16 %v12500_v43, %v12500_v43 }
 0x4f0   : > { %v12679_v18 = vor.u32 %v12678_v25, %v12674_v9  ;;  %v12695_v22 = vshll.u32 %v12519_v41, 16  ;;  %v12707_v55 = vrot.slane %v12519_v41, 1  ;;  %v12693_v46 = vshrl.u32 %v12519_v41, 16 }
 0x4f1   : > { %v12700_v58 = vshll.u32 %v12520_v56, 16  ;;  %v12708_v23 = vrot.slane %v12520_v56, 1 }
 0x4f2   : > { %v12684_v13 = vsel %vm445_vm1, %v12679_v18, %v12683_v39  ;;  %v12697_v1 = vrot.slane %v12695_v22, 1 }
 0x4f3   : > { %13521 = vmatmul.mubr.bf16.vlgmr.msra.gmra.mxu0 %v21326_v10  ;;  %v12709_v16 = vsel %vm626_vm0, %v12707_v55, %v12708_v23  ;;  %v12702_v60 = vrot.slane %v12700_v58, 1  ;;  %vm23246_vm0 = vmpackc.low %vm21957_vm2, %vm21998_vm7 }
 0x4f4   : > { %13528 = vmatprep.mubr.bf16.mxu0 %v21591_v8  ;;  %15650 = vmatpush3.bf16.msra.mxu0 %v21499_v62  ;;  %v12698_v14 = vor.u32 %v12697_v1, %v12693_v46  ;;  %v15965_v62 = vld [vmem:[%s22412_s5 + $0x220] sm:$0xff]  }
 0x4f5   : > { %14417 = vmatmul.mubr.msk.bf16.vlgmr.msra.gmra.mxu1 %vm21420_vm12, %v21439_v61  ;;  %15651 = vmatprep.subr.bf16.mxu0 %v15963_v51  ;;  %v15967_v61 = vld [vmem:[%s22412_s5 + $0x210] sm:$0xff]  }
 0x4f6   : > { %13625 = vmatprep.mubr.bf16.mxu1 %v21651_v11  ;;  %v12703_v10 = vsel %vm445_vm1, %v12698_v14, %v12702_v60  ;;  %vm14436_vm1 = vmpackc.low %vm22034_vm15, %vm22046_vm8 }
 0x4f8   : > { %15652 = vmatpush3.bf16.msra.mxu0 %v15963_v51 }
 0x4f9   : > { %15653 = vmatprep.subr.bf16.mxu0 %v15964_v47 }
 0x4fb   : > { %13529 = vmatmul.mubr.bf16.gmra.mxu0 %v21552_v3  ;;  %v15969_v3 = vld [vmem:[%s22412_s5 + $0x200] sm:$0xff]  }
 0x4fc   : > { %13536 = vmatprep.mubr.bf16.mxu0 %v21698_v34  ;;  %15654 = vmatpush3.bf16.msra.mxu0 %v15964_v47 }
 0x4fd   : > { %14420 = vmatmul.mubr.msk.bf16.gmra.mxu1 %vm21540_vm6, %v21557_v40  ;;  %15655 = vmatprep.subr.bf16.mxu0 %v15965_v62 }
 0x4fe   : > { %13633 = vmatprep.mubr.bf16.mxu1 %v21737_v53 }
 0x500   : > { %15656 = vmatpush3.bf16.msra.mxu0 %v15965_v62 }
 0x501   : > { %15657 = vmatprep.subr.bf16.mxu0 %v15966_v24 }
 0x503   : > { %13537 = vmatmul.mubr.bf16.gmra.mxu0 %v21651_v11 }
 0x504   : > { %13544 = vmatprep.mubr.bf16.mxu0 %v21794_v4  ;;  %15658 = vmatpush3.bf16.msra.mxu0 %v15966_v24 }
 0x505   : > { %14423 = vmatmul.mubr.msk.bf16.gmra.mxu1 %vm21659_vm11, %v21680_v7  ;;  %15659 = vmatprep.subr.bf16.mxu0 %v15967_v61  ;;  %v22149_v7 = vld [vmem:[%s22413_s6] ss:$0 sm:$0xff] }
 0x506   : > { %13641 = vmatprep.mubr.bf16.mxu1 %v21833_v36 }
 0x508   : > { %15660 = vmatpush3.bf16.msra.mxu0 %v15967_v61 }
 0x509   : > { %15661 = vmatprep.subr.bf16.mxu0 %v15968_v44 }
 0x50b   : > { %13545 = vmatmul.mubr.bf16.gmra.mxu0 %v21737_v53 }
 0x50c   : > { %13552 = vmatprep.mubr.bf16.mxu0 %v21893_v28  ;;  %15662 = vmatpush3.bf16.msra.mxu0 %v15968_v44 }
 0x50d   : > { %14426 = vmatmul.mubr.msk.bf16.gmra.mxu1 %vm21748_vm5, %v21763_v15  ;;  %15663 = vmatprep.subr.bf16.mxu0 %v15969_v3 }
 0x50e   : > { %13649 = vmatprep.mubr.bf16.mxu1 %v21949_v33 }
 0x510   : > { %15664 = vmatpush3.bf16.msra.mxu0 %v15969_v3 }
 0x513   : > { %13553 = vmatmul.mubr.bf16.gmra.mxu0 %v21833_v36 }
 0x514   : > { %13560 = vmatprep.mubr.bf16.mxu0 %v21964_v21 }
 0x515   : > { %14429 = vmatmul.mubr.msk.bf16.gmra.mxu1 %vm21888_vm9, %v21904_v19 }
 0x516   : > { %13657 = vmatprep.mubr.bf16.mxu1 %v22014_v12 }
 0x51b   : > { %13561 = vmatmul.mubr.bf16.gmra.mxu0 %v21949_v33 }
 0x51c   : > { %13568 = vmatprep.mubr.bf16.mxu0 %v22010_v48 }
 0x51d   : > { %14432 = vmatmul.mubr.msk.bf16.gmra.mxu1 %vm21938_vm13, %v21951_v2 }
 0x51e   : > { %13665 = vmatprep.mubr.bf16.mxu1 %v12684_v13 }
 0x523   : > { %13569 = vmatmul.mubr.bf16.gmra.mxu0 %v22014_v12 }
 0x524   : > { %13576 = vmatprep.mubr.bf16.mxu0 %v22062_v57 }
 0x525   : > { %14435 = vmatmul.mubr.msk.bf16.gmra.mxu1 %vm23246_vm0, %v22020_v27 }
 0x526   : > { %13673 = vmatprep.mubr.bf16.mxu1 %v12703_v10 }
 0x52b   : > { %13577 = vmatmul.mubr.bf16.gmra.mxu0 %v12684_v13 }
 0x52c   : > { %15665 = vmatprep.mubr.bf16.mxu0 %v21591_v8 }
 0x52d   : > { %14438 = vmatmul.mubr.msk.bf16.gmra.mxu1 %vm14436_vm1, %v14437_v29 }
 0x533   : > { %15666 = vmatmul.mubr.bf16.vlgmr.msra.gmra.mxu0 %v21698_v34 }
 0x534   : > { %15669 = vmatprep.mubr.bf16.mxu0 %v21794_v4 }
 0x53b   : > { %15670 = vmatmul.mubr.bf16.gmra.mxu0 %v21893_v28 }
 0x53c   : > { %15673 = vmatprep.mubr.bf16.mxu0 %v21964_v21 }
 0x543   : > { %15674 = vmatmul.mubr.bf16.gmra.mxu0 %v22010_v48 }
 0x544   : > { %15677 = vmatprep.mubr.bf16.mxu0 %v22062_v57 }
 0x54a   : > { %v15277_v40 = vpop.f32.mrf.mxu0 }
 0x54b   : > { %15678 = vmatmul.mubr.bf16.gmra.mxu0 %v12709_v16 }
 0x54c   : > { %v15278_v11 = vpop.f32.mrf.mxu0 }
 0x54d   : > { %v15279_v8 = vadd.f32 %v15278_v11, %v15277_v40 }
 0x54e   : > { %v15280_v59 = vpop.f32.mrf.mxu0 }
 0x54f   : > { %v13329_v15 = vadd.f32 %v15279_v8, %v22149_v7 }
 0x550   : > { %v15281_v34 = vpop.f32.mrf.mxu0  ;;  %v15341_v5 = vpop.f32.mrf.mxu1 }
 0x551   : > { %v15282_v53 = vadd.f32 %v15281_v34, %v15280_v59 }
 0x552   : > { %v15342_v4 = vpop.f32.mrf.mxu1 }
 0x553   : > { %v15343_v36 = vadd.f32 %v15342_v4, %v15341_v5  ;;  %v13332_v19 = vadd.f32 %v15282_v53, %v22149_v7 }
 0x554   : > { %v15344_v38 = vpop.f32.mrf.mxu1 }
 0x555   : > { %v22152_v28 = vadd.f32 %v15343_v36, %v13329_v15 }
 0x556   : > { %v15345_v45 = vpop.f32.mrf.mxu1 }
 0x557   : > { %v15346_v33 = vadd.f32 %v15345_v45, %v15344_v38 }
 0x558   : > { %v15283_v2 = vpop.f32.mrf.mxu0 }
 0x559   : > { %v22155_v35 = vadd.f32 %v15346_v33, %v13332_v19 }
 0x55a   : > { %v15284_v21 = vpop.f32.mrf.mxu0 }
 0x55b   : > { %v15285_v32 = vadd.f32 %v15284_v21, %v15283_v2 }
 0x55c   : > { %v15286_v0 = vpop.f32.mrf.mxu0 }
 0x55d   : > { %v13337_v26 = vadd.f32 %v15285_v32, %v22149_v7 }
 0x55e   : > { %v15287_v52 = vpop.f32.mrf.mxu0 }
 0x55f   : > { %v15288_v48 = vadd.f32 %v15287_v52, %v15286_v0 }
 0x561   : > { %v15347_v12 = vpop.f32.mrf.mxu1  ;;  %v13340_v6 = vadd.f32 %v15288_v48, %v22149_v7 }
 0x563   : > { %v15348_v63 = vpop.f32.mrf.mxu1 }
 0x564   : > { %v15349_v27 = vadd.f32 %v15348_v63, %v15347_v12 }
 0x565   : > { %v15350_v50 = vpop.f32.mrf.mxu1 }
 0x566   : > { %v22158_v31 = vadd.f32 %v15349_v27, %v13337_v26 }
 0x567   : > { %v15351_v42 = vpop.f32.mrf.mxu1 }
 0x568   : > { %v15352_v29 = vadd.f32 %v15351_v42, %v15350_v50 }
 0x56a   : > { %v22161_v30 = vadd.f32 %v15352_v29, %v13340_v6  ;;  %v15289_v20 = vpop.f32.mrf.mxu0 }
 0x56c   : > { %v15290_v54 = vpop.f32.mrf.mxu0 }
 0x56d   : > { %v15353_v49 = vpop.f32.mrf.mxu1  ;;  %v15291_v37 = vadd.f32 %v15290_v54, %v15289_v20 }
 0x56e   : > { %v15292_v17 = vpop.f32.mrf.mxu0 }
 0x56f   : > { %v15354_v9 = vpop.f32.mrf.mxu1  ;;  %v13345_v25 = vadd.f32 %v15291_v37, %v22149_v7 }
 0x570   : > { %v15355_v57 = vadd.f32 %v15354_v9, %v15353_v49  ;;  %v15293_v41 = vpop.f32.mrf.mxu0 }
 0x571   : > { %v15356_v43 = vpop.f32.mrf.mxu1  ;;  %v15294_v18 = vadd.f32 %v15293_v41, %v15292_v17 }
 0x572   : > { %v22164_v56 = vadd.f32 %v15355_v57, %v13345_v25 }
 0x573   : > { %v15357_v39 = vpop.f32.mrf.mxu1  ;;  %v13348_v22 = vadd.f32 %v15294_v18, %v22149_v7 }
 0x574   : > { %v15358_v55 = vadd.f32 %v15357_v39, %v15356_v43 }
 0x576   : > { %v22167_v51 = vadd.f32 %v15358_v55, %v13348_v22 }
 0x577   : > { %v15295_v58 = vpop.f32.mrf.mxu0 }
 0x579   : > { %v15296_v23 = vpop.f32.mrf.mxu0 }
 0x57a   : > { %v15297_v13 = vadd.f32 %v15296_v23, %v15295_v58  ;;  %v15359_v46 = vpop.f32.mrf.mxu1 }
 0x57b   : > { %v15298_v1 = vpop.f32.mrf.mxu0 }
 0x57c   : > { %v13353_v16 = vadd.f32 %v15297_v13, %v22149_v7  ;;  %v15360_v14 = vpop.f32.mrf.mxu1 }
 0x57d   : > { %v15299_v60 = vpop.f32.mrf.mxu0  ;;  %v15361_v47 = vadd.f32 %v15360_v14, %v15359_v46 }
 0x57e   : > { %v15300_v10 = vadd.f32 %v15299_v60, %v15298_v1  ;;  %v15362_v62 = vpop.f32.mrf.mxu1 }
 0x57f   : > { %v22170_v24 = vadd.f32 %v15361_v47, %v13353_v16 }
 0x580   : > { %v13356_v61 = vadd.f32 %v15300_v10, %v22149_v7  ;;  %v15363_v44 = vpop.f32.mrf.mxu1 }
 0x581   : > { %v15364_v3 = vadd.f32 %v15363_v44, %v15362_v62  ;;  %v15301_v40 = vpop.f32.mrf.mxu0 }
 0x583   : > { %v22173_v11 = vadd.f32 %v15364_v3, %v13356_v61  ;;  %v15302_v8 = vpop.f32.mrf.mxu0 }
 0x584   : > { %v15303_v59 = vadd.f32 %v15302_v8, %v15301_v40 }
 0x585   : > { %v15304_v34 = vpop.f32.mrf.mxu0 }
 0x586   : > { %v13361_v15 = vadd.f32 %v15303_v59, %v22149_v7 }
 0x587   : > { %v15305_v5 = vpop.f32.mrf.mxu0 }
 0x588   : > { %v15365_v53 = vpop.f32.mrf.mxu1  ;;  %v15306_v4 = vadd.f32 %v15305_v5, %v15304_v34 }
 0x58a   : > { %v15366_v36 = vpop.f32.mrf.mxu1  ;;  %v13364_v33 = vadd.f32 %v15306_v4, %v22149_v7 }
 0x58b   : > { %v15367_v38 = vadd.f32 %v15366_v36, %v15365_v53 }
 0x58c   : > { %v15368_v19 = vpop.f32.mrf.mxu1 }
 0x58d   : > { %v22176_v45 = vadd.f32 %v15367_v38, %v13361_v15 }
 0x58e   : > { %v15369_v2 = vpop.f32.mrf.mxu1 }
 0x58f   : > { %23247 = vst [vmem:[#allocation64_spill] sm:$0xff] %v22176_v45  ;;  %v15370_v21 = vadd.f32 %v15369_v2, %v15368_v19 }
 0x591   : > { %v22179_v32 = vadd.f32 %v15370_v21, %v13364_v33 }
 0x592   : > { %v15307_v0 = vpop.f32.mrf.mxu0 }
 0x593   : > { %23248 = vst [vmem:[#allocation63_spill] sm:$0xff] %v22179_v32 }
 0x594   : > { %v15308_v52 = vpop.f32.mrf.mxu0 }
 0x595   : > { %v15309_v48 = vadd.f32 %v15308_v52, %v15307_v0 }
 0x596   : > { %v15310_v12 = vpop.f32.mrf.mxu0 }
 0x597   : > { %v13369_v50 = vadd.f32 %v15309_v48, %v22149_v7 }
 0x598   : > { %v15311_v26 = vpop.f32.mrf.mxu0 }
 0x599   : > { %v15312_v63 = vadd.f32 %v15311_v26, %v15310_v12 }
 0x59a   : > { %v15371_v27 = vpop.f32.mrf.mxu1 }
 0x59b   : > { %v13372_v49 = vadd.f32 %v15312_v63, %v22149_v7 }
 0x59c   : > { %v15372_v6 = vpop.f32.mrf.mxu1 }
 0x59d   : > { %v15373_v42 = vadd.f32 %v15372_v6, %v15371_v27 }
 0x59e   : > { %v15374_v29 = vpop.f32.mrf.mxu1 }
 0x59f   : > { %v22182_v20 = vadd.f32 %v15373_v42, %v13369_v50 }
 0x5a0   : > { %v15375_v54 = vpop.f32.mrf.mxu1 }
 0x5a1   : > { %v15376_v37 = vadd.f32 %v15375_v54, %v15374_v29 }
 0x5a2   : > { %v15313_v9 = vpop.f32.mrf.mxu0 }
 0x5a3   : > { %v22185_v17 = vadd.f32 %v15376_v37, %v13372_v49  ;;  %v15377_v25 = vpop.f32.mrf.mxu1 }
 0x5a4   : > { %v15314_v57 = vpop.f32.mrf.mxu0 }
 0x5a5   : > { %23249 = vst [vmem:[#allocation67_spill] sm:$0xff] %v22185_v17  ;;  %v15315_v43 = vadd.f32 %v15314_v57, %v15313_v9  ;;  %v15378_v41 = vpop.f32.mrf.mxu1 }
 0x5a6   : > { %v15379_v18 = vadd.f32 %v15378_v41, %v15377_v25  ;;  %v15316_v39 = vpop.f32.mrf.mxu0 }
 0x5a7   : > { %v13377_v22 = vadd.f32 %v15315_v43, %v22149_v7  ;;  %v15380_v55 = vpop.f32.mrf.mxu1 }
 0x5a8   : > { %v15317_v58 = vpop.f32.mrf.mxu0 }
 0x5a9   : > { %v22188_v23 = vadd.f32 %v15379_v18, %v13377_v22  ;;  %v15318_v13 = vadd.f32 %v15317_v58, %v15316_v39  ;;  %v15381_v46 = vpop.f32.mrf.mxu1 }
 0x5aa   : > { %v15382_v1 = vadd.f32 %v15381_v46, %v15380_v55 }
 0x5ab   : > { %23250 = vst [vmem:[#allocation65_spill] sm:$0xff] %v22188_v23  ;;  %v13380_v16 = vadd.f32 %v15318_v13, %v22149_v7  ;;  %v15319_v14 = vpop.f32.mrf.mxu0 }
 0x5ac   : > { %v22191_v60 = vpop.f32.mrf.mxu1 }
 0x5ad   : > { %v22193_v47 = vadd.f32 %v15382_v1, %v13380_v16  ;;  %v15320_v10 = vpop.f32.mrf.mxu0 }
 0x5ae   : > { %v22195_v62 = vadd.f32 %v15320_v10, %v15319_v14  ;;  %v22197_v61 = vpop.f32.mrf.mxu1 }
 0x5af   : > { %23251 = vst [vmem:[#allocation68_spill] sm:$0xff] %v22193_v47  ;;  %v15322_v44 = vpop.f32.mrf.mxu0 }
 0x5b0   : > { %v22199_v3 = vpop.f32.mrf.mxu1 }
 0x5b1   : > { %23252 = vst [vmem:[#allocation66_spill] sm:$0xff] %v22199_v3  ;;  %v15323_v40 = vpop.f32.mrf.mxu0 }
 0x5b2   : > { %v22201_v8 = vadd.f32 %v15323_v40, %v15322_v44  ;;  %v22203_v59 = vpop.f32.mrf.mxu1 }
 0x5b3   : > { %23254 = vst [vmem:[#allocation7_spill] sm:$0xff] %v22203_v59  ;;  %v15405_v34 = vpop.f32.mrf.mxu0 }
 0x5b4   : > { %23253 = vst [vmem:[#allocation70_spill] sm:$0xff] %v22201_v8 }
 0x5b5   : > { %v15406_v53 = vpop.f32.mrf.mxu0  ;;  %v22205_v5 = vpop.f32.mrf.mxu1 }
 0x5b7   : > { %v22207_v15 = vpop.f32.mrf.mxu0  ;;  %v22209_v4 = vpop.f32.mrf.mxu1 }
 0x5b9   : > { %v22211_v36 = vpop.f32.mrf.mxu0  ;;  %v22213_v38 = vpop.f32.mrf.mxu1 }
 0x5bb   : > { %v15411_v19 = vpop.f32.mrf.mxu0  ;;  %v22215_v33 = vpop.f32.mrf.mxu1 }
 0x5bd   : > { %v15412_v2 = vpop.f32.mrf.mxu0  ;;  %v15475_v21 = vpop.f32.mrf.mxu1 }
 0x5bf   : > { %v15414_v0 = vpop.f32.mrf.mxu0  ;;  %v15476_v52 = vpop.f32.mrf.mxu1 }
 0x5c1   : > { %v15415_v48 = vpop.f32.mrf.mxu0  ;;  %v15478_v12 = vpop.f32.mrf.mxu1 }
 0x5c3   : > { %v15417_v26 = vpop.f32.mrf.mxu0  ;;  %v15479_v63 = vpop.f32.mrf.mxu1 }
 0x5c5   : > { %v15418_v27 = vpop.f32.mrf.mxu0  ;;  %v22217_v50 = vpop.f32.mrf.mxu1 }
 0x5c7   : > { %v22219_v6 = vpop.f32.mrf.mxu0  ;;  %v22221_v42 = vpop.f32.mrf.mxu1 }
 0x5c9   : > { %v22223_v29 = vpop.f32.mrf.mxu0  ;;  %v22225_v49 = vpop.f32.mrf.mxu1 }
 0x5cb   : > { %v15423_v54 = vpop.f32.mrf.mxu0  ;;  %v22227_v37 = vpop.f32.mrf.mxu1 }
 0x5cd   : > { %v15424_v9 = vpop.f32.mrf.mxu0  ;;  %v15487_v25 = vpop.f32.mrf.mxu1 }
 0x5cf   : > { %v15426_v57 = vpop.f32.mrf.mxu0  ;;  %v15488_v43 = vpop.f32.mrf.mxu1 }
 0x5d1   : > { %v15427_v41 = vpop.f32.mrf.mxu0  ;;  %v22229_v18 = vpop.f32.mrf.mxu1 }
 0x5d3   : > { %v22231_v39 = vpop.f32.mrf.mxu0  ;;  %v22233_v22 = vpop.f32.mrf.mxu1 }
 0x5d5   : > { %v22235_v55 = vpop.f32.mrf.mxu0  ;;  %v22237_v58 = vpop.f32.mrf.mxu1 }
 0x5d6   : > { %23255 = vst [vmem:[#allocation71_spill] sm:$0xff] %v22237_v58 }
 0x5d7   : > { %v22239_v13 = vpop.f32.mrf.mxu0  ;;  %v22241_v46 = vpop.f32.mrf.mxu1 }
 0x5d8   : > { %23256 = vst [vmem:[#allocation69_spill] sm:$0xff] %v22239_v13  ;;  %23257 = vst [vmem:[#allocation72_spill] sm:$0xff] %v22241_v46  ;;  %v15413_v46 = vadd.f32 %v15412_v2, %v15411_v19  ;;  %v15416_v13 = vadd.f32 %v15415_v48, %v15414_v0  ;;  %v15471_v19 = vadd.f32 %v22209_v4, %v22205_v5 }
 0x5d9   : > { %v22243_v1 = vpop.f32.mrf.mxu0  ;;  %v22245_v16 = vpop.f32.mrf.mxu1  ;;  %v15410_v2 = vadd.f32 %v22211_v36, %v22207_v15  ;;  %v15474_v15 = vadd.f32 %v22215_v33, %v22213_v38  ;;  %v15489_v36 = vadd.f32 %v15488_v43, %v15487_v25 }
 0x5da   : > { %23258 = vst [vmem:[#allocation74_spill] sm:$0xff] %v22243_v1  ;;  %23259 = vst [vmem:[#allocation73_spill] sm:$0xff] %v22245_v16  ;;  %v15407_v1 = vadd.f32 %v15406_v53, %v15405_v34  ;;  %v15425_v34 = vadd.f32 %v15424_v9, %v15423_v54 }
 0x5db   : > { %v22247_v14 = vpop.f32.mrf.mxu0  ;;  %v22249_v10 = vpop.f32.mrf.mxu1  ;;  %v13526_v5 = vadd.f32 %v15410_v2, %v22155_v35  ;;  %v15483_v35 = vadd.f32 %v22221_v42, %v22217_v50 }
 0x5dc   : > { %23260 = vst [vmem:[#allocation77_spill] sm:$0xff] %v22249_v10 }
 0x5dd   : > { %v22251_v44 = vpop.f32.mrf.mxu0  ;;  %v22253_v40 = vpop.f32.mrf.mxu1  ;;  %v13623_v33 = vadd.f32 %v15474_v15, %v13526_v5 }
 0x5de   : > { %v15437_v50 = vadd.f32 %v22251_v44, %v22247_v14 }
 0x5df   : > { %v22255_v47 = vpop.f32.mrf.mxu0  ;;  %v22257_v23 = vpop.f32.mrf.mxu1 }
 0x5e0   : > { %v15501_v14 = vadd.f32 %v22257_v23, %v22253_v40  ;;  %v23271_v23 = vld [vmem:[#allocation72_spill] sm:$0xff] }
 0x5e1   : > { %v22259_v32 = vpop.f32.mrf.mxu0  ;;  %v22262_v59 = vpop.f32.mrf.mxu1  ;;  %v23268_v44 = vld [vmem:[#allocation74_spill] sm:$0xff] }
 0x5e2   : > { %23261 = vst [vmem:[#allocation75_spill] sm:$0xff] %v22262_v59 }
 0x5e3   : > { %v22264_v3 = vpop.f32.mrf.mxu0  ;;  %v22268_v10 = vpop.f32.mrf.mxu1 }
 0x5e4   : > { %23262 = vst [vmem:[#allocation78_spill] sm:$0xff] %v22264_v3  ;;  %23264 = vst [vmem:[#allocation35_spill] sm:$0xff] %v22268_v10  ;;  %v15477_v3 = vadd.f32 %v15476_v52, %v15475_v21  ;;  %v15480_v21 = vadd.f32 %v15479_v63, %v15478_v12  ;;  %v15419_v52 = vadd.f32 %v15418_v27, %v15417_v26 }
 0x5e5   : > { %v22266_v16 = vpop.f32.mrf.mxu0  ;;  %v22275_v58 = vpop.f32.mrf.mxu1  ;;  %v15428_v26 = vadd.f32 %v15427_v41, %v15426_v57 }
 0x5e6   : > { %23263 = vst [vmem:[#allocation76_spill] sm:$0xff] %v22266_v16  ;;  %v13531_v16 = vadd.f32 %v15413_v46, %v22158_v31  ;;  %v13534_v31 = vadd.f32 %v15416_v13, %v22161_v30  ;;  %v13539_v54 = vadd.f32 %v15419_v52, %v22164_v56  ;;  %v15492_v56 = vadd.f32 %v22233_v22, %v22229_v18 }
 0x5e7   : > { %v22270_v8 = vpop.f32.mrf.mxu0  ;;  %v22282_v10 = vpop.f32.mrf.mxu1  ;;  %v13550_v43 = vadd.f32 %v15428_v26, %v22173_v11  ;;  %v15486_v46 = vadd.f32 %v22227_v37, %v22225_v49  ;;  %v15431_v11 = vadd.f32 %v22235_v55, %v22231_v39  ;;  %v15440_v22 = vadd.f32 %v22259_v32, %v22255_v47  ;;  %v23267_v55 = vld [vmem:[#allocation69_spill] sm:$0xff] }
 0x5e8   : > { %23265 = vst [vmem:[#allocation62_spill] sm:$0xff] %v22270_v8  ;;  %v13628_v0 = vadd.f32 %v15477_v3, %v13531_v16  ;;  %v13547_v3 = vadd.f32 %v15425_v34, %v22170_v24  ;;  %v13631_v27 = vadd.f32 %v15480_v21, %v13534_v31  ;;  %v13636_v41 = vadd.f32 %v15483_v35, %v13539_v54  ;;  %v23270_v34 = vld [vmem:[#allocation71_spill] sm:$0xff]  ;;  %v23279_v54 = vld [vmem:[#allocation73_spill] sm:$0xff] }
 0x5e9   : > { %v22272_v17 = vpop.f32.mrf.mxu0  ;;  %v22294_v48 = vpop.f32.mrf.mxu1  ;;  %v13563_v16 = vadd.f32 %v15437_v50, %v22182_v20  ;;  %v13647_v49 = vadd.f32 %v15492_v56, %v13550_v43  ;;  %v13385_v37 = vadd.f32 %v22195_v62, %v22149_v7  ;;  %v15385_v39 = vadd.f32 %v22197_v61, %v22191_v60  ;;  %v23269_v20 = vld [vmem:[#allocation64_spill] sm:$0xff]  ;;  %v23273_v52 = vld [vmem:[#allocation75_spill] sm:$0xff]  ;;  %v23280_v35 = vld [vmem:[#allocation77_spill] sm:$0xff] }
 0x5ea   : > { %23266 = vst [vmem:[#allocation6_spill] sm:$0xff] %v22272_v17  ;;  %v13523_v17 = vadd.f32 %v15407_v1, %v22152_v28  ;;  %v13644_v57 = vadd.f32 %v15489_v36, %v13547_v3  ;;  %v15434_v32 = vadd.f32 %v23268_v44, %v23267_v55  ;;  %v13555_v2 = vadd.f32 %v15431_v11, %v23269_v20  ;;  %v23276_v36 = vld [vmem:[#allocation66_spill] sm:$0xff] }
 0x5eb   : > { %v22277_v45 = vpop.f32.mrf.mxu0  ;;  %v22310_v9 = vpop.f32.mrf.mxu1  ;;  %v15495_v40 = vadd.f32 %v23271_v23, %v23270_v34 }
 0x5ec   : > { %v13620_v4 = vadd.f32 %v15471_v19, %v13523_v17  ;;  %v15422_v17 = vadd.f32 %v22223_v29, %v22219_v6 }
 0x5ed   : > { %v22279_v59 = vpop.f32.mrf.mxu0  ;;  %v15511_v6 = vpop.f32.mrf.mxu1 }
 0x5ee   : > { %v13542_v13 = vadd.f32 %v15422_v17, %v22167_v51  ;;  %v15449_v5 = vadd.f32 %v22279_v59, %v22277_v45  ;;  %v23281_v45 = vld [vmem:[#allocation78_spill] sm:$0xff]  ;;  %v23282_v59 = vld [vmem:[#allocation76_spill] sm:$0xff] }
 0x5ef   : > { %v22284_v8 = vpop.f32.mrf.mxu0  ;;  %v15512_v47 = vpop.f32.mrf.mxu1 }
 0x5f0   : > { %v13639_v21 = vadd.f32 %v15486_v46, %v13542_v13 }
 0x5f1   : > { %v22291_v53 = vpop.f32.mrf.mxu0  ;;  %v15514_v17 = vpop.f32.mrf.mxu1 }
 0x5f3   : > { %v15667_v28 = vpop.f32.mrf.mxu0  ;;  %v15515_v46 = vpop.f32.mrf.mxu1 }
 0x5f4   : > { %v13725_v30 = vadd.f32 %v15667_v28, %v13628_v0  ;;  %v23272_v0 = vld [vmem:[#allocation67_spill] sm:$0xff] }
 0x5f5   : > { %v13716_v12 = vpop.f32.mrf.mxu0  ;;  %v13566_v62 = vadd.f32 %v15440_v22, %v23272_v0  ;;  %v23274_v28 = vld [vmem:[#allocation35_spill] sm:$0xff]  ;;  %v23283_v22 = vld [vmem:[#allocation65_spill] sm:$0xff] }
 0x5f6   : > { %13782 = vst.msk [vmem:[%s22299_s9 + $0x10] sm:$0xff] %vm13779_vm3, %v13725_v30  ;;  %v13717_v63 = vadd.f32 %v13716_v12, %v13620_v4  ;;  %v15504_v60 = vadd.f32 %v23274_v28, %v23273_v52  ;;  %v13660_v30 = vadd.f32 %v15501_v14, %v13563_v16  ;;  %v23275_v4 = vld [vmem:[#allocation70_spill] sm:$0xff]  ;;  %v23277_v12 = vld [vmem:[#allocation7_spill] sm:$0xff]  ;;  %v15507_v16 = vadd.f32 %v22282_v10, %v22275_v58 }
 0x5f7   : > { %v15668_v38 = vpop.f32.mrf.mxu0  ;;  %v13388_v3 = vadd.f32 %v23275_v4, %v22149_v7  ;;  %v15388_v26 = vadd.f32 %v23277_v12, %v23276_v36  ;;  %v13652_v7 = vadd.f32 %v15495_v40, %v13555_v2  ;;  %v23284_v14 = vld [vmem:[#allocation62_spill] sm:$0xff]  ;;  %v15510_v58 = vadd.f32 %v22310_v9, %v22294_v48 }
 0x5f8   : > { %13780 = vst.msk [vmem:[%s22299_s9] sm:$0xff] %vm13779_vm3, %v13717_v63  ;;  %v13728_v24 = vadd.f32 %v15668_v38, %v13631_v27  ;;  %v23278_v63 = vld [vmem:[#allocation63_spill] sm:$0xff]  ;;  %v15498_v38 = vadd.f32 %v23280_v35, %v23279_v54  ;;  %v13663_v56 = vadd.f32 %v15504_v60, %v13566_v62 }
 0x5f9   : > { %v13719_v25 = vpop.f32.mrf.mxu0  ;;  %v13558_v27 = vadd.f32 %v15434_v32, %v23278_v63  ;;  %v13485_v13 = vadd.f32 %v15388_v26, %v13388_v3  ;;  %v23286_v32 = vld [vmem:[#allocation68_spill] sm:$0xff] }
 0x5fa   : > { %13783 = vst.msk [vmem:[%s22299_s9 + $0x18] sm:$0xff] %vm13779_vm3, %v13728_v24  ;;  %v13720_v42 = vadd.f32 %v13719_v25, %v13623_v33  ;;  %v13482_v33 = vadd.f32 %v15385_v39, %v13385_v37  ;;  %v15443_v25 = vadd.f32 %v23282_v59, %v23281_v45  ;;  %v15516_v37 = vadd.f32 %v15515_v46, %v15514_v17 }
 0x5fb   : > { %v15671_v29 = vpop.f32.mrf.mxu0 }
 0x5fc   : > { %13781 = vst.msk [vmem:[%s22299_s9 + $0x8] sm:$0xff] %vm13779_vm3, %v13720_v42  ;;  %v13741_v18 = vadd.f32 %v15671_v29, %v13644_v57  ;;  %v13579_v50 = vadd.f32 %v15449_v5, %v13482_v33  ;;  %v15513_v42 = vadd.f32 %v15512_v47, %v15511_v6  ;;  %v15452_v29 = vadd.f32 %v22291_v53, %v22284_v8 }
 0x5fd   : > { %v13732_v1 = vpop.f32.mrf.mxu0 }
 0x5fe   : > { %13786 = vst.msk [vmem:[%s22299_s9 + $0x30] sm:$0xff] %vm13779_vm3, %v13741_v18  ;;  %v13733_v51 = vadd.f32 %v13732_v1, %v13636_v41  ;;  %v13655_v18 = vadd.f32 %v15498_v38, %v13558_v27  ;;  %v13571_v1 = vadd.f32 %v15443_v25, %v23283_v22  ;;  %v13676_v55 = vadd.f32 %v15513_v42, %v13579_v50 }
 0x5ff   : > { %v15672_v19 = vpop.f32.mrf.mxu0 }
 0x600   : > { %13784 = vst.msk [vmem:[%s22299_s9 + $0x20] sm:$0xff] %vm13779_vm3, %v13733_v51  ;;  %v13744_v31 = vadd.f32 %v15672_v19, %v13647_v49  ;;  %v23285_v51 = vld [vmem:[#allocation6_spill] sm:$0xff]  ;;  %v13582_v49 = vadd.f32 %v15452_v29, %v13485_v13  ;;  %v13668_v19 = vadd.f32 %v15507_v16, %v13571_v1 }
 0x601   : > { %v13735_v61 = vpop.f32.mrf.mxu0  ;;  %v15446_v6 = vadd.f32 %v23285_v51, %v23284_v14 }
 0x602   : > { %13787 = vst.msk [vmem:[%s22299_s9 + $0x38] sm:$0xff] %vm13779_vm3, %v13744_v31  ;;  %v13736_v15 = vadd.f32 %v13735_v61, %v13639_v21  ;;  %v13679_v34 = vadd.f32 %v15516_v37, %v13582_v49 }
 0x603   : > { %v15675_v24 = vpop.f32.mrf.mxu0  ;;  %v13574_v47 = vadd.f32 %v15446_v6, %v23286_v32 }
 0x604   : > { %13785 = vst.msk [vmem:[%s22299_s9 + $0x28] sm:$0xff] %vm13779_vm3, %v13736_v15  ;;  %v13757_v57 = vadd.f32 %v15675_v24, %v13660_v30 }
 0x605   : > { %v13748_v43 = vpop.f32.mrf.mxu0  ;;  %v13671_v31 = vadd.f32 %v15510_v58, %v13574_v47 }
 0x606   : > { %13790 = vst.msk [vmem:[%s22299_s9 + $0x50] sm:$0xff] %vm13779_vm3, %v13757_v57  ;;  %v13749_v41 = vadd.f32 %v13748_v43, %v13652_v7 }
 0x607   : > { %v15676_v11 = vpop.f32.mrf.mxu0 }
 0x608   : > { %13788 = vst.msk [vmem:[%s22299_s9 + $0x40] sm:$0xff] %vm13779_vm3, %v13749_v41  ;;  %v13760_v8 = vadd.f32 %v15676_v11, %v13663_v56 }
 0x609   : > { %v13751_v53 = vpop.f32.mrf.mxu0 }
 0x60a   : > { %13791 = vst.msk [vmem:[%s22299_s9 + $0x58] sm:$0xff] %vm13779_vm3, %v13760_v8  ;;  %v13752_v39 = vadd.f32 %v13751_v53, %v13655_v18 }
 0x60b   : > { %v15679_v44 = vpop.f32.mrf.mxu0 }
 0x60c   : > { %13789 = vst.msk [vmem:[%s22299_s9 + $0x48] sm:$0xff] %vm13779_vm3, %v13752_v39  ;;  %v13773_v10 = vadd.f32 %v15679_v44, %v13676_v55 }
 0x60d   : > { %v13764_v20 = vpop.f32.mrf.mxu0 }
 0x60e   : > { %13794 = vst.msk [vmem:[%s22299_s9 + $0x70] sm:$0xff] %vm13779_vm3, %v13773_v10  ;;  %v13765_v2 = vadd.f32 %v13764_v20, %v13668_v19 }
 0x60f   : > { %v15680_v23 = vpop.f32.mrf.mxu0 }
 0x610   : > { %13792 = vst.msk [vmem:[%s22299_s9 + $0x60] sm:$0xff] %vm13779_vm3, %v13765_v2  ;;  %v13776_v40 = vadd.f32 %v15680_v23, %v13679_v34 }
 0x611   : > { %v13767_v21 = vpop.f32.mrf.mxu0 }
 0x612   : > { %13795 = vst.msk [vmem:[%s22299_s9 + $0x78] sm:$0xff] %vm13779_vm3, %v13776_v40  ;;  %v13768_v0 = vadd.f32 %v13767_v21, %v13671_v31 }
 0x614   : > { %13793 = vst.msk [vmem:[%s22299_s9 + $0x68] sm:$0xff] %vm13779_vm3, %v13768_v0 }
 0x615 PF: > { %s17_s28 = sadd.s32 1, %s16008_s28   ;;  %s23287_s24 = smov %s16000_s26 }
 0x616   : > { %p14_p7 = scmp.ge.s32.totalorder %s17_s28, 6   ;;  %s23288_s25 = smov %s16004_s27 }
 0x617   : > { %s23289_s26 = smov %s23292_s29  ;;  %s23290_s27 = smov %s23296_s30 }
 0x618   :  { %16 = sbr.rel (!%p14_p7) target bundleno = 3 (0x3), region = 79 }

</bundles_post_ra>
